<compile_context>
chip_gen: v5e
topology: v5e:2x2
jax: 0.10.0
libtpu: 0.0.40
codegen_flags: <defaults>
</compile_context>

<pallas_src>
import functools

import jax
import jax.numpy as jnp
from jax.experimental import pallas as pl
from jax.experimental.pallas import tpu as pltpu

NUM_CLASSES = 10
INIT_FEATURES = 16
GROWTH = 8
BN_SIZE = 4
BLOCK_CONFIG = (2, 2, 2, 2)
BN_EPS = 1e-5

ACT_DTYPE = jnp.bfloat16          # activations / conv weights (f32 accumulate)
_TM = 512                         # rows per matmul grid block
_VMEM_LIMIT = 32 * 1024 * 1024    # explicit scoped-VMEM limit (safe on v5e/v6e/v7x)


def _round_up(x, m):
    return (x + m - 1) // m * m


# ---------------- Pallas kernels ----------------
def _mm_kernel(*refs, pre, post):
    """o = [relu(. * s2 + b2)] ( [relu(a * s1 + b1)] @ w ) — BN/ReLU-fused matmul."""
    it = iter(refs)
    a_ref = next(it)
    w_ref = next(it)
    s1_ref = b1_ref = s2_ref = b2_ref = None
    if pre:
        s1_ref, b1_ref = next(it), next(it)
    if post:
        s2_ref, b2_ref = next(it), next(it)
    o_ref = next(it)

    a = a_ref[...]
    if pre:    # folded BN + ReLU on the matmul input (per-K scale/bias), f32 math
        a = jnp.maximum(a.astype(jnp.float32) * s1_ref[...] + b1_ref[...], 0.0)
        a = a.astype(w_ref.dtype)
    y = jnp.dot(a, w_ref[...], preferred_element_type=jnp.float32)
    if post:   # folded BN + ReLU on the matmul output (per-N scale/bias)
        y = jnp.maximum(y * s2_ref[...] + b2_ref[...], 0.0)
    o_ref[...] = y.astype(o_ref.dtype)


def _window_max_kernel(w_ref, o_ref):
    # 9-tap max pool over a lane-dense (taps, rows, 128) stack
    o_ref[...] = jnp.max(w_ref[...].astype(jnp.float32), axis=0).astype(o_ref.dtype)


def _bnrelu_mean_kernel(w_ref, s_ref, b_ref, o_ref):
    # folded BN + ReLU applied per tap, then 2x2 average (transition pooling)
    y = jnp.maximum(w_ref[...].astype(jnp.float32) * s_ref[...] + b_ref[...], 0.0)
    o_ref[...] = jnp.mean(y, axis=0).astype(o_ref.dtype)


def _gap_linear_kernel(x_ref, s_ref, b_ref, w_ref, cb_ref, o_ref):
    # norm5 + wrapper F.relu + global avg-pool + Linear classifier, fused
    y = jnp.maximum(x_ref[...].astype(jnp.float32) * s_ref[...] + b_ref[...], 0.0)
    pooled = jnp.mean(y, axis=1)                               # (N, C)
    o_ref[...] = jnp.dot(pooled, w_ref[...],
                         preferred_element_type=jnp.float32) + cb_ref[...]


# ---------------- pallas_call wrappers ----------------
def _pallas_matmul_fused(a, w, pre_sb=None, post_sb=None, out_dtype=None):
    """M-tiled matmul with optional fused BN+ReLU prologue/epilogue."""
    m, k = a.shape
    k2, n = w.shape
    assert k == k2, (k, k2)
    out_dtype = a.dtype if out_dtype is None else out_dtype

    tm = min(_TM, _round_up(m, 8))
    m_pad = _round_up(m, tm)
    if m_pad != m:
        a = jnp.pad(a, ((0, m_pad - m), (0, 0)))

    args = [a, w]
    in_specs = [pl.BlockSpec((tm, k), lambda i: (i, 0)),
                pl.BlockSpec((k, n), lambda i: (0, 0))]
    if pre_sb is not None:
        s1, b1 = pre_sb
        args += [s1.reshape(1, k).astype(jnp.float32),
                 b1.reshape(1, k).astype(jnp.float32)]
        in_specs += [pl.BlockSpec((1, k), lambda i: (0, 0))] * 2
    if post_sb is not None:
        s2, b2 = post_sb
        args += [s2.reshape(1, n).astype(jnp.float32),
                 b2.reshape(1, n).astype(jnp.float32)]
        in_specs += [pl.BlockSpec((1, n), lambda i: (0, 0))] * 2

    kern = functools.partial(_mm_kernel, pre=pre_sb is not None,
                             post=post_sb is not None)
    out = pl.pallas_call(
        kern,
        out_shape=jax.ShapeDtypeStruct((m_pad, n), out_dtype),
        grid=(m_pad // tm,),
        in_specs=in_specs,
        out_specs=pl.BlockSpec((tm, n), lambda i: (i, 0)),
        compiler_params=pltpu.CompilerParams(
            dimension_semantics=("parallel",),
            vmem_limit_bytes=_VMEM_LIMIT),
    )(*args)
    return out[:m] if m_pad != m else out


def _whole_array_call(kernel, args, out_shape):
    # small (<1 MiB) tensors: single-shot VMEM-resident kernel
    return pl.pallas_call(
        kernel,
        out_shape=out_shape,
        in_specs=[pl.BlockSpec(memory_space=pltpu.MemorySpace.VMEM)] * len(args),
        out_specs=pl.BlockSpec(memory_space=pltpu.MemorySpace.VMEM),
    )(*args)


# ---------------- layer helpers (JAX glue around the kernels) ----------------
def _im2col(x, kh, kw, stride, padding):
    n, h, w, c = x.shape
    oh = (h + 2 * padding - kh) // stride + 1
    ow = (w + 2 * padding - kw) // stride + 1
    if padding:
        x = jnp.pad(x, ((0, 0), (padding, padding), (padding, padding), (0, 0)))
    if kh == 1 and kw == 1 and stride == 1:
        return x.reshape(n * oh * ow, c), oh, ow
    # TODO(synk): at full 224x224 DenseNet scale, replace materialized im2col
    # with in-kernel tap accumulation (grid axis over taps + VMEM accumulator);
    # at these small shapes the kh*kw inflation is negligible.
    cols = [x[:, i:i + stride * oh:stride, j:j + stride * ow:stride, :]
            for i in range(kh) for j in range(kw)]
    patches = jnp.concatenate(cols, axis=-1).reshape(n * oh * ow, kh * kw * c)
    return patches, oh, ow


def conv2d(x, w2, kh, kw, stride=1, padding=0, pre_bn=None, post_bn=None):
    """Bias-free conv as im2col + fused matmul. w2 is pre-relaid (kh*kw*cin, cout)."""
    if pre_bn is not None:
        assert padding == 0, "pre-conv BN fusion requires zero spatial padding"
    n = x.shape[0]
    patches, oh, ow = _im2col(x, kh, kw, stride, padding)
    pre_sb = None
    if pre_bn is not None:
        s, b = pre_bn["scale"], pre_bn["bias"]
        if kh * kw > 1:
            s, b = jnp.tile(s, kh * kw), jnp.tile(b, kh * kw)
        pre_sb = (s, b)
    post_sb = None if post_bn is None else (post_bn["scale"], post_bn["bias"])
    out = _pallas_matmul_fused(patches, w2, pre_sb=pre_sb, post_sb=post_sb,
                               out_dtype=ACT_DTYPE)
    return out.reshape(n, oh, ow, w2.shape[1])


def maxpool_3x3_s2_p1(x):
    n, h, w, c = x.shape
    neg = float(jnp.finfo(x.dtype).min)
    xp = jnp.pad(x, ((0, 0), (1, 1), (1, 1), (0, 0)), constant_values=neg)
    oh = (h + 2 - 3) // 2 + 1
    ow = (w + 2 - 3) // 2 + 1
    wins = jnp.stack([xp[:, i:i + 2 * oh:2, j:j + 2 * ow:2, :]
                      for i in range(3) for j in range(3)], axis=0)
    m = n * oh * ow
    wins = wins.reshape(9, m, c)
    if (m * c) % 128 == 0:        # lane-dense: full-width 128-lane stores
        rows = (m * c) // 128
        out = _whole_array_call(_window_max_kernel,
                                [wins.reshape(9, rows, 128)],
                                jax.ShapeDtypeStruct((rows, 128), x.dtype))
        out = out.reshape(m, c)
    else:
        out = _whole_array_call(_window_max_kernel, [wins],
                                jax.ShapeDtypeStruct((m, c), x.dtype))
    return out.reshape(n, oh, ow, c)


def bnrelu_avgpool_2x2(x, bn):
    # DenseNet transition = BN-ReLU-Conv1x1-AvgPool2x2. The 1x1 conv is a
    # per-pixel linear map, so avgpool(conv1x1(y)) == conv1x1(avgpool(y)):
    # pool first (4x fewer matmul rows) and fuse BN+ReLU into the pool kernel.
    n, h, w, c = x.shape
    oh, ow = h // 2, w // 2
    x6 = x.reshape(n, oh, 2, ow, 2, c)
    taps = [x6[:, :, i, :, j, :] for i in range(2) for j in range(2)]
    m = n * oh * ow
    wins = jnp.stack(taps, axis=0).reshape(4, m, c)
    scale, bias = bn["scale"], bn["bias"]
    if (m * c) % 128 == 0 and 128 % c == 0:    # lane-dense path
        rows = (m * c) // 128
        out = _whole_array_call(
            _bnrelu_mean_kernel,
            [wins.reshape(4, rows, 128),
             jnp.tile(scale, 128 // c).reshape(1, 128),
             jnp.tile(bias, 128 // c).reshape(1, 128)],
            jax.ShapeDtypeStruct((rows, 128), ACT_DTYPE))
        out = out.reshape(m, c)
    else:
        out = _whole_array_call(
            _bnrelu_mean_kernel,
            [wins, scale.reshape(1, c), bias.reshape(1, c)],
            jax.ShapeDtypeStruct((m, c), ACT_DTYPE))
    return out.reshape(n, oh, ow, c)


def dense_layer(x, p):
    # norm1+relu fused as prologue and norm2+relu as epilogue of the 1x1 conv
    h = conv2d(x, p["conv1"], 1, 1, pre_bn=p["norm1"], post_bn=p["norm2"])
    # 3x3 conv -> growth_rate; zero-padding applies to the post-ReLU input
    return conv2d(h, p["conv2"], 3, 3, padding=1)


def dense_block(x, layers):
    feats = x
    for lp in layers:
        new = dense_layer(feats, lp)
        # TODO(synk): at full scale, write new features into a pre-allocated
        # channel buffer (input_output_aliases) instead of per-layer concat.
        feats = jnp.concatenate([feats, new], axis=-1)
    return feats


def transition(x, p):
    h = bnrelu_avgpool_2x2(x, p["norm"])     # BN+ReLU + 2x2 avg-pool, fused
    return conv2d(h, p["conv"], 1, 1)        # 1x1 conv on the pooled map


def densenet_forward(params, x_nchw):
    # accepts NCHW like PyTorch; NHWC (channels on the 128-lane axis) internally
    x = jnp.transpose(x_nchw, (0, 2, 3, 1)).astype(ACT_DTYPE)
    # features: conv0 (7x7 s2 p3) with norm0+relu0 fused as the matmul epilogue
    h = conv2d(x, params["conv0"], 7, 7, stride=2, padding=3,
               post_bn=params["norm0"])
    h = maxpool_3x3_s2_p1(h)
    for bi, block in enumerate(params["blocks"]):
        h = dense_block(h, block)
        if bi != len(params["blocks"]) - 1:
            h = transition(h, params["transitions"][bi])
    # norm5 + wrapper F.relu + avg_pool(out).view(N,-1) @ classifier, fused
    n, hh, ww, c = h.shape
    cls = params["classifier"]
    return _whole_array_call(
        _gap_linear_kernel,
        [h.reshape(n, hh * ww, c),
         params["norm5"]["scale"].reshape(1, c),
         params["norm5"]["bias"].reshape(1, c),
         cls["w"],
         cls["b"].reshape(1, NUM_CLASSES)],
        jax.ShapeDtypeStruct((n, NUM_CLASSES), jnp.float32))


# ---------------- deterministic synthetic parameters ----------------
def _bn_params(key, c):
    k1, k2, k3, k4 = jax.random.split(key, 4)
    gamma = 1.0 + 0.1 * jax.random.normal(k1, (c,), jnp.float32)
    beta = 0.1 * jax.random.normal(k2, (c,), jnp.float32)
    mean = 0.1 * jax.random.normal(k3, (c,), jnp.float32)
    var = 1.0 + 0.1 * jax.random.uniform(k4, (c,), jnp.float32)
    scale = gamma / jnp.sqrt(var + BN_EPS)     # eval-mode BN folded
    bias = beta - mean * scale
    return {"scale": scale, "bias": bias}


def _conv_params(key, cout, cin, kh, kw):
    fan_in = cin * kh * kw
    std = (2.0 / fan_in) ** 0.5
    w = std * jax.random.normal(key, (cout, cin, kh, kw), jnp.float32)
    # one-time relayout: OIHW -> (KH*KW*Cin, Cout), matching im2col column order
    return jnp.transpose(w, (2, 3, 1, 0)).reshape(kh * kw * cin, cout).astype(ACT_DTYPE)


def init_params(key):
    ks = iter(jax.random.split(key, 256))
    params = {}
    params["conv0"] = _conv_params(next(ks), INIT_FEATURES, 3, 7, 7)
    params["norm0"] = _bn_params(next(ks), INIT_FEATURES)
    ch = INIT_FEATURES
    blocks, transitions = [], []
    for bi, num_layers in enumerate(BLOCK_CONFIG):
        layers = []
        for _ in range(num_layers):
            layers.append({
                "norm1": _bn_params(next(ks), ch),
                "conv1": _conv_params(next(ks), BN_SIZE * GROWTH, ch, 1, 1),
                "norm2": _bn_params(next(ks), BN_SIZE * GROWTH),
                "conv2": _conv_params(next(ks), GROWTH, BN_SIZE * GROWTH, 3, 3),
            })
            ch += GROWTH
        blocks.append(layers)
        if bi != len(BLOCK_CONFIG) - 1:
            transitions.append({
                "norm": _bn_params(next(ks), ch),
                "conv": _conv_params(next(ks), ch // 2, ch, 1, 1),
            })
            ch = ch // 2
    params["blocks"] = blocks
    params["transitions"] = transitions
    params["norm5"] = _bn_params(next(ks), ch)
    kw_, kb = jax.random.split(next(ks))
    bound = 1.0 / (ch ** 0.5)
    params["classifier"] = {
        # stored pre-transposed (in_features, num_classes), kept f32
        "w": jax.random.uniform(kw_, (NUM_CLASSES, ch), jnp.float32,
                                -bound, bound).T,
        "b": jax.random.uniform(kb, (NUM_CLASSES,), jnp.float32, -bound, bound),
    }
    return params


if __name__ == "__main__":
    key = jax.random.PRNGKey(0)
    pkey, xkey = jax.random.split(key)
    params = init_params(pkey)
    x = jax.random.normal(xkey, (2, 3, 64, 64), jnp.float32)  # NCHW like PyTorch
    fwd = jax.jit(densenet_forward)
    out = fwd(params, x)
    jax.block_until_ready(out)
    assert out.shape == (2, NUM_CLASSES), out.shape
    assert out.dtype == jnp.float32
    print("KERNEL_OK")
</pallas_src>

<mosaic_0001>
module attributes {stable_mosaic.version = 11 : i64} {
  func.func @_mm_kernel(%arg0: i32, %arg1: memref<512x147xbf16, #tpu.memory_space<vmem>>, %arg2: memref<147x16xbf16, #tpu.memory_space<vmem>>, %arg3: memref<1x16xf32, #tpu.memory_space<vmem>>, %arg4: memref<1x16xf32, #tpu.memory_space<vmem>>, %arg5: memref<512x16xbf16, #tpu.memory_space<vmem>>) attributes {dimension_semantics = [#tpu.dimension_semantics<parallel>], iteration_bounds = array<i64: 4>, scalar_prefetch = 0 : i64, scratch_operands = 0 : i64, tpu.core_type = #tpu.core_type<tc>, window_params = [{transform_indices = @transform_0, window_bounds = array<i64: 512, 147>}, {pipeline_mode = #tpu.pipeline_mode<synchronous>, transform_indices = @transform_1, window_bounds = array<i64: 147, 16>}, {pipeline_mode = #tpu.pipeline_mode<synchronous>, transform_indices = @transform_2, window_bounds = array<i64: 1, 16>}, {pipeline_mode = #tpu.pipeline_mode<synchronous>, transform_indices = @transform_3, window_bounds = array<i64: 1, 16>}, {transform_indices = @transform_4, window_bounds = array<i64: 512, 16>}]} {
    %c0 = arith.constant 0 : index
    %c0_0 = arith.constant 0 : index
    %0 = vector.load %arg1[%c0, %c0_0] : memref<512x147xbf16, #tpu.memory_space<vmem>>, vector<512x147xbf16>
    %c0_1 = arith.constant 0 : index
    %c0_2 = arith.constant 0 : index
    %1 = vector.load %arg2[%c0_1, %c0_2] : memref<147x16xbf16, #tpu.memory_space<vmem>>, vector<147x16xbf16>
    %cst = arith.constant dense<0.000000e+00> : vector<512x16xf32>
    %2 = tpu.matmul %0, %1, %cst {dimension_numbers = #tpu.dot_dimension_numbers<[1], [0], [0], [1], [0, 0, 1, 1], [], []>} : vector<512x147xbf16>, vector<147x16xbf16>, vector<512x16xf32> -> vector<512x16xf32>
    %c0_3 = arith.constant 0 : index
    %c0_4 = arith.constant 0 : index
    %3 = vector.load %arg3[%c0_3, %c0_4] : memref<1x16xf32, #tpu.memory_space<vmem>>, vector<1x16xf32>
    %4 = vector.broadcast %3 : vector<1x16xf32> to vector<512x16xf32>
    %5 = arith.mulf %2, %4 : vector<512x16xf32>
    %c0_5 = arith.constant 0 : index
    %c0_6 = arith.constant 0 : index
    %6 = vector.load %arg4[%c0_5, %c0_6] : memref<1x16xf32, #tpu.memory_space<vmem>>, vector<1x16xf32>
    %7 = vector.broadcast %6 : vector<1x16xf32> to vector<512x16xf32>
    %8 = arith.addf %5, %7 : vector<512x16xf32>
    %cst_7 = arith.constant 0.000000e+00 : f32
    %9 = vector.broadcast %cst_7 : f32 to vector<512x16xf32>
    %10 = arith.maximumf %8, %9 : vector<512x16xf32>
    %11 = arith.truncf %10 : vector<512x16xf32> to vector<512x16xbf16>
    %c0_8 = arith.constant 0 : index
    %c0_9 = arith.constant 0 : index
    %12 = vector.load %arg5[%c0_8, %c0_9] : memref<512x16xbf16, #tpu.memory_space<vmem>>, vector<512x16xbf16>
    tpu.vector_store %arg5[%c0_8, %c0_9], %11 {strides = array<i32>} : memref<512x16xbf16, #tpu.memory_space<vmem>>, vector<512x16xbf16>,
    return
  }
  func.func @transform_0(%arg0: i32) -> (i32, i32) {
    %c0_i32 = arith.constant 0 : i32
    %c0_i32_0 = arith.constant 0 : i32
    return %arg0, %c0_i32 : i32, i32
  }
  func.func @transform_1(%arg0: i32) -> (i32, i32) {
    %c0_i32 = arith.constant 0 : i32
    %c0_i32_0 = arith.constant 0 : i32
    %c0_i32_1 = arith.constant 0 : i32
    return %c0_i32, %c0_i32_0 : i32, i32
  }
  func.func @transform_2(%arg0: i32) -> (i32, i32) {
    %c0_i32 = arith.constant 0 : i32
    %c0_i32_0 = arith.constant 0 : i32
    %c0_i32_1 = arith.constant 0 : i32
    return %c0_i32, %c0_i32_0 : i32, i32
  }
  func.func @transform_3(%arg0: i32) -> (i32, i32) {
    %c0_i32 = arith.constant 0 : i32
    %c0_i32_0 = arith.constant 0 : i32
    %c0_i32_1 = arith.constant 0 : i32
    return %c0_i32, %c0_i32_0 : i32, i32
  }
  func.func @transform_4(%arg0: i32) -> (i32, i32) {
    %c0_i32 = arith.constant 0 : i32
    %c0_i32_0 = arith.constant 0 : i32
    return %arg0, %c0_i32 : i32, i32
  }
}

module attributes {stable_mosaic.version = 11 : i64} {
  func.func @_window_max_kernel(%arg0: memref<9x64x128xbf16, #tpu.memory_space<vmem>>, %arg1: memref<64x128xbf16, #tpu.memory_space<vmem>>) attributes {dimension_semantics = [], scalar_prefetch = 0 : i64, scratch_operands = 0 : i64, tpu.core_type = #tpu.core_type<tc>} {
    %c0 = arith.constant 0 : index
    %c0_0 = arith.constant 0 : index
    %c0_1 = arith.constant 0 : index
    %0 = vector.load %arg0[%c0, %c0_0, %c0_1] : memref<9x64x128xbf16, #tpu.memory_space<vmem>>, vector<9x64x128xbf16>
    %1 = arith.extf %0 : vector<9x64x128xbf16> to vector<9x64x128xf32>
    %cst = arith.constant dense<0xFF800000> : vector<64x128xf32>
    %2 = vector.multi_reduction <maximumf>, %1, %cst [0] : vector<9x64x128xf32> to vector<64x128xf32>
    %3 = arith.truncf %2 : vector<64x128xf32> to vector<64x128xbf16>
    %c0_2 = arith.constant 0 : index
    %c0_3 = arith.constant 0 : index
    %4 = vector.load %arg1[%c0_2, %c0_3] : memref<64x128xbf16, #tpu.memory_space<vmem>>, vector<64x128xbf16>
    tpu.vector_store %arg1[%c0_2, %c0_3], %3 {strides = array<i32>} : memref<64x128xbf16, #tpu.memory_space<vmem>>, vector<64x128xbf16>,
    return
  }
}

module attributes {stable_mosaic.version = 11 : i64} {
  func.func @_mm_kernel(%arg0: i32, %arg1: memref<512x16xbf16, #tpu.memory_space<vmem>>, %arg2: memref<16x32xbf16, #tpu.memory_space<vmem>>, %arg3: memref<1x16xf32, #tpu.memory_space<vmem>>, %arg4: memref<1x16xf32, #tpu.memory_space<vmem>>, %arg5: memref<1x32xf32, #tpu.memory_space<vmem>>, %arg6: memref<1x32xf32, #tpu.memory_space<vmem>>, %arg7: memref<512x32xbf16, #tpu.memory_space<vmem>>) attributes {dimension_semantics = [#tpu.dimension_semantics<parallel>], iteration_bounds = array<i64: 1>, scalar_prefetch = 0 : i64, scratch_operands = 0 : i64, tpu.core_type = #tpu.core_type<tc>, window_params = [{transform_indices = @transform_0, window_bounds = array<i64: 512, 16>}, {pipeline_mode = #tpu.pipeline_mode<synchronous>, transform_indices = @transform_1, window_bounds = array<i64: 16, 32>}, {pipeline_mode = #tpu.pipeline_mode<synchronous>, transform_indices = @transform_2, window_bounds = array<i64: 1, 16>}, {pipeline_mode = #tpu.pipeline_mode<synchronous>, transform_indices = @transform_3, window_bounds = array<i64: 1, 16>}, {pipeline_mode = #tpu.pipeline_mode<synchronous>, transform_indices = @transform_4, window_bounds = array<i64: 1, 32>}, {pipeline_mode = #tpu.pipeline_mode<synchronous>, transform_indices = @transform_5, window_bounds = array<i64: 1, 32>}, {transform_indices = @transform_6, window_bounds = array<i64: 512, 32>}]} {
    %c0 = arith.constant 0 : index
    %c0_0 = arith.constant 0 : index
    %0 = vector.load %arg1[%c0, %c0_0] : memref<512x16xbf16, #tpu.memory_space<vmem>>, vector<512x16xbf16>
    %1 = arith.extf %0 : vector<512x16xbf16> to vector<512x16xf32>
    %c0_1 = arith.constant 0 : index
    %c0_2 = arith.constant 0 : index
    %2 = vector.load %arg3[%c0_1, %c0_2] : memref<1x16xf32, #tpu.memory_space<vmem>>, vector<1x16xf32>
    %3 = vector.broadcast %2 : vector<1x16xf32> to vector<512x16xf32>
    %4 = arith.mulf %1, %3 : vector<512x16xf32>
    %c0_3 = arith.constant 0 : index
    %c0_4 = arith.constant 0 : index
    %5 = vector.load %arg4[%c0_3, %c0_4] : memref<1x16xf32, #tpu.memory_space<vmem>>, vector<1x16xf32>
    %6 = vector.broadcast %5 : vector<1x16xf32> to vector<512x16xf32>
    %7 = arith.addf %4, %6 : vector<512x16xf32>
    %cst = arith.constant 0.000000e+00 : f32
    %8 = vector.broadcast %cst : f32 to vector<512x16xf32>
    %9 = arith.maximumf %7, %8 : vector<512x16xf32>
    %10 = arith.truncf %9 : vector<512x16xf32> to vector<512x16xbf16>
    %c0_5 = arith.constant 0 : index
    %c0_6 = arith.constant 0 : index
    %11 = vector.load %arg2[%c0_5, %c0_6] : memref<16x32xbf16, #tpu.memory_space<vmem>>, vector<16x32xbf16>
    %cst_7 = arith.constant dense<0.000000e+00> : vector<512x32xf32>
    %12 = tpu.matmul %10, %11, %cst_7 {dimension_numbers = #tpu.dot_dimension_numbers<[1], [0], [0], [1], [0, 0, 1, 1], [], []>} : vector<512x16xbf16>, vector<16x32xbf16>, vector<512x32xf32> -> vector<512x32xf32>
    %c0_8 = arith.constant 0 : index
    %c0_9 = arith.constant 0 : index
    %13 = vector.load %arg5[%c0_8, %c0_9] : memref<1x32xf32, #tpu.memory_space<vmem>>, vector<1x32xf32>
    %14 = vector.broadcast %13 : vector<1x32xf32> to vector<512x32xf32>
    %15 = arith.mulf %12, %14 : vector<512x32xf32>
    %c0_10 = arith.constant 0 : index
    %c0_11 = arith.constant 0 : index
    %16 = vector.load %arg6[%c0_10, %c0_11] : memref<1x32xf32, #tpu.memory_space<vmem>>, vector<1x32xf32>
    %17 = vector.broadcast %16 : vector<1x32xf32> to vector<512x32xf32>
    %18 = arith.addf %15, %17 : vector<512x32xf32>
    %cst_12 = arith.constant 0.000000e+00 : f32
    %19 = vector.broadcast %cst_12 : f32 to vector<512x32xf32>
    %20 = arith.maximumf %18, %19 : vector<512x32xf32>
    %21 = arith.truncf %20 : vector<512x32xf32> to vector<512x32xbf16>
    %c0_13 = arith.constant 0 : index
    %c0_14 = arith.constant 0 : index
    %22 = vector.load %arg7[%c0_13, %c0_14] : memref<512x32xbf16, #tpu.memory_space<vmem>>, vector<512x32xbf16>
    tpu.vector_store %arg7[%c0_13, %c0_14], %21 {strides = array<i32>} : memref<512x32xbf16, #tpu.memory_space<vmem>>, vector<512x32xbf16>,
    return
  }
  func.func @transform_0(%arg0: i32) -> (i32, i32) {
    %c0_i32 = arith.constant 0 : i32
    %c0_i32_0 = arith.constant 0 : i32
    return %arg0, %c0_i32 : i32, i32
  }
  func.func @transform_1(%arg0: i32) -> (i32, i32) {
    %c0_i32 = arith.constant 0 : i32
    %c0_i32_0 = arith.constant 0 : i32
    %c0_i32_1 = arith.constant 0 : i32
    return %c0_i32, %c0_i32_0 : i32, i32
  }
  func.func @transform_2(%arg0: i32) -> (i32, i32) {
    %c0_i32 = arith.constant 0 : i32
    %c0_i32_0 = arith.constant 0 : i32
    %c0_i32_1 = arith.constant 0 : i32
    return %c0_i32, %c0_i32_0 : i32, i32
  }
  func.func @transform_3(%arg0: i32) -> (i32, i32) {
    %c0_i32 = arith.constant 0 : i32
    %c0_i32_0 = arith.constant 0 : i32
    %c0_i32_1 = arith.constant 0 : i32
    return %c0_i32, %c0_i32_0 : i32, i32
  }
  func.func @transform_4(%arg0: i32) -> (i32, i32) {
    %c0_i32 = arith.constant 0 : i32
    %c0_i32_0 = arith.constant 0 : i32
    %c0_i32_1 = arith.constant 0 : i32
    return %c0_i32, %c0_i32_0 : i32, i32
  }
  func.func @transform_5(%arg0: i32) -> (i32, i32) {
    %c0_i32 = arith.constant 0 : i32
    %c0_i32_0 = arith.constant 0 : i32
    %c0_i32_1 = arith.constant 0 : i32
    return %c0_i32, %c0_i32_0 : i32, i32
  }
  func.func @transform_6(%arg0: i32) -> (i32, i32) {
    %c0_i32 = arith.constant 0 : i32
    %c0_i32_0 = arith.constant 0 : i32
    return %arg0, %c0_i32 : i32, i32
  }
}

module attributes {stable_mosaic.version = 11 : i64} {
  func.func @_mm_kernel(%arg0: i32, %arg1: memref<512x288xbf16, #tpu.memory_space<vmem>>, %arg2: memref<288x8xbf16, #tpu.memory_space<vmem>>, %arg3: memref<512x8xbf16, #tpu.memory_space<vmem>>) attributes {dimension_semantics = [#tpu.dimension_semantics<parallel>], iteration_bounds = array<i64: 1>, scalar_prefetch = 0 : i64, scratch_operands = 0 : i64, tpu.core_type = #tpu.core_type<tc>, window_params = [{transform_indices = @transform_0, window_bounds = array<i64: 512, 288>}, {pipeline_mode = #tpu.pipeline_mode<synchronous>, transform_indices = @transform_1, window_bounds = array<i64: 288, 8>}, {transform_indices = @transform_2, window_bounds = array<i64: 512, 8>}]} {
    %c0 = arith.constant 0 : index
    %c0_0 = arith.constant 0 : index
    %0 = vector.load %arg1[%c0, %c0_0] : memref<512x288xbf16, #tpu.memory_space<vmem>>, vector<512x288xbf16>
    %c0_1 = arith.constant 0 : index
    %c0_2 = arith.constant 0 : index
    %1 = vector.load %arg2[%c0_1, %c0_2] : memref<288x8xbf16, #tpu.memory_space<vmem>>, vector<288x8xbf16>
    %cst = arith.constant dense<0.000000e+00> : vector<512x8xf32>
    %2 = tpu.matmul %0, %1, %cst {dimension_numbers = #tpu.dot_dimension_numbers<[1], [0], [0], [1], [0, 0, 1, 1], [], []>} : vector<512x288xbf16>, vector<288x8xbf16>, vector<512x8xf32> -> vector<512x8xf32>
    %3 = arith.truncf %2 : vector<512x8xf32> to vector<512x8xbf16>
    %c0_3 = arith.constant 0 : index
    %c0_4 = arith.constant 0 : index
    %4 = vector.load %arg3[%c0_3, %c0_4] : memref<512x8xbf16, #tpu.memory_space<vmem>>, vector<512x8xbf16>
    tpu.vector_store %arg3[%c0_3, %c0_4], %3 {strides = array<i32>} : memref<512x8xbf16, #tpu.memory_space<vmem>>, vector<512x8xbf16>,
    return
  }
  func.func @transform_0(%arg0: i32) -> (i32, i32) {
    %c0_i32 = arith.constant 0 : i32
    %c0_i32_0 = arith.constant 0 : i32
    return %arg0, %c0_i32 : i32, i32
  }
  func.func @transform_1(%arg0: i32) -> (i32, i32) {
    %c0_i32 = arith.constant 0 : i32
    %c0_i32_0 = arith.constant 0 : i32
    %c0_i32_1 = arith.constant 0 : i32
    return %c0_i32, %c0_i32_0 : i32, i32
  }
  func.func @transform_2(%arg0: i32) -> (i32, i32) {
    %c0_i32 = arith.constant 0 : i32
    %c0_i32_0 = arith.constant 0 : i32
    return %arg0, %c0_i32 : i32, i32
  }
}

module attributes {stable_mosaic.version = 11 : i64} {
  func.func @_mm_kernel(%arg0: i32, %arg1: memref<512x24xbf16, #tpu.memory_space<vmem>>, %arg2: memref<24x32xbf16, #tpu.memory_space<vmem>>, %arg3: memref<1x24xf32, #tpu.memory_space<vmem>>, %arg4: memref<1x24xf32, #tpu.memory_space<vmem>>, %arg5: memref<1x32xf32, #tpu.memory_space<vmem>>, %arg6: memref<1x32xf32, #tpu.memory_space<vmem>>, %arg7: memref<512x32xbf16, #tpu.memory_space<vmem>>) attributes {dimension_semantics = [#tpu.dimension_semantics<parallel>], iteration_bounds = array<i64: 1>, scalar_prefetch = 0 : i64, scratch_operands = 0 : i64, tpu.core_type = #tpu.core_type<tc>, window_params = [{transform_indices = @transform_0, window_bounds = array<i64: 512, 24>}, {pipeline_mode = #tpu.pipeline_mode<synchronous>, transform_indices = @transform_1, window_bounds = array<i64: 24, 32>}, {pipeline_mode = #tpu.pipeline_mode<synchronous>, transform_indices = @transform_2, window_bounds = array<i64: 1, 24>}, {pipeline_mode = #tpu.pipeline_mode<synchronous>, transform_indices = @transform_3, window_bounds = array<i64: 1, 24>}, {pipeline_mode = #tpu.pipeline_mode<synchronous>, transform_indices = @transform_4, window_bounds = array<i64: 1, 32>}, {pipeline_mode = #tpu.pipeline_mode<synchronous>, transform_indices = @transform_5, window_bounds = array<i64: 1, 32>}, {transform_indices = @transform_6, window_bounds = array<i64: 512, 32>}]} {
    %c0 = arith.constant 0 : index
    %c0_0 = arith.constant 0 : index
    %0 = vector.load %arg1[%c0, %c0_0] : memref<512x24xbf16, #tpu.memory_space<vmem>>, vector<512x24xbf16>
    %1 = arith.extf %0 : vector<512x24xbf16> to vector<512x24xf32>
    %c0_1 = arith.constant 0 : index
    %c0_2 = arith.constant 0 : index
    %2 = vector.load %arg3[%c0_1, %c0_2] : memref<1x24xf32, #tpu.memory_space<vmem>>, vector<1x24xf32>
    %3 = vector.broadcast %2 : vector<1x24xf32> to vector<512x24xf32>
    %4 = arith.mulf %1, %3 : vector<512x24xf32>
    %c0_3 = arith.constant 0 : index
    %c0_4 = arith.constant 0 : index
    %5 = vector.load %arg4[%c0_3, %c0_4] : memref<1x24xf32, #tpu.memory_space<vmem>>, vector<1x24xf32>
    %6 = vector.broadcast %5 : vector<1x24xf32> to vector<512x24xf32>
    %7 = arith.addf %4, %6 : vector<512x24xf32>
    %cst = arith.constant 0.000000e+00 : f32
    %8 = vector.broadcast %cst : f32 to vector<512x24xf32>
    %9 = arith.maximumf %7, %8 : vector<512x24xf32>
    %10 = arith.truncf %9 : vector<512x24xf32> to vector<512x24xbf16>
    %c0_5 = arith.constant 0 : index
    %c0_6 = arith.constant 0 : index
    %11 = vector.load %arg2[%c0_5, %c0_6] : memref<24x32xbf16, #tpu.memory_space<vmem>>, vector<24x32xbf16>
    %cst_7 = arith.constant dense<0.000000e+00> : vector<512x32xf32>
    %12 = tpu.matmul %10, %11, %cst_7 {dimension_numbers = #tpu.dot_dimension_numbers<[1], [0], [0], [1], [0, 0, 1, 1], [], []>} : vector<512x24xbf16>, vector<24x32xbf16>, vector<512x32xf32> -> vector<512x32xf32>
    %c0_8 = arith.constant 0 : index
    %c0_9 = arith.constant 0 : index
    %13 = vector.load %arg5[%c0_8, %c0_9] : memref<1x32xf32, #tpu.memory_space<vmem>>, vector<1x32xf32>
    %14 = vector.broadcast %13 : vector<1x32xf32> to vector<512x32xf32>
    %15 = arith.mulf %12, %14 : vector<512x32xf32>
    %c0_10 = arith.constant 0 : index
    %c0_11 = arith.constant 0 : index
    %16 = vector.load %arg6[%c0_10, %c0_11] : memref<1x32xf32, #tpu.memory_space<vmem>>, vector<1x32xf32>
    %17 = vector.broadcast %16 : vector<1x32xf32> to vector<512x32xf32>
    %18 = arith.addf %15, %17 : vector<512x32xf32>
    %cst_12 = arith.constant 0.000000e+00 : f32
    %19 = vector.broadcast %cst_12 : f32 to vector<512x32xf32>
    %20 = arith.maximumf %18, %19 : vector<512x32xf32>
    %21 = arith.truncf %20 : vector<512x32xf32> to vector<512x32xbf16>
    %c0_13 = arith.constant 0 : index
    %c0_14 = arith.constant 0 : index
    %22 = vector.load %arg7[%c0_13, %c0_14] : memref<512x32xbf16, #tpu.memory_space<vmem>>, vector<512x32xbf16>
    tpu.vector_store %arg7[%c0_13, %c0_14], %21 {strides = array<i32>} : memref<512x32xbf16, #tpu.memory_space<vmem>>, vector<512x32xbf16>,
    return
  }
  func.func @transform_0(%arg0: i32) -> (i32, i32) {
    %c0_i32 = arith.constant 0 : i32
    %c0_i32_0 = arith.constant 0 : i32
    return %arg0, %c0_i32 : i32, i32
  }
  func.func @transform_1(%arg0: i32) -> (i32, i32) {
    %c0_i32 = arith.constant 0 : i32
    %c0_i32_0 = arith.constant 0 : i32
    %c0_i32_1 = arith.constant 0 : i32
    return %c0_i32, %c0_i32_0 : i32, i32
  }
  func.func @transform_2(%arg0: i32) -> (i32, i32) {
    %c0_i32 = arith.constant 0 : i32
    %c0_i32_0 = arith.constant 0 : i32
    %c0_i32_1 = arith.constant 0 : i32
    return %c0_i32, %c0_i32_0 : i32, i32
  }
  func.func @transform_3(%arg0: i32) -> (i32, i32) {
    %c0_i32 = arith.constant 0 : i32
    %c0_i32_0 = arith.constant 0 : i32
    %c0_i32_1 = arith.constant 0 : i32
    return %c0_i32, %c0_i32_0 : i32, i32
  }
  func.func @transform_4(%arg0: i32) -> (i32, i32) {
    %c0_i32 = arith.constant 0 : i32
    %c0_i32_0 = arith.constant 0 : i32
    %c0_i32_1 = arith.constant 0 : i32
    return %c0_i32, %c0_i32_0 : i32, i32
  }
  func.func @transform_5(%arg0: i32) -> (i32, i32) {
    %c0_i32 = arith.constant 0 : i32
    %c0_i32_0 = arith.constant 0 : i32
    %c0_i32_1 = arith.constant 0 : i32
    return %c0_i32, %c0_i32_0 : i32, i32
  }
  func.func @transform_6(%arg0: i32) -> (i32, i32) {
    %c0_i32 = arith.constant 0 : i32
    %c0_i32_0 = arith.constant 0 : i32
    return %arg0, %c0_i32 : i32, i32
  }
}

module attributes {stable_mosaic.version = 11 : i64} {
  func.func @_mm_kernel(%arg0: i32, %arg1: memref<128x16xbf16, #tpu.memory_space<vmem>>, %arg2: memref<16x32xbf16, #tpu.memory_space<vmem>>, %arg3: memref<1x16xf32, #tpu.memory_space<vmem>>, %arg4: memref<1x16xf32, #tpu.memory_space<vmem>>, %arg5: memref<1x32xf32, #tpu.memory_space<vmem>>, %arg6: memref<1x32xf32, #tpu.memory_space<vmem>>, %arg7: memref<128x32xbf16, #tpu.memory_space<vmem>>) attributes {dimension_semantics = [#tpu.dimension_semantics<parallel>], iteration_bounds = array<i64: 1>, scalar_prefetch = 0 : i64, scratch_operands = 0 : i64, tpu.core_type = #tpu.core_type<tc>, window_params = [{transform_indices = @transform_0, window_bounds = array<i64: 128, 16>}, {pipeline_mode = #tpu.pipeline_mode<synchronous>, transform_indices = @transform_1, window_bounds = array<i64: 16, 32>}, {pipeline_mode = #tpu.pipeline_mode<synchronous>, transform_indices = @transform_2, window_bounds = array<i64: 1, 16>}, {pipeline_mode = #tpu.pipeline_mode<synchronous>, transform_indices = @transform_3, window_bounds = array<i64: 1, 16>}, {pipeline_mode = #tpu.pipeline_mode<synchronous>, transform_indices = @transform_4, window_bounds = array<i64: 1, 32>}, {pipeline_mode = #tpu.pipeline_mode<synchronous>, transform_indices = @transform_5, window_bounds = array<i64: 1, 32>}, {transform_indices = @transform_6, window_bounds = array<i64: 128, 32>}]} {
    %c0 = arith.constant 0 : index
    %c0_0 = arith.constant 0 : index
    %0 = vector.load %arg1[%c0, %c0_0] : memref<128x16xbf16, #tpu.memory_space<vmem>>, vector<128x16xbf16>
    %1 = arith.extf %0 : vector<128x16xbf16> to vector<128x16xf32>
    %c0_1 = arith.constant 0 : index
    %c0_2 = arith.constant 0 : index
    %2 = vector.load %arg3[%c0_1, %c0_2] : memref<1x16xf32, #tpu.memory_space<vmem>>, vector<1x16xf32>
    %3 = vector.broadcast %2 : vector<1x16xf32> to vector<128x16xf32>
    %4 = arith.mulf %1, %3 : vector<128x16xf32>
    %c0_3 = arith.constant 0 : index
    %c0_4 = arith.constant 0 : index
    %5 = vector.load %arg4[%c0_3, %c0_4] : memref<1x16xf32, #tpu.memory_space<vmem>>, vector<1x16xf32>
    %6 = vector.broadcast %5 : vector<1x16xf32> to vector<128x16xf32>
    %7 = arith.addf %4, %6 : vector<128x16xf32>
    %cst = arith.constant 0.000000e+00 : f32
    %8 = vector.broadcast %cst : f32 to vector<128x16xf32>
    %9 = arith.maximumf %7, %8 : vector<128x16xf32>
    %10 = arith.truncf %9 : vector<128x16xf32> to vector<128x16xbf16>
    %c0_5 = arith.constant 0 : index
    %c0_6 = arith.constant 0 : index
    %11 = vector.load %arg2[%c0_5, %c0_6] : memref<16x32xbf16, #tpu.memory_space<vmem>>, vector<16x32xbf16>
    %cst_7 = arith.constant dense<0.000000e+00> : vector<128x32xf32>
    %12 = tpu.matmul %10, %11, %cst_7 {dimension_numbers = #tpu.dot_dimension_numbers<[1], [0], [0], [1], [0, 0, 1, 1], [], []>} : vector<128x16xbf16>, vector<16x32xbf16>, vector<128x32xf32> -> vector<128x32xf32>
    %c0_8 = arith.constant 0 : index
    %c0_9 = arith.constant 0 : index
    %13 = vector.load %arg5[%c0_8, %c0_9] : memref<1x32xf32, #tpu.memory_space<vmem>>, vector<1x32xf32>
    %14 = vector.broadcast %13 : vector<1x32xf32> to vector<128x32xf32>
    %15 = arith.mulf %12, %14 : vector<128x32xf32>
    %c0_10 = arith.constant 0 : index
    %c0_11 = arith.constant 0 : index
    %16 = vector.load %arg6[%c0_10, %c0_11] : memref<1x32xf32, #tpu.memory_space<vmem>>, vector<1x32xf32>
    %17 = vector.broadcast %16 : vector<1x32xf32> to vector<128x32xf32>
    %18 = arith.addf %15, %17 : vector<128x32xf32>
    %cst_12 = arith.constant 0.000000e+00 : f32
    %19 = vector.broadcast %cst_12 : f32 to vector<128x32xf32>
    %20 = arith.maximumf %18, %19 : vector<128x32xf32>
    %21 = arith.truncf %20 : vector<128x32xf32> to vector<128x32xbf16>
    %c0_13 = arith.constant 0 : index
    %c0_14 = arith.constant 0 : index
    %22 = vector.load %arg7[%c0_13, %c0_14] : memref<128x32xbf16, #tpu.memory_space<vmem>>, vector<128x32xbf16>
    tpu.vector_store %arg7[%c0_13, %c0_14], %21 {strides = array<i32>} : memref<128x32xbf16, #tpu.memory_space<vmem>>, vector<128x32xbf16>,
    return
  }
  func.func @transform_0(%arg0: i32) -> (i32, i32) {
    %c0_i32 = arith.constant 0 : i32
    %c0_i32_0 = arith.constant 0 : i32
    return %arg0, %c0_i32 : i32, i32
  }
  func.func @transform_1(%arg0: i32) -> (i32, i32) {
    %c0_i32 = arith.constant 0 : i32
    %c0_i32_0 = arith.constant 0 : i32
    %c0_i32_1 = arith.constant 0 : i32
    return %c0_i32, %c0_i32_0 : i32, i32
  }
  func.func @transform_2(%arg0: i32) -> (i32, i32) {
    %c0_i32 = arith.constant 0 : i32
    %c0_i32_0 = arith.constant 0 : i32
    %c0_i32_1 = arith.constant 0 : i32
    return %c0_i32, %c0_i32_0 : i32, i32
  }
  func.func @transform_3(%arg0: i32) -> (i32, i32) {
    %c0_i32 = arith.constant 0 : i32
    %c0_i32_0 = arith.constant 0 : i32
    %c0_i32_1 = arith.constant 0 : i32
    return %c0_i32, %c0_i32_0 : i32, i32
  }
  func.func @transform_4(%arg0: i32) -> (i32, i32) {
    %c0_i32 = arith.constant 0 : i32
    %c0_i32_0 = arith.constant 0 : i32
    %c0_i32_1 = arith.constant 0 : i32
    return %c0_i32, %c0_i32_0 : i32, i32
  }
  func.func @transform_5(%arg0: i32) -> (i32, i32) {
    %c0_i32 = arith.constant 0 : i32
    %c0_i32_0 = arith.constant 0 : i32
    %c0_i32_1 = arith.constant 0 : i32
    return %c0_i32, %c0_i32_0 : i32, i32
  }
  func.func @transform_6(%arg0: i32) -> (i32, i32) {
    %c0_i32 = arith.constant 0 : i32
    %c0_i32_0 = arith.constant 0 : i32
    return %arg0, %c0_i32 : i32, i32
  }
}

module attributes {stable_mosaic.version = 11 : i64} {
  func.func @_mm_kernel(%arg0: i32, %arg1: memref<128x32xbf16, #tpu.memory_space<vmem>>, %arg2: memref<32x16xbf16, #tpu.memory_space<vmem>>, %arg3: memref<128x16xbf16, #tpu.memory_space<vmem>>) attributes {dimension_semantics = [#tpu.dimension_semantics<parallel>], iteration_bounds = array<i64: 1>, scalar_prefetch = 0 : i64, scratch_operands = 0 : i64, tpu.core_type = #tpu.core_type<tc>, window_params = [{transform_indices = @transform_0, window_bounds = array<i64: 128, 32>}, {pipeline_mode = #tpu.pipeline_mode<synchronous>, transform_indices = @transform_1, window_bounds = array<i64: 32, 16>}, {transform_indices = @transform_2, window_bounds = array<i64: 128, 16>}]} {
    %c0 = arith.constant 0 : index
    %c0_0 = arith.constant 0 : index
    %0 = vector.load %arg1[%c0, %c0_0] : memref<128x32xbf16, #tpu.memory_space<vmem>>, vector<128x32xbf16>
    %c0_1 = arith.constant 0 : index
    %c0_2 = arith.constant 0 : index
    %1 = vector.load %arg2[%c0_1, %c0_2] : memref<32x16xbf16, #tpu.memory_space<vmem>>, vector<32x16xbf16>
    %cst = arith.constant dense<0.000000e+00> : vector<128x16xf32>
    %2 = tpu.matmul %0, %1, %cst {dimension_numbers = #tpu.dot_dimension_numbers<[1], [0], [0], [1], [0, 0, 1, 1], [], []>} : vector<128x32xbf16>, vector<32x16xbf16>, vector<128x16xf32> -> vector<128x16xf32>
    %3 = arith.truncf %2 : vector<128x16xf32> to vector<128x16xbf16>
    %c0_3 = arith.constant 0 : index
    %c0_4 = arith.constant 0 : index
    %4 = vector.load %arg3[%c0_3, %c0_4] : memref<128x16xbf16, #tpu.memory_space<vmem>>, vector<128x16xbf16>
    tpu.vector_store %arg3[%c0_3, %c0_4], %3 {strides = array<i32>} : memref<128x16xbf16, #tpu.memory_space<vmem>>, vector<128x16xbf16>,
    return
  }
  func.func @transform_0(%arg0: i32) -> (i32, i32) {
    %c0_i32 = arith.constant 0 : i32
    %c0_i32_0 = arith.constant 0 : i32
    return %arg0, %c0_i32 : i32, i32
  }
  func.func @transform_1(%arg0: i32) -> (i32, i32) {
    %c0_i32 = arith.constant 0 : i32
    %c0_i32_0 = arith.constant 0 : i32
    %c0_i32_1 = arith.constant 0 : i32
    return %c0_i32, %c0_i32_0 : i32, i32
  }
  func.func @transform_2(%arg0: i32) -> (i32, i32) {
    %c0_i32 = arith.constant 0 : i32
    %c0_i32_0 = arith.constant 0 : i32
    return %arg0, %c0_i32 : i32, i32
  }
}

module attributes {stable_mosaic.version = 11 : i64} {
  func.func @_bnrelu_mean_kernel(%arg0: memref<4x32x128xbf16, #tpu.memory_space<vmem>>, %arg1: memref<1x128xf32, #tpu.memory_space<vmem>>, %arg2: memref<1x128xf32, #tpu.memory_space<vmem>>, %arg3: memref<32x128xbf16, #tpu.memory_space<vmem>>) attributes {dimension_semantics = [], scalar_prefetch = 0 : i64, scratch_operands = 0 : i64, tpu.core_type = #tpu.core_type<tc>} {
    %c0 = arith.constant 0 : index
    %c0_0 = arith.constant 0 : index
    %c0_1 = arith.constant 0 : index
    %0 = vector.load %arg0[%c0, %c0_0, %c0_1] : memref<4x32x128xbf16, #tpu.memory_space<vmem>>, vector<4x32x128xbf16>
    %1 = arith.extf %0 : vector<4x32x128xbf16> to vector<4x32x128xf32>
    %c0_2 = arith.constant 0 : index
    %c0_3 = arith.constant 0 : index
    %2 = vector.load %arg1[%c0_2, %c0_3] : memref<1x128xf32, #tpu.memory_space<vmem>>, vector<1x128xf32>
    %3 = vector.shape_cast %2 : vector<1x128xf32> to vector<1x1x128xf32>
    %4 = vector.broadcast %3 : vector<1x1x128xf32> to vector<4x32x128xf32>
    %5 = arith.mulf %1, %4 : vector<4x32x128xf32>
    %c0_4 = arith.constant 0 : index
    %c0_5 = arith.constant 0 : index
    %6 = vector.load %arg2[%c0_4, %c0_5] : memref<1x128xf32, #tpu.memory_space<vmem>>, vector<1x128xf32>
    %7 = vector.shape_cast %6 : vector<1x128xf32> to vector<1x1x128xf32>
    %8 = vector.broadcast %7 : vector<1x1x128xf32> to vector<4x32x128xf32>
    %9 = arith.addf %5, %8 : vector<4x32x128xf32>
    %cst = arith.constant 0.000000e+00 : f32
    %10 = vector.broadcast %cst : f32 to vector<4x32x128xf32>
    %11 = arith.maximumf %9, %10 : vector<4x32x128xf32>
    %cst_6 = arith.constant dense<0.000000e+00> : vector<32x128xf32>
    %12 = vector.multi_reduction <add>, %11, %cst_6 [0] : vector<4x32x128xf32> to vector<32x128xf32>
    %cst_7 = arith.constant 4.000000e+00 : f32
    %13 = vector.broadcast %cst_7 : f32 to vector<32x128xf32>
    %14 = arith.divf %12, %13 : vector<32x128xf32>
    %15 = arith.truncf %14 : vector<32x128xf32> to vector<32x128xbf16>
    %c0_8 = arith.constant 0 : index
    %c0_9 = arith.constant 0 : index
    %16 = vector.load %arg3[%c0_8, %c0_9] : memref<32x128xbf16, #tpu.memory_space<vmem>>, vector<32x128xbf16>
    tpu.vector_store %arg3[%c0_8, %c0_9], %15 {strides = array<i32>} : memref<32x128xbf16, #tpu.memory_space<vmem>>, vector<32x128xbf16>,
    return
  }
}

module attributes {stable_mosaic.version = 11 : i64} {
  func.func @_mm_kernel(%arg0: i32, %arg1: memref<128x288xbf16, #tpu.memory_space<vmem>>, %arg2: memref<288x8xbf16, #tpu.memory_space<vmem>>, %arg3: memref<128x8xbf16, #tpu.memory_space<vmem>>) attributes {dimension_semantics = [#tpu.dimension_semantics<parallel>], iteration_bounds = array<i64: 1>, scalar_prefetch = 0 : i64, scratch_operands = 0 : i64, tpu.core_type = #tpu.core_type<tc>, window_params = [{transform_indices = @transform_0, window_bounds = array<i64: 128, 288>}, {pipeline_mode = #tpu.pipeline_mode<synchronous>, transform_indices = @transform_1, window_bounds = array<i64: 288, 8>}, {transform_indices = @transform_2, window_bounds = array<i64: 128, 8>}]} {
    %c0 = arith.constant 0 : index
    %c0_0 = arith.constant 0 : index
    %0 = vector.load %arg1[%c0, %c0_0] : memref<128x288xbf16, #tpu.memory_space<vmem>>, vector<128x288xbf16>
    %c0_1 = arith.constant 0 : index
    %c0_2 = arith.constant 0 : index
    %1 = vector.load %arg2[%c0_1, %c0_2] : memref<288x8xbf16, #tpu.memory_space<vmem>>, vector<288x8xbf16>
    %cst = arith.constant dense<0.000000e+00> : vector<128x8xf32>
    %2 = tpu.matmul %0, %1, %cst {dimension_numbers = #tpu.dot_dimension_numbers<[1], [0], [0], [1], [0, 0, 1, 1], [], []>} : vector<128x288xbf16>, vector<288x8xbf16>, vector<128x8xf32> -> vector<128x8xf32>
    %3 = arith.truncf %2 : vector<128x8xf32> to vector<128x8xbf16>
    %c0_3 = arith.constant 0 : index
    %c0_4 = arith.constant 0 : index
    %4 = vector.load %arg3[%c0_3, %c0_4] : memref<128x8xbf16, #tpu.memory_space<vmem>>, vector<128x8xbf16>
    tpu.vector_store %arg3[%c0_3, %c0_4], %3 {strides = array<i32>} : memref<128x8xbf16, #tpu.memory_space<vmem>>, vector<128x8xbf16>,
    return
  }
  func.func @transform_0(%arg0: i32) -> (i32, i32) {
    %c0_i32 = arith.constant 0 : i32
    %c0_i32_0 = arith.constant 0 : i32
    return %arg0, %c0_i32 : i32, i32
  }
  func.func @transform_1(%arg0: i32) -> (i32, i32) {
    %c0_i32 = arith.constant 0 : i32
    %c0_i32_0 = arith.constant 0 : i32
    %c0_i32_1 = arith.constant 0 : i32
    return %c0_i32, %c0_i32_0 : i32, i32
  }
  func.func @transform_2(%arg0: i32) -> (i32, i32) {
    %c0_i32 = arith.constant 0 : i32
    %c0_i32_0 = arith.constant 0 : i32
    return %arg0, %c0_i32 : i32, i32
  }
}

module attributes {stable_mosaic.version = 11 : i64} {
  func.func @_mm_kernel(%arg0: i32, %arg1: memref<128x24xbf16, #tpu.memory_space<vmem>>, %arg2: memref<24x32xbf16, #tpu.memory_space<vmem>>, %arg3: memref<1x24xf32, #tpu.memory_space<vmem>>, %arg4: memref<1x24xf32, #tpu.memory_space<vmem>>, %arg5: memref<1x32xf32, #tpu.memory_space<vmem>>, %arg6: memref<1x32xf32, #tpu.memory_space<vmem>>, %arg7: memref<128x32xbf16, #tpu.memory_space<vmem>>) attributes {dimension_semantics = [#tpu.dimension_semantics<parallel>], iteration_bounds = array<i64: 1>, scalar_prefetch = 0 : i64, scratch_operands = 0 : i64, tpu.core_type = #tpu.core_type<tc>, window_params = [{transform_indices = @transform_0, window_bounds = array<i64: 128, 24>}, {pipeline_mode = #tpu.pipeline_mode<synchronous>, transform_indices = @transform_1, window_bounds = array<i64: 24, 32>}, {pipeline_mode = #tpu.pipeline_mode<synchronous>, transform_indices = @transform_2, window_bounds = array<i64: 1, 24>}, {pipeline_mode = #tpu.pipeline_mode<synchronous>, transform_indices = @transform_3, window_bounds = array<i64: 1, 24>}, {pipeline_mode = #tpu.pipeline_mode<synchronous>, transform_indices = @transform_4, window_bounds = array<i64: 1, 32>}, {pipeline_mode = #tpu.pipeline_mode<synchronous>, transform_indices = @transform_5, window_bounds = array<i64: 1, 32>}, {transform_indices = @transform_6, window_bounds = array<i64: 128, 32>}]} {
    %c0 = arith.constant 0 : index
    %c0_0 = arith.constant 0 : index
    %0 = vector.load %arg1[%c0, %c0_0] : memref<128x24xbf16, #tpu.memory_space<vmem>>, vector<128x24xbf16>
    %1 = arith.extf %0 : vector<128x24xbf16> to vector<128x24xf32>
    %c0_1 = arith.constant 0 : index
    %c0_2 = arith.constant 0 : index
    %2 = vector.load %arg3[%c0_1, %c0_2] : memref<1x24xf32, #tpu.memory_space<vmem>>, vector<1x24xf32>
    %3 = vector.broadcast %2 : vector<1x24xf32> to vector<128x24xf32>
    %4 = arith.mulf %1, %3 : vector<128x24xf32>
    %c0_3 = arith.constant 0 : index
    %c0_4 = arith.constant 0 : index
    %5 = vector.load %arg4[%c0_3, %c0_4] : memref<1x24xf32, #tpu.memory_space<vmem>>, vector<1x24xf32>
    %6 = vector.broadcast %5 : vector<1x24xf32> to vector<128x24xf32>
    %7 = arith.addf %4, %6 : vector<128x24xf32>
    %cst = arith.constant 0.000000e+00 : f32
    %8 = vector.broadcast %cst : f32 to vector<128x24xf32>
    %9 = arith.maximumf %7, %8 : vector<128x24xf32>
    %10 = arith.truncf %9 : vector<128x24xf32> to vector<128x24xbf16>
    %c0_5 = arith.constant 0 : index
    %c0_6 = arith.constant 0 : index
    %11 = vector.load %arg2[%c0_5, %c0_6] : memref<24x32xbf16, #tpu.memory_space<vmem>>, vector<24x32xbf16>
    %cst_7 = arith.constant dense<0.000000e+00> : vector<128x32xf32>
    %12 = tpu.matmul %10, %11, %cst_7 {dimension_numbers = #tpu.dot_dimension_numbers<[1], [0], [0], [1], [0, 0, 1, 1], [], []>} : vector<128x24xbf16>, vector<24x32xbf16>, vector<128x32xf32> -> vector<128x32xf32>
    %c0_8 = arith.constant 0 : index
    %c0_9 = arith.constant 0 : index
    %13 = vector.load %arg5[%c0_8, %c0_9] : memref<1x32xf32, #tpu.memory_space<vmem>>, vector<1x32xf32>
    %14 = vector.broadcast %13 : vector<1x32xf32> to vector<128x32xf32>
    %15 = arith.mulf %12, %14 : vector<128x32xf32>
    %c0_10 = arith.constant 0 : index
    %c0_11 = arith.constant 0 : index
    %16 = vector.load %arg6[%c0_10, %c0_11] : memref<1x32xf32, #tpu.memory_space<vmem>>, vector<1x32xf32>
    %17 = vector.broadcast %16 : vector<1x32xf32> to vector<128x32xf32>
    %18 = arith.addf %15, %17 : vector<128x32xf32>
    %cst_12 = arith.constant 0.000000e+00 : f32
    %19 = vector.broadcast %cst_12 : f32 to vector<128x32xf32>
    %20 = arith.maximumf %18, %19 : vector<128x32xf32>
    %21 = arith.truncf %20 : vector<128x32xf32> to vector<128x32xbf16>
    %c0_13 = arith.constant 0 : index
    %c0_14 = arith.constant 0 : index
    %22 = vector.load %arg7[%c0_13, %c0_14] : memref<128x32xbf16, #tpu.memory_space<vmem>>, vector<128x32xbf16>
    tpu.vector_store %arg7[%c0_13, %c0_14], %21 {strides = array<i32>} : memref<128x32xbf16, #tpu.memory_space<vmem>>, vector<128x32xbf16>,
    return
  }
  func.func @transform_0(%arg0: i32) -> (i32, i32) {
    %c0_i32 = arith.constant 0 : i32
    %c0_i32_0 = arith.constant 0 : i32
    return %arg0, %c0_i32 : i32, i32
  }
  func.func @transform_1(%arg0: i32) -> (i32, i32) {
    %c0_i32 = arith.constant 0 : i32
    %c0_i32_0 = arith.constant 0 : i32
    %c0_i32_1 = arith.constant 0 : i32
    return %c0_i32, %c0_i32_0 : i32, i32
  }
  func.func @transform_2(%arg0: i32) -> (i32, i32) {
    %c0_i32 = arith.constant 0 : i32
    %c0_i32_0 = arith.constant 0 : i32
    %c0_i32_1 = arith.constant 0 : i32
    return %c0_i32, %c0_i32_0 : i32, i32
  }
  func.func @transform_3(%arg0: i32) -> (i32, i32) {
    %c0_i32 = arith.constant 0 : i32
    %c0_i32_0 = arith.constant 0 : i32
    %c0_i32_1 = arith.constant 0 : i32
    return %c0_i32, %c0_i32_0 : i32, i32
  }
  func.func @transform_4(%arg0: i32) -> (i32, i32) {
    %c0_i32 = arith.constant 0 : i32
    %c0_i32_0 = arith.constant 0 : i32
    %c0_i32_1 = arith.constant 0 : i32
    return %c0_i32, %c0_i32_0 : i32, i32
  }
  func.func @transform_5(%arg0: i32) -> (i32, i32) {
    %c0_i32 = arith.constant 0 : i32
    %c0_i32_0 = arith.constant 0 : i32
    %c0_i32_1 = arith.constant 0 : i32
    return %c0_i32, %c0_i32_0 : i32, i32
  }
  func.func @transform_6(%arg0: i32) -> (i32, i32) {
    %c0_i32 = arith.constant 0 : i32
    %c0_i32_0 = arith.constant 0 : i32
    return %arg0, %c0_i32 : i32, i32
  }
}

module attributes {stable_mosaic.version = 11 : i64} {
  func.func @_mm_kernel(%arg0: i32, %arg1: memref<32x32xbf16, #tpu.memory_space<vmem>>, %arg2: memref<32x16xbf16, #tpu.memory_space<vmem>>, %arg3: memref<32x16xbf16, #tpu.memory_space<vmem>>) attributes {dimension_semantics = [#tpu.dimension_semantics<parallel>], iteration_bounds = array<i64: 1>, scalar_prefetch = 0 : i64, scratch_operands = 0 : i64, tpu.core_type = #tpu.core_type<tc>, window_params = [{transform_indices = @transform_0, window_bounds = array<i64: 32, 32>}, {pipeline_mode = #tpu.pipeline_mode<synchronous>, transform_indices = @transform_1, window_bounds = array<i64: 32, 16>}, {transform_indices = @transform_2, window_bounds = array<i64: 32, 16>}]} {
    %c0 = arith.constant 0 : index
    %c0_0 = arith.constant 0 : index
    %0 = vector.load %arg1[%c0, %c0_0] : memref<32x32xbf16, #tpu.memory_space<vmem>>, vector<32x32xbf16>
    %c0_1 = arith.constant 0 : index
    %c0_2 = arith.constant 0 : index
    %1 = vector.load %arg2[%c0_1, %c0_2] : memref<32x16xbf16, #tpu.memory_space<vmem>>, vector<32x16xbf16>
    %cst = arith.constant dense<0.000000e+00> : vector<32x16xf32>
    %2 = tpu.matmul %0, %1, %cst {dimension_numbers = #tpu.dot_dimension_numbers<[1], [0], [0], [1], [0, 0, 1, 1], [], []>} : vector<32x32xbf16>, vector<32x16xbf16>, vector<32x16xf32> -> vector<32x16xf32>
    %3 = arith.truncf %2 : vector<32x16xf32> to vector<32x16xbf16>
    %c0_3 = arith.constant 0 : index
    %c0_4 = arith.constant 0 : index
    %4 = vector.load %arg3[%c0_3, %c0_4] : memref<32x16xbf16, #tpu.memory_space<vmem>>, vector<32x16xbf16>
    tpu.vector_store %arg3[%c0_3, %c0_4], %3 {strides = array<i32>} : memref<32x16xbf16, #tpu.memory_space<vmem>>, vector<32x16xbf16>,
    return
  }
  func.func @transform_0(%arg0: i32) -> (i32, i32) {
    %c0_i32 = arith.constant 0 : i32
    %c0_i32_0 = arith.constant 0 : i32
    return %arg0, %c0_i32 : i32, i32
  }
  func.func @transform_1(%arg0: i32) -> (i32, i32) {
    %c0_i32 = arith.constant 0 : i32
    %c0_i32_0 = arith.constant 0 : i32
    %c0_i32_1 = arith.constant 0 : i32
    return %c0_i32, %c0_i32_0 : i32, i32
  }
  func.func @transform_2(%arg0: i32) -> (i32, i32) {
    %c0_i32 = arith.constant 0 : i32
    %c0_i32_0 = arith.constant 0 : i32
    return %arg0, %c0_i32 : i32, i32
  }
}

module attributes {stable_mosaic.version = 11 : i64} {
  func.func @_mm_kernel(%arg0: i32, %arg1: memref<32x16xbf16, #tpu.memory_space<vmem>>, %arg2: memref<16x32xbf16, #tpu.memory_space<vmem>>, %arg3: memref<1x16xf32, #tpu.memory_space<vmem>>, %arg4: memref<1x16xf32, #tpu.memory_space<vmem>>, %arg5: memref<1x32xf32, #tpu.memory_space<vmem>>, %arg6: memref<1x32xf32, #tpu.memory_space<vmem>>, %arg7: memref<32x32xbf16, #tpu.memory_space<vmem>>) attributes {dimension_semantics = [#tpu.dimension_semantics<parallel>], iteration_bounds = array<i64: 1>, scalar_prefetch = 0 : i64, scratch_operands = 0 : i64, tpu.core_type = #tpu.core_type<tc>, window_params = [{transform_indices = @transform_0, window_bounds = array<i64: 32, 16>}, {pipeline_mode = #tpu.pipeline_mode<synchronous>, transform_indices = @transform_1, window_bounds = array<i64: 16, 32>}, {pipeline_mode = #tpu.pipeline_mode<synchronous>, transform_indices = @transform_2, window_bounds = array<i64: 1, 16>}, {pipeline_mode = #tpu.pipeline_mode<synchronous>, transform_indices = @transform_3, window_bounds = array<i64: 1, 16>}, {pipeline_mode = #tpu.pipeline_mode<synchronous>, transform_indices = @transform_4, window_bounds = array<i64: 1, 32>}, {pipeline_mode = #tpu.pipeline_mode<synchronous>, transform_indices = @transform_5, window_bounds = array<i64: 1, 32>}, {transform_indices = @transform_6, window_bounds = array<i64: 32, 32>}]} {
    %c0 = arith.constant 0 : index
    %c0_0 = arith.constant 0 : index
    %0 = vector.load %arg1[%c0, %c0_0] : memref<32x16xbf16, #tpu.memory_space<vmem>>, vector<32x16xbf16>
    %1 = arith.extf %0 : vector<32x16xbf16> to vector<32x16xf32>
    %c0_1 = arith.constant 0 : index
    %c0_2 = arith.constant 0 : index
    %2 = vector.load %arg3[%c0_1, %c0_2] : memref<1x16xf32, #tpu.memory_space<vmem>>, vector<1x16xf32>
    %3 = vector.broadcast %2 : vector<1x16xf32> to vector<32x16xf32>
    %4 = arith.mulf %1, %3 : vector<32x16xf32>
    %c0_3 = arith.constant 0 : index
    %c0_4 = arith.constant 0 : index
    %5 = vector.load %arg4[%c0_3, %c0_4] : memref<1x16xf32, #tpu.memory_space<vmem>>, vector<1x16xf32>
    %6 = vector.broadcast %5 : vector<1x16xf32> to vector<32x16xf32>
    %7 = arith.addf %4, %6 : vector<32x16xf32>
    %cst = arith.constant 0.000000e+00 : f32
    %8 = vector.broadcast %cst : f32 to vector<32x16xf32>
    %9 = arith.maximumf %7, %8 : vector<32x16xf32>
    %10 = arith.truncf %9 : vector<32x16xf32> to vector<32x16xbf16>
    %c0_5 = arith.constant 0 : index
    %c0_6 = arith.constant 0 : index
    %11 = vector.load %arg2[%c0_5, %c0_6] : memref<16x32xbf16, #tpu.memory_space<vmem>>, vector<16x32xbf16>
    %cst_7 = arith.constant dense<0.000000e+00> : vector<32x32xf32>
    %12 = tpu.matmul %10, %11, %cst_7 {dimension_numbers = #tpu.dot_dimension_numbers<[1], [0], [0], [1], [0, 0, 1, 1], [], []>} : vector<32x16xbf16>, vector<16x32xbf16>, vector<32x32xf32> -> vector<32x32xf32>
    %c0_8 = arith.constant 0 : index
    %c0_9 = arith.constant 0 : index
    %13 = vector.load %arg5[%c0_8, %c0_9] : memref<1x32xf32, #tpu.memory_space<vmem>>, vector<1x32xf32>
    %14 = vector.broadcast %13 : vector<1x32xf32> to vector<32x32xf32>
    %15 = arith.mulf %12, %14 : vector<32x32xf32>
    %c0_10 = arith.constant 0 : index
    %c0_11 = arith.constant 0 : index
    %16 = vector.load %arg6[%c0_10, %c0_11] : memref<1x32xf32, #tpu.memory_space<vmem>>, vector<1x32xf32>
    %17 = vector.broadcast %16 : vector<1x32xf32> to vector<32x32xf32>
    %18 = arith.addf %15, %17 : vector<32x32xf32>
    %cst_12 = arith.constant 0.000000e+00 : f32
    %19 = vector.broadcast %cst_12 : f32 to vector<32x32xf32>
    %20 = arith.maximumf %18, %19 : vector<32x32xf32>
    %21 = arith.truncf %20 : vector<32x32xf32> to vector<32x32xbf16>
    %c0_13 = arith.constant 0 : index
    %c0_14 = arith.constant 0 : index
    %22 = vector.load %arg7[%c0_13, %c0_14] : memref<32x32xbf16, #tpu.memory_space<vmem>>, vector<32x32xbf16>
    tpu.vector_store %arg7[%c0_13, %c0_14], %21 {strides = array<i32>} : memref<32x32xbf16, #tpu.memory_space<vmem>>, vector<32x32xbf16>,
    return
  }
  func.func @transform_0(%arg0: i32) -> (i32, i32) {
    %c0_i32 = arith.constant 0 : i32
    %c0_i32_0 = arith.constant 0 : i32
    return %arg0, %c0_i32 : i32, i32
  }
  func.func @transform_1(%arg0: i32) -> (i32, i32) {
    %c0_i32 = arith.constant 0 : i32
    %c0_i32_0 = arith.constant 0 : i32
    %c0_i32_1 = arith.constant 0 : i32
    return %c0_i32, %c0_i32_0 : i32, i32
  }
  func.func @transform_2(%arg0: i32) -> (i32, i32) {
    %c0_i32 = arith.constant 0 : i32
    %c0_i32_0 = arith.constant 0 : i32
    %c0_i32_1 = arith.constant 0 : i32
    return %c0_i32, %c0_i32_0 : i32, i32
  }
  func.func @transform_3(%arg0: i32) -> (i32, i32) {
    %c0_i32 = arith.constant 0 : i32
    %c0_i32_0 = arith.constant 0 : i32
    %c0_i32_1 = arith.constant 0 : i32
    return %c0_i32, %c0_i32_0 : i32, i32
  }
  func.func @transform_4(%arg0: i32) -> (i32, i32) {
    %c0_i32 = arith.constant 0 : i32
    %c0_i32_0 = arith.constant 0 : i32
    %c0_i32_1 = arith.constant 0 : i32
    return %c0_i32, %c0_i32_0 : i32, i32
  }
  func.func @transform_5(%arg0: i32) -> (i32, i32) {
    %c0_i32 = arith.constant 0 : i32
    %c0_i32_0 = arith.constant 0 : i32
    %c0_i32_1 = arith.constant 0 : i32
    return %c0_i32, %c0_i32_0 : i32, i32
  }
  func.func @transform_6(%arg0: i32) -> (i32, i32) {
    %c0_i32 = arith.constant 0 : i32
    %c0_i32_0 = arith.constant 0 : i32
    return %arg0, %c0_i32 : i32, i32
  }
}

module attributes {stable_mosaic.version = 11 : i64} {
  func.func @_bnrelu_mean_kernel(%arg0: memref<4x8x128xbf16, #tpu.memory_space<vmem>>, %arg1: memref<1x128xf32, #tpu.memory_space<vmem>>, %arg2: memref<1x128xf32, #tpu.memory_space<vmem>>, %arg3: memref<8x128xbf16, #tpu.memory_space<vmem>>) attributes {dimension_semantics = [], scalar_prefetch = 0 : i64, scratch_operands = 0 : i64, tpu.core_type = #tpu.core_type<tc>} {
    %c0 = arith.constant 0 : index
    %c0_0 = arith.constant 0 : index
    %c0_1 = arith.constant 0 : index
    %0 = vector.load %arg0[%c0, %c0_0, %c0_1] : memref<4x8x128xbf16, #tpu.memory_space<vmem>>, vector<4x8x128xbf16>
    %1 = arith.extf %0 : vector<4x8x128xbf16> to vector<4x8x128xf32>
    %c0_2 = arith.constant 0 : index
    %c0_3 = arith.constant 0 : index
    %2 = vector.load %arg1[%c0_2, %c0_3] : memref<1x128xf32, #tpu.memory_space<vmem>>, vector<1x128xf32>
    %3 = vector.shape_cast %2 : vector<1x128xf32> to vector<1x1x128xf32>
    %4 = vector.broadcast %3 : vector<1x1x128xf32> to vector<4x8x128xf32>
    %5 = arith.mulf %1, %4 : vector<4x8x128xf32>
    %c0_4 = arith.constant 0 : index
    %c0_5 = arith.constant 0 : index
    %6 = vector.load %arg2[%c0_4, %c0_5] : memref<1x128xf32, #tpu.memory_space<vmem>>, vector<1x128xf32>
    %7 = vector.shape_cast %6 : vector<1x128xf32> to vector<1x1x128xf32>
    %8 = vector.broadcast %7 : vector<1x1x128xf32> to vector<4x8x128xf32>
    %9 = arith.addf %5, %8 : vector<4x8x128xf32>
    %cst = arith.constant 0.000000e+00 : f32
    %10 = vector.broadcast %cst : f32 to vector<4x8x128xf32>
    %11 = arith.maximumf %9, %10 : vector<4x8x128xf32>
    %cst_6 = arith.constant dense<0.000000e+00> : vector<8x128xf32>
    %12 = vector.multi_reduction <add>, %11, %cst_6 [0] : vector<4x8x128xf32> to vector<8x128xf32>
    %cst_7 = arith.constant 4.000000e+00 : f32
    %13 = vector.broadcast %cst_7 : f32 to vector<8x128xf32>
    %14 = arith.divf %12, %13 : vector<8x128xf32>
    %15 = arith.truncf %14 : vector<8x128xf32> to vector<8x128xbf16>
    %c0_8 = arith.constant 0 : index
    %c0_9 = arith.constant 0 : index
    %16 = vector.load %arg3[%c0_8, %c0_9] : memref<8x128xbf16, #tpu.memory_space<vmem>>, vector<8x128xbf16>
    tpu.vector_store %arg3[%c0_8, %c0_9], %15 {strides = array<i32>} : memref<8x128xbf16, #tpu.memory_space<vmem>>, vector<8x128xbf16>,
    return
  }
}

module attributes {stable_mosaic.version = 11 : i64} {
  func.func @_mm_kernel(%arg0: i32, %arg1: memref<32x288xbf16, #tpu.memory_space<vmem>>, %arg2: memref<288x8xbf16, #tpu.memory_space<vmem>>, %arg3: memref<32x8xbf16, #tpu.memory_space<vmem>>) attributes {dimension_semantics = [#tpu.dimension_semantics<parallel>], iteration_bounds = array<i64: 1>, scalar_prefetch = 0 : i64, scratch_operands = 0 : i64, tpu.core_type = #tpu.core_type<tc>, window_params = [{transform_indices = @transform_0, window_bounds = array<i64: 32, 288>}, {pipeline_mode = #tpu.pipeline_mode<synchronous>, transform_indices = @transform_1, window_bounds = array<i64: 288, 8>}, {transform_indices = @transform_2, window_bounds = array<i64: 32, 8>}]} {
    %c0 = arith.constant 0 : index
    %c0_0 = arith.constant 0 : index
    %0 = vector.load %arg1[%c0, %c0_0] : memref<32x288xbf16, #tpu.memory_space<vmem>>, vector<32x288xbf16>
    %c0_1 = arith.constant 0 : index
    %c0_2 = arith.constant 0 : index
    %1 = vector.load %arg2[%c0_1, %c0_2] : memref<288x8xbf16, #tpu.memory_space<vmem>>, vector<288x8xbf16>
    %cst = arith.constant dense<0.000000e+00> : vector<32x8xf32>
    %2 = tpu.matmul %0, %1, %cst {dimension_numbers = #tpu.dot_dimension_numbers<[1], [0], [0], [1], [0, 0, 1, 1], [], []>} : vector<32x288xbf16>, vector<288x8xbf16>, vector<32x8xf32> -> vector<32x8xf32>
    %3 = arith.truncf %2 : vector<32x8xf32> to vector<32x8xbf16>
    %c0_3 = arith.constant 0 : index
    %c0_4 = arith.constant 0 : index
    %4 = vector.load %arg3[%c0_3, %c0_4] : memref<32x8xbf16, #tpu.memory_space<vmem>>, vector<32x8xbf16>
    tpu.vector_store %arg3[%c0_3, %c0_4], %3 {strides = array<i32>} : memref<32x8xbf16, #tpu.memory_space<vmem>>, vector<32x8xbf16>,
    return
  }
  func.func @transform_0(%arg0: i32) -> (i32, i32) {
    %c0_i32 = arith.constant 0 : i32
    %c0_i32_0 = arith.constant 0 : i32
    return %arg0, %c0_i32 : i32, i32
  }
  func.func @transform_1(%arg0: i32) -> (i32, i32) {
    %c0_i32 = arith.constant 0 : i32
    %c0_i32_0 = arith.constant 0 : i32
    %c0_i32_1 = arith.constant 0 : i32
    return %c0_i32, %c0_i32_0 : i32, i32
  }
  func.func @transform_2(%arg0: i32) -> (i32, i32) {
    %c0_i32 = arith.constant 0 : i32
    %c0_i32_0 = arith.constant 0 : i32
    return %arg0, %c0_i32 : i32, i32
  }
}

module attributes {stable_mosaic.version = 11 : i64} {
  func.func @_mm_kernel(%arg0: i32, %arg1: memref<32x24xbf16, #tpu.memory_space<vmem>>, %arg2: memref<24x32xbf16, #tpu.memory_space<vmem>>, %arg3: memref<1x24xf32, #tpu.memory_space<vmem>>, %arg4: memref<1x24xf32, #tpu.memory_space<vmem>>, %arg5: memref<1x32xf32, #tpu.memory_space<vmem>>, %arg6: memref<1x32xf32, #tpu.memory_space<vmem>>, %arg7: memref<32x32xbf16, #tpu.memory_space<vmem>>) attributes {dimension_semantics = [#tpu.dimension_semantics<parallel>], iteration_bounds = array<i64: 1>, scalar_prefetch = 0 : i64, scratch_operands = 0 : i64, tpu.core_type = #tpu.core_type<tc>, window_params = [{transform_indices = @transform_0, window_bounds = array<i64: 32, 24>}, {pipeline_mode = #tpu.pipeline_mode<synchronous>, transform_indices = @transform_1, window_bounds = array<i64: 24, 32>}, {pipeline_mode = #tpu.pipeline_mode<synchronous>, transform_indices = @transform_2, window_bounds = array<i64: 1, 24>}, {pipeline_mode = #tpu.pipeline_mode<synchronous>, transform_indices = @transform_3, window_bounds = array<i64: 1, 24>}, {pipeline_mode = #tpu.pipeline_mode<synchronous>, transform_indices = @transform_4, window_bounds = array<i64: 1, 32>}, {pipeline_mode = #tpu.pipeline_mode<synchronous>, transform_indices = @transform_5, window_bounds = array<i64: 1, 32>}, {transform_indices = @transform_6, window_bounds = array<i64: 32, 32>}]} {
    %c0 = arith.constant 0 : index
    %c0_0 = arith.constant 0 : index
    %0 = vector.load %arg1[%c0, %c0_0] : memref<32x24xbf16, #tpu.memory_space<vmem>>, vector<32x24xbf16>
    %1 = arith.extf %0 : vector<32x24xbf16> to vector<32x24xf32>
    %c0_1 = arith.constant 0 : index
    %c0_2 = arith.constant 0 : index
    %2 = vector.load %arg3[%c0_1, %c0_2] : memref<1x24xf32, #tpu.memory_space<vmem>>, vector<1x24xf32>
    %3 = vector.broadcast %2 : vector<1x24xf32> to vector<32x24xf32>
    %4 = arith.mulf %1, %3 : vector<32x24xf32>
    %c0_3 = arith.constant 0 : index
    %c0_4 = arith.constant 0 : index
    %5 = vector.load %arg4[%c0_3, %c0_4] : memref<1x24xf32, #tpu.memory_space<vmem>>, vector<1x24xf32>
    %6 = vector.broadcast %5 : vector<1x24xf32> to vector<32x24xf32>
    %7 = arith.addf %4, %6 : vector<32x24xf32>
    %cst = arith.constant 0.000000e+00 : f32
    %8 = vector.broadcast %cst : f32 to vector<32x24xf32>
    %9 = arith.maximumf %7, %8 : vector<32x24xf32>
    %10 = arith.truncf %9 : vector<32x24xf32> to vector<32x24xbf16>
    %c0_5 = arith.constant 0 : index
    %c0_6 = arith.constant 0 : index
    %11 = vector.load %arg2[%c0_5, %c0_6] : memref<24x32xbf16, #tpu.memory_space<vmem>>, vector<24x32xbf16>
    %cst_7 = arith.constant dense<0.000000e+00> : vector<32x32xf32>
    %12 = tpu.matmul %10, %11, %cst_7 {dimension_numbers = #tpu.dot_dimension_numbers<[1], [0], [0], [1], [0, 0, 1, 1], [], []>} : vector<32x24xbf16>, vector<24x32xbf16>, vector<32x32xf32> -> vector<32x32xf32>
    %c0_8 = arith.constant 0 : index
    %c0_9 = arith.constant 0 : index
    %13 = vector.load %arg5[%c0_8, %c0_9] : memref<1x32xf32, #tpu.memory_space<vmem>>, vector<1x32xf32>
    %14 = vector.broadcast %13 : vector<1x32xf32> to vector<32x32xf32>
    %15 = arith.mulf %12, %14 : vector<32x32xf32>
    %c0_10 = arith.constant 0 : index
    %c0_11 = arith.constant 0 : index
    %16 = vector.load %arg6[%c0_10, %c0_11] : memref<1x32xf32, #tpu.memory_space<vmem>>, vector<1x32xf32>
    %17 = vector.broadcast %16 : vector<1x32xf32> to vector<32x32xf32>
    %18 = arith.addf %15, %17 : vector<32x32xf32>
    %cst_12 = arith.constant 0.000000e+00 : f32
    %19 = vector.broadcast %cst_12 : f32 to vector<32x32xf32>
    %20 = arith.maximumf %18, %19 : vector<32x32xf32>
    %21 = arith.truncf %20 : vector<32x32xf32> to vector<32x32xbf16>
    %c0_13 = arith.constant 0 : index
    %c0_14 = arith.constant 0 : index
    %22 = vector.load %arg7[%c0_13, %c0_14] : memref<32x32xbf16, #tpu.memory_space<vmem>>, vector<32x32xbf16>
    tpu.vector_store %arg7[%c0_13, %c0_14], %21 {strides = array<i32>} : memref<32x32xbf16, #tpu.memory_space<vmem>>, vector<32x32xbf16>,
    return
  }
  func.func @transform_0(%arg0: i32) -> (i32, i32) {
    %c0_i32 = arith.constant 0 : i32
    %c0_i32_0 = arith.constant 0 : i32
    return %arg0, %c0_i32 : i32, i32
  }
  func.func @transform_1(%arg0: i32) -> (i32, i32) {
    %c0_i32 = arith.constant 0 : i32
    %c0_i32_0 = arith.constant 0 : i32
    %c0_i32_1 = arith.constant 0 : i32
    return %c0_i32, %c0_i32_0 : i32, i32
  }
  func.func @transform_2(%arg0: i32) -> (i32, i32) {
    %c0_i32 = arith.constant 0 : i32
    %c0_i32_0 = arith.constant 0 : i32
    %c0_i32_1 = arith.constant 0 : i32
    return %c0_i32, %c0_i32_0 : i32, i32
  }
  func.func @transform_3(%arg0: i32) -> (i32, i32) {
    %c0_i32 = arith.constant 0 : i32
    %c0_i32_0 = arith.constant 0 : i32
    %c0_i32_1 = arith.constant 0 : i32
    return %c0_i32, %c0_i32_0 : i32, i32
  }
  func.func @transform_4(%arg0: i32) -> (i32, i32) {
    %c0_i32 = arith.constant 0 : i32
    %c0_i32_0 = arith.constant 0 : i32
    %c0_i32_1 = arith.constant 0 : i32
    return %c0_i32, %c0_i32_0 : i32, i32
  }
  func.func @transform_5(%arg0: i32) -> (i32, i32) {
    %c0_i32 = arith.constant 0 : i32
    %c0_i32_0 = arith.constant 0 : i32
    %c0_i32_1 = arith.constant 0 : i32
    return %c0_i32, %c0_i32_0 : i32, i32
  }
  func.func @transform_6(%arg0: i32) -> (i32, i32) {
    %c0_i32 = arith.constant 0 : i32
    %c0_i32_0 = arith.constant 0 : i32
    return %arg0, %c0_i32 : i32, i32
  }
}

module attributes {stable_mosaic.version = 11 : i64} {
  func.func @_bnrelu_mean_kernel(%arg0: memref<4x2x128xbf16, #tpu.memory_space<vmem>>, %arg1: memref<1x128xf32, #tpu.memory_space<vmem>>, %arg2: memref<1x128xf32, #tpu.memory_space<vmem>>, %arg3: memref<2x128xbf16, #tpu.memory_space<vmem>>) attributes {dimension_semantics = [], scalar_prefetch = 0 : i64, scratch_operands = 0 : i64, tpu.core_type = #tpu.core_type<tc>} {
    %c0 = arith.constant 0 : index
    %c0_0 = arith.constant 0 : index
    %c0_1 = arith.constant 0 : index
    %0 = vector.load %arg0[%c0, %c0_0, %c0_1] : memref<4x2x128xbf16, #tpu.memory_space<vmem>>, vector<4x2x128xbf16>
    %1 = arith.extf %0 : vector<4x2x128xbf16> to vector<4x2x128xf32>
    %c0_2 = arith.constant 0 : index
    %c0_3 = arith.constant 0 : index
    %2 = vector.load %arg1[%c0_2, %c0_3] : memref<1x128xf32, #tpu.memory_space<vmem>>, vector<1x128xf32>
    %3 = vector.shape_cast %2 : vector<1x128xf32> to vector<1x1x128xf32>
    %4 = vector.broadcast %3 : vector<1x1x128xf32> to vector<4x2x128xf32>
    %5 = arith.mulf %1, %4 : vector<4x2x128xf32>
    %c0_4 = arith.constant 0 : index
    %c0_5 = arith.constant 0 : index
    %6 = vector.load %arg2[%c0_4, %c0_5] : memref<1x128xf32, #tpu.memory_space<vmem>>, vector<1x128xf32>
    %7 = vector.shape_cast %6 : vector<1x128xf32> to vector<1x1x128xf32>
    %8 = vector.broadcast %7 : vector<1x1x128xf32> to vector<4x2x128xf32>
    %9 = arith.addf %5, %8 : vector<4x2x128xf32>
    %cst = arith.constant 0.000000e+00 : f32
    %10 = vector.broadcast %cst : f32 to vector<4x2x128xf32>
    %11 = arith.maximumf %9, %10 : vector<4x2x128xf32>
    %cst_6 = arith.constant dense<0.000000e+00> : vector<2x128xf32>
    %12 = vector.multi_reduction <add>, %11, %cst_6 [0] : vector<4x2x128xf32> to vector<2x128xf32>
    %cst_7 = arith.constant 4.000000e+00 : f32
    %13 = vector.broadcast %cst_7 : f32 to vector<2x128xf32>
    %14 = arith.divf %12, %13 : vector<2x128xf32>
    %15 = arith.truncf %14 : vector<2x128xf32> to vector<2x128xbf16>
    %c0_8 = arith.constant 0 : index
    %c0_9 = arith.constant 0 : index
    %16 = vector.load %arg3[%c0_8, %c0_9] : memref<2x128xbf16, #tpu.memory_space<vmem>>, vector<2x128xbf16>
    tpu.vector_store %arg3[%c0_8, %c0_9], %15 {strides = array<i32>} : memref<2x128xbf16, #tpu.memory_space<vmem>>, vector<2x128xbf16>,
    return
  }
}

module attributes {stable_mosaic.version = 11 : i64} {
  func.func @_mm_kernel(%arg0: i32, %arg1: memref<8x16xbf16, #tpu.memory_space<vmem>>, %arg2: memref<16x32xbf16, #tpu.memory_space<vmem>>, %arg3: memref<1x16xf32, #tpu.memory_space<vmem>>, %arg4: memref<1x16xf32, #tpu.memory_space<vmem>>, %arg5: memref<1x32xf32, #tpu.memory_space<vmem>>, %arg6: memref<1x32xf32, #tpu.memory_space<vmem>>, %arg7: memref<8x32xbf16, #tpu.memory_space<vmem>>) attributes {dimension_semantics = [#tpu.dimension_semantics<parallel>], iteration_bounds = array<i64: 1>, scalar_prefetch = 0 : i64, scratch_operands = 0 : i64, tpu.core_type = #tpu.core_type<tc>, window_params = [{transform_indices = @transform_0, window_bounds = array<i64: 8, 16>}, {pipeline_mode = #tpu.pipeline_mode<synchronous>, transform_indices = @transform_1, window_bounds = array<i64: 16, 32>}, {pipeline_mode = #tpu.pipeline_mode<synchronous>, transform_indices = @transform_2, window_bounds = array<i64: 1, 16>}, {pipeline_mode = #tpu.pipeline_mode<synchronous>, transform_indices = @transform_3, window_bounds = array<i64: 1, 16>}, {pipeline_mode = #tpu.pipeline_mode<synchronous>, transform_indices = @transform_4, window_bounds = array<i64: 1, 32>}, {pipeline_mode = #tpu.pipeline_mode<synchronous>, transform_indices = @transform_5, window_bounds = array<i64: 1, 32>}, {transform_indices = @transform_6, window_bounds = array<i64: 8, 32>}]} {
    %c0 = arith.constant 0 : index
    %c0_0 = arith.constant 0 : index
    %0 = vector.load %arg1[%c0, %c0_0] : memref<8x16xbf16, #tpu.memory_space<vmem>>, vector<8x16xbf16>
    %1 = arith.extf %0 : vector<8x16xbf16> to vector<8x16xf32>
    %c0_1 = arith.constant 0 : index
    %c0_2 = arith.constant 0 : index
    %2 = vector.load %arg3[%c0_1, %c0_2] : memref<1x16xf32, #tpu.memory_space<vmem>>, vector<1x16xf32>
    %3 = vector.broadcast %2 : vector<1x16xf32> to vector<8x16xf32>
    %4 = arith.mulf %1, %3 : vector<8x16xf32>
    %c0_3 = arith.constant 0 : index
    %c0_4 = arith.constant 0 : index
    %5 = vector.load %arg4[%c0_3, %c0_4] : memref<1x16xf32, #tpu.memory_space<vmem>>, vector<1x16xf32>
    %6 = vector.broadcast %5 : vector<1x16xf32> to vector<8x16xf32>
    %7 = arith.addf %4, %6 : vector<8x16xf32>
    %cst = arith.constant 0.000000e+00 : f32
    %8 = vector.broadcast %cst : f32 to vector<8x16xf32>
    %9 = arith.maximumf %7, %8 : vector<8x16xf32>
    %10 = arith.truncf %9 : vector<8x16xf32> to vector<8x16xbf16>
    %c0_5 = arith.constant 0 : index
    %c0_6 = arith.constant 0 : index
    %11 = vector.load %arg2[%c0_5, %c0_6] : memref<16x32xbf16, #tpu.memory_space<vmem>>, vector<16x32xbf16>
    %cst_7 = arith.constant dense<0.000000e+00> : vector<8x32xf32>
    %12 = tpu.matmul %10, %11, %cst_7 {dimension_numbers = #tpu.dot_dimension_numbers<[1], [0], [0], [1], [0, 0, 1, 1], [], []>} : vector<8x16xbf16>, vector<16x32xbf16>, vector<8x32xf32> -> vector<8x32xf32>
    %c0_8 = arith.constant 0 : index
    %c0_9 = arith.constant 0 : index
    %13 = vector.load %arg5[%c0_8, %c0_9] : memref<1x32xf32, #tpu.memory_space<vmem>>, vector<1x32xf32>
    %14 = vector.broadcast %13 : vector<1x32xf32> to vector<8x32xf32>
    %15 = arith.mulf %12, %14 : vector<8x32xf32>
    %c0_10 = arith.constant 0 : index
    %c0_11 = arith.constant 0 : index
    %16 = vector.load %arg6[%c0_10, %c0_11] : memref<1x32xf32, #tpu.memory_space<vmem>>, vector<1x32xf32>
    %17 = vector.broadcast %16 : vector<1x32xf32> to vector<8x32xf32>
    %18 = arith.addf %15, %17 : vector<8x32xf32>
    %cst_12 = arith.constant 0.000000e+00 : f32
    %19 = vector.broadcast %cst_12 : f32 to vector<8x32xf32>
    %20 = arith.maximumf %18, %19 : vector<8x32xf32>
    %21 = arith.truncf %20 : vector<8x32xf32> to vector<8x32xbf16>
    %c0_13 = arith.constant 0 : index
    %c0_14 = arith.constant 0 : index
    %22 = vector.load %arg7[%c0_13, %c0_14] : memref<8x32xbf16, #tpu.memory_space<vmem>>, vector<8x32xbf16>
    tpu.vector_store %arg7[%c0_13, %c0_14], %21 {strides = array<i32>} : memref<8x32xbf16, #tpu.memory_space<vmem>>, vector<8x32xbf16>,
    return
  }
  func.func @transform_0(%arg0: i32) -> (i32, i32) {
    %c0_i32 = arith.constant 0 : i32
    %c0_i32_0 = arith.constant 0 : i32
    return %arg0, %c0_i32 : i32, i32
  }
  func.func @transform_1(%arg0: i32) -> (i32, i32) {
    %c0_i32 = arith.constant 0 : i32
    %c0_i32_0 = arith.constant 0 : i32
    %c0_i32_1 = arith.constant 0 : i32
    return %c0_i32, %c0_i32_0 : i32, i32
  }
  func.func @transform_2(%arg0: i32) -> (i32, i32) {
    %c0_i32 = arith.constant 0 : i32
    %c0_i32_0 = arith.constant 0 : i32
    %c0_i32_1 = arith.constant 0 : i32
    return %c0_i32, %c0_i32_0 : i32, i32
  }
  func.func @transform_3(%arg0: i32) -> (i32, i32) {
    %c0_i32 = arith.constant 0 : i32
    %c0_i32_0 = arith.constant 0 : i32
    %c0_i32_1 = arith.constant 0 : i32
    return %c0_i32, %c0_i32_0 : i32, i32
  }
  func.func @transform_4(%arg0: i32) -> (i32, i32) {
    %c0_i32 = arith.constant 0 : i32
    %c0_i32_0 = arith.constant 0 : i32
    %c0_i32_1 = arith.constant 0 : i32
    return %c0_i32, %c0_i32_0 : i32, i32
  }
  func.func @transform_5(%arg0: i32) -> (i32, i32) {
    %c0_i32 = arith.constant 0 : i32
    %c0_i32_0 = arith.constant 0 : i32
    %c0_i32_1 = arith.constant 0 : i32
    return %c0_i32, %c0_i32_0 : i32, i32
  }
  func.func @transform_6(%arg0: i32) -> (i32, i32) {
    %c0_i32 = arith.constant 0 : i32
    %c0_i32_0 = arith.constant 0 : i32
    return %arg0, %c0_i32 : i32, i32
  }
}

module attributes {stable_mosaic.version = 11 : i64} {
  func.func @_mm_kernel(%arg0: i32, %arg1: memref<8x32xbf16, #tpu.memory_space<vmem>>, %arg2: memref<32x16xbf16, #tpu.memory_space<vmem>>, %arg3: memref<8x16xbf16, #tpu.memory_space<vmem>>) attributes {dimension_semantics = [#tpu.dimension_semantics<parallel>], iteration_bounds = array<i64: 1>, scalar_prefetch = 0 : i64, scratch_operands = 0 : i64, tpu.core_type = #tpu.core_type<tc>, window_params = [{transform_indices = @transform_0, window_bounds = array<i64: 8, 32>}, {pipeline_mode = #tpu.pipeline_mode<synchronous>, transform_indices = @transform_1, window_bounds = array<i64: 32, 16>}, {transform_indices = @transform_2, window_bounds = array<i64: 8, 16>}]} {
    %c0 = arith.constant 0 : index
    %c0_0 = arith.constant 0 : index
    %0 = vector.load %arg1[%c0, %c0_0] : memref<8x32xbf16, #tpu.memory_space<vmem>>, vector<8x32xbf16>
    %c0_1 = arith.constant 0 : index
    %c0_2 = arith.constant 0 : index
    %1 = vector.load %arg2[%c0_1, %c0_2] : memref<32x16xbf16, #tpu.memory_space<vmem>>, vector<32x16xbf16>
    %cst = arith.constant dense<0.000000e+00> : vector<8x16xf32>
    %2 = tpu.matmul %0, %1, %cst {dimension_numbers = #tpu.dot_dimension_numbers<[1], [0], [0], [1], [0, 0, 1, 1], [], []>} : vector<8x32xbf16>, vector<32x16xbf16>, vector<8x16xf32> -> vector<8x16xf32>
    %3 = arith.truncf %2 : vector<8x16xf32> to vector<8x16xbf16>
    %c0_3 = arith.constant 0 : index
    %c0_4 = arith.constant 0 : index
    %4 = vector.load %arg3[%c0_3, %c0_4] : memref<8x16xbf16, #tpu.memory_space<vmem>>, vector<8x16xbf16>
    tpu.vector_store %arg3[%c0_3, %c0_4], %3 {strides = array<i32>} : memref<8x16xbf16, #tpu.memory_space<vmem>>, vector<8x16xbf16>,
    return
  }
  func.func @transform_0(%arg0: i32) -> (i32, i32) {
    %c0_i32 = arith.constant 0 : i32
    %c0_i32_0 = arith.constant 0 : i32
    return %arg0, %c0_i32 : i32, i32
  }
  func.func @transform_1(%arg0: i32) -> (i32, i32) {
    %c0_i32 = arith.constant 0 : i32
    %c0_i32_0 = arith.constant 0 : i32
    %c0_i32_1 = arith.constant 0 : i32
    return %c0_i32, %c0_i32_0 : i32, i32
  }
  func.func @transform_2(%arg0: i32) -> (i32, i32) {
    %c0_i32 = arith.constant 0 : i32
    %c0_i32_0 = arith.constant 0 : i32
    return %arg0, %c0_i32 : i32, i32
  }
}

module attributes {stable_mosaic.version = 11 : i64} {
  func.func @_mm_kernel(%arg0: i32, %arg1: memref<8x288xbf16, #tpu.memory_space<vmem>>, %arg2: memref<288x8xbf16, #tpu.memory_space<vmem>>, %arg3: memref<8x8xbf16, #tpu.memory_space<vmem>>) attributes {dimension_semantics = [#tpu.dimension_semantics<parallel>], iteration_bounds = array<i64: 1>, scalar_prefetch = 0 : i64, scratch_operands = 0 : i64, tpu.core_type = #tpu.core_type<tc>, window_params = [{transform_indices = @transform_0, window_bounds = array<i64: 8, 288>}, {pipeline_mode = #tpu.pipeline_mode<synchronous>, transform_indices = @transform_1, window_bounds = array<i64: 288, 8>}, {transform_indices = @transform_2, window_bounds = array<i64: 8, 8>}]} {
    %c0 = arith.constant 0 : index
    %c0_0 = arith.constant 0 : index
    %0 = vector.load %arg1[%c0, %c0_0] : memref<8x288xbf16, #tpu.memory_space<vmem>>, vector<8x288xbf16>
    %c0_1 = arith.constant 0 : index
    %c0_2 = arith.constant 0 : index
    %1 = vector.load %arg2[%c0_1, %c0_2] : memref<288x8xbf16, #tpu.memory_space<vmem>>, vector<288x8xbf16>
    %cst = arith.constant dense<0.000000e+00> : vector<8x8xf32>
    %2 = tpu.matmul %0, %1, %cst {dimension_numbers = #tpu.dot_dimension_numbers<[1], [0], [0], [1], [0, 0, 1, 1], [], []>} : vector<8x288xbf16>, vector<288x8xbf16>, vector<8x8xf32> -> vector<8x8xf32>
    %3 = arith.truncf %2 : vector<8x8xf32> to vector<8x8xbf16>
    %c0_3 = arith.constant 0 : index
    %c0_4 = arith.constant 0 : index
    %4 = vector.load %arg3[%c0_3, %c0_4] : memref<8x8xbf16, #tpu.memory_space<vmem>>, vector<8x8xbf16>
    tpu.vector_store %arg3[%c0_3, %c0_4], %3 {strides = array<i32>} : memref<8x8xbf16, #tpu.memory_space<vmem>>, vector<8x8xbf16>,
    return
  }
  func.func @transform_0(%arg0: i32) -> (i32, i32) {
    %c0_i32 = arith.constant 0 : i32
    %c0_i32_0 = arith.constant 0 : i32
    return %arg0, %c0_i32 : i32, i32
  }
  func.func @transform_1(%arg0: i32) -> (i32, i32) {
    %c0_i32 = arith.constant 0 : i32
    %c0_i32_0 = arith.constant 0 : i32
    %c0_i32_1 = arith.constant 0 : i32
    return %c0_i32, %c0_i32_0 : i32, i32
  }
  func.func @transform_2(%arg0: i32) -> (i32, i32) {
    %c0_i32 = arith.constant 0 : i32
    %c0_i32_0 = arith.constant 0 : i32
    return %arg0, %c0_i32 : i32, i32
  }
}

module attributes {stable_mosaic.version = 11 : i64} {
  func.func @_gap_linear_kernel(%arg0: memref<2x4x32xbf16, #tpu.memory_space<vmem>>, %arg1: memref<1x32xf32, #tpu.memory_space<vmem>>, %arg2: memref<1x32xf32, #tpu.memory_space<vmem>>, %arg3: memref<32x10xf32, #tpu.memory_space<vmem>>, %arg4: memref<1x10xf32, #tpu.memory_space<vmem>>, %arg5: memref<2x10xf32, #tpu.memory_space<vmem>>) attributes {dimension_semantics = [], scalar_prefetch = 0 : i64, scratch_operands = 0 : i64, tpu.core_type = #tpu.core_type<tc>} {
    %c0 = arith.constant 0 : index
    %c0_0 = arith.constant 0 : index
    %c0_1 = arith.constant 0 : index
    %0 = vector.load %arg0[%c0, %c0_0, %c0_1] : memref<2x4x32xbf16, #tpu.memory_space<vmem>>, vector<2x4x32xbf16>
    %1 = arith.extf %0 : vector<2x4x32xbf16> to vector<2x4x32xf32>
    %c0_2 = arith.constant 0 : index
    %c0_3 = arith.constant 0 : index
    %2 = vector.load %arg1[%c0_2, %c0_3] : memref<1x32xf32, #tpu.memory_space<vmem>>, vector<1x32xf32>
    %3 = vector.shape_cast %2 : vector<1x32xf32> to vector<1x1x32xf32>
    %4 = vector.broadcast %3 : vector<1x1x32xf32> to vector<2x4x32xf32>
    %5 = arith.mulf %1, %4 : vector<2x4x32xf32>
    %c0_4 = arith.constant 0 : index
    %c0_5 = arith.constant 0 : index
    %6 = vector.load %arg2[%c0_4, %c0_5] : memref<1x32xf32, #tpu.memory_space<vmem>>, vector<1x32xf32>
    %7 = vector.shape_cast %6 : vector<1x32xf32> to vector<1x1x32xf32>
    %8 = vector.broadcast %7 : vector<1x1x32xf32> to vector<2x4x32xf32>
    %9 = arith.addf %5, %8 : vector<2x4x32xf32>
    %cst = arith.constant 0.000000e+00 : f32
    %10 = vector.broadcast %cst : f32 to vector<2x4x32xf32>
    %11 = arith.maximumf %9, %10 : vector<2x4x32xf32>
    %cst_6 = arith.constant dense<0.000000e+00> : vector<2x32xf32>
    %12 = vector.multi_reduction <add>, %11, %cst_6 [1] : vector<2x4x32xf32> to vector<2x32xf32>
    %cst_7 = arith.constant 4.000000e+00 : f32
    %13 = vector.broadcast %cst_7 : f32 to vector<2x32xf32>
    %14 = arith.divf %12, %13 : vector<2x32xf32>
    %c0_8 = arith.constant 0 : index
    %c0_9 = arith.constant 0 : index
    %15 = vector.load %arg3[%c0_8, %c0_9] : memref<32x10xf32, #tpu.memory_space<vmem>>, vector<32x10xf32>
    %cst_10 = arith.constant dense<0.000000e+00> : vector<2x10xf32>
    %16 = tpu.matmul %14, %15, %cst_10 {dimension_numbers = #tpu.dot_dimension_numbers<[1], [0], [0], [1], [0, 0, 1, 1], [], []>} : vector<2x32xf32>, vector<32x10xf32>, vector<2x10xf32> -> vector<2x10xf32>
    %c0_11 = arith.constant 0 : index
    %c0_12 = arith.constant 0 : index
    %17 = vector.load %arg4[%c0_11, %c0_12] : memref<1x10xf32, #tpu.memory_space<vmem>>, vector<1x10xf32>
    %18 = vector.broadcast %17 : vector<1x10xf32> to vector<2x10xf32>
    %19 = arith.addf %16, %18 : vector<2x10xf32>
    %c0_13 = arith.constant 0 : index
    %c0_14 = arith.constant 0 : index
    %20 = vector.load %arg5[%c0_13, %c0_14] : memref<2x10xf32, #tpu.memory_space<vmem>>, vector<2x10xf32>
    tpu.vector_store %arg5[%c0_13, %c0_14], %19 {strides = array<i32>} : memref<2x10xf32, #tpu.memory_space<vmem>>, vector<2x10xf32>,
    return
  }
}

module attributes {stable_mosaic.version = 11 : i64} {
  func.func @_mm_kernel(%arg0: i32, %arg1: memref<8x24xbf16, #tpu.memory_space<vmem>>, %arg2: memref<24x32xbf16, #tpu.memory_space<vmem>>, %arg3: memref<1x24xf32, #tpu.memory_space<vmem>>, %arg4: memref<1x24xf32, #tpu.memory_space<vmem>>, %arg5: memref<1x32xf32, #tpu.memory_space<vmem>>, %arg6: memref<1x32xf32, #tpu.memory_space<vmem>>, %arg7: memref<8x32xbf16, #tpu.memory_space<vmem>>) attributes {dimension_semantics = [#tpu.dimension_semantics<parallel>], iteration_bounds = array<i64: 1>, scalar_prefetch = 0 : i64, scratch_operands = 0 : i64, tpu.core_type = #tpu.core_type<tc>, window_params = [{transform_indices = @transform_0, window_bounds = array<i64: 8, 24>}, {pipeline_mode = #tpu.pipeline_mode<synchronous>, transform_indices = @transform_1, window_bounds = array<i64: 24, 32>}, {pipeline_mode = #tpu.pipeline_mode<synchronous>, transform_indices = @transform_2, window_bounds = array<i64: 1, 24>}, {pipeline_mode = #tpu.pipeline_mode<synchronous>, transform_indices = @transform_3, window_bounds = array<i64: 1, 24>}, {pipeline_mode = #tpu.pipeline_mode<synchronous>, transform_indices = @transform_4, window_bounds = array<i64: 1, 32>}, {pipeline_mode = #tpu.pipeline_mode<synchronous>, transform_indices = @transform_5, window_bounds = array<i64: 1, 32>}, {transform_indices = @transform_6, window_bounds = array<i64: 8, 32>}]} {
    %c0 = arith.constant 0 : index
    %c0_0 = arith.constant 0 : index
    %0 = vector.load %arg1[%c0, %c0_0] : memref<8x24xbf16, #tpu.memory_space<vmem>>, vector<8x24xbf16>
    %1 = arith.extf %0 : vector<8x24xbf16> to vector<8x24xf32>
    %c0_1 = arith.constant 0 : index
    %c0_2 = arith.constant 0 : index
    %2 = vector.load %arg3[%c0_1, %c0_2] : memref<1x24xf32, #tpu.memory_space<vmem>>, vector<1x24xf32>
    %3 = vector.broadcast %2 : vector<1x24xf32> to vector<8x24xf32>
    %4 = arith.mulf %1, %3 : vector<8x24xf32>
    %c0_3 = arith.constant 0 : index
    %c0_4 = arith.constant 0 : index
    %5 = vector.load %arg4[%c0_3, %c0_4] : memref<1x24xf32, #tpu.memory_space<vmem>>, vector<1x24xf32>
    %6 = vector.broadcast %5 : vector<1x24xf32> to vector<8x24xf32>
    %7 = arith.addf %4, %6 : vector<8x24xf32>
    %cst = arith.constant 0.000000e+00 : f32
    %8 = vector.broadcast %cst : f32 to vector<8x24xf32>
    %9 = arith.maximumf %7, %8 : vector<8x24xf32>
    %10 = arith.truncf %9 : vector<8x24xf32> to vector<8x24xbf16>
    %c0_5 = arith.constant 0 : index
    %c0_6 = arith.constant 0 : index
    %11 = vector.load %arg2[%c0_5, %c0_6] : memref<24x32xbf16, #tpu.memory_space<vmem>>, vector<24x32xbf16>
    %cst_7 = arith.constant dense<0.000000e+00> : vector<8x32xf32>
    %12 = tpu.matmul %10, %11, %cst_7 {dimension_numbers = #tpu.dot_dimension_numbers<[1], [0], [0], [1], [0, 0, 1, 1], [], []>} : vector<8x24xbf16>, vector<24x32xbf16>, vector<8x32xf32> -> vector<8x32xf32>
    %c0_8 = arith.constant 0 : index
    %c0_9 = arith.constant 0 : index
    %13 = vector.load %arg5[%c0_8, %c0_9] : memref<1x32xf32, #tpu.memory_space<vmem>>, vector<1x32xf32>
    %14 = vector.broadcast %13 : vector<1x32xf32> to vector<8x32xf32>
    %15 = arith.mulf %12, %14 : vector<8x32xf32>
    %c0_10 = arith.constant 0 : index
    %c0_11 = arith.constant 0 : index
    %16 = vector.load %arg6[%c0_10, %c0_11] : memref<1x32xf32, #tpu.memory_space<vmem>>, vector<1x32xf32>
    %17 = vector.broadcast %16 : vector<1x32xf32> to vector<8x32xf32>
    %18 = arith.addf %15, %17 : vector<8x32xf32>
    %cst_12 = arith.constant 0.000000e+00 : f32
    %19 = vector.broadcast %cst_12 : f32 to vector<8x32xf32>
    %20 = arith.maximumf %18, %19 : vector<8x32xf32>
    %21 = arith.truncf %20 : vector<8x32xf32> to vector<8x32xbf16>
    %c0_13 = arith.constant 0 : index
    %c0_14 = arith.constant 0 : index
    %22 = vector.load %arg7[%c0_13, %c0_14] : memref<8x32xbf16, #tpu.memory_space<vmem>>, vector<8x32xbf16>
    tpu.vector_store %arg7[%c0_13, %c0_14], %21 {strides = array<i32>} : memref<8x32xbf16, #tpu.memory_space<vmem>>, vector<8x32xbf16>,
    return
  }
  func.func @transform_0(%arg0: i32) -> (i32, i32) {
    %c0_i32 = arith.constant 0 : i32
    %c0_i32_0 = arith.constant 0 : i32
    return %arg0, %c0_i32 : i32, i32
  }
  func.func @transform_1(%arg0: i32) -> (i32, i32) {
    %c0_i32 = arith.constant 0 : i32
    %c0_i32_0 = arith.constant 0 : i32
    %c0_i32_1 = arith.constant 0 : i32
    return %c0_i32, %c0_i32_0 : i32, i32
  }
  func.func @transform_2(%arg0: i32) -> (i32, i32) {
    %c0_i32 = arith.constant 0 : i32
    %c0_i32_0 = arith.constant 0 : i32
    %c0_i32_1 = arith.constant 0 : i32
    return %c0_i32, %c0_i32_0 : i32, i32
  }
  func.func @transform_3(%arg0: i32) -> (i32, i32) {
    %c0_i32 = arith.constant 0 : i32
    %c0_i32_0 = arith.constant 0 : i32
    %c0_i32_1 = arith.constant 0 : i32
    return %c0_i32, %c0_i32_0 : i32, i32
  }
  func.func @transform_4(%arg0: i32) -> (i32, i32) {
    %c0_i32 = arith.constant 0 : i32
    %c0_i32_0 = arith.constant 0 : i32
    %c0_i32_1 = arith.constant 0 : i32
    return %c0_i32, %c0_i32_0 : i32, i32
  }
  func.func @transform_5(%arg0: i32) -> (i32, i32) {
    %c0_i32 = arith.constant 0 : i32
    %c0_i32_0 = arith.constant 0 : i32
    %c0_i32_1 = arith.constant 0 : i32
    return %c0_i32, %c0_i32_0 : i32, i32
  }
  func.func @transform_6(%arg0: i32) -> (i32, i32) {
    %c0_i32 = arith.constant 0 : i32
    %c0_i32_0 = arith.constant 0 : i32
    return %arg0, %c0_i32 : i32, i32
  }
}

</mosaic_0001>

<bundles_post_ra>
// kernel: densenet_forward.25
= control target key start
LH: loop header
LB: loop body
LE: loop exit
PB: predicated region body
PF: predicated region fallthrough
CT: control target
= control target key end

     0   :  { %s1927_s15 = smov 0   ;;  %s2469_s0 = inlined_call_operand.vmem [shape: bf16[2048,147], index: 0, kind: input, shape index: {}]   ;;  %s2470_s1 = inlined_call_operand.vmem [shape: bf16[147,16], index: 1, kind: input, shape index: {}]   ;;  %s2471_s2 = inlined_call_operand.vmem [shape: f32[1,16], index: 2, kind: input, shape index: {}]   ;;  %s2472_s3 = inlined_call_operand.vmem [shape: f32[1,16], index: 3, kind: input, shape index: {}]   ;;  %s2473_s4 = inlined_call_operand.vmem [shape: bf16[2048,16], index: 4, kind: output, shape index: {}]  }
   0x1 LB: > { %s1460_s16 = sadd.s32 4294967295, %s1899_s15   ;;  %p1464_p0 = scmp.ge.s32.totalorder %s1899_s15, 1  ;;  %s1899_s15 = sphi %s1927_s15, %s14_s15  }
   0x2   : > { %p164_p1 = scmp.lt.s32.totalorder %s1899_s15, 5 }
   0x4   : > { %p165_p2 = pnand %p1464_p0, %p164_p1 }
   0x5   : > { %s1465_s21 = sshll.u32 (!%p165_p2), %s1460_s16, 6 }
   0x6   : > { %168 = sbr.rel (%p165_p2) target bundleno = 434 (0x1b2), region = 36  ;;  %p192_p3 = scmp.lt.s32.totalorder (!%p165_p2), %s1465_s21, 255 }
   0xb   : > { %v1868_v0 = vld [vmem:[%s2470_s1 + $0x38] sm:$0xff]  ;;  %v287_v1 = vld [vmem:[%s2470_s1 + $0x48] sm:$0x3]  ;;  %vm730_vm0 = vcmask 1040384   ;;  %vm731_vm1 = vcmask 1041408   ;;  %v1867_v3 = vld [vmem:[%s2470_s1 + $0x30] sm:$0xff] }
   0xc   : > { %v613_v2 = vunpack.c.l.b16 %v287_v1  ;;  %737 = vmatpush.bf16.msra.mxu0 %v1868_v0  ;;  %1870 = vmatpush.bf16.msra.mxu2 %v1868_v0  ;;  %v1901_v4 = vmov 65535   ;;  %s2475_s21 = smov (!%p192_p3, %s1465_s21), 255  ;;  %v1866_v9 = vld [vmem:[%s2470_s1 + $0x28] sm:$0xff]  ;;  %v1869_v10 = vld [vmem:[%s2470_s1 + $0x40] sm:$0xff]  ;;  %vm633_vm2 = vcmask 154624   ;;  %v1864_v18 = vld [vmem:[%s2470_s1 + $0x18] sm:$0xff] }
   0xd   : > { %v732_v5 = vsel %vm730_vm0, 4294967295, %v1901_v4  ;;  %s1796_s26 = sshll.u32 %s2475_s21, 3  ;;  %v1865_v14 = vld [vmem:[%s2470_s1 + $0x20] sm:$0xff]  ;;  %v1863_v19 = vld [vmem:[%s2470_s1 + $0x10] sm:$0xff]  ;;  %v1862_v20 = vld [vmem:[%s2470_s1 + $0x8] sm:$0xff]  ;;  %s1469_s22 = sshll.u32 %s2475_s21, 2 }
   0xe   : > { %v623_v6 = vpack.c.b16 %v613_v2, %v613_v2  ;;  %v733_v7 = vsel %vm731_vm1, %v732_v5, 0  ;;  %s1956_s5 = scalar_lea.vmem %s2469_s0, %s1796_s26  ;;  %v1861_v26 = vld [vmem:[%s2470_s1] sm:$0xff]  ;;  %s2093_s25 = scalar_lea.vmem %s2473_s4, %s1469_s22  ;;  %vm1339_vm3 = vcmask 125952  }
   0xf   : > { %v1797_v11 = vld [vmem:[%s1956_s5 + $0x4] sm:$0xf]  ;;  %v1474_v12 = vld [vmem:[%s1956_s5 + $0x8] sm:$0xf0]  ;;  %v1831_v15 = vld [vmem:[%s1956_s5 + $0x114] sm:$0xf] }
  0x10   : > { %v735_v8 = vand.u32 %v733_v7, %v623_v6  ;;  %738 = vmatpush.bf16.msra.mxu0 %v1867_v3  ;;  %1871 = vmatpush.bf16.msra.mxu2 %v1867_v3  ;;  %v1477_v13 = vor.u32 %v1797_v11, %v1474_v12  ;;  %v1610_v16 = vld [vmem:[%s1956_s5 + $0x118] sm:$0xf0]  ;;  %v1799_v21 = vld [vmem:[%s1956_s5 + $0x14] sm:$0xf]  ;;  %v1833_v23 = vld [vmem:[%s1956_s5 + $0x124] sm:$0xf] }
  0x11   : > { %v1613_v17 = vor.u32 %v1831_v15, %v1610_v16  ;;  %v1482_v22 = vld [vmem:[%s1956_s5 + $0x18] sm:$0xf0]  ;;  %v1618_v24 = vld [vmem:[%s1956_s5 + $0x128] sm:$0xf0]  ;;  %v1472_v27 = vld [vmem:[%s1956_s5] sm:$0xf] }
  0x12   : > { %912 = vmatpush.bf16.msra.mxu1 %v735_v8  ;;  %1878 = vmatpush.bf16.msra.mxu3 %v735_v8  ;;  %v1485_v25 = vor.u32 %v1799_v21, %v1482_v22  ;;  %v1798_v28 = vld [vmem:[%s1956_s5 + $0x4] sm:$0xf0]  ;;  %v1600_v29 = vld [vmem:[%s1956_s5 + $0x100] sm:$0xf]  ;;  %v1621_v31 = vor.u32 %v1833_v23, %v1618_v24  ;;  %v1801_v34 = vld [vmem:[%s1956_s5 + $0x24] sm:$0xf] }
  0x13   : > { %v1830_v30 = vld [vmem:[%s1956_s5 + $0x104] sm:$0xf0]  ;;  %v1473_v32 = vor.u32 %v1798_v28, %v1472_v27  ;;  %v1490_v35 = vld [vmem:[%s1956_s5 + $0x28] sm:$0xf0]  ;;  %v1835_v36 = vld [vmem:[%s1956_s5 + $0x134] sm:$0xf] }
  0x14   : > { %739 = vmatpush.bf16.msra.mxu0 %v1866_v9  ;;  %1872 = vmatpush.bf16.msra.mxu2 %v1866_v9  ;;  %v1601_v33 = vor.u32 %v1830_v30, %v1600_v29  ;;  %v1626_v37 = vld [vmem:[%s1956_s5 + $0x138] sm:$0xf0]  ;;  %v1493_v38 = vor.u32 %v1801_v34, %v1490_v35  ;;  %v1480_v39 = vld [vmem:[%s1956_s5 + $0x10] sm:$0xf]  ;;  %v1800_v40 = vld [vmem:[%s1956_s5 + $0x14] sm:$0xf0] }
  0x15   : > { %v1608_v41 = vld [vmem:[%s1956_s5 + $0x110] sm:$0xf]  ;;  %v1832_v42 = vld [vmem:[%s1956_s5 + $0x114] sm:$0xf0]  ;;  %v1629_v43 = vor.u32 %v1835_v36, %v1626_v37  ;;  %v1481_v44 = vor.u32 %v1800_v40, %v1480_v39  ;;  %v1803_v46 = vld [vmem:[%s1956_s5 + $0x34] sm:$0xf] }
  0x16   : > { %913 = vmatpush.bf16.msra.mxu1 %v1869_v10  ;;  %1879 = vmatpush.bf16.msra.mxu3 %v1869_v10  ;;  %v1609_v45 = vor.u32 %v1832_v42, %v1608_v41  ;;  %v1498_v47 = vld [vmem:[%s1956_s5 + $0x38] sm:$0xf0]  ;;  %v1837_v48 = vld [vmem:[%s1956_s5 + $0x144] sm:$0xf]  ;;  %v1634_v49 = vld [vmem:[%s1956_s5 + $0x148] sm:$0xf0] }
  0x17   : > { %v1501_v50 = vor.u32 %v1803_v46, %v1498_v47  ;;  %v1488_v51 = vld [vmem:[%s1956_s5 + $0x20] sm:$0xf]  ;;  %v1802_v52 = vld [vmem:[%s1956_s5 + $0x24] sm:$0xf0]  ;;  %v1637_v55 = vor.u32 %v1837_v48, %v1634_v49  ;;  %v1805_v58 = vld [vmem:[%s1956_s5 + $0x44] sm:$0xf] }
  0x18   : > { %740 = vmatpush.bf16.msra.mxu0 %v1865_v14  ;;  %1873 = vmatpush.bf16.msra.mxu2 %v1865_v14  ;;  %v1616_v53 = vld [vmem:[%s1956_s5 + $0x120] sm:$0xf]  ;;  %v1834_v54 = vld [vmem:[%s1956_s5 + $0x124] sm:$0xf0]  ;;  %v1489_v56 = vor.u32 %v1802_v52, %v1488_v51  ;;  %v1506_v59 = vld [vmem:[%s1956_s5 + $0x48] sm:$0xf0] }
  0x19   : > { %1762 = vmatmul.msk.bf16.vlgmr.msra.gmra.mxu1 %vm633_vm2, %v1477_v13  ;;  %1779 = vmatmul.msk.bf16.vlgmr.msra.gmra.mxu3 %vm633_vm2, %v1613_v17  ;;  %v1617_v57 = vor.u32 %v1834_v54, %v1616_v53  ;;  %v1839_v60 = vld [vmem:[%s1956_s5 + $0x154] sm:$0xf]  ;;  %v1642_v61 = vld [vmem:[%s1956_s5 + $0x158] sm:$0xf0]  ;;  %v1509_v62 = vor.u32 %v1805_v58, %v1506_v59  ;;  %v1496_v63 = vld [vmem:[%s1956_s5 + $0x30] sm:$0xf] }
  0x1a   : > { %v1804_v0 = vld [vmem:[%s1956_s5 + $0x34] sm:$0xf0]  ;;  %v1624_v1 = vld [vmem:[%s1956_s5 + $0x130] sm:$0xf]  ;;  %v1645_v3 = vor.u32 %v1839_v60, %v1642_v61  ;;  %v1807_v6 = vld [vmem:[%s1956_s5 + $0x54] sm:$0xf] }
  0x1b   : > { %v1836_v2 = vld [vmem:[%s1956_s5 + $0x134] sm:$0xf0]  ;;  %v1497_v4 = vor.u32 %v1804_v0, %v1496_v63  ;;  %v1514_v7 = vld [vmem:[%s1956_s5 + $0x58] sm:$0xf0]  ;;  %v1841_v8 = vld [vmem:[%s1956_s5 + $0x164] sm:$0xf] }
  0x1c   : > { %741 = vmatpush.bf16.msra.mxu0 %v1864_v18  ;;  %1874 = vmatpush.bf16.msra.mxu2 %v1864_v18  ;;  %v1625_v5 = vor.u32 %v1836_v2, %v1624_v1  ;;  %v1650_v9 = vld [vmem:[%s1956_s5 + $0x168] sm:$0xf0]  ;;  %v1517_v10 = vor.u32 %v1807_v6, %v1514_v7  ;;  %v1504_v11 = vld [vmem:[%s1956_s5 + $0x40] sm:$0xf]  ;;  %v1806_v12 = vld [vmem:[%s1956_s5 + $0x44] sm:$0xf0] }
  0x1d   : > { %v1632_v13 = vld [vmem:[%s1956_s5 + $0x140] sm:$0xf]  ;;  %v1838_v14 = vld [vmem:[%s1956_s5 + $0x144] sm:$0xf0]  ;;  %v1653_v15 = vor.u32 %v1841_v8, %v1650_v9  ;;  %v1505_v16 = vor.u32 %v1806_v12, %v1504_v11  ;;  %v1809_v18 = vld [vmem:[%s1956_s5 + $0x64] sm:$0xf] }
  0x1e   : > { %v1633_v17 = vor.u32 %v1838_v14, %v1632_v13  ;;  %v1658_v21 = vld [vmem:[%s1956_s5 + $0x178] sm:$0xf0]  ;;  %v1512_v23 = vld [vmem:[%s1956_s5 + $0x50] sm:$0xf]  ;;  %v1808_v24 = vld [vmem:[%s1956_s5 + $0x54] sm:$0xf0] }
  0x1f   : > { %v1513_v28 = vor.u32 %v1808_v24, %v1512_v23  ;;  %v1811_v30 = vld [vmem:[%s1956_s5 + $0x74] sm:$0xf]  ;;  %v1520_v35 = vld [vmem:[%s1956_s5 + $0x60] sm:$0xf]  ;;  %v1810_v36 = vld [vmem:[%s1956_s5 + $0x64] sm:$0xf0] }
  0x20   : > { %742 = vmatpush.bf16.msra.mxu0 %v1863_v19  ;;  %1875 = vmatpush.bf16.msra.mxu2 %v1863_v19  ;;  %v1522_v19 = vld [vmem:[%s1956_s5 + $0x68] sm:$0xf0]  ;;  %v1648_v37 = vld [vmem:[%s1956_s5 + $0x160] sm:$0xf]  ;;  %v1521_v40 = vor.u32 %v1810_v36, %v1520_v35  ;;  %v1813_v42 = vld [vmem:[%s1956_s5 + $0x84] sm:$0xf] }
  0x21   : > { %v1525_v22 = vor.u32 %v1809_v18, %v1522_v19  ;;  %v1528_v47 = vld [vmem:[%s1956_s5 + $0x70] sm:$0xf]  ;;  %v1812_v48 = vld [vmem:[%s1956_s5 + $0x74] sm:$0xf0]  ;;  %v1546_v58 = vld [vmem:[%s1956_s5 + $0x98] sm:$0xf0] }
  0x22   : > { %v1844_v51 = vld [vmem:[%s1956_s5 + $0x174] sm:$0xf0]  ;;  %v1529_v53 = vor.u32 %v1812_v48, %v1528_v47  ;;  %v1849_v59 = vld [vmem:[%s1956_s5 + $0x1a4] sm:$0xf]  ;;  %v1682_v60 = vld [vmem:[%s1956_s5 + $0x1a8] sm:$0xf0] }
  0x23   : > { %v1814_v63 = vld [vmem:[%s1956_s5 + $0x84] sm:$0xf0]  ;;  %v1664_v2 = vld [vmem:[%s1956_s5 + $0x180] sm:$0xf]  ;;  %v1690_v23 = vld [vmem:[%s1956_s5 + $0x1b8] sm:$0xf0] }
  0x24   : > { %743 = vmatpush.bf16.msra.mxu0 %v1862_v20  ;;  %1876 = vmatpush.bf16.msra.mxu2 %v1862_v20  ;;  %v1843_v20 = vld [vmem:[%s1956_s5 + $0x174] sm:$0xf] }
  0x25   : > { %v1661_v27 = vor.u32 %v1843_v20, %v1658_v21  ;;  %v1817_v20 = vld [vmem:[%s1956_s5 + $0xa4] sm:$0xf]  ;;  %v1554_v21 = vld [vmem:[%s1956_s5 + $0xa8] sm:$0xf0] }
  0x28   : > { %744 = vmatpush.bf16.msra.mxu0 %v1861_v26  ;;  %1877 = vmatpush.bf16.msra.mxu2 %v1861_v26  ;;  %v1840_v26 = vld [vmem:[%s1956_s5 + $0x154] sm:$0xf0] }
  0x29   : > { %1763 = vmatmul.msk.bf16.gmra.mxu1 %vm633_vm2, %v1485_v25  ;;  %1780 = vmatmul.msk.bf16.gmra.mxu3 %vm633_vm2, %v1621_v31  ;;  %v1640_v25 = vld [vmem:[%s1956_s5 + $0x150] sm:$0xf]  ;;  %v1530_v31 = vld [vmem:[%s1956_s5 + $0x78] sm:$0xf0] }
  0x2a   : > { %v1641_v29 = vor.u32 %v1840_v26, %v1640_v25  ;;  %v1533_v34 = vor.u32 %v1811_v30, %v1530_v31  ;;  %v1557_v25 = vor.u32 %v1817_v20, %v1554_v21  ;;  %v1544_v26 = vld [vmem:[%s1956_s5 + $0x90] sm:$0xf] }
  0x2b   : > { %745 = vmatmul.bf16.vlgmr.msra.gmra.mxu0 %v1473_v32  ;;  %825 = vmatmul.bf16.vlgmr.msra.gmra.mxu2 %v1601_v33  ;;  %v1845_v32 = vld [vmem:[%s1956_s5 + $0x184] sm:$0xf]  ;;  %v1666_v33 = vld [vmem:[%s1956_s5 + $0x188] sm:$0xf0]  ;;  %v1672_v31 = vld [vmem:[%s1956_s5 + $0x190] sm:$0xf] }
  0x2c   : > { %v1669_v39 = vor.u32 %v1845_v32, %v1666_v33  ;;  %v1848_v32 = vld [vmem:[%s1956_s5 + $0x194] sm:$0xf0] }
  0x39   : > { %1764 = vmatmul.msk.bf16.gmra.mxu1 %vm633_vm2, %v1493_v38  ;;  %1781 = vmatmul.msk.bf16.gmra.mxu3 %vm633_vm2, %v1629_v43  ;;  %v1842_v38 = vld [vmem:[%s1956_s5 + $0x164] sm:$0xf0]  ;;  %v1538_v43 = vld [vmem:[%s1956_s5 + $0x88] sm:$0xf0] }
  0x3a   : > { %v1649_v41 = vor.u32 %v1842_v38, %v1648_v37  ;;  %v1541_v46 = vor.u32 %v1813_v42, %v1538_v43  ;;  %v1673_v38 = vor.u32 %v1848_v32, %v1672_v31  ;;  %v1821_v32 = vld [vmem:[%s1956_s5 + $0xc4] sm:$0xf] }
  0x3b   : > { %750 = vmatmul.bf16.gmra.mxu0 %v1481_v44  ;;  %830 = vmatmul.bf16.gmra.mxu2 %v1609_v45  ;;  %v1847_v44 = vld [vmem:[%s1956_s5 + $0x194] sm:$0xf]  ;;  %v1674_v45 = vld [vmem:[%s1956_s5 + $0x198] sm:$0xf0] }
  0x3c   : > { %v1677_v52 = vor.u32 %v1847_v44, %v1674_v45 }
  0x49   : > { %1765 = vmatmul.msk.bf16.gmra.mxu1 %vm633_vm2, %v1501_v50  ;;  %1782 = vmatmul.msk.bf16.gmra.mxu3 %vm633_vm2, %v1637_v55  ;;  %v1656_v50 = vld [vmem:[%s1956_s5 + $0x170] sm:$0xf] }
  0x4a   : > { %v1657_v54 = vor.u32 %v1844_v51, %v1656_v50  ;;  %v1819_v51 = vld [vmem:[%s1956_s5 + $0xb4] sm:$0xf] }
  0x4b   : > { %755 = vmatmul.bf16.gmra.mxu0 %v1489_v56  ;;  %835 = vmatmul.bf16.gmra.mxu2 %v1617_v57  ;;  %v1815_v57 = vld [vmem:[%s1956_s5 + $0x94] sm:$0xf] }
  0x4c   : > { %v1549_v61 = vor.u32 %v1815_v57, %v1546_v58 }
  0x59   : > { %1766 = vmatmul.msk.bf16.gmra.mxu1 %vm633_vm2, %v1509_v62  ;;  %1783 = vmatmul.msk.bf16.gmra.mxu3 %vm633_vm2, %v1645_v3  ;;  %v1536_v62 = vld [vmem:[%s1956_s5 + $0x80] sm:$0xf]  ;;  %v1846_v3 = vld [vmem:[%s1956_s5 + $0x184] sm:$0xf0] }
  0x5a   : > { %v1537_v6 = vor.u32 %v1814_v63, %v1536_v62  ;;  %v1665_v8 = vor.u32 %v1846_v3, %v1664_v2  ;;  %v1850_v2 = vld [vmem:[%s1956_s5 + $0x1a4] sm:$0xf0] }
  0x5b   : > { %760 = vmatmul.bf16.gmra.mxu0 %v1497_v4  ;;  %840 = vmatmul.bf16.gmra.mxu2 %v1625_v5  ;;  %v1685_v4 = vor.u32 %v1849_v59, %v1682_v60  ;;  %v2074_v5 = vld [vmem:[%s2471_s2] ss:$0 sm:$0xff] }
  0x5c   : > { %v1552_v60 = vld [vmem:[%s1956_s5 + $0xa0] sm:$0xf] }
  0x69   : > { %1767 = vmatmul.msk.bf16.gmra.mxu1 %vm633_vm2, %v1517_v10  ;;  %1784 = vmatmul.msk.bf16.gmra.mxu3 %vm633_vm2, %v1653_v15  ;;  %v2080_v10 = vld [vmem:[%s2472_s3] ss:$0 sm:$0xff] }
  0x6b   : > { %765 = vmatmul.bf16.gmra.mxu0 %v1505_v16  ;;  %845 = vmatmul.bf16.gmra.mxu2 %v1633_v17 }
  0x79   : > { %1768 = vmatmul.msk.bf16.gmra.mxu1 %vm633_vm2, %v1525_v22  ;;  %1785 = vmatmul.msk.bf16.gmra.mxu3 %vm633_vm2, %v1661_v27  ;;  %v1851_v22 = vld [vmem:[%s1956_s5 + $0x1b4] sm:$0xf]  ;;  %v1816_v27 = vld [vmem:[%s1956_s5 + $0x94] sm:$0xf0] }
  0x7a   : > { %v1693_v33 = vor.u32 %v1851_v22, %v1690_v23  ;;  %v1545_v36 = vor.u32 %v1816_v27, %v1544_v26 }
  0x7b   : > { %770 = vmatmul.bf16.gmra.mxu0 %v1513_v28  ;;  %850 = vmatmul.bf16.gmra.mxu2 %v1641_v29 }
  0x89   : > { %1769 = vmatmul.msk.bf16.gmra.mxu1 %vm633_vm2, %v1533_v34  ;;  %1786 = vmatmul.msk.bf16.gmra.mxu3 %vm633_vm2, %v1669_v39 }
  0x8b   : > { %775 = vmatmul.bf16.gmra.mxu0 %v1521_v40  ;;  %855 = vmatmul.bf16.gmra.mxu2 %v1649_v41 }
  0x96   : > { %v915_v49 = vpop.f32.mrf.mxu1 }
  0x99   : > { %1770 = vmatmul.msk.bf16.gmra.mxu1 %vm633_vm2, %v1541_v46  ;;  %1787 = vmatmul.msk.bf16.gmra.mxu3 %vm633_vm2, %v1677_v52  ;;  %v1562_v52 = vld [vmem:[%s1956_s5 + $0xb8] sm:$0xf0] }
  0x9a   : > { %v1565_v59 = vor.u32 %v1819_v51, %v1562_v52 }
  0x9b   : > { %780 = vmatmul.bf16.gmra.mxu0 %v1529_v53  ;;  %860 = vmatmul.bf16.gmra.mxu2 %v1657_v54  ;;  %v1853_v54 = vld [vmem:[%s1956_s5 + $0x1c4] sm:$0xf] }
  0x9c   : > { %v2059_v55 = vpop.f32.mrf.mxu3 }
  0x9e   : > { %v917_v56 = vpop.f32.mrf.mxu1 }
  0xa4   : > { %v2067_v0 = vpop.f32.mrf.mxu3 }
  0xa6   : > { %v920_v1 = vpop.f32.mrf.mxu1 }
  0xa8   : > { %v746_v7 = vpop.f32.mrf.mxu0 }
  0xa9   : > { %1771 = vmatmul.msk.bf16.gmra.mxu1 %vm633_vm2, %v1549_v61  ;;  %v916_v9 = vadd.f32 %v915_v49, %v746_v7  ;;  %1788 = vmatmul.msk.bf16.gmra.mxu3 %vm633_vm2, %v1685_v4 }
  0xab   : > { %v1079_v11 = vmul.f32 %v2074_v5, %v916_v9  ;;  %785 = vmatmul.bf16.gmra.mxu0 %v1537_v6  ;;  %865 = vmatmul.bf16.gmra.mxu2 %v1665_v8 }
  0xac   : > { %v2084_v12 = vpop.f32.mrf.mxu3 }
  0xad   : > { %v1147_v13 = vadd.f32 %v2080_v10, %v1079_v11 }
  0xae   : > { %v922_v14 = vpop.f32.mrf.mxu1  ;;  %v2088_v16 = vpop.f32.mrf.mxu2 }
  0xaf   : > { %v1211_v15 = vmax.f32 %v1147_v13, 0.0 }
  0xb0   : > { %v748_v17 = vpop.f32.mrf.mxu0 }
  0xb1   : > { %v1275_v18 = vpack.c.bf16 %v1211_v15, %v1211_v15  ;;  %v918_v19 = vadd.f32 %v917_v56, %v748_v17  ;;  %v1698_v56 = vld [vmem:[%s1956_s5 + $0x1c8] sm:$0xf0] }
  0xb2   : > { %v1701_v3 = vor.u32 %v1853_v54, %v1698_v56 }
  0xb3   : > { %1340 = vst.msk [vmem:[%s2093_s25] sm:$0xf] %vm1339_vm3, %v1275_v18  ;;  %v1080_v24 = vmul.f32 %v2074_v5, %v918_v19 }
  0xb4   : > { %v2104_v28 = vpop.f32.mrf.mxu3 }
  0xb5   : > { %v1148_v29 = vadd.f32 %v2080_v10, %v1080_v24 }
  0xb6   : > { %v925_v30 = vpop.f32.mrf.mxu1  ;;  %v2109_v35 = vpop.f32.mrf.mxu2 }
  0xb7   : > { %v1212_v34 = vmax.f32 %v1148_v29, 0.0 }
  0xb8   : > { %v751_v37 = vpop.f32.mrf.mxu0 }
  0xb9   : > { %1772 = vmatmul.msk.bf16.gmra.mxu1 %vm633_vm2, %v1557_v25  ;;  %v1276_v39 = vpack.c.bf16 %v1212_v34, %v1212_v34  ;;  %v921_v40 = vadd.f32 %v920_v1, %v751_v37  ;;  %1789 = vmatmul.msk.bf16.gmra.mxu3 %vm633_vm2, %v1693_v33  ;;  %v1680_v1 = vld [vmem:[%s1956_s5 + $0x1a0] sm:$0xf]  ;;  %v1570_v33 = vld [vmem:[%s1956_s5 + $0xc8] sm:$0xf0]  ;;  %v1706_v37 = vld [vmem:[%s1956_s5 + $0x1d8] sm:$0xf0] }
  0xbb   : > { %1341 = vst.msk [vmem:[%s2093_s25 + $0x4] sm:$0xf] %vm1339_vm3, %v1276_v39  ;;  %v1081_v41 = vmul.f32 %v2074_v5, %v921_v40  ;;  %790 = vmatmul.bf16.gmra.mxu0 %v1545_v36  ;;  %870 = vmatmul.bf16.gmra.mxu2 %v1673_v38  ;;  %v1855_v36 = vld [vmem:[%s1956_s5 + $0x1d4] sm:$0xf]  ;;  %v1560_v40 = vld [vmem:[%s1956_s5 + $0xb0] sm:$0xf] }
  0xbc   : > { %v2116_v42 = vpop.f32.mrf.mxu3 }
  0xbd   : > { %v1149_v43 = vadd.f32 %v2080_v10, %v1081_v41  ;;  %v1820_v41 = vld [vmem:[%s1956_s5 + $0xb4] sm:$0xf0] }
  0xbe   : > { %v927_v44 = vpop.f32.mrf.mxu1  ;;  %v831_v46 = vpop.f32.mrf.mxu2  ;;  %v1561_v52 = vor.u32 %v1820_v41, %v1560_v40 }
  0xbf   : > { %v1213_v45 = vmax.f32 %v1149_v43, 0.0  ;;  %v1001_v47 = vadd.f32 %v2059_v55, %v831_v46  ;;  %v1818_v55 = vld [vmem:[%s1956_s5 + $0xa4] sm:$0xf0]  ;;  %v1688_v46 = vld [vmem:[%s1956_s5 + $0x1b0] sm:$0xf] }
  0xc0   : > { %v753_v48 = vpop.f32.mrf.mxu0  ;;  %v1553_v8 = vor.u32 %v1818_v55, %v1552_v60 }
  0xc1   : > { %v1277_v49 = vpack.c.bf16 %v1213_v45, %v1213_v45  ;;  %v923_v50 = vadd.f32 %v922_v14, %v753_v48  ;;  %v1113_v53 = vmul.f32 %v2074_v5, %v1001_v47  ;;  %v1681_v14 = vor.u32 %v1850_v2, %v1680_v1  ;;  %v1852_v47 = vld [vmem:[%s1956_s5 + $0x1b4] sm:$0xf0] }
  0xc2   : > { %v1709_v48 = vor.u32 %v1855_v36, %v1706_v37 }
  0xc3   : > { %1342 = vst.msk [vmem:[%s2093_s25 + $0x8] sm:$0xf] %vm1339_vm3, %v1277_v49  ;;  %v1082_v57 = vmul.f32 %v2074_v5, %v923_v50  ;;  %v1181_v58 = vadd.f32 %v2080_v10, %v1113_v53 }
  0xc4   : > { %v2131_v61 = vpop.f32.mrf.mxu3 }
  0xc5   : > { %v1150_v62 = vadd.f32 %v2080_v10, %v1082_v57  ;;  %v1245_v4 = vmax.f32 %v1181_v58, 0.0  ;;  %v1689_v57 = vor.u32 %v1852_v47, %v1688_v46 }
  0xc6   : > { %v930_v63 = vpop.f32.mrf.mxu1  ;;  %v833_v7 = vpop.f32.mrf.mxu2 }
  0xc7   : > { %v1214_v6 = vmax.f32 %v1150_v62, 0.0  ;;  %v1309_v9 = vpack.c.bf16 %v1245_v4, %v1245_v4  ;;  %v1003_v11 = vadd.f32 %v2067_v0, %v833_v7 }
  0xc8   : > { %v756_v13 = vpop.f32.mrf.mxu0 }
  0xc9   : > { %1773 = vmatmul.msk.bf16.gmra.mxu1 %vm633_vm2, %v1565_v59  ;;  %v1278_v15 = vpack.c.bf16 %v1214_v6, %v1214_v6  ;;  %v926_v17 = vadd.f32 %v925_v30, %v756_v13  ;;  %1790 = vmatmul.msk.bf16.gmra.mxu3 %vm633_vm2, %v1701_v3  ;;  %1374 = vst.msk [vmem:[%s2093_s25 + $0x88] sm:$0xf] %vm1339_vm3, %v1309_v9  ;;  %v1823_v13 = vld [vmem:[%s1956_s5 + $0xd4] sm:$0xf] }
  0xca   : > { %v1114_v18 = vmul.f32 %v2074_v5, %v1003_v11 }
  0xcb   : > { %1343 = vst.msk [vmem:[%s2093_s25 + $0xc] sm:$0xf] %vm1339_vm3, %v1278_v15  ;;  %v1083_v19 = vmul.f32 %v2074_v5, %v926_v17  ;;  %795 = vmatmul.bf16.gmra.mxu0 %v1553_v8  ;;  %875 = vmatmul.bf16.gmra.mxu2 %v1681_v14  ;;  %v1578_v14 = vld [vmem:[%s1956_s5 + $0xd8] sm:$0xf0]  ;;  %v1857_v17 = vld [vmem:[%s1956_s5 + $0x1e4] sm:$0xf] }
  0xcc   : > { %v1182_v0 = vadd.f32 %v2080_v10, %v1114_v18  ;;  %v2146_v20 = vpop.f32.mrf.mxu3  ;;  %v1714_v18 = vld [vmem:[%s1956_s5 + $0x1e8] sm:$0xf0] }
  0xcd   : > { %v1151_v21 = vadd.f32 %v2080_v10, %v1083_v19 }
  0xce   : > { %v932_v22 = vpop.f32.mrf.mxu1  ;;  %v1246_v23 = vmax.f32 %v1182_v0, 0.0  ;;  %v836_v25 = vpop.f32.mrf.mxu2 }
  0xcf   : > { %v1215_v24 = vmax.f32 %v1151_v21, 0.0  ;;  %v1006_v27 = vadd.f32 %v2084_v12, %v836_v25  ;;  %v1573_v12 = vor.u32 %v1821_v32, %v1570_v33  ;;  %v1568_v21 = vld [vmem:[%s1956_s5 + $0xc0] sm:$0xf] }
  0xd0   : > { %v1310_v26 = vpack.c.bf16 %v1246_v23, %v1246_v23  ;;  %v758_v29 = vpop.f32.mrf.mxu0  ;;  %v1822_v23 = vld [vmem:[%s1956_s5 + $0xc4] sm:$0xf0] }
  0xd1   : > { %v1279_v30 = vpack.c.bf16 %v1215_v24, %v1215_v24  ;;  %v928_v31 = vadd.f32 %v927_v44, %v758_v29  ;;  %v1115_v34 = vmul.f32 %v2074_v5, %v1006_v27  ;;  %v1854_v27 = vld [vmem:[%s1956_s5 + $0x1c4] sm:$0xf0]  ;;  %v1717_v29 = vor.u32 %v1857_v17, %v1714_v18 }
  0xd2   : > { %1375 = vst.msk [vmem:[%s2093_s25 + $0x8c] sm:$0xf] %vm1339_vm3, %v1310_v26  ;;  %v1696_v26 = vld [vmem:[%s1956_s5 + $0x1c0] sm:$0xf]  ;;  %v1569_v33 = vor.u32 %v1822_v23, %v1568_v21 }
  0xd3   : > { %1344 = vst.msk [vmem:[%s2093_s25 + $0x10] sm:$0xf] %vm1339_vm3, %v1279_v30  ;;  %v1084_v38 = vmul.f32 %v2074_v5, %v928_v31  ;;  %v1183_v39 = vadd.f32 %v2080_v10, %v1115_v34 }
  0xd4   : > { %v2163_v43 = vpop.f32.mrf.mxu3 }
  0xd5   : > { %v1152_v44 = vadd.f32 %v2080_v10, %v1084_v38  ;;  %v1247_v49 = vmax.f32 %v1183_v39, 0.0  ;;  %v1697_v38 = vor.u32 %v1854_v27, %v1696_v26 }
  0xd6   : > { %v935_v45 = vpop.f32.mrf.mxu1  ;;  %v838_v51 = vpop.f32.mrf.mxu2 }
  0xd7   : > { %v1216_v50 = vmax.f32 %v1152_v44, 0.0  ;;  %v1311_v53 = vpack.c.bf16 %v1247_v49, %v1247_v49  ;;  %v1008_v54 = vadd.f32 %v2104_v28, %v838_v51 }
  0xd8   : > { %v761_v56 = vpop.f32.mrf.mxu0 }
  0xd9   : > { %1774 = vmatmul.msk.bf16.gmra.mxu1 %vm633_vm2, %v1573_v12  ;;  %v1280_v58 = vpack.c.bf16 %v1216_v50, %v1216_v50  ;;  %v931_v59 = vadd.f32 %v930_v63, %v761_v56  ;;  %1791 = vmatmul.msk.bf16.gmra.mxu3 %vm633_vm2, %v1709_v48  ;;  %1376 = vst.msk [vmem:[%s2093_s25 + $0x90] sm:$0xf] %vm1339_vm3, %v1311_v53  ;;  %v1825_v56 = vld [vmem:[%s1956_s5 + $0xe4] sm:$0xf] }
  0xda   : > { %v1116_v60 = vmul.f32 %v2074_v5, %v1008_v54 }
  0xdb   : > { %1345 = vst.msk [vmem:[%s2093_s25 + $0x14] sm:$0xf] %vm1339_vm3, %v1280_v58  ;;  %v1085_v55 = vmul.f32 %v2074_v5, %v931_v59  ;;  %800 = vmatmul.bf16.gmra.mxu0 %v1561_v52  ;;  %880 = vmatmul.bf16.gmra.mxu2 %v1689_v57  ;;  %v1586_v57 = vld [vmem:[%s1956_s5 + $0xe8] sm:$0xf0]  ;;  %v1859_v59 = vld [vmem:[%s1956_s5 + $0x1f4] sm:$0xf] }
  0xdc   : > { %v1184_v28 = vadd.f32 %v2080_v10, %v1116_v60  ;;  %v2178_v62 = vpop.f32.mrf.mxu3  ;;  %v1722_v60 = vld [vmem:[%s1956_s5 + $0x1f8] sm:$0xf0] }
  0xdd   : > { %v1153_v63 = vadd.f32 %v2080_v10, %v1085_v55 }
  0xde   : > { %v937_v1 = vpop.f32.mrf.mxu1  ;;  %v1248_v2 = vmax.f32 %v1184_v28, 0.0  ;;  %v841_v4 = vpop.f32.mrf.mxu2 }
  0xdf   : > { %v1217_v3 = vmax.f32 %v1153_v63, 0.0  ;;  %v1011_v7 = vadd.f32 %v2116_v42, %v841_v4  ;;  %v1581_v42 = vor.u32 %v1823_v13, %v1578_v14  ;;  %v1576_v63 = vld [vmem:[%s1956_s5 + $0xd0] sm:$0xf] }
  0xe0   : > { %v1312_v6 = vpack.c.bf16 %v1248_v2, %v1248_v2  ;;  %v763_v8 = vpop.f32.mrf.mxu0  ;;  %v1824_v2 = vld [vmem:[%s1956_s5 + $0xd4] sm:$0xf0] }
  0xe1   : > { %v1281_v9 = vpack.c.bf16 %v1217_v3, %v1217_v3  ;;  %v933_v11 = vadd.f32 %v932_v22, %v763_v8  ;;  %v1117_v15 = vmul.f32 %v2074_v5, %v1011_v7  ;;  %v1856_v7 = vld [vmem:[%s1956_s5 + $0x1d4] sm:$0xf0]  ;;  %v1725_v8 = vor.u32 %v1859_v59, %v1722_v60 }
  0xe2   : > { %1377 = vst.msk [vmem:[%s2093_s25 + $0x94] sm:$0xf] %vm1339_vm3, %v1312_v6  ;;  %v1704_v6 = vld [vmem:[%s1956_s5 + $0x1d0] sm:$0xf]  ;;  %v1577_v14 = vor.u32 %v1824_v2, %v1576_v63 }
  0xe3   : > { %1346 = vst.msk [vmem:[%s2093_s25 + $0x18] sm:$0xf] %vm1339_vm3, %v1281_v9  ;;  %v1086_v19 = vmul.f32 %v2074_v5, %v933_v11  ;;  %v1185_v0 = vadd.f32 %v2080_v10, %v1117_v15 }
  0xe4   : > { %v2195_v22 = vpop.f32.mrf.mxu3 }
  0xe5   : > { %v1154_v24 = vadd.f32 %v2080_v10, %v1086_v19  ;;  %v1249_v30 = vmax.f32 %v1185_v0, 0.0  ;;  %v1705_v19 = vor.u32 %v1856_v7, %v1704_v6 }
  0xe6   : > { %v940_v25 = vpop.f32.mrf.mxu1  ;;  %v843_v32 = vpop.f32.mrf.mxu2 }
  0xe7   : > { %v1218_v31 = vmax.f32 %v1154_v24, 0.0  ;;  %v1313_v34 = vpack.c.bf16 %v1249_v30, %v1249_v30  ;;  %v1013_v36 = vadd.f32 %v2131_v61, %v843_v32 }
  0xe8   : > { %v766_v37 = vpop.f32.mrf.mxu0 }
  0xe9   : > { %1775 = vmatmul.msk.bf16.gmra.mxu1 %vm633_vm2, %v1581_v42  ;;  %v1282_v39 = vpack.c.bf16 %v1218_v31, %v1218_v31  ;;  %v936_v12 = vadd.f32 %v935_v45, %v766_v37  ;;  %1792 = vmatmul.msk.bf16.gmra.mxu3 %vm633_vm2, %v1717_v29  ;;  %1378 = vst.msk [vmem:[%s2093_s25 + $0x98] sm:$0xf] %vm1339_vm3, %v1313_v34  ;;  %v1827_v37 = vld [vmem:[%s1956_s5 + $0xf4] sm:$0xf] }
  0xea   : > { %v1118_v40 = vmul.f32 %v2074_v5, %v1013_v36 }
  0xeb   : > { %1347 = vst.msk [vmem:[%s2093_s25 + $0x1c] sm:$0xf] %vm1339_vm3, %v1282_v39  ;;  %v1087_v41 = vmul.f32 %v2074_v5, %v936_v12  ;;  %805 = vmatmul.bf16.gmra.mxu0 %v1569_v33  ;;  %885 = vmatmul.bf16.gmra.mxu2 %v1697_v38  ;;  %v1594_v38 = vld [vmem:[%s1956_s5 + $0xf8] sm:$0xf0] }
  0xec   : > { %v1186_v61 = vadd.f32 %v2080_v10, %v1118_v40  ;;  %v2210_v44 = vpop.f32.mrf.mxu3 }
  0xed   : > { %v1155_v45 = vadd.f32 %v2080_v10, %v1087_v41  ;;  %v1597_v41 = vor.u32 %v1827_v37, %v1594_v38 }
  0xee   : > { %v942_v46 = vpop.f32.mrf.mxu1  ;;  %v1250_v47 = vmax.f32 %v1186_v61, 0.0  ;;  %v846_v49 = vpop.f32.mrf.mxu2  ;;  %v1584_v61 = vld [vmem:[%s1956_s5 + $0xe0] sm:$0xf] }
  0xef   : > { %v1219_v48 = vmax.f32 %v1155_v45, 0.0  ;;  %v1016_v51 = vadd.f32 %v2146_v20, %v846_v49  ;;  %v1589_v20 = vor.u32 %v1825_v56, %v1586_v57 }
  0xf0   : > { %v1314_v50 = vpack.c.bf16 %v1250_v47, %v1250_v47  ;;  %v768_v52 = vpop.f32.mrf.mxu0 }
  0xf1   : > { %v1283_v53 = vpack.c.bf16 %v1219_v48, %v1219_v48  ;;  %v938_v54 = vadd.f32 %v937_v1, %v768_v52  ;;  %v1119_v58 = vmul.f32 %v2074_v5, %v1016_v51  ;;  %v1858_v48 = vld [vmem:[%s1956_s5 + $0x1e4] sm:$0xf0] }
  0xf2   : > { %1379 = vst.msk [vmem:[%s2093_s25 + $0x9c] sm:$0xf] %vm1339_vm3, %v1314_v50 }
  0xf3   : > { %1348 = vst.msk [vmem:[%s2093_s25 + $0x20] sm:$0xf] %vm1339_vm3, %v1283_v53  ;;  %v1088_v55 = vmul.f32 %v2074_v5, %v938_v54  ;;  %v1187_v28 = vadd.f32 %v2080_v10, %v1119_v58 }
  0xf4   : > { %v2227_v1 = vpop.f32.mrf.mxu3 }
  0xf5   : > { %v1156_v3 = vadd.f32 %v2080_v10, %v1088_v55  ;;  %v1251_v9 = vmax.f32 %v1187_v28, 0.0 }
  0xf6   : > { %v945_v4 = vpop.f32.mrf.mxu1  ;;  %v848_v13 = vpop.f32.mrf.mxu2 }
  0xf7   : > { %v1220_v11 = vmax.f32 %v1156_v3, 0.0  ;;  %v1315_v15 = vpack.c.bf16 %v1251_v9, %v1251_v9  ;;  %v1018_v17 = vadd.f32 %v2163_v43, %v848_v13  ;;  %v1829_v13 = vld [vmem:[%s1956_s5 + $0x104] sm:$0xf] }
  0xf8   : > { %v771_v18 = vpop.f32.mrf.mxu0 }
  0xf9   : > { %1776 = vmatmul.msk.bf16.gmra.mxu1 %vm633_vm2, %v1589_v20  ;;  %v1284_v0 = vpack.c.bf16 %v1220_v11, %v1220_v11  ;;  %v941_v42 = vadd.f32 %v940_v25, %v771_v18  ;;  %1793 = vmatmul.msk.bf16.gmra.mxu3 %vm633_vm2, %v1725_v8  ;;  %1380 = vst.msk [vmem:[%s2093_s25 + $0xa0] sm:$0xf] %vm1339_vm3, %v1315_v15 }
  0xfa   : > { %v1120_v21 = vmul.f32 %v2074_v5, %v1018_v17 }
  0xfb   : > { %1349 = vst.msk [vmem:[%s2093_s25 + $0x24] sm:$0xf] %vm1339_vm3, %v1284_v0  ;;  %v1089_v23 = vmul.f32 %v2074_v5, %v941_v42  ;;  %810 = vmatmul.bf16.gmra.mxu0 %v1577_v14  ;;  %890 = vmatmul.bf16.gmra.mxu2 %v1705_v19  ;;  %v1602_v14 = vld [vmem:[%s1956_s5 + $0x108] sm:$0xf0]  ;;  %v1592_v0 = vld [vmem:[%s1956_s5 + $0xf0] sm:$0xf] }
  0xfc   : > { %v1188_v43 = vadd.f32 %v2080_v10, %v1120_v21  ;;  %v2243_v26 = vpop.f32.mrf.mxu3  ;;  %v1828_v42 = vld [vmem:[%s1956_s5 + $0xf4] sm:$0xf0] }
  0xfd   : > { %v1157_v24 = vadd.f32 %v2080_v10, %v1089_v23 }
  0xfe   : > { %v947_v25 = vpop.f32.mrf.mxu1  ;;  %v1252_v27 = vmax.f32 %v1188_v43, 0.0  ;;  %v851_v30 = vpop.f32.mrf.mxu2  ;;  %v1720_v43 = vld [vmem:[%s1956_s5 + $0x1f0] sm:$0xf] }
  0xff   : > { %v1221_v29 = vmax.f32 %v1157_v24, 0.0  ;;  %v1021_v32 = vadd.f32 %v2178_v62, %v851_v30  ;;  %v1826_v62 = vld [vmem:[%s1956_s5 + $0xe4] sm:$0xf0]  ;;  %v1860_v24 = vld [vmem:[%s1956_s5 + $0x1f4] sm:$0xf0]  ;;  %v1593_v30 = vor.u32 %v1828_v42, %v1592_v0 }
 0x100   : > { %v1316_v31 = vpack.c.bf16 %v1252_v27, %v1252_v27  ;;  %v773_v33 = vpop.f32.mrf.mxu0  ;;  %v1585_v52 = vor.u32 %v1826_v62, %v1584_v61 }
 0x101   : > { %v1285_v34 = vpack.c.bf16 %v1221_v29, %v1221_v29  ;;  %v943_v36 = vadd.f32 %v942_v46, %v773_v33  ;;  %v1121_v39 = vmul.f32 %v2074_v5, %v1021_v32  ;;  %v1712_v46 = vld [vmem:[%s1956_s5 + $0x1e0] sm:$0xf] }
 0x102   : > { %1381 = vst.msk [vmem:[%s2093_s25 + $0xa4] sm:$0xf] %vm1339_vm3, %v1316_v31  ;;  %v1713_v58 = vor.u32 %v1858_v48, %v1712_v46 }
 0x103   : > { %1350 = vst.msk [vmem:[%s2093_s25 + $0x28] sm:$0xf] %vm1339_vm3, %v1285_v34  ;;  %v1090_v12 = vmul.f32 %v2074_v5, %v943_v36  ;;  %v1189_v40 = vadd.f32 %v2080_v10, %v1121_v39  ;;  %v1721_v34 = vor.u32 %v1860_v24, %v1720_v43 }
 0x104   : > { %v2260_v53 = vpop.f32.mrf.mxu3 }
 0x105   : > { %v1158_v45 = vadd.f32 %v2080_v10, %v1090_v12  ;;  %v1253_v49 = vmax.f32 %v1189_v40, 0.0 }
 0x106   : > { %v950_v47 = vpop.f32.mrf.mxu1  ;;  %v853_v51 = vpop.f32.mrf.mxu2 }
 0x107   : > { %v1222_v50 = vmax.f32 %v1158_v45, 0.0  ;;  %v1317_v54 = vpack.c.bf16 %v1253_v49, %v1253_v49  ;;  %v1023_v56 = vadd.f32 %v2195_v22, %v853_v51 }
 0x108   : > { %v776_v57 = vpop.f32.mrf.mxu0 }
 0x109   : > { %1777 = vmatmul.msk.bf16.gmra.mxu1 %vm633_vm2, %v1597_v41  ;;  %v1286_v59 = vpack.c.bf16 %v1222_v50, %v1222_v50  ;;  %v946_v60 = vadd.f32 %v945_v4, %v776_v57  ;;  %1382 = vst.msk [vmem:[%s2093_s25 + $0xa8] sm:$0xf] %vm1339_vm3, %v1317_v54  ;;  %v1122_v55 = vmul.f32 %v2074_v5, %v1023_v56 }
 0x10b   : > { %1351 = vst.msk [vmem:[%s2093_s25 + $0x2c] sm:$0xf] %vm1339_vm3, %v1286_v59  ;;  %v1091_v28 = vmul.f32 %v2074_v5, %v946_v60  ;;  %815 = vmatmul.bf16.gmra.mxu0 %v1585_v52  ;;  %v1190_v22 = vadd.f32 %v2080_v10, %v1122_v55  ;;  %895 = vmatmul.bf16.gmra.mxu2 %v1713_v58 }
 0x10c   : > { %v2275_v15 = vpop.f32.mrf.mxu3 }
 0x10d   : > { %v1159_v20 = vadd.f32 %v2080_v10, %v1091_v28  ;;  %v1254_v2 = vmax.f32 %v1190_v22, 0.0 }
 0x10e   : > { %v952_v63 = vpop.f32.mrf.mxu1  ;;  %v856_v4 = vpop.f32.mrf.mxu2 }
 0x10f   : > { %v1223_v3 = vmax.f32 %v1159_v20, 0.0  ;;  %v1318_v6 = vpack.c.bf16 %v1254_v2, %v1254_v2  ;;  %v1026_v7 = vadd.f32 %v2210_v44, %v856_v4  ;;  %v1605_v44 = vor.u32 %v1829_v13, %v1602_v14 }
 0x110   : > { %v778_v8 = vpop.f32.mrf.mxu0 }
 0x111   : > { %v1287_v9 = vpack.c.bf16 %v1223_v3, %v1223_v3  ;;  %v948_v11 = vadd.f32 %v947_v25, %v778_v8  ;;  %1383 = vst.msk [vmem:[%s2093_s25 + $0xac] sm:$0xf] %vm1339_vm3, %v1318_v6  ;;  %v1123_v17 = vmul.f32 %v2074_v5, %v1026_v7 }
 0x113   : > { %1352 = vst.msk [vmem:[%s2093_s25 + $0x30] sm:$0xf] %vm1339_vm3, %v1287_v9  ;;  %v1092_v18 = vmul.f32 %v2074_v5, %v948_v11  ;;  %v1191_v19 = vadd.f32 %v2080_v10, %v1123_v17 }
 0x114   : > { %v1037_v12 = vpop.f32.mrf.mxu3 }
 0x115   : > { %v1160_v21 = vadd.f32 %v2080_v10, %v1092_v18  ;;  %v1255_v25 = vmax.f32 %v1191_v19, 0.0 }
 0x116   : > { %v955_v23 = vpop.f32.mrf.mxu1  ;;  %v858_v29 = vpop.f32.mrf.mxu2 }
 0x117   : > { %v1224_v27 = vmax.f32 %v1160_v21, 0.0  ;;  %v1319_v31 = vpack.c.bf16 %v1255_v25, %v1255_v25  ;;  %v1028_v32 = vadd.f32 %v2227_v1, %v858_v29 }
 0x118   : > { %v781_v33 = vpop.f32.mrf.mxu0 }
 0x119   : > { %1778 = vmatmul.msk.bf16.gmra.mxu1 %vm633_vm2, %v1605_v44  ;;  %v1288_v36 = vpack.c.bf16 %v1224_v27, %v1224_v27  ;;  %v951_v37 = vadd.f32 %v950_v47, %v781_v33  ;;  %1384 = vst.msk [vmem:[%s2093_s25 + $0xb0] sm:$0xf] %vm1339_vm3, %v1319_v31  ;;  %v1124_v38 = vmul.f32 %v2074_v5, %v1028_v32 }
 0x11b   : > { %1353 = vst.msk [vmem:[%s2093_s25 + $0x34] sm:$0xf] %vm1339_vm3, %v1288_v36  ;;  %v1093_v39 = vmul.f32 %v2074_v5, %v951_v37  ;;  %820 = vmatmul.bf16.gmra.mxu0 %v1593_v30  ;;  %v1192_v1 = vadd.f32 %v2080_v10, %v1124_v38  ;;  %900 = vmatmul.bf16.gmra.mxu2 %v1721_v34 }
 0x11c   : > { %v1040_v58 = vpop.f32.mrf.mxu3 }
 0x11d   : > { %v1161_v40 = vadd.f32 %v2080_v10, %v1093_v39  ;;  %v1256_v61 = vmax.f32 %v1192_v1, 0.0 }
 0x11e   : > { %v957_v41 = vpop.f32.mrf.mxu1  ;;  %v861_v45 = vpop.f32.mrf.mxu2 }
 0x11f   : > { %v1225_v62 = vmax.f32 %v1161_v40, 0.0  ;;  %v1320_v47 = vpack.c.bf16 %v1256_v61, %v1256_v61  ;;  %v1031_v46 = vadd.f32 %v2243_v26, %v861_v45 }
 0x120   : > { %v783_v48 = vpop.f32.mrf.mxu0 }
 0x121   : > { %v1289_v49 = vpack.c.bf16 %v1225_v62, %v1225_v62  ;;  %v953_v50 = vadd.f32 %v952_v63, %v783_v48  ;;  %1385 = vst.msk [vmem:[%s2093_s25 + $0xb4] sm:$0xf] %vm1339_vm3, %v1320_v47  ;;  %v1125_v51 = vmul.f32 %v2074_v5, %v1031_v46 }
 0x123   : > { %1354 = vst.msk [vmem:[%s2093_s25 + $0x38] sm:$0xf] %vm1339_vm3, %v1289_v49  ;;  %v1094_v52 = vmul.f32 %v2074_v5, %v953_v50  ;;  %v1193_v54 = vadd.f32 %v2080_v10, %v1125_v51 }
 0x124   : > { %v1042_v11 = vpop.f32.mrf.mxu3 }
 0x125   : > { %v1162_v56 = vadd.f32 %v2080_v10, %v1094_v52  ;;  %v1257_v26 = vmax.f32 %v1193_v54, 0.0 }
 0x126   : > { %v960_v57 = vpop.f32.mrf.mxu1  ;;  %v863_v60 = vpop.f32.mrf.mxu2 }
 0x127   : > { %v1226_v59 = vmax.f32 %v1162_v56, 0.0  ;;  %v1321_v55 = vpack.c.bf16 %v1257_v26, %v1257_v26  ;;  %v1033_v28 = vadd.f32 %v2260_v53, %v863_v60 }
 0x128   : > { %v786_v22 = vpop.f32.mrf.mxu0 }
 0x129   : > { %v1290_v20 = vpack.c.bf16 %v1226_v59, %v1226_v59  ;;  %v956_v63 = vadd.f32 %v955_v23, %v786_v22  ;;  %1386 = vst.msk [vmem:[%s2093_s25 + $0xb8] sm:$0xf] %vm1339_vm3, %v1321_v55  ;;  %v1126_v2 = vmul.f32 %v2074_v5, %v1033_v28 }
 0x12b   : > { %1355 = vst.msk [vmem:[%s2093_s25 + $0x3c] sm:$0xf] %vm1339_vm3, %v1290_v20  ;;  %v1095_v3 = vmul.f32 %v2074_v5, %v956_v63  ;;  %v1194_v4 = vadd.f32 %v2080_v10, %v1126_v2 }
 0x12c   : > { %v1045_v32 = vpop.f32.mrf.mxu3 }
 0x12d   : > { %v1163_v6 = vadd.f32 %v2080_v10, %v1095_v3  ;;  %v1258_v8 = vmax.f32 %v1194_v4, 0.0 }
 0x12e   : > { %v962_v7 = vpop.f32.mrf.mxu1  ;;  %v866_v9 = vpop.f32.mrf.mxu2 }
 0x12f   : > { %v1227_v53 = vmax.f32 %v1163_v6, 0.0  ;;  %v1322_v13 = vpack.c.bf16 %v1258_v8, %v1258_v8  ;;  %v1036_v14 = vadd.f32 %v2275_v15, %v866_v9 }
 0x130   : > { %v788_v17 = vpop.f32.mrf.mxu0 }
 0x131   : > { %v1291_v18 = vpack.c.bf16 %v1227_v53, %v1227_v53  ;;  %v958_v19 = vadd.f32 %v957_v41, %v788_v17  ;;  %1387 = vst.msk [vmem:[%s2093_s25 + $0xbc] sm:$0xf] %vm1339_vm3, %v1322_v13  ;;  %v1127_v44 = vmul.f32 %v2074_v5, %v1036_v14 }
 0x133   : > { %1356 = vst.msk [vmem:[%s2093_s25 + $0x40] sm:$0xf] %vm1339_vm3, %v1291_v18  ;;  %v1096_v0 = vmul.f32 %v2074_v5, %v958_v19  ;;  %v1195_v42 = vadd.f32 %v2080_v10, %v1127_v44 }
 0x134   : > { %v1047_v48 = vpop.f32.mrf.mxu3 }
 0x135   : > { %v1164_v21 = vadd.f32 %v2080_v10, %v1096_v0  ;;  %v1259_v43 = vmax.f32 %v1195_v42, 0.0 }
 0x136   : > { %v965_v23 = vpop.f32.mrf.mxu1  ;;  %v868_v24 = vpop.f32.mrf.mxu2 }
 0x137   : > { %v1228_v15 = vmax.f32 %v1164_v21, 0.0  ;;  %v1323_v25 = vpack.c.bf16 %v1259_v43, %v1259_v43  ;;  %v1038_v27 = vadd.f32 %v1037_v12, %v868_v24 }
 0x138   : > { %v791_v29 = vpop.f32.mrf.mxu0 }
 0x139   : > { %v1292_v30 = vpack.c.bf16 %v1228_v15, %v1228_v15  ;;  %v961_v31 = vadd.f32 %v960_v57, %v791_v29  ;;  %1388 = vst.msk [vmem:[%s2093_s25 + $0xc0] sm:$0xf] %vm1339_vm3, %v1323_v25  ;;  %v1128_v33 = vmul.f32 %v2074_v5, %v1038_v27 }
 0x13b   : > { %1357 = vst.msk [vmem:[%s2093_s25 + $0x44] sm:$0xf] %vm1339_vm3, %v1292_v30  ;;  %v1097_v34 = vmul.f32 %v2074_v5, %v961_v31  ;;  %v1196_v36 = vadd.f32 %v2080_v10, %v1128_v33 }
 0x13c   : > { %v1050_v2 = vpop.f32.mrf.mxu3 }
 0x13d   : > { %v1165_v37 = vadd.f32 %v2080_v10, %v1097_v34  ;;  %v1260_v39 = vmax.f32 %v1196_v36, 0.0 }
 0x13e   : > { %v967_v38 = vpop.f32.mrf.mxu1  ;;  %v871_v1 = vpop.f32.mrf.mxu2 }
 0x13f   : > { %v1229_v12 = vmax.f32 %v1165_v37, 0.0  ;;  %v1324_v40 = vpack.c.bf16 %v1260_v39, %v1260_v39  ;;  %v1041_v41 = vadd.f32 %v1040_v58, %v871_v1 }
 0x140   : > { %v793_v61 = vpop.f32.mrf.mxu0 }
 0x141   : > { %v1293_v62 = vpack.c.bf16 %v1229_v12, %v1229_v12  ;;  %v963_v45 = vadd.f32 %v962_v7, %v793_v61  ;;  %1389 = vst.msk [vmem:[%s2093_s25 + $0xc4] sm:$0xf] %vm1339_vm3, %v1324_v40  ;;  %v1129_v47 = vmul.f32 %v2074_v5, %v1041_v41 }
 0x143   : > { %1358 = vst.msk [vmem:[%s2093_s25 + $0x48] sm:$0xf] %vm1339_vm3, %v1293_v62  ;;  %v1098_v46 = vmul.f32 %v2074_v5, %v963_v45  ;;  %v1197_v49 = vadd.f32 %v2080_v10, %v1129_v47 }
 0x144   : > { %v1052_v21 = vpop.f32.mrf.mxu3 }
 0x145   : > { %v1166_v50 = vadd.f32 %v2080_v10, %v1098_v46  ;;  %v1261_v52 = vmax.f32 %v1197_v49, 0.0 }
 0x146   : > { %v970_v51 = vpop.f32.mrf.mxu1  ;;  %v873_v56 = vpop.f32.mrf.mxu2 }
 0x147   : > { %v1230_v54 = vmax.f32 %v1166_v50, 0.0  ;;  %v1325_v57 = vpack.c.bf16 %v1261_v52, %v1261_v52  ;;  %v1043_v58 = vadd.f32 %v1042_v11, %v873_v56 }
 0x148   : > { %v796_v26 = vpop.f32.mrf.mxu0 }
 0x149   : > { %v1294_v59 = vpack.c.bf16 %v1230_v54, %v1230_v54  ;;  %v966_v60 = vadd.f32 %v965_v23, %v796_v26  ;;  %1390 = vst.msk [vmem:[%s2093_s25 + $0xc8] sm:$0xf] %vm1339_vm3, %v1325_v57  ;;  %v1130_v55 = vmul.f32 %v2074_v5, %v1043_v58 }
 0x14b   : > { %1359 = vst.msk [vmem:[%s2093_s25 + $0x4c] sm:$0xf] %vm1339_vm3, %v1294_v59  ;;  %v1099_v28 = vmul.f32 %v2074_v5, %v966_v60  ;;  %v1198_v22 = vadd.f32 %v2080_v10, %v1130_v55 }
 0x14c   : > { %v1055_v40 = vpop.f32.mrf.mxu3 }
 0x14d   : > { %v1167_v20 = vadd.f32 %v2080_v10, %v1099_v28  ;;  %v1262_v3 = vmax.f32 %v1198_v22, 0.0 }
 0x14e   : > { %v972_v63 = vpop.f32.mrf.mxu1  ;;  %v876_v6 = vpop.f32.mrf.mxu2 }
 0x14f   : > { %v1231_v4 = vmax.f32 %v1167_v20, 0.0  ;;  %v1326_v7 = vpack.c.bf16 %v1262_v3, %v1262_v3  ;;  %v1046_v8 = vadd.f32 %v1045_v32, %v876_v6 }
 0x150   : > { %v798_v53 = vpop.f32.mrf.mxu0 }
 0x151   : > { %v1295_v9 = vpack.c.bf16 %v1231_v4, %v1231_v4  ;;  %v968_v11 = vadd.f32 %v967_v38, %v798_v53  ;;  %1391 = vst.msk [vmem:[%s2093_s25 + $0xcc] sm:$0xf] %vm1339_vm3, %v1326_v7  ;;  %v1131_v13 = vmul.f32 %v2074_v5, %v1046_v8 }
 0x153   : > { %1360 = vst.msk [vmem:[%s2093_s25 + $0x50] sm:$0xf] %vm1339_vm3, %v1295_v9  ;;  %v1100_v14 = vmul.f32 %v2074_v5, %v968_v11  ;;  %v1199_v17 = vadd.f32 %v2080_v10, %v1131_v13 }
 0x154   : > { %v1057_v26 = vpop.f32.mrf.mxu3 }
 0x155   : > { %v1168_v18 = vadd.f32 %v2080_v10, %v1100_v14  ;;  %v1263_v44 = vmax.f32 %v1199_v17, 0.0 }
 0x156   : > { %v975_v19 = vpop.f32.mrf.mxu1  ;;  %v878_v42 = vpop.f32.mrf.mxu2 }
 0x157   : > { %v1232_v0 = vmax.f32 %v1168_v18, 0.0  ;;  %v1327_v23 = vpack.c.bf16 %v1263_v44, %v1263_v44  ;;  %v1048_v43 = vadd.f32 %v1047_v48, %v878_v42 }
 0x158   : > { %v801_v15 = vpop.f32.mrf.mxu0 }
 0x159   : > { %v1296_v24 = vpack.c.bf16 %v1232_v0, %v1232_v0  ;;  %v971_v25 = vadd.f32 %v970_v51, %v801_v15  ;;  %1392 = vst.msk [vmem:[%s2093_s25 + $0xd0] sm:$0xf] %vm1339_vm3, %v1327_v23  ;;  %v1132_v27 = vmul.f32 %v2074_v5, %v1048_v43 }
 0x15b   : > { %1361 = vst.msk [vmem:[%s2093_s25 + $0x54] sm:$0xf] %vm1339_vm3, %v1296_v24  ;;  %v1101_v29 = vmul.f32 %v2074_v5, %v971_v25  ;;  %v1200_v30 = vadd.f32 %v2080_v10, %v1132_v27 }
 0x15c   : > { %v1060_v13 = vpop.f32.mrf.mxu3 }
 0x15d   : > { %v1169_v31 = vadd.f32 %v2080_v10, %v1101_v29  ;;  %v1264_v33 = vmax.f32 %v1200_v30, 0.0 }
 0x15e   : > { %v977_v32 = vpop.f32.mrf.mxu1  ;;  %v881_v36 = vpop.f32.mrf.mxu2 }
 0x15f   : > { %v1233_v34 = vmax.f32 %v1169_v31, 0.0  ;;  %v1328_v37 = vpack.c.bf16 %v1264_v33, %v1264_v33  ;;  %v1051_v38 = vadd.f32 %v1050_v2, %v881_v36 }
 0x160   : > { %v803_v39 = vpop.f32.mrf.mxu0 }
 0x161   : > { %v1297_v12 = vpack.c.bf16 %v1233_v34, %v1233_v34  ;;  %v973_v1 = vadd.f32 %v972_v63, %v803_v39  ;;  %1393 = vst.msk [vmem:[%s2093_s25 + $0xd4] sm:$0xf] %vm1339_vm3, %v1328_v37  ;;  %v1133_v41 = vmul.f32 %v2074_v5, %v1051_v38 }
 0x163   : > { %1362 = vst.msk [vmem:[%s2093_s25 + $0x58] sm:$0xf] %vm1339_vm3, %v1297_v12  ;;  %v1102_v61 = vmul.f32 %v2074_v5, %v973_v1  ;;  %v1201_v62 = vadd.f32 %v2080_v10, %v1133_v41 }
 0x164   : > { %v1062_v31 = vpop.f32.mrf.mxu3 }
 0x165   : > { %v1170_v45 = vadd.f32 %v2080_v10, %v1102_v61  ;;  %v1265_v46 = vmax.f32 %v1201_v62, 0.0 }
 0x166   : > { %v980_v47 = vpop.f32.mrf.mxu1  ;;  %v883_v49 = vpop.f32.mrf.mxu2 }
 0x167   : > { %v1234_v48 = vmax.f32 %v1170_v45, 0.0  ;;  %v1329_v50 = vpack.c.bf16 %v1265_v46, %v1265_v46  ;;  %v1053_v51 = vadd.f32 %v1052_v21, %v883_v49 }
 0x168   : > { %v806_v52 = vpop.f32.mrf.mxu0 }
 0x169   : > { %v1298_v54 = vpack.c.bf16 %v1234_v48, %v1234_v48  ;;  %v976_v56 = vadd.f32 %v975_v19, %v806_v52  ;;  %1394 = vst.msk [vmem:[%s2093_s25 + $0xd8] sm:$0xf] %vm1339_vm3, %v1329_v50  ;;  %v1134_v57 = vmul.f32 %v2074_v5, %v1053_v51 }
 0x16b   : > { %1363 = vst.msk [vmem:[%s2093_s25 + $0x5c] sm:$0xf] %vm1339_vm3, %v1298_v54  ;;  %v1103_v58 = vmul.f32 %v2074_v5, %v976_v56  ;;  %v1202_v59 = vadd.f32 %v2080_v10, %v1134_v57 }
 0x16c   : > { %v1065_v49 = vpop.f32.mrf.mxu3 }
 0x16d   : > { %v1171_v60 = vadd.f32 %v2080_v10, %v1103_v58  ;;  %v1266_v28 = vmax.f32 %v1202_v59, 0.0 }
 0x16e   : > { %v982_v55 = vpop.f32.mrf.mxu1  ;;  %v886_v20 = vpop.f32.mrf.mxu2 }
 0x16f   : > { %v1235_v22 = vmax.f32 %v1171_v60, 0.0  ;;  %v1330_v63 = vpack.c.bf16 %v1266_v28, %v1266_v28  ;;  %v1056_v2 = vadd.f32 %v1055_v40, %v886_v20 }
 0x170   : > { %v808_v3 = vpop.f32.mrf.mxu0 }
 0x171   : > { %v1299_v4 = vpack.c.bf16 %v1235_v22, %v1235_v22  ;;  %v978_v6 = vadd.f32 %v977_v32, %v808_v3  ;;  %1395 = vst.msk [vmem:[%s2093_s25 + $0xdc] sm:$0xf] %vm1339_vm3, %v1330_v63  ;;  %v1135_v7 = vmul.f32 %v2074_v5, %v1056_v2 }
 0x173   : > { %1364 = vst.msk [vmem:[%s2093_s25 + $0x60] sm:$0xf] %vm1339_vm3, %v1299_v4  ;;  %v1104_v8 = vmul.f32 %v2074_v5, %v978_v6  ;;  %v1203_v53 = vadd.f32 %v2080_v10, %v1135_v7  ;;  %v2395_v5 = vld [vmem:[%s2471_s2] ss:$0 sm:$0xff] }
 0x174   : > { %v1067_v2 = vpop.f32.mrf.mxu3 }
 0x175   : > { %v1172_v9 = vadd.f32 %v2080_v10, %v1104_v8  ;;  %v1267_v14 = vmax.f32 %v1203_v53, 0.0 }
 0x176   : > { %v985_v11 = vpop.f32.mrf.mxu1  ;;  %v888_v18 = vpop.f32.mrf.mxu2 }
 0x177   : > { %v1236_v17 = vmax.f32 %v1172_v9, 0.0  ;;  %v1331_v19 = vpack.c.bf16 %v1267_v14, %v1267_v14  ;;  %v1058_v44 = vadd.f32 %v1057_v26, %v888_v18 }
 0x178   : > { %v811_v0 = vpop.f32.mrf.mxu0 }
 0x179   : > { %v1300_v42 = vpack.c.bf16 %v1236_v17, %v1236_v17  ;;  %v981_v21 = vadd.f32 %v980_v47, %v811_v0  ;;  %1396 = vst.msk [vmem:[%s2093_s25 + $0xe0] sm:$0xf] %vm1339_vm3, %v1331_v19  ;;  %v1136_v23 = vmul.f32 %v2395_v5, %v1058_v44 }
 0x17b   : > { %1365 = vst.msk [vmem:[%s2093_s25 + $0x64] sm:$0xf] %vm1339_vm3, %v1300_v42  ;;  %v1105_v43 = vmul.f32 %v2395_v5, %v981_v21  ;;  %v1204_v15 = vadd.f32 %v2080_v10, %v1136_v23 }
 0x17d   : > { %v1173_v24 = vadd.f32 %v2080_v10, %v1105_v43  ;;  %v1268_v27 = vmax.f32 %v1204_v15, 0.0  ;;  %v2412_v10 = vld [vmem:[%s2472_s3] ss:$0 sm:$0xff]  ;;  %v1070_v43 = vpop.f32.mrf.mxu3 }
 0x17e   : > { %v987_v25 = vpop.f32.mrf.mxu1  ;;  %v891_v30 = vpop.f32.mrf.mxu2 }
 0x17f   : > { %v1237_v29 = vmax.f32 %v1173_v24, 0.0  ;;  %v1332_v32 = vpack.c.bf16 %v1268_v27, %v1268_v27  ;;  %v1061_v33 = vadd.f32 %v1060_v13, %v891_v30 }
 0x180   : > { %v813_v34 = vpop.f32.mrf.mxu0 }
 0x181   : > { %v1301_v36 = vpack.c.bf16 %v1237_v29, %v1237_v29  ;;  %v983_v37 = vadd.f32 %v982_v55, %v813_v34  ;;  %1397 = vst.msk [vmem:[%s2093_s25 + $0xe4] sm:$0xf] %vm1339_vm3, %v1332_v32  ;;  %v1137_v38 = vmul.f32 %v2395_v5, %v1061_v33 }
 0x183   : > { %1366 = vst.msk [vmem:[%s2093_s25 + $0x68] sm:$0xf] %vm1339_vm3, %v1301_v36  ;;  %v1106_v39 = vmul.f32 %v2395_v5, %v983_v37  ;;  %v1205_v12 = vadd.f32 %v2412_v10, %v1137_v38 }
 0x185   : > { %v1174_v1 = vadd.f32 %v2412_v10, %v1106_v39  ;;  %v1269_v41 = vmax.f32 %v1205_v12, 0.0 }
 0x186   : > { %v990_v40 = vpop.f32.mrf.mxu1  ;;  %v893_v62 = vpop.f32.mrf.mxu2 }
 0x187   : > { %v1238_v61 = vmax.f32 %v1174_v1, 0.0  ;;  %v1333_v45 = vpack.c.bf16 %v1269_v41, %v1269_v41  ;;  %v1063_v47 = vadd.f32 %v1062_v31, %v893_v62 }
 0x188   : > { %v816_v46 = vpop.f32.mrf.mxu0 }
 0x189   : > { %v1302_v48 = vpack.c.bf16 %v1238_v61, %v1238_v61  ;;  %v986_v50 = vadd.f32 %v985_v11, %v816_v46  ;;  %1398 = vst.msk [vmem:[%s2093_s25 + $0xe8] sm:$0xf] %vm1339_vm3, %v1333_v45  ;;  %v1138_v51 = vmul.f32 %v2395_v5, %v1063_v47  ;;  %v1072_v45 = vpop.f32.mrf.mxu3 }
 0x18b   : > { %1367 = vst.msk [vmem:[%s2093_s25 + $0x6c] sm:$0xf] %vm1339_vm3, %v1302_v48  ;;  %v1107_v52 = vmul.f32 %v2395_v5, %v986_v50  ;;  %v1206_v54 = vadd.f32 %v2412_v10, %v1138_v51 }
 0x18d   : > { %v1175_v56 = vadd.f32 %v2412_v10, %v1107_v52  ;;  %v1270_v58 = vmax.f32 %v1206_v54, 0.0 }
 0x18e   : > { %v992_v57 = vpop.f32.mrf.mxu1  ;;  %v896_v59 = vpop.f32.mrf.mxu2 }
 0x18f   : > { %v1239_v26 = vmax.f32 %v1175_v56, 0.0  ;;  %v1334_v60 = vpack.c.bf16 %v1270_v58, %v1270_v58  ;;  %v1066_v55 = vadd.f32 %v1065_v49, %v896_v59 }
 0x190   : > { %v818_v28 = vpop.f32.mrf.mxu0 }
 0x191   : > { %v1303_v22 = vpack.c.bf16 %v1239_v26, %v1239_v26  ;;  %v988_v20 = vadd.f32 %v987_v25, %v818_v28  ;;  %1399 = vst.msk [vmem:[%s2093_s25 + $0xec] sm:$0xf] %vm1339_vm3, %v1334_v60  ;;  %v1139_v63 = vmul.f32 %v2395_v5, %v1066_v55 }
 0x193   : > { %1368 = vst.msk [vmem:[%s2093_s25 + $0x70] sm:$0xf] %vm1339_vm3, %v1303_v22  ;;  %v1108_v3 = vmul.f32 %v2395_v5, %v988_v20  ;;  %v1207_v4 = vadd.f32 %v2412_v10, %v1139_v63 }
 0x195   : > { %v1176_v6 = vadd.f32 %v2412_v10, %v1108_v3  ;;  %v1271_v8 = vmax.f32 %v1207_v4, 0.0 }
 0x196   : > { %v995_v7 = vpop.f32.mrf.mxu1  ;;  %v898_v11 = vpop.f32.mrf.mxu2 }
 0x197   : > { %v996_v53 = vadd.f32 %v995_v7, %v2088_v16  ;;  %v1240_v9 = vmax.f32 %v1176_v6, 0.0  ;;  %v1335_v13 = vpack.c.bf16 %v1271_v8, %v1271_v8  ;;  %v1068_v17 = vadd.f32 %v1067_v2, %v898_v11 }
 0x198   : > { %v821_v18 = vpop.f32.mrf.mxu0 }
 0x199   : > { %v1111_v14 = vmul.f32 %v2395_v5, %v996_v53  ;;  %v1304_v19 = vpack.c.bf16 %v1240_v9, %v1240_v9  ;;  %v991_v44 = vadd.f32 %v990_v40, %v821_v18  ;;  %1400 = vst.msk [vmem:[%s2093_s25 + $0xf0] sm:$0xf] %vm1339_vm3, %v1335_v13  ;;  %v1140_v42 = vmul.f32 %v2395_v5, %v1068_v17 }
 0x19b   : > { %v1179_v0 = vadd.f32 %v2412_v10, %v1111_v14  ;;  %1369 = vst.msk [vmem:[%s2093_s25 + $0x74] sm:$0xf] %vm1339_vm3, %v1304_v19  ;;  %v1109_v16 = vmul.f32 %v2395_v5, %v991_v44  ;;  %v1208_v23 = vadd.f32 %v2412_v10, %v1140_v42 }
 0x19d   : > { %v1243_v21 = vmax.f32 %v1179_v0, 0.0  ;;  %v1177_v15 = vadd.f32 %v2412_v10, %v1109_v16  ;;  %v1272_v27 = vmax.f32 %v1208_v23, 0.0 }
 0x19e   : > { %v997_v24 = vpop.f32.mrf.mxu1  ;;  %v901_v31 = vpop.f32.mrf.mxu2 }
 0x19f   : > { %v1307_v25 = vpack.c.bf16 %v1243_v21, %v1243_v21  ;;  %v998_v29 = vadd.f32 %v997_v24, %v2109_v35  ;;  %v1241_v30 = vmax.f32 %v1177_v15, 0.0  ;;  %v1336_v32 = vpack.c.bf16 %v1272_v27, %v1272_v27 }
 0x1a0   : > { %v1071_v34 = vadd.f32 %v1070_v43, %v901_v31  ;;  %v823_v36 = vpop.f32.mrf.mxu0 }
 0x1a1   : > { %1372 = vst.msk [vmem:[%s2093_s25 + $0x80] sm:$0xf] %vm1339_vm3, %v1307_v25  ;;  %v1112_v33 = vmul.f32 %v2395_v5, %v998_v29  ;;  %v1305_v37 = vpack.c.bf16 %v1241_v30, %v1241_v30  ;;  %v993_v38 = vadd.f32 %v992_v57, %v823_v36 }
 0x1a2   : > { %1401 = vst.msk [vmem:[%s2093_s25 + $0xf4] sm:$0xf] %vm1339_vm3, %v1336_v32  ;;  %v1141_v12 = vmul.f32 %v2395_v5, %v1071_v34 }
 0x1a3   : > { %v1180_v39 = vadd.f32 %v2412_v10, %v1112_v33  ;;  %1370 = vst.msk [vmem:[%s2093_s25 + $0x78] sm:$0xf] %vm1339_vm3, %v1305_v37  ;;  %v1110_v35 = vmul.f32 %v2395_v5, %v993_v38 }
 0x1a4   : > { %v1209_v40 = vadd.f32 %v2412_v10, %v1141_v12 }
 0x1a5   : > { %v1244_v1 = vmax.f32 %v1180_v39, 0.0  ;;  %v1178_v41 = vadd.f32 %v2412_v10, %v1110_v35 }
 0x1a6   : > { %v1273_v62 = vmax.f32 %v1209_v40, 0.0  ;;  %v903_v46 = vpop.f32.mrf.mxu2 }
 0x1a7   : > { %v1308_v61 = vpack.c.bf16 %v1244_v1, %v1244_v1  ;;  %v1242_v47 = vmax.f32 %v1178_v41, 0.0  ;;  %v1073_v49 = vadd.f32 %v1072_v45, %v903_v46 }
 0x1a8   : > { %v1337_v48 = vpack.c.bf16 %v1273_v62, %v1273_v62 }
 0x1a9   : > { %1373 = vst.msk [vmem:[%s2093_s25 + $0x84] sm:$0xf] %vm1339_vm3, %v1308_v61  ;;  %v1306_v50 = vpack.c.bf16 %v1242_v47, %v1242_v47  ;;  %v1142_v51 = vmul.f32 %v2395_v5, %v1073_v49 }
 0x1aa   : > { %1402 = vst.msk [vmem:[%s2093_s25 + $0xf8] sm:$0xf] %vm1339_vm3, %v1337_v48 }
 0x1ab   : > { %1371 = vst.msk [vmem:[%s2093_s25 + $0x7c] sm:$0xf] %vm1339_vm3, %v1306_v50  ;;  %v1210_v52 = vadd.f32 %v2412_v10, %v1142_v51 }
 0x1ad   : > { %v1274_v54 = vmax.f32 %v1210_v52, 0.0 }
 0x1af   : > { %v1338_v56 = vpack.c.bf16 %v1274_v54, %v1274_v54 }
 0x1b1   : > { %1403 = vst.msk [vmem:[%s2093_s25 + $0xfc] sm:$0xf] %vm1339_vm3, %v1338_v56 }
 0x1b2 PF: > { %s14_s15 = sadd.s32 1, %s1899_s15  }
 0x1b3   : > { %p11_p4 = scmp.ge.s32.totalorder %s14_s15, 6  }
 0x1b5   :  { %13 = sbr.rel (!%p11_p4) target bundleno = 1 (0x1), region = 66 }

// kernel: densenet_forward.26
= control target key start
LH: loop header
LB: loop body
LE: loop exit
PB: predicated region body
PF: predicated region fallthrough
CT: control target
= control target key end

     0   :  { %s568_s0 = inlined_call_operand.vmem [shape: bf16[9,64,128], index: 0, kind: input, shape index: {}]   ;;  %s569_s1 = inlined_call_operand.vmem [shape: bf16[64,128], index: 1, kind: output, shape index: {}]  }
   0x1   :  { %v237_v0 = vld [vmem:[%s568_s0] sm:$0xff]   ;;  %v400_v16 = vld [vmem:[%s568_s0 + $0x8] sm:$0xff]   ;;  %v401_v55 = vld [vmem:[%s568_s0 + $0x10] sm:$0xff]  }
   0x2   :  { %v403_v1 = vld [vmem:[%s568_s0 + $0x20] sm:$0xff]   ;;  %v238_v3 = vunpack.c.l.bf16 %v237_v0  ;;  %v239_v4 = vunpack.c.h.bf16 %v237_v0  ;;  %v404_v17 = vld [vmem:[%s568_s0 + $0x28] sm:$0xff]   ;;  %v242_v27 = vunpack.c.l.bf16 %v400_v16  ;;  %v243_v28 = vunpack.c.h.bf16 %v400_v16  ;;  %v405_v60 = vld [vmem:[%s568_s0 + $0x30] sm:$0xff]  }
   0x3   :  { %v407_v2 = vld [vmem:[%s568_s0 + $0x40] sm:$0xff]   ;;  %v254_v5 = vunpack.c.l.bf16 %v403_v1  ;;  %v255_v6 = vunpack.c.h.bf16 %v403_v1  ;;  %v408_v25 = vld [vmem:[%s568_s0 + $0x48] sm:$0xff]   ;;  %v258_v29 = vunpack.c.l.bf16 %v404_v17  ;;  %v259_v30 = vunpack.c.h.bf16 %v404_v17 }
   0x4   :  { %v411_v7 = vld [vmem:[%s568_s0 + $0x60] sm:$0xff]   ;;  %v270_v8 = vunpack.c.l.bf16 %v407_v2  ;;  %v271_v9 = vunpack.c.h.bf16 %v407_v2  ;;  %v412_v35 = vld [vmem:[%s568_s0 + $0x68] sm:$0xff]   ;;  %v274_v38 = vunpack.c.l.bf16 %v408_v25  ;;  %v275_v39 = vunpack.c.h.bf16 %v408_v25  ;;  %v417_v25 = vld [vmem:[%s568_s0 + $0x90] sm:$0xff]  }
   0x5   :  { %v415_v10 = vld [vmem:[%s568_s0 + $0x80] sm:$0xff]   ;;  %v286_v12 = vunpack.c.l.bf16 %v411_v7  ;;  %v287_v13 = vunpack.c.h.bf16 %v411_v7  ;;  %v152_v14 = vmax.f32 %v238_v3, %v254_v5  ;;  %v160_v15 = vmax.f32 %v239_v4, %v255_v6  ;;  %v416_v40 = vld [vmem:[%s568_s0 + $0x88] sm:$0xff]   ;;  %v409_v6 = vld [vmem:[%s568_s0 + $0x50] sm:$0xff]  }
   0x6   :  { %v419_v11 = vld [vmem:[%s568_s0 + $0xa0] sm:$0xff]   ;;  %v302_v18 = vunpack.c.l.bf16 %v415_v10  ;;  %v303_v20 = vunpack.c.h.bf16 %v415_v10  ;;  %v420_v45 = vld [vmem:[%s568_s0 + $0xa8] sm:$0xff]   ;;  %v290_v46 = vunpack.c.l.bf16 %v412_v35  ;;  %v291_v47 = vunpack.c.h.bf16 %v412_v35  ;;  %v402_v35 = vld [vmem:[%s568_s0 + $0x18] sm:$0xff]  }
   0x7   :  { %v423_v19 = vld [vmem:[%s568_s0 + $0xc0] sm:$0xff]   ;;  %v318_v21 = vunpack.c.l.bf16 %v419_v11  ;;  %v153_v23 = vmax.f32 %v152_v14, %v270_v8  ;;  %v161_v24 = vmax.f32 %v160_v15, %v271_v9  ;;  %v319_v31 = vunpack.c.h.bf16 %v419_v11  ;;  %v424_v48 = vld [vmem:[%s568_s0 + $0xc8] sm:$0xff]   ;;  %v413_v11 = vld [vmem:[%s568_s0 + $0x70] sm:$0xff]  }
   0x8   :  { %v427_v22 = vld [vmem:[%s568_s0 + $0xe0] sm:$0xff]   ;;  %v334_v32 = vunpack.c.l.bf16 %v423_v19  ;;  %v335_v36 = vunpack.c.h.bf16 %v423_v19  ;;  %v168_v49 = vmax.f32 %v242_v27, %v258_v29  ;;  %v176_v50 = vmax.f32 %v243_v28, %v259_v30  ;;  %v428_v1 = vld [vmem:[%s568_s0 + $0xe8] sm:$0xff]   ;;  %v421_v28 = vld [vmem:[%s568_s0 + $0xb0] sm:$0xff]  }
   0x9   :  { %v431_v26 = vld [vmem:[%s568_s0 + $0x100] sm:$0xff]   ;;  %v154_v33 = vmax.f32 %v153_v23, %v286_v12  ;;  %v162_v34 = vmax.f32 %v161_v24, %v287_v13  ;;  %v350_v37 = vunpack.c.l.bf16 %v427_v22  ;;  %v351_v41 = vunpack.c.h.bf16 %v427_v22 }
   0xa   :  { %v366_v42 = vunpack.c.l.bf16 %v431_v26  ;;  %v367_v51 = vunpack.c.h.bf16 %v431_v26  ;;  %v306_v54 = vunpack.c.l.bf16 %v416_v40  ;;  %v307_v56 = vunpack.c.h.bf16 %v416_v40  ;;  %v406_v40 = vld [vmem:[%s568_s0 + $0x38] sm:$0xff]  }
   0xb   :  { %v155_v43 = vmax.f32 %v154_v33, %v302_v18  ;;  %v163_v44 = vmax.f32 %v162_v34, %v303_v20  ;;  %v322_v57 = vunpack.c.l.bf16 %v420_v45  ;;  %v169_v58 = vmax.f32 %v168_v49, %v274_v38  ;;  %v432_v18 = vld [vmem:[%s568_s0 + $0x108] sm:$0xff]  }
   0xc   :  { %v177_v59 = vmax.f32 %v176_v50, %v275_v39  ;;  %v323_v63 = vunpack.c.h.bf16 %v420_v45  ;;  %v338_v0 = vunpack.c.l.bf16 %v424_v48  ;;  %v246_v4 = vunpack.c.l.bf16 %v401_v55  ;;  %v425_v45 = vld [vmem:[%s568_s0 + $0xd0] sm:$0xff]   ;;  %v410_v50 = vld [vmem:[%s568_s0 + $0x58] sm:$0xff]  }
   0xd   :  { %v156_v52 = vmax.f32 %v155_v43, %v318_v21  ;;  %v164_v53 = vmax.f32 %v163_v44, %v319_v31  ;;  %v170_v2 = vmax.f32 %v169_v58, %v290_v46  ;;  %v247_v5 = vunpack.c.h.bf16 %v401_v55 }
   0xe   :  { %v178_v3 = vmax.f32 %v177_v59, %v291_v47  ;;  %v262_v9 = vunpack.c.l.bf16 %v405_v60  ;;  %v263_v10 = vunpack.c.h.bf16 %v405_v60  ;;  %v339_v12 = vunpack.c.h.bf16 %v424_v48  ;;  %v414_v60 = vld [vmem:[%s568_s0 + $0x78] sm:$0xff]  }
   0xf   :  { %v157_v61 = vmax.f32 %v156_v52, %v334_v32  ;;  %v165_v62 = vmax.f32 %v164_v53, %v335_v36  ;;  %v354_v13 = vunpack.c.l.bf16 %v428_v1  ;;  %v171_v14 = vmax.f32 %v170_v2, %v306_v54  ;;  %v429_v53 = vld [vmem:[%s568_s0 + $0xf0] sm:$0xff]  }
  0x10   :  { %v179_v15 = vmax.f32 %v178_v3, %v307_v56  ;;  %v278_v19 = vunpack.c.l.bf16 %v409_v6  ;;  %v279_v20 = vunpack.c.h.bf16 %v409_v6  ;;  %v355_v21 = vunpack.c.h.bf16 %v428_v1 }
  0x11   :  { %v158_v7 = vmax.f32 %v157_v61, %v350_v37  ;;  %v166_v8 = vmax.f32 %v165_v62, %v351_v41  ;;  %v172_v22 = vmax.f32 %v171_v14, %v322_v57  ;;  %v294_v24 = vunpack.c.l.bf16 %v413_v11  ;;  %v433_v62 = vld [vmem:[%s568_s0 + $0x110] sm:$0xff]   ;;  %v422_v14 = vld [vmem:[%s568_s0 + $0xb8] sm:$0xff]  }
  0x12   :  { %v180_v23 = vmax.f32 %v179_v15, %v323_v63  ;;  %v295_v27 = vunpack.c.h.bf16 %v413_v11  ;;  %v184_v29 = vmax.f32 %v246_v4, %v262_v9  ;;  %v192_v30 = vmax.f32 %v247_v5, %v263_v10  ;;  %v418_v5 = vld [vmem:[%s568_s0 + $0x98] sm:$0xff]  }
  0x13   :  { %v159_v16 = vmax.f32 %v158_v7, %v366_v42  ;;  %v167_v17 = vmax.f32 %v166_v8, %v367_v51  ;;  %v370_v31 = vunpack.c.l.bf16 %v432_v18  ;;  %v371_v32 = vunpack.c.h.bf16 %v432_v18 }
  0x14   :  { %v173_v33 = vmax.f32 %v172_v22, %v338_v0  ;;  %v181_v34 = vmax.f32 %v180_v23, %v339_v12  ;;  %v310_v36 = vunpack.c.l.bf16 %v417_v25  ;;  %v311_v37 = vunpack.c.h.bf16 %v417_v25 }
  0x15   :  { %v383_v26 = vpack.c.bf16 %v167_v17, %v159_v16  ;;  %v185_v38 = vmax.f32 %v184_v29, %v278_v19  ;;  %v193_v39 = vmax.f32 %v192_v30, %v279_v20  ;;  %v326_v43 = vunpack.c.l.bf16 %v421_v28 }
  0x16   :  { %v174_v41 = vmax.f32 %v173_v33, %v354_v13  ;;  %v182_v42 = vmax.f32 %v181_v34, %v355_v21  ;;  %v327_v44 = vunpack.c.h.bf16 %v421_v28  ;;  %v250_v48 = vunpack.c.l.bf16 %v402_v35  ;;  %v426_v21 = vld [vmem:[%s568_s0 + $0xd8] sm:$0xff]  }
  0x17   :  { %384 = vst [vmem:[%s569_s1] sm:$0xff] %v383_v26   ;;  %v186_v46 = vmax.f32 %v185_v38, %v294_v24  ;;  %v194_v47 = vmax.f32 %v193_v39, %v295_v27  ;;  %v251_v49 = vunpack.c.h.bf16 %v402_v35  ;;  %v266_v54 = vunpack.c.l.bf16 %v406_v40  ;;  %v430_v28 = vld [vmem:[%s568_s0 + $0xf8] sm:$0xff]  }
  0x18   :  { %v175_v51 = vmax.f32 %v174_v41, %v370_v31  ;;  %v183_v52 = vmax.f32 %v182_v42, %v371_v32  ;;  %v267_v55 = vunpack.c.h.bf16 %v406_v40  ;;  %v342_v56 = vunpack.c.l.bf16 %v425_v45  ;;  %v434_v34 = vld [vmem:[%s568_s0 + $0x118] sm:$0xff]  }
  0x19   :  { %v343_v57 = vunpack.c.h.bf16 %v425_v45  ;;  %v187_v58 = vmax.f32 %v186_v46, %v310_v36  ;;  %v195_v59 = vmax.f32 %v194_v47, %v311_v37  ;;  %v282_v63 = vunpack.c.l.bf16 %v410_v50 }
  0x1a   :  { %v388_v61 = vpack.c.bf16 %v183_v52, %v175_v51  ;;  %v283_v0 = vunpack.c.h.bf16 %v410_v50  ;;  %v358_v1 = vunpack.c.l.bf16 %v429_v53  ;;  %v359_v2 = vunpack.c.h.bf16 %v429_v53 }
  0x1b   :  { %v188_v3 = vmax.f32 %v187_v58, %v326_v43  ;;  %v196_v4 = vmax.f32 %v195_v59, %v327_v44  ;;  %v298_v6 = vunpack.c.l.bf16 %v414_v60  ;;  %v299_v7 = vunpack.c.h.bf16 %v414_v60 }
  0x1c   :  { %435 = vst [vmem:[%s569_s1 + $0x8] sm:$0xff] %v388_v61   ;;  %v200_v8 = vmax.f32 %v250_v48, %v266_v54  ;;  %v208_v9 = vmax.f32 %v251_v49, %v267_v55  ;;  %v374_v10 = vunpack.c.l.bf16 %v433_v62  ;;  %v375_v11 = vunpack.c.h.bf16 %v433_v62 }
  0x1d   :  { %v189_v12 = vmax.f32 %v188_v3, %v342_v56  ;;  %v197_v13 = vmax.f32 %v196_v4, %v343_v57  ;;  %v314_v15 = vunpack.c.l.bf16 %v418_v5  ;;  %v315_v16 = vunpack.c.h.bf16 %v418_v5 }
  0x1e   :  { %v201_v17 = vmax.f32 %v200_v8, %v282_v63  ;;  %v209_v18 = vmax.f32 %v208_v9, %v283_v0  ;;  %v330_v22 = vunpack.c.l.bf16 %v422_v14  ;;  %v331_v23 = vunpack.c.h.bf16 %v422_v14 }
  0x1f   :  { %v190_v19 = vmax.f32 %v189_v12, %v358_v1  ;;  %v198_v20 = vmax.f32 %v197_v13, %v359_v2  ;;  %v346_v29 = vunpack.c.l.bf16 %v426_v21  ;;  %v347_v30 = vunpack.c.h.bf16 %v426_v21 }
  0x20   :  { %v202_v24 = vmax.f32 %v201_v17, %v298_v6  ;;  %v210_v25 = vmax.f32 %v209_v18, %v299_v7  ;;  %v362_v35 = vunpack.c.l.bf16 %v430_v28  ;;  %v363_v36 = vunpack.c.h.bf16 %v430_v28 }
  0x21   :  { %v191_v26 = vmax.f32 %v190_v19, %v374_v10  ;;  %v199_v27 = vmax.f32 %v198_v20, %v375_v11  ;;  %v378_v39 = vunpack.c.l.bf16 %v434_v34  ;;  %v379_v40 = vunpack.c.h.bf16 %v434_v34 }
  0x22   :  { %v203_v31 = vmax.f32 %v202_v24, %v314_v15  ;;  %v211_v32 = vmax.f32 %v210_v25, %v315_v16 }
  0x23   :  { %v393_v33 = vpack.c.bf16 %v199_v27, %v191_v26 }
  0x24   :  { %v204_v37 = vmax.f32 %v203_v31, %v330_v22  ;;  %v212_v38 = vmax.f32 %v211_v32, %v331_v23 }
  0x25   :  { %436 = vst [vmem:[%s569_s1 + $0x10] sm:$0xff] %v393_v33  }
  0x26   :  { %v205_v41 = vmax.f32 %v204_v37, %v346_v29  ;;  %v213_v42 = vmax.f32 %v212_v38, %v347_v30 }
  0x28   :  { %v206_v43 = vmax.f32 %v205_v41, %v362_v35  ;;  %v214_v44 = vmax.f32 %v213_v42, %v363_v36 }
  0x2a   :  { %v207_v45 = vmax.f32 %v206_v43, %v378_v39  ;;  %v215_v46 = vmax.f32 %v214_v44, %v379_v40 }
  0x2c   :  { %v398_v47 = vpack.c.bf16 %v215_v46, %v207_v45 }
  0x2e   :  { %437 = vst [vmem:[%s569_s1 + $0x18] sm:$0xff] %v398_v47  }

// kernel: densenet_forward.27
= control target key start
LH: loop header
LB: loop body
LE: loop exit
PB: predicated region body
PF: predicated region fallthrough
CT: control target
= control target key end

     0   :  { %vm392_vm0 = vcmask 130048   ;;  %vm922_vm1 = vcmask 257024   ;;  %s1892_s1 = inlined_call_operand.vmem [shape: bf16[16,32], index: 1, kind: input, shape index: {}]   ;;  %s1893_s0 = inlined_call_operand.vmem [shape: bf16[512,16], index: 0, kind: input, shape index: {}]   ;;  %s1894_s2 = inlined_call_operand.vmem [shape: f32[1,16], index: 2, kind: input, shape index: {}]   ;;  %s1895_s3 = inlined_call_operand.vmem [shape: f32[1,16], index: 3, kind: input, shape index: {}]   ;;  %s1896_s4 = inlined_call_operand.vmem [shape: f32[1,32], index: 4, kind: input, shape index: {}]   ;;  %s1897_s5 = inlined_call_operand.vmem [shape: f32[1,32], index: 5, kind: input, shape index: {}]   ;;  %s1898_s6 = inlined_call_operand.vmem [shape: bf16[512,32], index: 6, kind: output, shape index: {}]  }
   0x1   :  { %v1027_v0 = vld [vmem:[%s1892_s1] sm:$0xff]  ;;  %v1156_v25 = vld [vmem:[%s1893_s0 + $0x8] sm:$0xff]  }
   0x2   :  { %v1029_v1 = vld [vmem:[%s1893_s0] sm:$0xff]   ;;  %496 = vmatpush.bf16.msra.mxu0 %v1027_v0  ;;  %1187 = vmatpush.bf16.msra.mxu1 %v1027_v0  ;;  %v1164_v34 = vld [vmem:[%s1893_s0 + $0x48] sm:$0xff]   ;;  %v1034_v38 = vunpack.c.l.bf16 %v1156_v25  ;;  %v1035_v45 = vunpack.c.h.bf16 %v1156_v25 }
   0x3   :  { %v1030_v2 = vunpack.c.l.bf16 %v1029_v1  ;;  %v1031_v3 = vunpack.c.h.bf16 %v1029_v1  ;;  %v1238_v4 = vld [vmem:[%s1894_s2] ss:$0 sm:$0xff]  ;;  %1188 = vmatpush.bf16.msra.mxu2 %v1027_v0  ;;  %1189 = vmatpush.bf16.msra.mxu3 %v1027_v0  ;;  %v1172_v39 = vld [vmem:[%s1893_s0 + $0x88] sm:$0xff]   ;;  %v1066_v47 = vunpack.c.l.bf16 %v1164_v34  ;;  %v1067_v51 = vunpack.c.h.bf16 %v1164_v34 }
   0x4   :  { %v1243_v5 = vld [vmem:[%s1895_s3] ss:$0 sm:$0xff]  ;;  %v158_v46 = vmul.f32 %v1238_v4, %v1034_v38  ;;  %v1180_v48 = vld [vmem:[%s1893_s0 + $0xc8] sm:$0xff]   ;;  %v1098_v52 = vunpack.c.l.bf16 %v1172_v39  ;;  %v159_v53 = vmul.f32 %v1238_v4, %v1035_v45  ;;  %v1099_v55 = vunpack.c.h.bf16 %v1172_v39 }
   0x5   :  { %v1163_v6 = vld [vmem:[%s1893_s0 + $0x40] sm:$0xff]   ;;  %v156_v9 = vmul.f32 %v1238_v4, %v1030_v2  ;;  %v157_v10 = vmul.f32 %v1238_v4, %v1031_v3  ;;  %v174_v54 = vmul.f32 %v1238_v4, %v1066_v47  ;;  %v175_v56 = vmul.f32 %v1238_v4, %v1067_v51 }
   0x6   :  { %v1171_v7 = vld [vmem:[%s1893_s0 + $0x80] sm:$0xff]   ;;  %v1062_v11 = vunpack.c.l.bf16 %v1163_v6  ;;  %v1063_v12 = vunpack.c.h.bf16 %v1163_v6  ;;  %v190_v57 = vmul.f32 %v1238_v4, %v1098_v52  ;;  %v1130_v58 = vunpack.c.l.bf16 %v1180_v48 }
   0x7   :  { %v1179_v8 = vld [vmem:[%s1893_s0 + $0xc0] sm:$0xff]   ;;  %v1094_v13 = vunpack.c.l.bf16 %v1171_v7  ;;  %v1095_v14 = vunpack.c.h.bf16 %v1171_v7  ;;  %v224_v17 = vadd.f32 %v1243_v5, %v156_v9  ;;  %v225_v18 = vadd.f32 %v1243_v5, %v157_v10 }
   0x8   :  { %v1126_v15 = vunpack.c.l.bf16 %v1179_v8  ;;  %v1127_v16 = vunpack.c.h.bf16 %v1179_v8  ;;  %v172_v19 = vmul.f32 %v1238_v4, %v1062_v11  ;;  %v173_v20 = vmul.f32 %v1238_v4, %v1063_v12  ;;  %v1157_v11 = vld [vmem:[%s1893_s0 + $0x10] sm:$0xff]  }
   0x9   :  { %v188_v21 = vmul.f32 %v1238_v4, %v1094_v13  ;;  %v189_v22 = vmul.f32 %v1238_v4, %v1095_v14  ;;  %v288_v26 = vmax.f32 %v224_v17, 0.0  ;;  %v289_v27 = vmax.f32 %v225_v18, 0.0  ;;  %v1165_v14 = vld [vmem:[%s1893_s0 + $0x50] sm:$0xff]  }
   0xa   :  { %v204_v23 = vmul.f32 %v1238_v4, %v1126_v15  ;;  %v205_v24 = vmul.f32 %v1238_v4, %v1127_v16  ;;  %v240_v28 = vadd.f32 %v1243_v5, %v172_v19  ;;  %v241_v29 = vadd.f32 %v1243_v5, %v173_v20  ;;  %v1173_v19 = vld [vmem:[%s1893_s0 + $0x90] sm:$0xff]  }
   0xb   :  { %v256_v30 = vadd.f32 %v1243_v5, %v188_v21  ;;  %v257_v31 = vadd.f32 %v1243_v5, %v189_v22  ;;  %v352_v35 = vpack.c.bf16 %v289_v27, %v288_v26  ;;  %v1131_v59 = vunpack.c.h.bf16 %v1180_v48 }
   0xc   :  { %v272_v32 = vadd.f32 %v1243_v5, %v204_v23  ;;  %v273_v33 = vadd.f32 %v1243_v5, %v205_v24  ;;  %v304_v36 = vmax.f32 %v240_v28, 0.0  ;;  %v305_v37 = vmax.f32 %v241_v29, 0.0  ;;  %v1181_v23 = vld [vmem:[%s1893_s0 + $0xd0] sm:$0xff]  }
   0xd   :  { %v320_v40 = vmax.f32 %v256_v30, 0.0  ;;  %v321_v41 = vmax.f32 %v257_v31, 0.0  ;;  %995 = vmatmul.msk.bf16.vlgmr.msra.gmra.mxu0 %vm392_vm0, %v352_v35  ;;  %v226_v60 = vadd.f32 %v1243_v5, %v158_v46  ;;  %v227_v61 = vadd.f32 %v1243_v5, %v159_v53  ;;  %v1158_v53 = vld [vmem:[%s1893_s0 + $0x18] sm:$0xff]  }
   0xe   :  { %v336_v42 = vmax.f32 %v272_v32, 0.0  ;;  %v337_v43 = vmax.f32 %v273_v33, 0.0  ;;  %v360_v44 = vpack.c.bf16 %v305_v37, %v304_v36  ;;  %v191_v62 = vmul.f32 %v1238_v4, %v1099_v55 }
   0xf   :  { %v368_v49 = vpack.c.bf16 %v321_v41, %v320_v40  ;;  %v206_v63 = vmul.f32 %v1238_v4, %v1130_v58  ;;  %v207_v0 = vmul.f32 %v1238_v4, %v1131_v59  ;;  %v242_v1 = vadd.f32 %v1243_v5, %v174_v54  ;;  %v1166_v58 = vld [vmem:[%s1893_s0 + $0x58] sm:$0xff]  }
  0x10   :  { %v376_v50 = vpack.c.bf16 %v337_v43, %v336_v42  ;;  %1003 = vmatmul.msk.bf16.vlgmr.msra.gmra.mxu1 %vm392_vm0, %v360_v44  ;;  %v243_v2 = vadd.f32 %v1243_v5, %v175_v56  ;;  %v258_v3 = vadd.f32 %v1243_v5, %v190_v57  ;;  %v259_v6 = vadd.f32 %v1243_v5, %v191_v62  ;;  %v1174_v59 = vld [vmem:[%s1893_s0 + $0x98] sm:$0xff]  }
  0x11   :  { %1011 = vmatmul.msk.bf16.vlgmr.msra.gmra.mxu2 %vm392_vm0, %v368_v49  ;;  %v274_v7 = vadd.f32 %v1243_v5, %v206_v63  ;;  %v275_v8 = vadd.f32 %v1243_v5, %v207_v0  ;;  %v290_v9 = vmax.f32 %v226_v60, 0.0  ;;  %v291_v10 = vmax.f32 %v227_v61, 0.0  ;;  %v1182_v63 = vld [vmem:[%s1893_s0 + $0xd8] sm:$0xff]  }
  0x12   :  { %1019 = vmatmul.msk.bf16.vlgmr.msra.gmra.mxu3 %vm392_vm0, %v376_v50  ;;  %v306_v12 = vmax.f32 %v242_v1, 0.0  ;;  %v307_v13 = vmax.f32 %v243_v2, 0.0  ;;  %v322_v15 = vmax.f32 %v258_v3, 0.0  ;;  %v323_v16 = vmax.f32 %v259_v6, 0.0 }
  0x13   :  { %v338_v17 = vmax.f32 %v274_v7, 0.0  ;;  %v339_v18 = vmax.f32 %v275_v8, 0.0  ;;  %v353_v20 = vpack.c.bf16 %v291_v10, %v290_v9  ;;  %v1038_v21 = vunpack.c.l.bf16 %v1157_v11 }
  0x14   :  { %v1039_v22 = vunpack.c.h.bf16 %v1157_v11  ;;  %v1070_v24 = vunpack.c.l.bf16 %v1165_v14  ;;  %v1071_v25 = vunpack.c.h.bf16 %v1165_v14  ;;  %v361_v26 = vpack.c.bf16 %v307_v13, %v306_v12 }
  0x15   :  { %v1102_v27 = vunpack.c.l.bf16 %v1173_v19  ;;  %v1103_v28 = vunpack.c.h.bf16 %v1173_v19  ;;  %v369_v29 = vpack.c.bf16 %v323_v16, %v322_v15  ;;  %v377_v30 = vpack.c.bf16 %v339_v18, %v338_v17 }
  0x16   :  { %v1134_v31 = vunpack.c.l.bf16 %v1181_v23  ;;  %v1135_v32 = vunpack.c.h.bf16 %v1181_v23  ;;  %v160_v33 = vmul.f32 %v1238_v4, %v1038_v21  ;;  %v161_v34 = vmul.f32 %v1238_v4, %v1039_v22 }
  0x17   :  { %v176_v35 = vmul.f32 %v1238_v4, %v1070_v24  ;;  %v177_v36 = vmul.f32 %v1238_v4, %v1071_v25  ;;  %v192_v37 = vmul.f32 %v1238_v4, %v1102_v27  ;;  %v193_v38 = vmul.f32 %v1238_v4, %v1103_v28 }
  0x18   :  { %v208_v39 = vmul.f32 %v1238_v4, %v1134_v31  ;;  %v209_v40 = vmul.f32 %v1238_v4, %v1135_v32  ;;  %v228_v41 = vadd.f32 %v1243_v5, %v160_v33  ;;  %v229_v42 = vadd.f32 %v1243_v5, %v161_v34  ;;  %v1167_v32 = vld [vmem:[%s1893_s0 + $0x60] sm:$0xff]  }
  0x19   :  { %v244_v43 = vadd.f32 %v1243_v5, %v176_v35  ;;  %v245_v44 = vadd.f32 %v1243_v5, %v177_v36  ;;  %v260_v45 = vadd.f32 %v1243_v5, %v192_v37  ;;  %v261_v46 = vadd.f32 %v1243_v5, %v193_v38  ;;  %v1175_v37 = vld [vmem:[%s1893_s0 + $0xa0] sm:$0xff]  }
  0x1a   :  { %v276_v47 = vadd.f32 %v1243_v5, %v208_v39  ;;  %v277_v48 = vadd.f32 %v1243_v5, %v209_v40  ;;  %v292_v49 = vmax.f32 %v228_v41, 0.0  ;;  %v293_v50 = vmax.f32 %v229_v42, 0.0  ;;  %v1183_v41 = vld [vmem:[%s1893_s0 + $0xe0] sm:$0xff]  }
  0x1b   :  { %v308_v51 = vmax.f32 %v244_v43, 0.0  ;;  %v309_v52 = vmax.f32 %v245_v44, 0.0  ;;  %v324_v54 = vmax.f32 %v260_v45, 0.0  ;;  %v325_v55 = vmax.f32 %v261_v46, 0.0 }
  0x1c   :  { %v340_v56 = vmax.f32 %v276_v47, 0.0  ;;  %v341_v57 = vmax.f32 %v277_v48, 0.0  ;;  %v354_v60 = vpack.c.bf16 %v293_v50, %v292_v49  ;;  %v1042_v61 = vunpack.c.l.bf16 %v1158_v53 }
  0x1d   :  { %996 = vmatmul.msk.bf16.gmra.mxu0 %vm392_vm0, %v353_v20  ;;  %v1043_v62 = vunpack.c.h.bf16 %v1158_v53  ;;  %v362_v0 = vpack.c.bf16 %v309_v52, %v308_v51  ;;  %v370_v1 = vpack.c.bf16 %v325_v55, %v324_v54  ;;  %v1074_v2 = vunpack.c.l.bf16 %v1166_v58 }
  0x1e   :  { %v1075_v3 = vunpack.c.h.bf16 %v1166_v58  ;;  %v1106_v6 = vunpack.c.l.bf16 %v1174_v59  ;;  %v378_v7 = vpack.c.bf16 %v341_v57, %v340_v56  ;;  %v1107_v8 = vunpack.c.h.bf16 %v1174_v59 }
  0x1f   :  { %v1138_v9 = vunpack.c.l.bf16 %v1182_v63  ;;  %v1139_v10 = vunpack.c.h.bf16 %v1182_v63  ;;  %v162_v11 = vmul.f32 %v1238_v4, %v1042_v61  ;;  %v163_v12 = vmul.f32 %v1238_v4, %v1043_v62 }
  0x20   :  { %1004 = vmatmul.msk.bf16.gmra.mxu1 %vm392_vm0, %v361_v26  ;;  %v178_v13 = vmul.f32 %v1238_v4, %v1074_v2  ;;  %v179_v14 = vmul.f32 %v1238_v4, %v1075_v3  ;;  %v194_v15 = vmul.f32 %v1238_v4, %v1106_v6  ;;  %v195_v16 = vmul.f32 %v1238_v4, %v1107_v8 }
  0x21   :  { %1012 = vmatmul.msk.bf16.gmra.mxu2 %vm392_vm0, %v369_v29  ;;  %v210_v17 = vmul.f32 %v1238_v4, %v1138_v9  ;;  %v211_v18 = vmul.f32 %v1238_v4, %v1139_v10  ;;  %v230_v19 = vadd.f32 %v1243_v5, %v162_v11  ;;  %v231_v20 = vadd.f32 %v1243_v5, %v163_v12  ;;  %v1159_v29 = vld [vmem:[%s1893_s0 + $0x20] sm:$0xff]   ;;  %v1160_v9 = vld [vmem:[%s1893_s0 + $0x28] sm:$0xff]  }
  0x22   :  { %1020 = vmatmul.msk.bf16.gmra.mxu3 %vm392_vm0, %v377_v30  ;;  %v246_v21 = vadd.f32 %v1243_v5, %v178_v13  ;;  %v247_v22 = vadd.f32 %v1243_v5, %v179_v14  ;;  %v262_v23 = vadd.f32 %v1243_v5, %v194_v15  ;;  %v263_v24 = vadd.f32 %v1243_v5, %v195_v16  ;;  %v1168_v14 = vld [vmem:[%s1893_s0 + $0x68] sm:$0xff]  }
  0x23   :  { %v278_v25 = vadd.f32 %v1243_v5, %v210_v17  ;;  %v279_v26 = vadd.f32 %v1243_v5, %v211_v18  ;;  %v294_v27 = vmax.f32 %v230_v19, 0.0  ;;  %v295_v28 = vmax.f32 %v231_v20, 0.0  ;;  %v1176_v15 = vld [vmem:[%s1893_s0 + $0xa8] sm:$0xff]  }
  0x24   :  { %v310_v30 = vmax.f32 %v246_v21, 0.0  ;;  %v311_v31 = vmax.f32 %v247_v22, 0.0  ;;  %v326_v33 = vmax.f32 %v262_v23, 0.0  ;;  %v327_v34 = vmax.f32 %v263_v24, 0.0  ;;  %v1184_v19 = vld [vmem:[%s1893_s0 + $0xe8] sm:$0xff]  }
  0x25   :  { %v342_v35 = vmax.f32 %v278_v25, 0.0  ;;  %v343_v36 = vmax.f32 %v279_v26, 0.0  ;;  %v355_v38 = vpack.c.bf16 %v295_v28, %v294_v27  ;;  %v1046_v39 = vunpack.c.l.bf16 %v1159_v29 }
  0x26   :  { %v1047_v40 = vunpack.c.h.bf16 %v1159_v29  ;;  %v1078_v42 = vunpack.c.l.bf16 %v1167_v32  ;;  %v1079_v43 = vunpack.c.h.bf16 %v1167_v32  ;;  %v363_v44 = vpack.c.bf16 %v311_v31, %v310_v30 }
  0x27   :  { %v1110_v45 = vunpack.c.l.bf16 %v1175_v37  ;;  %v1111_v46 = vunpack.c.h.bf16 %v1175_v37  ;;  %v371_v47 = vpack.c.bf16 %v327_v34, %v326_v33  ;;  %v379_v48 = vpack.c.bf16 %v343_v36, %v342_v35 }
  0x28   :  { %v1142_v49 = vunpack.c.l.bf16 %v1183_v41  ;;  %v1143_v50 = vunpack.c.h.bf16 %v1183_v41  ;;  %v164_v51 = vmul.f32 %v1238_v4, %v1046_v39  ;;  %v165_v52 = vmul.f32 %v1238_v4, %v1047_v40 }
  0x29   :  { %v180_v53 = vmul.f32 %v1238_v4, %v1078_v42  ;;  %v181_v54 = vmul.f32 %v1238_v4, %v1079_v43  ;;  %v196_v55 = vmul.f32 %v1238_v4, %v1110_v45  ;;  %v197_v56 = vmul.f32 %v1238_v4, %v1111_v46 }
  0x2a   :  { %v212_v57 = vmul.f32 %v1238_v4, %v1142_v49  ;;  %v213_v58 = vmul.f32 %v1238_v4, %v1143_v50  ;;  %v232_v59 = vadd.f32 %v1243_v5, %v164_v51  ;;  %v1050_v17 = vunpack.c.l.bf16 %v1160_v9  ;;  %v1169_v50 = vld [vmem:[%s1893_s0 + $0x70] sm:$0xff]  }
  0x2b   :  { %v248_v61 = vadd.f32 %v1243_v5, %v180_v53  ;;  %v249_v62 = vadd.f32 %v1243_v5, %v181_v54  ;;  %v264_v63 = vadd.f32 %v1243_v5, %v196_v55  ;;  %v1051_v18 = vunpack.c.h.bf16 %v1160_v9  ;;  %v1177_v55 = vld [vmem:[%s1893_s0 + $0xb0] sm:$0xff]  }
  0x2c   :  { %v281_v2 = vadd.f32 %v1243_v5, %v213_v58  ;;  %v296_v3 = vmax.f32 %v232_v59, 0.0  ;;  %v1082_v22 = vunpack.c.l.bf16 %v1168_v14  ;;  %v1083_v23 = vunpack.c.h.bf16 %v1168_v14  ;;  %v1185_v59 = vld [vmem:[%s1893_s0 + $0xf0] sm:$0xff]  }
  0x2d   :  { %997 = vmatmul.msk.bf16.gmra.mxu0 %vm392_vm0, %v354_v60  ;;  %v233_v60 = vadd.f32 %v1243_v5, %v165_v52  ;;  %v313_v8 = vmax.f32 %v249_v62, 0.0  ;;  %v328_v10 = vmax.f32 %v264_v63, 0.0  ;;  %v1114_v24 = vunpack.c.l.bf16 %v1176_v15 }
  0x2e   :  { %v345_v13 = vmax.f32 %v281_v2, 0.0  ;;  %v1115_v26 = vunpack.c.h.bf16 %v1176_v15  ;;  %v1146_v27 = vunpack.c.l.bf16 %v1184_v19  ;;  %v1147_v28 = vunpack.c.h.bf16 %v1184_v19 }
  0x2f   :  { %v297_v6 = vmax.f32 %v233_v60, 0.0  ;;  %v166_v29 = vmul.f32 %v1238_v4, %v1050_v17  ;;  %v167_v30 = vmul.f32 %v1238_v4, %v1051_v18  ;;  %v182_v31 = vmul.f32 %v1238_v4, %v1082_v22 }
  0x30   :  { %1005 = vmatmul.msk.bf16.gmra.mxu1 %vm392_vm0, %v362_v0  ;;  %v265_v0 = vadd.f32 %v1243_v5, %v197_v56  ;;  %v183_v32 = vmul.f32 %v1238_v4, %v1083_v23  ;;  %v198_v33 = vmul.f32 %v1238_v4, %v1114_v24  ;;  %v199_v34 = vmul.f32 %v1238_v4, %v1115_v26 }
  0x31   :  { %1013 = vmatmul.msk.bf16.gmra.mxu2 %vm392_vm0, %v370_v1  ;;  %v280_v1 = vadd.f32 %v1243_v5, %v212_v57  ;;  %v356_v16 = vpack.c.bf16 %v297_v6, %v296_v3  ;;  %v214_v35 = vmul.f32 %v1238_v4, %v1146_v27  ;;  %v215_v36 = vmul.f32 %v1238_v4, %v1147_v28  ;;  %v1162_v27 = vld [vmem:[%s1893_s0 + $0x38] sm:$0xff]  }
  0x32   :  { %1021 = vmatmul.msk.bf16.gmra.mxu3 %vm392_vm0, %v378_v7  ;;  %v312_v7 = vmax.f32 %v248_v61, 0.0  ;;  %v329_v11 = vmax.f32 %v265_v0, 0.0  ;;  %v234_v37 = vadd.f32 %v1243_v5, %v166_v29  ;;  %v250_v39 = vadd.f32 %v1243_v5, %v182_v31 }
  0x33   :  { %v344_v12 = vmax.f32 %v280_v1, 0.0  ;;  %v251_v40 = vadd.f32 %v1243_v5, %v183_v32  ;;  %v266_v41 = vadd.f32 %v1243_v5, %v198_v33  ;;  %v267_v42 = vadd.f32 %v1243_v5, %v199_v34  ;;  %v1170_v32 = vld [vmem:[%s1893_s0 + $0x78] sm:$0xff]  }
  0x34   :  { %v364_v20 = vpack.c.bf16 %v313_v8, %v312_v7  ;;  %v372_v21 = vpack.c.bf16 %v329_v11, %v328_v10  ;;  %v282_v43 = vadd.f32 %v1243_v5, %v214_v35  ;;  %v298_v45 = vmax.f32 %v234_v37, 0.0  ;;  %v1178_v33 = vld [vmem:[%s1893_s0 + $0xb8] sm:$0xff]  }
  0x35   :  { %v380_v25 = vpack.c.bf16 %v345_v13, %v344_v12  ;;  %v315_v49 = vmax.f32 %v251_v40, 0.0  ;;  %v330_v51 = vmax.f32 %v266_v41, 0.0  ;;  %v331_v52 = vmax.f32 %v267_v42, 0.0  ;;  %v1186_v37 = vld [vmem:[%s1893_s0 + $0xf8] sm:$0xff]  }
  0x36   :  { %v346_v53 = vmax.f32 %v282_v43, 0.0  ;;  %v1086_v60 = vunpack.c.l.bf16 %v1169_v50  ;;  %v1087_v61 = vunpack.c.h.bf16 %v1169_v50  ;;  %v1118_v63 = vunpack.c.l.bf16 %v1177_v55 }
  0x37   :  { %v1119_v0 = vunpack.c.h.bf16 %v1177_v55  ;;  %v373_v1 = vpack.c.bf16 %v331_v52, %v330_v51  ;;  %v1150_v3 = vunpack.c.l.bf16 %v1185_v59  ;;  %v1151_v6 = vunpack.c.h.bf16 %v1185_v59 }
  0x38   :  { %v184_v9 = vmul.f32 %v1238_v4, %v1086_v60  ;;  %v185_v10 = vmul.f32 %v1238_v4, %v1087_v61  ;;  %v200_v11 = vmul.f32 %v1238_v4, %v1118_v63  ;;  %v1058_v35 = vunpack.c.l.bf16 %v1162_v27 }
  0x39   :  { %v201_v12 = vmul.f32 %v1238_v4, %v1119_v0  ;;  %v216_v13 = vmul.f32 %v1238_v4, %v1150_v3  ;;  %v217_v14 = vmul.f32 %v1238_v4, %v1151_v6  ;;  %v1090_v40 = vunpack.c.l.bf16 %v1170_v32 }
  0x3a   :  { %v252_v17 = vadd.f32 %v1243_v5, %v184_v9  ;;  %v253_v18 = vadd.f32 %v1243_v5, %v185_v10  ;;  %v268_v19 = vadd.f32 %v1243_v5, %v200_v11  ;;  %v1091_v41 = vunpack.c.h.bf16 %v1170_v32 }
  0x3b   :  { %v285_v22 = vadd.f32 %v1243_v5, %v217_v14  ;;  %v1122_v42 = vunpack.c.l.bf16 %v1178_v33 }
  0x3c   :  { %v317_v26 = vmax.f32 %v253_v18, 0.0  ;;  %v332_v28 = vmax.f32 %v268_v19, 0.0  ;;  %v187_v50 = vmul.f32 %v1238_v4, %v1091_v41 }
  0x3d   :  { %998 = vmatmul.msk.bf16.gmra.mxu0 %vm392_vm0, %v355_v38  ;;  %v235_v38 = vadd.f32 %v1243_v5, %v167_v30  ;;  %v349_v31 = vmax.f32 %v285_v22, 0.0  ;;  %v202_v51 = vmul.f32 %v1238_v4, %v1122_v42 }
  0x3f   :  { %v299_v46 = vmax.f32 %v235_v38, 0.0  ;;  %v270_v59 = vadd.f32 %v1243_v5, %v202_v51 }
  0x40   :  { %1006 = vmatmul.msk.bf16.gmra.mxu1 %vm392_vm0, %v363_v44  ;;  %v283_v44 = vadd.f32 %v1243_v5, %v215_v36  ;;  %v1059_v36 = vunpack.c.h.bf16 %v1162_v27 }
  0x41   :  { %1014 = vmatmul.msk.bf16.gmra.mxu2 %vm392_vm0, %v371_v47  ;;  %v1161_v47 = vld [vmem:[%s1893_s0 + $0x30] sm:$0xff]   ;;  %v357_v56 = vpack.c.bf16 %v299_v46, %v298_v45  ;;  %v1154_v45 = vunpack.c.l.bf16 %v1186_v37  ;;  %v1155_v46 = vunpack.c.h.bf16 %v1186_v37 }
  0x42   :  { %1022 = vmatmul.msk.bf16.gmra.mxu3 %vm392_vm0, %v379_v48  ;;  %v314_v48 = vmax.f32 %v250_v39, 0.0  ;;  %v347_v54 = vmax.f32 %v283_v44, 0.0  ;;  %v1054_v57 = vunpack.c.l.bf16 %v1161_v47  ;;  %v1055_v58 = vunpack.c.h.bf16 %v1161_v47 }
  0x43   :  { %v1123_v44 = vunpack.c.h.bf16 %v1178_v33  ;;  %v170_v47 = vmul.f32 %v1238_v4, %v1058_v35 }
  0x44   :  { %v365_v62 = vpack.c.bf16 %v315_v49, %v314_v48  ;;  %v381_v2 = vpack.c.bf16 %v347_v54, %v346_v53  ;;  %v168_v7 = vmul.f32 %v1238_v4, %v1054_v57  ;;  %v169_v8 = vmul.f32 %v1238_v4, %v1055_v58 }
  0x45   :  { %v171_v48 = vmul.f32 %v1238_v4, %v1059_v36  ;;  %v186_v49 = vmul.f32 %v1238_v4, %v1090_v40  ;;  %v203_v52 = vmul.f32 %v1238_v4, %v1123_v44  ;;  %v218_v53 = vmul.f32 %v1238_v4, %v1154_v45 }
  0x46   :  { %v236_v15 = vadd.f32 %v1243_v5, %v168_v7  ;;  %v219_v54 = vmul.f32 %v1238_v4, %v1155_v46  ;;  %v238_v55 = vadd.f32 %v1243_v5, %v170_v47  ;;  %v255_v58 = vadd.f32 %v1243_v5, %v187_v50 }
  0x47   :  { %v254_v57 = vadd.f32 %v1243_v5, %v186_v49  ;;  %v271_v60 = vadd.f32 %v1243_v5, %v203_v52  ;;  %v286_v61 = vadd.f32 %v1243_v5, %v218_v53 }
  0x48   :  { %v300_v23 = vmax.f32 %v236_v15, 0.0  ;;  %v302_v63 = vmax.f32 %v238_v55, 0.0  ;;  %v319_v4 = vmax.f32 %v255_v58, 0.0 }
  0x49   :  { %v335_v3 = vmax.f32 %v271_v60, 0.0  ;;  %v350_v6 = vmax.f32 %v286_v61, 0.0 }
  0x4d   :  { %999 = vmatmul.msk.bf16.gmra.mxu0 %vm392_vm0, %v356_v16  ;;  %v237_v16 = vadd.f32 %v1243_v5, %v169_v8 }
  0x4f   :  { %v301_v24 = vmax.f32 %v237_v16, 0.0 }
  0x50   :  { %1007 = vmatmul.msk.bf16.gmra.mxu1 %vm392_vm0, %v364_v20  ;;  %v269_v20 = vadd.f32 %v1243_v5, %v201_v12  ;;  %v1506_v12 = vld [vmem:[%s1897_s5] ss:$0 sm:$0xff] }
  0x51   :  { %1015 = vmatmul.msk.bf16.gmra.mxu2 %vm392_vm0, %v372_v21  ;;  %v284_v21 = vadd.f32 %v1243_v5, %v216_v13  ;;  %v358_v34 = vpack.c.bf16 %v301_v24, %v300_v23 }
  0x52   :  { %1023 = vmatmul.msk.bf16.gmra.mxu3 %vm392_vm0, %v380_v25  ;;  %v316_v25 = vmax.f32 %v252_v17, 0.0  ;;  %v333_v29 = vmax.f32 %v269_v20, 0.0 }
  0x53   :  { %v348_v30 = vmax.f32 %v284_v21, 0.0 }
  0x54   :  { %v366_v38 = vpack.c.bf16 %v317_v26, %v316_v25  ;;  %v374_v39 = vpack.c.bf16 %v333_v29, %v332_v28 }
  0x55   :  { %v382_v43 = vpack.c.bf16 %v349_v31, %v348_v30 }
  0x5d   :  { %1000 = vmatmul.msk.bf16.gmra.mxu0 %vm392_vm0, %v357_v56  ;;  %v239_v56 = vadd.f32 %v1243_v5, %v171_v48 }
  0x5f   :  { %v303_v0 = vmax.f32 %v239_v56, 0.0 }
  0x60   :  { %1008 = vmatmul.msk.bf16.gmra.mxu1 %vm392_vm0, %v365_v62  ;;  %v287_v62 = vadd.f32 %v1243_v5, %v219_v54  ;;  %v1501_v5 = vld [vmem:[%s1896_s4] ss:$0 sm:$0xff] }
  0x61   :  { %1016 = vmatmul.msk.bf16.gmra.mxu2 %vm392_vm0, %v373_v1  ;;  %v318_v1 = vmax.f32 %v254_v57, 0.0  ;;  %v359_v8 = vpack.c.bf16 %v303_v0, %v302_v63 }
  0x62   :  { %1024 = vmatmul.msk.bf16.gmra.mxu3 %vm392_vm0, %v381_v2  ;;  %v334_v2 = vmax.f32 %v270_v59, 0.0  ;;  %v351_v7 = vmax.f32 %v287_v62, 0.0 }
  0x63   :  { %v367_v9 = vpack.c.bf16 %v319_v4, %v318_v1 }
  0x64   :  { %v375_v10 = vpack.c.bf16 %v335_v3, %v334_v2  ;;  %v383_v11 = vpack.c.bf16 %v351_v7, %v350_v6 }
  0x6d   :  { %1001 = vmatmul.msk.bf16.gmra.mxu0 %vm392_vm0, %v358_v34 }
  0x70   :  { %1009 = vmatmul.msk.bf16.gmra.mxu1 %vm392_vm0, %v366_v38 }
  0x71   :  { %1017 = vmatmul.msk.bf16.gmra.mxu2 %vm392_vm0, %v374_v39 }
  0x72   :  { %1025 = vmatmul.msk.bf16.gmra.mxu3 %vm392_vm0, %v382_v43 }
  0x7d   :  { %1002 = vmatmul.msk.bf16.gmra.mxu0 %vm392_vm0, %v359_v8 }
  0x80   :  { %1010 = vmatmul.msk.bf16.gmra.mxu1 %vm392_vm0, %v367_v9 }
  0x81   :  { %1018 = vmatmul.msk.bf16.gmra.mxu2 %vm392_vm0, %v375_v10 }
  0x82   :  { %1026 = vmatmul.msk.bf16.gmra.mxu3 %vm392_vm0, %v383_v11 }
  0x8a   :  { %v498_v13 = vpop.f32.mrf.mxu0 }
  0x8b   :  { %v662_v14 = vmul.f32 %v1501_v5, %v498_v13 }
  0x8d   :  { %v538_v15 = vpop.f32.mrf.mxu1  ;;  %v730_v16 = vadd.f32 %v1506_v12, %v662_v14 }
  0x8e   :  { %v678_v17 = vmul.f32 %v1501_v5, %v538_v15 }
  0x8f   :  { %v794_v18 = vmax.f32 %v730_v16, 0.0 }
  0x90   :  { %v746_v19 = vadd.f32 %v1506_v12, %v678_v17 }
  0x91   :  { %v858_v20 = vpack.c.bf16 %v794_v18, %v794_v18 }
  0x92   :  { %v810_v21 = vmax.f32 %v746_v19, 0.0  ;;  %v500_v22 = vpop.f32.mrf.mxu0 }
  0x93   :  { %923 = vst.msk [vmem:[%s1898_s6] sm:$0xf] %vm922_vm1, %v858_v20  ;;  %v663_v26 = vmul.f32 %v1501_v5, %v500_v22 }
  0x94   :  { %v874_v23 = vpack.c.bf16 %v810_v21, %v810_v21  ;;  %v578_v24 = vpop.f32.mrf.mxu2 }
  0x95   :  { %v618_v25 = vpop.f32.mrf.mxu3  ;;  %v694_v27 = vmul.f32 %v1501_v5, %v578_v24  ;;  %v540_v29 = vpop.f32.mrf.mxu1  ;;  %v731_v30 = vadd.f32 %v1506_v12, %v663_v26 }
  0x96   :  { %v710_v28 = vmul.f32 %v1501_v5, %v618_v25  ;;  %939 = vst.msk [vmem:[%s1898_s6 + $0x40] sm:$0xf] %vm922_vm1, %v874_v23  ;;  %v679_v31 = vmul.f32 %v1501_v5, %v540_v29 }
  0x97   :  { %v762_v32 = vadd.f32 %v1506_v12, %v694_v27  ;;  %v795_v34 = vmax.f32 %v731_v30, 0.0 }
  0x98   :  { %v778_v33 = vadd.f32 %v1506_v12, %v710_v28  ;;  %v747_v35 = vadd.f32 %v1506_v12, %v679_v31 }
  0x99   :  { %v826_v36 = vmax.f32 %v762_v32, 0.0  ;;  %v859_v38 = vpack.c.bf16 %v795_v34, %v795_v34 }
  0x9a   :  { %v842_v37 = vmax.f32 %v778_v33, 0.0  ;;  %v811_v39 = vmax.f32 %v747_v35, 0.0  ;;  %v503_v42 = vpop.f32.mrf.mxu0 }
  0x9b   :  { %v890_v40 = vpack.c.bf16 %v826_v36, %v826_v36  ;;  %924 = vst.msk [vmem:[%s1898_s6 + $0x4] sm:$0xf] %vm922_vm1, %v859_v38  ;;  %v664_v46 = vmul.f32 %v1501_v5, %v503_v42 }
  0x9c   :  { %v906_v41 = vpack.c.bf16 %v842_v37, %v842_v37  ;;  %v875_v43 = vpack.c.bf16 %v811_v39, %v811_v39  ;;  %v580_v44 = vpop.f32.mrf.mxu2 }
  0x9d   :  { %v620_v45 = vpop.f32.mrf.mxu3  ;;  %955 = vst.msk [vmem:[%s1898_s6 + $0x80] sm:$0xf] %vm922_vm1, %v890_v40  ;;  %v695_v47 = vmul.f32 %v1501_v5, %v580_v44  ;;  %v543_v49 = vpop.f32.mrf.mxu1  ;;  %v732_v50 = vadd.f32 %v1506_v12, %v664_v46 }
  0x9e   :  { %v711_v48 = vmul.f32 %v1501_v5, %v620_v45  ;;  %971 = vst.msk [vmem:[%s1898_s6 + $0xc0] sm:$0xf] %vm922_vm1, %v906_v41  ;;  %v680_v51 = vmul.f32 %v1501_v5, %v543_v49 }
  0x9f   :  { %940 = vst.msk [vmem:[%s1898_s6 + $0x44] sm:$0xf] %vm922_vm1, %v875_v43  ;;  %v763_v52 = vadd.f32 %v1506_v12, %v695_v47  ;;  %v796_v54 = vmax.f32 %v732_v50, 0.0 }
  0xa0   :  { %v779_v53 = vadd.f32 %v1506_v12, %v711_v48  ;;  %v748_v55 = vadd.f32 %v1506_v12, %v680_v51 }
  0xa1   :  { %v827_v56 = vmax.f32 %v763_v52, 0.0  ;;  %v860_v58 = vpack.c.bf16 %v796_v54, %v796_v54 }
  0xa2   :  { %v843_v57 = vmax.f32 %v779_v53, 0.0  ;;  %v812_v59 = vmax.f32 %v748_v55, 0.0  ;;  %v505_v62 = vpop.f32.mrf.mxu0 }
  0xa3   :  { %v891_v60 = vpack.c.bf16 %v827_v56, %v827_v56  ;;  %925 = vst.msk [vmem:[%s1898_s6 + $0x8] sm:$0xf] %vm922_vm1, %v860_v58  ;;  %v665_v4 = vmul.f32 %v1501_v5, %v505_v62 }
  0xa4   :  { %v907_v61 = vpack.c.bf16 %v843_v57, %v843_v57  ;;  %v876_v63 = vpack.c.bf16 %v812_v59, %v812_v59  ;;  %v583_v0 = vpop.f32.mrf.mxu2 }
  0xa5   :  { %v623_v1 = vpop.f32.mrf.mxu3  ;;  %956 = vst.msk [vmem:[%s1898_s6 + $0x84] sm:$0xf] %vm922_vm1, %v891_v60  ;;  %v696_v2 = vmul.f32 %v1501_v5, %v583_v0  ;;  %v545_v6 = vpop.f32.mrf.mxu1  ;;  %v733_v7 = vadd.f32 %v1506_v12, %v665_v4 }
  0xa6   :  { %v712_v3 = vmul.f32 %v1501_v5, %v623_v1  ;;  %972 = vst.msk [vmem:[%s1898_s6 + $0xc4] sm:$0xf] %vm922_vm1, %v907_v61  ;;  %v681_v8 = vmul.f32 %v1501_v5, %v545_v6 }
  0xa7   :  { %941 = vst.msk [vmem:[%s1898_s6 + $0x48] sm:$0xf] %vm922_vm1, %v876_v63  ;;  %v764_v9 = vadd.f32 %v1506_v12, %v696_v2  ;;  %v797_v11 = vmax.f32 %v733_v7, 0.0 }
  0xa8   :  { %v780_v10 = vadd.f32 %v1506_v12, %v712_v3  ;;  %v749_v13 = vadd.f32 %v1506_v12, %v681_v8 }
  0xa9   :  { %v828_v14 = vmax.f32 %v764_v9, 0.0  ;;  %v861_v16 = vpack.c.bf16 %v797_v11, %v797_v11 }
  0xaa   :  { %v844_v15 = vmax.f32 %v780_v10, 0.0  ;;  %v813_v17 = vmax.f32 %v749_v13, 0.0  ;;  %v508_v20 = vpop.f32.mrf.mxu0 }
  0xab   :  { %v892_v18 = vpack.c.bf16 %v828_v14, %v828_v14  ;;  %926 = vst.msk [vmem:[%s1898_s6 + $0xc] sm:$0xf] %vm922_vm1, %v861_v16  ;;  %v666_v24 = vmul.f32 %v1501_v5, %v508_v20 }
  0xac   :  { %v908_v19 = vpack.c.bf16 %v844_v15, %v844_v15  ;;  %v877_v21 = vpack.c.bf16 %v813_v17, %v813_v17  ;;  %v585_v22 = vpop.f32.mrf.mxu2 }
  0xad   :  { %v625_v23 = vpop.f32.mrf.mxu3  ;;  %957 = vst.msk [vmem:[%s1898_s6 + $0x88] sm:$0xf] %vm922_vm1, %v892_v18  ;;  %v697_v25 = vmul.f32 %v1501_v5, %v585_v22  ;;  %v548_v27 = vpop.f32.mrf.mxu1  ;;  %v734_v28 = vadd.f32 %v1506_v12, %v666_v24 }
  0xae   :  { %v713_v26 = vmul.f32 %v1501_v5, %v625_v23  ;;  %973 = vst.msk [vmem:[%s1898_s6 + $0xc8] sm:$0xf] %vm922_vm1, %v908_v19  ;;  %v682_v29 = vmul.f32 %v1501_v5, %v548_v27 }
  0xaf   :  { %942 = vst.msk [vmem:[%s1898_s6 + $0x4c] sm:$0xf] %vm922_vm1, %v877_v21  ;;  %v765_v30 = vadd.f32 %v1506_v12, %v697_v25  ;;  %v798_v32 = vmax.f32 %v734_v28, 0.0 }
  0xb0   :  { %v781_v31 = vadd.f32 %v1506_v12, %v713_v26  ;;  %v750_v33 = vadd.f32 %v1506_v12, %v682_v29 }
  0xb1   :  { %v829_v34 = vmax.f32 %v765_v30, 0.0  ;;  %v862_v36 = vpack.c.bf16 %v798_v32, %v798_v32 }
  0xb2   :  { %v845_v35 = vmax.f32 %v781_v31, 0.0  ;;  %v814_v37 = vmax.f32 %v750_v33, 0.0  ;;  %v510_v40 = vpop.f32.mrf.mxu0 }
  0xb3   :  { %v893_v38 = vpack.c.bf16 %v829_v34, %v829_v34  ;;  %927 = vst.msk [vmem:[%s1898_s6 + $0x10] sm:$0xf] %vm922_vm1, %v862_v36  ;;  %v667_v44 = vmul.f32 %v1501_v5, %v510_v40 }
  0xb4   :  { %v909_v39 = vpack.c.bf16 %v845_v35, %v845_v35  ;;  %v878_v41 = vpack.c.bf16 %v814_v37, %v814_v37  ;;  %v588_v42 = vpop.f32.mrf.mxu2 }
  0xb5   :  { %v628_v43 = vpop.f32.mrf.mxu3  ;;  %958 = vst.msk [vmem:[%s1898_s6 + $0x8c] sm:$0xf] %vm922_vm1, %v893_v38  ;;  %v698_v45 = vmul.f32 %v1501_v5, %v588_v42  ;;  %v550_v47 = vpop.f32.mrf.mxu1  ;;  %v735_v48 = vadd.f32 %v1506_v12, %v667_v44 }
  0xb6   :  { %v714_v46 = vmul.f32 %v1501_v5, %v628_v43  ;;  %974 = vst.msk [vmem:[%s1898_s6 + $0xcc] sm:$0xf] %vm922_vm1, %v909_v39  ;;  %v683_v49 = vmul.f32 %v1501_v5, %v550_v47 }
  0xb7   :  { %943 = vst.msk [vmem:[%s1898_s6 + $0x50] sm:$0xf] %vm922_vm1, %v878_v41  ;;  %v766_v50 = vadd.f32 %v1506_v12, %v698_v45  ;;  %v799_v52 = vmax.f32 %v735_v48, 0.0 }
  0xb8   :  { %v782_v51 = vadd.f32 %v1506_v12, %v714_v46  ;;  %v751_v53 = vadd.f32 %v1506_v12, %v683_v49 }
  0xb9   :  { %v830_v54 = vmax.f32 %v766_v50, 0.0  ;;  %v863_v56 = vpack.c.bf16 %v799_v52, %v799_v52 }
  0xba   :  { %v846_v55 = vmax.f32 %v782_v51, 0.0  ;;  %v815_v57 = vmax.f32 %v751_v53, 0.0  ;;  %v513_v60 = vpop.f32.mrf.mxu0 }
  0xbb   :  { %v894_v58 = vpack.c.bf16 %v830_v54, %v830_v54  ;;  %928 = vst.msk [vmem:[%s1898_s6 + $0x14] sm:$0xf] %vm922_vm1, %v863_v56  ;;  %v668_v0 = vmul.f32 %v1501_v5, %v513_v60 }
  0xbc   :  { %v910_v59 = vpack.c.bf16 %v846_v55, %v846_v55  ;;  %v879_v61 = vpack.c.bf16 %v815_v57, %v815_v57  ;;  %v590_v62 = vpop.f32.mrf.mxu2 }
  0xbd   :  { %v630_v63 = vpop.f32.mrf.mxu3  ;;  %959 = vst.msk [vmem:[%s1898_s6 + $0x90] sm:$0xf] %vm922_vm1, %v894_v58  ;;  %v699_v1 = vmul.f32 %v1501_v5, %v590_v62  ;;  %v553_v2 = vpop.f32.mrf.mxu1  ;;  %v736_v3 = vadd.f32 %v1506_v12, %v668_v0 }
  0xbe   :  { %v715_v4 = vmul.f32 %v1501_v5, %v630_v63  ;;  %975 = vst.msk [vmem:[%s1898_s6 + $0xd0] sm:$0xf] %vm922_vm1, %v910_v59  ;;  %v684_v6 = vmul.f32 %v1501_v5, %v553_v2 }
  0xbf   :  { %944 = vst.msk [vmem:[%s1898_s6 + $0x54] sm:$0xf] %vm922_vm1, %v879_v61  ;;  %v767_v7 = vadd.f32 %v1506_v12, %v699_v1  ;;  %v800_v9 = vmax.f32 %v736_v3, 0.0 }
  0xc0   :  { %v783_v8 = vadd.f32 %v1506_v12, %v715_v4  ;;  %v752_v10 = vadd.f32 %v1506_v12, %v684_v6 }
  0xc1   :  { %v831_v11 = vmax.f32 %v767_v7, 0.0  ;;  %v864_v14 = vpack.c.bf16 %v800_v9, %v800_v9 }
  0xc2   :  { %v847_v13 = vmax.f32 %v783_v8, 0.0  ;;  %v816_v15 = vmax.f32 %v752_v10, 0.0  ;;  %v515_v18 = vpop.f32.mrf.mxu0 }
  0xc3   :  { %v895_v16 = vpack.c.bf16 %v831_v11, %v831_v11  ;;  %929 = vst.msk [vmem:[%s1898_s6 + $0x18] sm:$0xf] %vm922_vm1, %v864_v14  ;;  %v669_v22 = vmul.f32 %v1501_v5, %v515_v18 }
  0xc4   :  { %v911_v17 = vpack.c.bf16 %v847_v13, %v847_v13  ;;  %v880_v19 = vpack.c.bf16 %v816_v15, %v816_v15  ;;  %v593_v20 = vpop.f32.mrf.mxu2 }
  0xc5   :  { %v633_v21 = vpop.f32.mrf.mxu3  ;;  %960 = vst.msk [vmem:[%s1898_s6 + $0x94] sm:$0xf] %vm922_vm1, %v895_v16  ;;  %v700_v23 = vmul.f32 %v1501_v5, %v593_v20  ;;  %v555_v25 = vpop.f32.mrf.mxu1  ;;  %v737_v26 = vadd.f32 %v1506_v12, %v669_v22 }
  0xc6   :  { %v716_v24 = vmul.f32 %v1501_v5, %v633_v21  ;;  %976 = vst.msk [vmem:[%s1898_s6 + $0xd4] sm:$0xf] %vm922_vm1, %v911_v17  ;;  %v685_v27 = vmul.f32 %v1501_v5, %v555_v25 }
  0xc7   :  { %945 = vst.msk [vmem:[%s1898_s6 + $0x58] sm:$0xf] %vm922_vm1, %v880_v19  ;;  %v768_v28 = vadd.f32 %v1506_v12, %v700_v23  ;;  %v801_v30 = vmax.f32 %v737_v26, 0.0 }
  0xc8   :  { %v784_v29 = vadd.f32 %v1506_v12, %v716_v24  ;;  %v753_v31 = vadd.f32 %v1506_v12, %v685_v27 }
  0xc9   :  { %v832_v32 = vmax.f32 %v768_v28, 0.0  ;;  %v865_v34 = vpack.c.bf16 %v801_v30, %v801_v30 }
  0xca   :  { %v848_v33 = vmax.f32 %v784_v29, 0.0  ;;  %v817_v35 = vmax.f32 %v753_v31, 0.0  ;;  %v518_v38 = vpop.f32.mrf.mxu0 }
  0xcb   :  { %v896_v36 = vpack.c.bf16 %v832_v32, %v832_v32  ;;  %930 = vst.msk [vmem:[%s1898_s6 + $0x1c] sm:$0xf] %vm922_vm1, %v865_v34  ;;  %v670_v42 = vmul.f32 %v1501_v5, %v518_v38 }
  0xcc   :  { %v912_v37 = vpack.c.bf16 %v848_v33, %v848_v33  ;;  %v881_v39 = vpack.c.bf16 %v817_v35, %v817_v35  ;;  %v595_v40 = vpop.f32.mrf.mxu2 }
  0xcd   :  { %v635_v41 = vpop.f32.mrf.mxu3  ;;  %961 = vst.msk [vmem:[%s1898_s6 + $0x98] sm:$0xf] %vm922_vm1, %v896_v36  ;;  %v701_v43 = vmul.f32 %v1501_v5, %v595_v40  ;;  %v558_v45 = vpop.f32.mrf.mxu1  ;;  %v738_v46 = vadd.f32 %v1506_v12, %v670_v42 }
  0xce   :  { %v717_v44 = vmul.f32 %v1501_v5, %v635_v41  ;;  %977 = vst.msk [vmem:[%s1898_s6 + $0xd8] sm:$0xf] %vm922_vm1, %v912_v37  ;;  %v686_v47 = vmul.f32 %v1501_v5, %v558_v45 }
  0xcf   :  { %946 = vst.msk [vmem:[%s1898_s6 + $0x5c] sm:$0xf] %vm922_vm1, %v881_v39  ;;  %v769_v48 = vadd.f32 %v1506_v12, %v701_v43  ;;  %v802_v50 = vmax.f32 %v738_v46, 0.0 }
  0xd0   :  { %v785_v49 = vadd.f32 %v1506_v12, %v717_v44  ;;  %v754_v51 = vadd.f32 %v1506_v12, %v686_v47 }
  0xd1   :  { %v833_v52 = vmax.f32 %v769_v48, 0.0  ;;  %v866_v54 = vpack.c.bf16 %v802_v50, %v802_v50 }
  0xd2   :  { %v849_v53 = vmax.f32 %v785_v49, 0.0  ;;  %v818_v55 = vmax.f32 %v754_v51, 0.0  ;;  %v520_v58 = vpop.f32.mrf.mxu0 }
  0xd3   :  { %v897_v56 = vpack.c.bf16 %v833_v52, %v833_v52  ;;  %931 = vst.msk [vmem:[%s1898_s6 + $0x20] sm:$0xf] %vm922_vm1, %v866_v54  ;;  %v671_v62 = vmul.f32 %v1501_v5, %v520_v58 }
  0xd4   :  { %v913_v57 = vpack.c.bf16 %v849_v53, %v849_v53  ;;  %v882_v59 = vpack.c.bf16 %v818_v55, %v818_v55  ;;  %v598_v60 = vpop.f32.mrf.mxu2 }
  0xd5   :  { %v638_v61 = vpop.f32.mrf.mxu3  ;;  %962 = vst.msk [vmem:[%s1898_s6 + $0x9c] sm:$0xf] %vm922_vm1, %v897_v56  ;;  %v702_v63 = vmul.f32 %v1501_v5, %v598_v60  ;;  %v560_v1 = vpop.f32.mrf.mxu1  ;;  %v739_v4 = vadd.f32 %v1506_v12, %v671_v62 }
  0xd6   :  { %v718_v0 = vmul.f32 %v1501_v5, %v638_v61  ;;  %978 = vst.msk [vmem:[%s1898_s6 + $0xdc] sm:$0xf] %vm922_vm1, %v913_v57  ;;  %v687_v2 = vmul.f32 %v1501_v5, %v560_v1 }
  0xd7   :  { %947 = vst.msk [vmem:[%s1898_s6 + $0x60] sm:$0xf] %vm922_vm1, %v882_v59  ;;  %v770_v3 = vadd.f32 %v1506_v12, %v702_v63  ;;  %v803_v7 = vmax.f32 %v739_v4, 0.0 }
  0xd8   :  { %v786_v6 = vadd.f32 %v1506_v12, %v718_v0  ;;  %v755_v8 = vadd.f32 %v1506_v12, %v687_v2 }
  0xd9   :  { %v834_v9 = vmax.f32 %v770_v3, 0.0  ;;  %v867_v11 = vpack.c.bf16 %v803_v7, %v803_v7 }
  0xda   :  { %v850_v10 = vmax.f32 %v786_v6, 0.0  ;;  %v819_v13 = vmax.f32 %v755_v8, 0.0  ;;  %v523_v16 = vpop.f32.mrf.mxu0 }
  0xdb   :  { %v898_v14 = vpack.c.bf16 %v834_v9, %v834_v9  ;;  %932 = vst.msk [vmem:[%s1898_s6 + $0x24] sm:$0xf] %vm922_vm1, %v867_v11  ;;  %v672_v20 = vmul.f32 %v1501_v5, %v523_v16 }
  0xdc   :  { %v914_v15 = vpack.c.bf16 %v850_v10, %v850_v10  ;;  %v883_v17 = vpack.c.bf16 %v819_v13, %v819_v13  ;;  %v600_v18 = vpop.f32.mrf.mxu2 }
  0xdd   :  { %v640_v19 = vpop.f32.mrf.mxu3  ;;  %963 = vst.msk [vmem:[%s1898_s6 + $0xa0] sm:$0xf] %vm922_vm1, %v898_v14  ;;  %v703_v21 = vmul.f32 %v1501_v5, %v600_v18  ;;  %v563_v23 = vpop.f32.mrf.mxu1  ;;  %v740_v24 = vadd.f32 %v1506_v12, %v672_v20 }
  0xde   :  { %v719_v22 = vmul.f32 %v1501_v5, %v640_v19  ;;  %979 = vst.msk [vmem:[%s1898_s6 + $0xe0] sm:$0xf] %vm922_vm1, %v914_v15  ;;  %v688_v25 = vmul.f32 %v1501_v5, %v563_v23 }
  0xdf   :  { %948 = vst.msk [vmem:[%s1898_s6 + $0x64] sm:$0xf] %vm922_vm1, %v883_v17  ;;  %v771_v26 = vadd.f32 %v1506_v12, %v703_v21  ;;  %v804_v28 = vmax.f32 %v740_v24, 0.0 }
  0xe0   :  { %v787_v27 = vadd.f32 %v1506_v12, %v719_v22  ;;  %v756_v29 = vadd.f32 %v1506_v12, %v688_v25 }
  0xe1   :  { %v835_v30 = vmax.f32 %v771_v26, 0.0  ;;  %v868_v32 = vpack.c.bf16 %v804_v28, %v804_v28 }
  0xe2   :  { %v851_v31 = vmax.f32 %v787_v27, 0.0  ;;  %v820_v33 = vmax.f32 %v756_v29, 0.0  ;;  %v525_v36 = vpop.f32.mrf.mxu0 }
  0xe3   :  { %v899_v34 = vpack.c.bf16 %v835_v30, %v835_v30  ;;  %933 = vst.msk [vmem:[%s1898_s6 + $0x28] sm:$0xf] %vm922_vm1, %v868_v32  ;;  %v673_v40 = vmul.f32 %v1501_v5, %v525_v36 }
  0xe4   :  { %v915_v35 = vpack.c.bf16 %v851_v31, %v851_v31  ;;  %v884_v37 = vpack.c.bf16 %v820_v33, %v820_v33  ;;  %v603_v38 = vpop.f32.mrf.mxu2 }
  0xe5   :  { %v643_v39 = vpop.f32.mrf.mxu3  ;;  %964 = vst.msk [vmem:[%s1898_s6 + $0xa4] sm:$0xf] %vm922_vm1, %v899_v34  ;;  %v704_v41 = vmul.f32 %v1501_v5, %v603_v38  ;;  %v565_v43 = vpop.f32.mrf.mxu1  ;;  %v741_v44 = vadd.f32 %v1506_v12, %v673_v40 }
  0xe6   :  { %v720_v42 = vmul.f32 %v1501_v5, %v643_v39  ;;  %980 = vst.msk [vmem:[%s1898_s6 + $0xe4] sm:$0xf] %vm922_vm1, %v915_v35  ;;  %v689_v45 = vmul.f32 %v1501_v5, %v565_v43 }
  0xe7   :  { %949 = vst.msk [vmem:[%s1898_s6 + $0x68] sm:$0xf] %vm922_vm1, %v884_v37  ;;  %v772_v46 = vadd.f32 %v1506_v12, %v704_v41  ;;  %v805_v48 = vmax.f32 %v741_v44, 0.0 }
  0xe8   :  { %v788_v47 = vadd.f32 %v1506_v12, %v720_v42  ;;  %v757_v49 = vadd.f32 %v1506_v12, %v689_v45 }
  0xe9   :  { %v836_v50 = vmax.f32 %v772_v46, 0.0  ;;  %v869_v52 = vpack.c.bf16 %v805_v48, %v805_v48 }
  0xea   :  { %v852_v51 = vmax.f32 %v788_v47, 0.0  ;;  %v821_v53 = vmax.f32 %v757_v49, 0.0  ;;  %v528_v56 = vpop.f32.mrf.mxu0 }
  0xeb   :  { %v900_v54 = vpack.c.bf16 %v836_v50, %v836_v50  ;;  %934 = vst.msk [vmem:[%s1898_s6 + $0x2c] sm:$0xf] %vm922_vm1, %v869_v52  ;;  %v674_v60 = vmul.f32 %v1501_v5, %v528_v56 }
  0xec   :  { %v916_v55 = vpack.c.bf16 %v852_v51, %v852_v51  ;;  %v885_v57 = vpack.c.bf16 %v821_v53, %v821_v53  ;;  %v605_v58 = vpop.f32.mrf.mxu2 }
  0xed   :  { %v645_v59 = vpop.f32.mrf.mxu3  ;;  %965 = vst.msk [vmem:[%s1898_s6 + $0xa8] sm:$0xf] %vm922_vm1, %v900_v54  ;;  %v705_v61 = vmul.f32 %v1501_v5, %v605_v58  ;;  %v568_v63 = vpop.f32.mrf.mxu1  ;;  %v742_v0 = vadd.f32 %v1506_v12, %v674_v60 }
  0xee   :  { %v721_v62 = vmul.f32 %v1501_v5, %v645_v59  ;;  %981 = vst.msk [vmem:[%s1898_s6 + $0xe8] sm:$0xf] %vm922_vm1, %v916_v55  ;;  %v690_v1 = vmul.f32 %v1501_v5, %v568_v63 }
  0xef   :  { %950 = vst.msk [vmem:[%s1898_s6 + $0x6c] sm:$0xf] %vm922_vm1, %v885_v57  ;;  %v773_v4 = vadd.f32 %v1506_v12, %v705_v61  ;;  %v806_v3 = vmax.f32 %v742_v0, 0.0 }
  0xf0   :  { %v789_v2 = vadd.f32 %v1506_v12, %v721_v62  ;;  %v758_v6 = vadd.f32 %v1506_v12, %v690_v1 }
  0xf1   :  { %v837_v7 = vmax.f32 %v773_v4, 0.0  ;;  %v870_v9 = vpack.c.bf16 %v806_v3, %v806_v3 }
  0xf2   :  { %v853_v8 = vmax.f32 %v789_v2, 0.0  ;;  %v822_v10 = vmax.f32 %v758_v6, 0.0  ;;  %v530_v14 = vpop.f32.mrf.mxu0 }
  0xf3   :  { %v901_v11 = vpack.c.bf16 %v837_v7, %v837_v7  ;;  %935 = vst.msk [vmem:[%s1898_s6 + $0x30] sm:$0xf] %vm922_vm1, %v870_v9  ;;  %v675_v18 = vmul.f32 %v1501_v5, %v530_v14 }
  0xf4   :  { %v917_v13 = vpack.c.bf16 %v853_v8, %v853_v8  ;;  %v886_v15 = vpack.c.bf16 %v822_v10, %v822_v10  ;;  %v608_v16 = vpop.f32.mrf.mxu2 }
  0xf5   :  { %v648_v17 = vpop.f32.mrf.mxu3  ;;  %966 = vst.msk [vmem:[%s1898_s6 + $0xac] sm:$0xf] %vm922_vm1, %v901_v11  ;;  %v706_v19 = vmul.f32 %v1501_v5, %v608_v16  ;;  %v570_v21 = vpop.f32.mrf.mxu1  ;;  %v743_v22 = vadd.f32 %v1506_v12, %v675_v18 }
  0xf6   :  { %v722_v20 = vmul.f32 %v1501_v5, %v648_v17  ;;  %982 = vst.msk [vmem:[%s1898_s6 + $0xec] sm:$0xf] %vm922_vm1, %v917_v13  ;;  %v691_v23 = vmul.f32 %v1501_v5, %v570_v21 }
  0xf7   :  { %951 = vst.msk [vmem:[%s1898_s6 + $0x70] sm:$0xf] %vm922_vm1, %v886_v15  ;;  %v774_v24 = vadd.f32 %v1506_v12, %v706_v19  ;;  %v807_v26 = vmax.f32 %v743_v22, 0.0 }
  0xf8   :  { %v790_v25 = vadd.f32 %v1506_v12, %v722_v20  ;;  %v759_v27 = vadd.f32 %v1506_v12, %v691_v23 }
  0xf9   :  { %v838_v28 = vmax.f32 %v774_v24, 0.0  ;;  %v871_v30 = vpack.c.bf16 %v807_v26, %v807_v26 }
  0xfa   :  { %v854_v29 = vmax.f32 %v790_v25, 0.0  ;;  %v823_v31 = vmax.f32 %v759_v27, 0.0  ;;  %v533_v34 = vpop.f32.mrf.mxu0 }
  0xfb   :  { %v902_v32 = vpack.c.bf16 %v838_v28, %v838_v28  ;;  %936 = vst.msk [vmem:[%s1898_s6 + $0x34] sm:$0xf] %vm922_vm1, %v871_v30  ;;  %v676_v38 = vmul.f32 %v1501_v5, %v533_v34 }
  0xfc   :  { %v918_v33 = vpack.c.bf16 %v854_v29, %v854_v29  ;;  %v887_v35 = vpack.c.bf16 %v823_v31, %v823_v31  ;;  %v610_v36 = vpop.f32.mrf.mxu2 }
  0xfd   :  { %v650_v37 = vpop.f32.mrf.mxu3  ;;  %967 = vst.msk [vmem:[%s1898_s6 + $0xb0] sm:$0xf] %vm922_vm1, %v902_v32  ;;  %v707_v39 = vmul.f32 %v1501_v5, %v610_v36  ;;  %v573_v41 = vpop.f32.mrf.mxu1  ;;  %v744_v42 = vadd.f32 %v1506_v12, %v676_v38 }
  0xfe   :  { %v723_v40 = vmul.f32 %v1501_v5, %v650_v37  ;;  %983 = vst.msk [vmem:[%s1898_s6 + $0xf0] sm:$0xf] %vm922_vm1, %v918_v33  ;;  %v692_v43 = vmul.f32 %v1501_v5, %v573_v41 }
  0xff   :  { %952 = vst.msk [vmem:[%s1898_s6 + $0x74] sm:$0xf] %vm922_vm1, %v887_v35  ;;  %v775_v44 = vadd.f32 %v1506_v12, %v707_v39  ;;  %v808_v46 = vmax.f32 %v744_v42, 0.0 }
 0x100   :  { %v791_v45 = vadd.f32 %v1506_v12, %v723_v40  ;;  %v760_v47 = vadd.f32 %v1506_v12, %v692_v43 }
 0x101   :  { %v839_v48 = vmax.f32 %v775_v44, 0.0  ;;  %v872_v50 = vpack.c.bf16 %v808_v46, %v808_v46 }
 0x102   :  { %v855_v49 = vmax.f32 %v791_v45, 0.0  ;;  %v824_v51 = vmax.f32 %v760_v47, 0.0  ;;  %v535_v54 = vpop.f32.mrf.mxu0 }
 0x103   :  { %v903_v52 = vpack.c.bf16 %v839_v48, %v839_v48  ;;  %937 = vst.msk [vmem:[%s1898_s6 + $0x38] sm:$0xf] %vm922_vm1, %v872_v50  ;;  %v677_v58 = vmul.f32 %v1501_v5, %v535_v54 }
 0x104   :  { %v919_v53 = vpack.c.bf16 %v855_v49, %v855_v49  ;;  %v888_v55 = vpack.c.bf16 %v824_v51, %v824_v51  ;;  %v613_v56 = vpop.f32.mrf.mxu2 }
 0x105   :  { %v653_v57 = vpop.f32.mrf.mxu3  ;;  %968 = vst.msk [vmem:[%s1898_s6 + $0xb4] sm:$0xf] %vm922_vm1, %v903_v52  ;;  %v708_v59 = vmul.f32 %v1501_v5, %v613_v56  ;;  %v575_v61 = vpop.f32.mrf.mxu1  ;;  %v745_v62 = vadd.f32 %v1506_v12, %v677_v58 }
 0x106   :  { %v724_v60 = vmul.f32 %v1501_v5, %v653_v57  ;;  %984 = vst.msk [vmem:[%s1898_s6 + $0xf4] sm:$0xf] %vm922_vm1, %v919_v53  ;;  %v693_v63 = vmul.f32 %v1501_v5, %v575_v61 }
 0x107   :  { %953 = vst.msk [vmem:[%s1898_s6 + $0x78] sm:$0xf] %vm922_vm1, %v888_v55  ;;  %v776_v0 = vadd.f32 %v1506_v12, %v708_v59  ;;  %v809_v4 = vmax.f32 %v745_v62, 0.0 }
 0x108   :  { %v792_v1 = vadd.f32 %v1506_v12, %v724_v60  ;;  %v761_v2 = vadd.f32 %v1506_v12, %v693_v63 }
 0x109   :  { %v840_v3 = vmax.f32 %v776_v0, 0.0  ;;  %v873_v7 = vpack.c.bf16 %v809_v4, %v809_v4 }
 0x10a   :  { %v856_v6 = vmax.f32 %v792_v1, 0.0  ;;  %v825_v8 = vmax.f32 %v761_v2, 0.0 }
 0x10b   :  { %v904_v9 = vpack.c.bf16 %v840_v3, %v840_v3  ;;  %938 = vst.msk [vmem:[%s1898_s6 + $0x3c] sm:$0xf] %vm922_vm1, %v873_v7 }
 0x10c   :  { %v920_v10 = vpack.c.bf16 %v856_v6, %v856_v6  ;;  %v889_v11 = vpack.c.bf16 %v825_v8, %v825_v8  ;;  %v615_v13 = vpop.f32.mrf.mxu2 }
 0x10d   :  { %v655_v14 = vpop.f32.mrf.mxu3  ;;  %969 = vst.msk [vmem:[%s1898_s6 + $0xb8] sm:$0xf] %vm922_vm1, %v904_v9  ;;  %v709_v15 = vmul.f32 %v1501_v5, %v615_v13 }
 0x10e   :  { %v725_v16 = vmul.f32 %v1501_v5, %v655_v14  ;;  %985 = vst.msk [vmem:[%s1898_s6 + $0xf8] sm:$0xf] %vm922_vm1, %v920_v10 }
 0x10f   :  { %954 = vst.msk [vmem:[%s1898_s6 + $0x7c] sm:$0xf] %vm922_vm1, %v889_v11  ;;  %v777_v17 = vadd.f32 %v1506_v12, %v709_v15 }
 0x110   :  { %v793_v18 = vadd.f32 %v1506_v12, %v725_v16 }
 0x111   :  { %v841_v19 = vmax.f32 %v777_v17, 0.0 }
 0x112   :  { %v857_v20 = vmax.f32 %v793_v18, 0.0 }
 0x113   :  { %v905_v21 = vpack.c.bf16 %v841_v19, %v841_v19 }
 0x114   :  { %v921_v22 = vpack.c.bf16 %v857_v20, %v857_v20 }
 0x115   :  { %970 = vst.msk [vmem:[%s1898_s6 + $0xbc] sm:$0xf] %vm922_vm1, %v905_v21 }
 0x116   :  { %986 = vst.msk [vmem:[%s1898_s6 + $0xfc] sm:$0xf] %vm922_vm1, %v921_v22 }

// kernel: densenet_forward.28
= control target key start
LH: loop header
LB: loop body
LE: loop exit
PB: predicated region body
PF: predicated region fallthrough
CT: control target
= control target key end

     0   :  { %vm764_vm0 = vcmask 261120   ;;  %vm1432_vm1 = vcmask 60416   ;;  %s3158_s1 = inlined_call_operand.vmem [shape: bf16[288,8], index: 1, kind: input, shape index: {}]   ;;  %s3159_s0 = inlined_call_operand.vmem [shape: bf16[512,288], index: 0, kind: input, shape index: {}]   ;;  %s3160_s2 = inlined_call_operand.vmem [shape: bf16[512,8], index: 2, kind: output, shape index: {}]  }
   0x1   :  { %v2092_v0 = vld [vmem:[%s3158_s1 + $0x38] sm:$0xff]  ;;  %v2145_v2 = vld [vmem:[%s3158_s1 + $0x88] sm:$0xff]  ;;  %v2091_v3 = vld [vmem:[%s3158_s1 + $0x30] sm:$0xff] }
   0x2   :  { %v2100_v1 = vld [vmem:[%s3158_s1 + $0x78] sm:$0xff]  ;;  %861 = vmatpush.bf16.msra.mxu0 %v2092_v0  ;;  %2103 = vmatpush.bf16.msra.mxu3 %v2092_v0  ;;  %v2099_v4 = vld [vmem:[%s3158_s1 + $0x70] sm:$0xff]  ;;  %v2157_v5 = vld [vmem:[%s3158_s1 + $0x80] sm:$0xff] }
   0x3   :  { %1030 = vmatpush.bf16.msra.mxu1 %v2100_v1  ;;  %1205 = vmatpush.bf16.msra.mxu2 %v2145_v2  ;;  %v1511_v6 = vld [vmem:[%s3159_s0 + $0x8] sm:$0xf]  ;;  %v1991_v7 = vld [vmem:[%s3159_s0 + $0x10] sm:$0xf0]  ;;  %v2089_v11 = vld [vmem:[%s3158_s1 + $0x20] sm:$0xff] }
   0x4   :  { %v1512_v8 = vor.u32 %v1991_v7, %v1511_v6  ;;  %v2090_v9 = vld [vmem:[%s3158_s1 + $0x28] sm:$0xff]  ;;  %v2097_v12 = vld [vmem:[%s3158_s1 + $0x60] sm:$0xff]  ;;  %v2088_v13 = vld [vmem:[%s3158_s1 + $0x18] sm:$0xff] }
   0x5   :  { %v2098_v10 = vld [vmem:[%s3158_s1 + $0x68] sm:$0xff]  ;;  %v2096_v14 = vld [vmem:[%s3158_s1 + $0x58] sm:$0xff]  ;;  %v2087_v15 = vld [vmem:[%s3158_s1 + $0x10] sm:$0xff] }
   0x6   :  { %862 = vmatpush.bf16.msra.mxu0 %v2091_v3  ;;  %2104 = vmatpush.bf16.msra.mxu3 %v2091_v3  ;;  %v2095_v16 = vld [vmem:[%s3158_s1 + $0x50] sm:$0xff]  ;;  %v1523_v17 = vld [vmem:[%s3159_s0 + $0x20] sm:$0xf]  ;;  %v1994_v18 = vld [vmem:[%s3159_s0 + $0x28] sm:$0xf0] }
   0x7   :  { %1031 = vmatpush.bf16.msra.mxu1 %v2099_v4  ;;  %1206 = vmatpush.bf16.msra.mxu2 %v2157_v5  ;;  %v1524_v19 = vor.u32 %v1994_v18, %v1523_v17  ;;  %v2086_v20 = vld [vmem:[%s3158_s1 + $0x8] sm:$0xff]  ;;  %v2085_v22 = vld [vmem:[%s3158_s1] sm:$0xff]  ;;  %v1505_v29 = vld [vmem:[%s3159_s0 + $0xc] sm:$0xf0] }
   0x8   :  { %v2094_v21 = vld [vmem:[%s3158_s1 + $0x48] sm:$0xff]  ;;  %v2093_v23 = vld [vmem:[%s3158_s1 + $0x40] sm:$0xff]  ;;  %v1535_v33 = vld [vmem:[%s3159_s0 + $0x38] sm:$0xf] }
   0x9   :  { %v1503_v24 = vld [vmem:[%s3159_s0] sm:$0xf]  ;;  %v1990_v25 = vld [vmem:[%s3159_s0 + $0x8] sm:$0xf0]  ;;  %v1989_v28 = vld [vmem:[%s3159_s0 + $0x4] sm:$0xf] }
   0xa   :  { %1957 = vmatmul.msk.bf16.vlgmr.msra.gmra.mxu2 %vm764_vm0, %v1512_v8  ;;  %863 = vmatpush.bf16.msra.mxu0 %v2090_v9  ;;  %v1791_v26 = vld [vmem:[%s3159_s0 + $0x240] sm:$0xf]  ;;  %v2062_v27 = vld [vmem:[%s3159_s0 + $0x248] sm:$0xf0]  ;;  %v1504_v30 = vor.u32 %v1990_v25, %v1503_v24  ;;  %v1508_v32 = vor.u32 %v1989_v28, %v1505_v29  ;;  %v1997_v34 = vld [vmem:[%s3159_s0 + $0x40] sm:$0xf0] }
   0xb   :  { %2105 = vmatpush.bf16.msra.mxu3 %v2090_v9  ;;  %1032 = vmatpush.bf16.msra.mxu1 %v2098_v10  ;;  %v1792_v31 = vor.u32 %v2062_v27, %v1791_v26  ;;  %v1536_v35 = vor.u32 %v1997_v34, %v1535_v33  ;;  %v1515_v36 = vld [vmem:[%s3159_s0 + $0x18] sm:$0xf]  ;;  %v1993_v37 = vld [vmem:[%s3159_s0 + $0x20] sm:$0xf0]  ;;  %v1992_v40 = vld [vmem:[%s3159_s0 + $0x1c] sm:$0xf] }
   0xc   :  { %v1803_v38 = vld [vmem:[%s3159_s0 + $0x258] sm:$0xf]  ;;  %v2065_v39 = vld [vmem:[%s3159_s0 + $0x260] sm:$0xf0]  ;;  %v1517_v41 = vld [vmem:[%s3159_s0 + $0x24] sm:$0xf0]  ;;  %v1516_v42 = vor.u32 %v1993_v37, %v1515_v36 }
   0xd   :  { %v1804_v43 = vor.u32 %v2065_v39, %v1803_v38  ;;  %v1520_v44 = vor.u32 %v1992_v40, %v1517_v41  ;;  %v1547_v45 = vld [vmem:[%s3159_s0 + $0x50] sm:$0xf]  ;;  %v2000_v46 = vld [vmem:[%s3159_s0 + $0x58] sm:$0xf0]  ;;  %v1995_v52 = vld [vmem:[%s3159_s0 + $0x34] sm:$0xf] }
   0xe   :  { %864 = vmatpush.bf16.msra.mxu0 %v2089_v11  ;;  %v1548_v47 = vor.u32 %v2000_v46, %v1547_v45  ;;  %v1527_v48 = vld [vmem:[%s3159_s0 + $0x30] sm:$0xf]  ;;  %v1996_v49 = vld [vmem:[%s3159_s0 + $0x38] sm:$0xf0]  ;;  %v1529_v53 = vld [vmem:[%s3159_s0 + $0x3c] sm:$0xf0] }
   0xf   :  { %2106 = vmatpush.bf16.msra.mxu3 %v2089_v11  ;;  %1033 = vmatpush.bf16.msra.mxu1 %v2097_v12  ;;  %v1815_v50 = vld [vmem:[%s3159_s0 + $0x270] sm:$0xf]  ;;  %v2068_v51 = vld [vmem:[%s3159_s0 + $0x278] sm:$0xf0]  ;;  %v1528_v54 = vor.u32 %v1996_v49, %v1527_v48  ;;  %v1532_v56 = vor.u32 %v1995_v52, %v1529_v53  ;;  %v1559_v57 = vld [vmem:[%s3159_s0 + $0x68] sm:$0xf] }
  0x10   :  { %v1816_v55 = vor.u32 %v2068_v51, %v1815_v50  ;;  %v2003_v58 = vld [vmem:[%s3159_s0 + $0x70] sm:$0xf0]  ;;  %v1539_v60 = vld [vmem:[%s3159_s0 + $0x48] sm:$0xf]  ;;  %v1998_v0 = vld [vmem:[%s3159_s0 + $0x4c] sm:$0xf] }
  0x11   :  { %v1560_v59 = vor.u32 %v2003_v58, %v1559_v57  ;;  %v1999_v61 = vld [vmem:[%s3159_s0 + $0x50] sm:$0xf0]  ;;  %v1827_v62 = vld [vmem:[%s3159_s0 + $0x288] sm:$0xf]  ;;  %v2006_v6 = vld [vmem:[%s3159_s0 + $0x88] sm:$0xf0] }
  0x12   :  { %865 = vmatpush.bf16.msra.mxu0 %v2088_v13  ;;  %v2071_v63 = vld [vmem:[%s3159_s0 + $0x290] sm:$0xf0]  ;;  %v1551_v8 = vld [vmem:[%s3159_s0 + $0x60] sm:$0xf]  ;;  %v2002_v9 = vld [vmem:[%s3159_s0 + $0x68] sm:$0xf0] }
  0x13   :  { %2107 = vmatpush.bf16.msra.mxu3 %v2088_v13  ;;  %1034 = vmatpush.bf16.msra.mxu1 %v2096_v14  ;;  %v1828_v3 = vor.u32 %v2071_v63, %v1827_v62  ;;  %v2074_v11 = vld [vmem:[%s3159_s0 + $0x2a8] sm:$0xf0]  ;;  %v1553_v13 = vld [vmem:[%s3159_s0 + $0x6c] sm:$0xf0]  ;;  %v1583_v17 = vld [vmem:[%s3159_s0 + $0x98] sm:$0xf] }
  0x14   :  { %v2009_v18 = vld [vmem:[%s3159_s0 + $0xa0] sm:$0xf0]  ;;  %v2004_v24 = vld [vmem:[%s3159_s0 + $0x7c] sm:$0xf]  ;;  %v1565_v25 = vld [vmem:[%s3159_s0 + $0x84] sm:$0xf0] }
  0x15   :  { %v1568_v28 = vor.u32 %v2004_v24, %v1565_v25  ;;  %v1595_v29 = vld [vmem:[%s3159_s0 + $0xb0] sm:$0xf]  ;;  %v2008_v33 = vld [vmem:[%s3159_s0 + $0x98] sm:$0xf0]  ;;  %v2007_v36 = vld [vmem:[%s3159_s0 + $0x94] sm:$0xf] }
  0x16   :  { %866 = vmatpush.bf16.msra.mxu0 %v2087_v15  ;;  %v1863_v34 = vld [vmem:[%s3159_s0 + $0x2d0] sm:$0xf]  ;;  %v1577_v37 = vld [vmem:[%s3159_s0 + $0x9c] sm:$0xf0]  ;;  %v1607_v41 = vld [vmem:[%s3159_s0 + $0xc8] sm:$0xf] }
  0x17   :  { %2108 = vmatpush.bf16.msra.mxu3 %v2087_v15  ;;  %1035 = vmatpush.bf16.msra.mxu1 %v2095_v16  ;;  %v1580_v40 = vor.u32 %v2007_v36, %v1577_v37  ;;  %v2011_v45 = vld [vmem:[%s3159_s0 + $0xb0] sm:$0xf0]  ;;  %v1875_v46 = vld [vmem:[%s3159_s0 + $0x2e8] sm:$0xf]  ;;  %v2010_v48 = vld [vmem:[%s3159_s0 + $0xac] sm:$0xf] }
  0x18   :  { %v1589_v49 = vld [vmem:[%s3159_s0 + $0xb4] sm:$0xf0]  ;;  %v1599_v58 = vld [vmem:[%s3159_s0 + $0xc0] sm:$0xf]  ;;  %v2061_v62 = vld [vmem:[%s3159_s0 + $0x244] sm:$0xf] }
  0x19   :  { %v1592_v53 = vor.u32 %v2010_v48, %v1589_v49  ;;  %v1793_v63 = vld [vmem:[%s3159_s0 + $0x24c] sm:$0xf0]  ;;  %v2067_v48 = vld [vmem:[%s3159_s0 + $0x274] sm:$0xf]  ;;  %v1817_v49 = vld [vmem:[%s3159_s0 + $0x27c] sm:$0xf0] }
  0x1a   :  { %1958 = vmatmul.msk.bf16.gmra.mxu2 %vm764_vm0, %v1524_v19  ;;  %867 = vmatpush.bf16.msra.mxu0 %v2086_v20  ;;  %v1584_v19 = vor.u32 %v2009_v18, %v1583_v17  ;;  %v1611_v18 = vld [vmem:[%s3159_s0 + $0xd8] sm:$0xf] }
  0x1b   :  { %2109 = vmatpush.bf16.msra.mxu3 %v2086_v20  ;;  %1036 = vmatpush.bf16.msra.mxu1 %v2094_v21  ;;  %v1563_v20 = vld [vmem:[%s3159_s0 + $0x78] sm:$0xf] }
  0x1e   :  { %868 = vmatpush.bf16.msra.mxu0 %v2085_v22 }
  0x1f   :  { %2110 = vmatpush.bf16.msra.mxu3 %v2085_v22  ;;  %1037 = vmatpush.bf16.msra.mxu1 %v2093_v23  ;;  %v1851_v22 = vld [vmem:[%s3159_s0 + $0x2b8] sm:$0xf] }
  0x21   :  { %869 = vmatmul.bf16.vlgmr.msra.gmra.mxu0 %v1504_v30  ;;  %v2012_v30 = vld [vmem:[%s3159_s0 + $0xb8] sm:$0xf0] }
  0x22   :  { %989 = vmatmul.bf16.vlgmr.msra.gmra.mxu3 %v1792_v31  ;;  %1038 = vmatmul.bf16.vlgmr.msra.gmra.mxu1 %v1508_v32  ;;  %v1596_v31 = vor.u32 %v2012_v30, %v1595_v29  ;;  %v1575_v32 = vld [vmem:[%s3159_s0 + $0x90] sm:$0xf] }
  0x23   :  { %2111 = vmatpush.bf16.msrb.mxu3 %v2100_v1  ;;  %v1541_v1 = vld [vmem:[%s3159_s0 + $0x54] sm:$0xf0]  ;;  %v1576_v38 = vor.u32 %v2008_v33, %v1575_v32 }
  0x27   :  { %2112 = vmatpush.bf16.msrb.mxu3 %v2099_v4  ;;  %v1544_v4 = vor.u32 %v1998_v0, %v1541_v1 }
  0x2a   :  { %1959 = vmatmul.msk.bf16.gmra.mxu2 %vm764_vm0, %v1536_v35  ;;  %v2080_v35 = vld [vmem:[%s3159_s0 + $0x2d8] sm:$0xf0] }
  0x2b   :  { %2113 = vmatpush.bf16.msrb.mxu3 %v2098_v10  ;;  %v1839_v10 = vld [vmem:[%s3159_s0 + $0x2a0] sm:$0xf]  ;;  %v1864_v39 = vor.u32 %v2080_v35, %v1863_v34  ;;  %v1643_v34 = vld [vmem:[%s3159_s0 + $0x110] sm:$0xf]  ;;  %v2024_v35 = vld [vmem:[%s3159_s0 + $0x118] sm:$0xf0] }
  0x2c   :  { %v1840_v15 = vor.u32 %v2074_v11, %v1839_v10 }
  0x2f   :  { %2114 = vmatpush.bf16.msrb.mxu3 %v2097_v12  ;;  %v2001_v12 = vld [vmem:[%s3159_s0 + $0x64] sm:$0xf] }
  0x31   :  { %874 = vmatmul.bf16.gmra.mxu0 %v1516_v42  ;;  %v2015_v42 = vld [vmem:[%s3159_s0 + $0xd0] sm:$0xf0] }
  0x32   :  { %994 = vmatmul.bf16.gmra.mxu3 %v1804_v43  ;;  %1043 = vmatmul.bf16.gmra.mxu1 %v1520_v44  ;;  %v1608_v43 = vor.u32 %v2015_v42, %v1607_v41  ;;  %v1587_v44 = vld [vmem:[%s3159_s0 + $0xa8] sm:$0xf] }
  0x33   :  { %2115 = vmatpush.bf16.msrb.mxu3 %v2096_v14  ;;  %v1552_v14 = vor.u32 %v2002_v9, %v1551_v8  ;;  %v1588_v51 = vor.u32 %v2011_v45, %v1587_v44  ;;  %v1631_v8 = vld [vmem:[%s3159_s0 + $0xf8] sm:$0xf]  ;;  %v2021_v9 = vld [vmem:[%s3159_s0 + $0x100] sm:$0xf0]  ;;  %v1623_v44 = vld [vmem:[%s3159_s0 + $0xf0] sm:$0xf] }
  0x34   :  { %v2020_v45 = vld [vmem:[%s3159_s0 + $0xf8] sm:$0xf0] }
  0x37   :  { %2116 = vmatpush.bf16.msrb.mxu3 %v2095_v16  ;;  %v1556_v16 = vor.u32 %v2001_v12, %v1553_v13 }
  0x3a   :  { %1960 = vmatmul.msk.bf16.gmra.mxu2 %vm764_vm0, %v1548_v47  ;;  %v2083_v47 = vld [vmem:[%s3159_s0 + $0x2f0] sm:$0xf0] }
  0x3b   :  { %2117 = vmatpush.bf16.msrb.mxu3 %v2094_v21  ;;  %v2005_v21 = vld [vmem:[%s3159_s0 + $0x80] sm:$0xf0]  ;;  %v1876_v52 = vor.u32 %v2083_v47, %v1875_v46  ;;  %v2019_v46 = vld [vmem:[%s3159_s0 + $0xf4] sm:$0xf]  ;;  %v1625_v47 = vld [vmem:[%s3159_s0 + $0xfc] sm:$0xf0] }
  0x3c   :  { %v1564_v26 = vor.u32 %v2005_v21, %v1563_v20  ;;  %v2016_v20 = vld [vmem:[%s3159_s0 + $0xdc] sm:$0xf]  ;;  %v1613_v21 = vld [vmem:[%s3159_s0 + $0xe4] sm:$0xf0] }
  0x3d   :  { %v1616_v29 = vor.u32 %v2016_v20, %v1613_v21 }
  0x3f   :  { %2118 = vmatpush.bf16.msrb.mxu3 %v2093_v23  ;;  %v2077_v23 = vld [vmem:[%s3159_s0 + $0x2c0] sm:$0xf0] }
  0x40   :  { %v1852_v27 = vor.u32 %v2077_v23, %v1851_v22  ;;  %v2064_v22 = vld [vmem:[%s3159_s0 + $0x25c] sm:$0xf]  ;;  %v1805_v23 = vld [vmem:[%s3159_s0 + $0x264] sm:$0xf0] }
  0x41   :  { %879 = vmatmul.bf16.gmra.mxu0 %v1528_v54  ;;  %v1619_v54 = vld [vmem:[%s3159_s0 + $0xe0] sm:$0xf]  ;;  %v1808_v30 = vor.u32 %v2064_v22, %v1805_v23 }
  0x42   :  { %999 = vmatmul.bf16.gmra.mxu3 %v1816_v55  ;;  %1048 = vmatmul.bf16.gmra.mxu1 %v1532_v56  ;;  %v2018_v55 = vld [vmem:[%s3159_s0 + $0xe8] sm:$0xf0]  ;;  %v1667_v23 = vld [vmem:[%s3159_s0 + $0x140] sm:$0xf] }
  0x43   :  { %2119 = vmatpush.bf16.msra.mxu3 %v2145_v2  ;;  %v1540_v2 = vor.u32 %v1999_v61, %v1539_v60  ;;  %v1620_v57 = vor.u32 %v2018_v55, %v1619_v54  ;;  %v2013_v60 = vld [vmem:[%s3159_s0 + $0xc4] sm:$0xf]  ;;  %v1601_v61 = vld [vmem:[%s3159_s0 + $0xcc] sm:$0xf0]  ;;  %v1628_v55 = vor.u32 %v2019_v46, %v1625_v47 }
  0x47   :  { %2120 = vmatpush.bf16.msra.mxu3 %v2157_v5  ;;  %v1571_v5 = vld [vmem:[%s3159_s0 + $0x80] sm:$0xf] }
  0x48   :  { %v1572_v7 = vor.u32 %v2006_v6, %v1571_v5 }
  0x4a   :  { %1961 = vmatmul.msk.bf16.gmra.mxu2 %vm764_vm0, %v1560_v59  ;;  %v2014_v59 = vld [vmem:[%s3159_s0 + $0xc8] sm:$0xf0] }
  0x4b   :  { %v1600_v1 = vor.u32 %v2014_v59, %v1599_v58 }
  0x51   :  { %884 = vmatmul.bf16.gmra.mxu0 %v1540_v2 }
  0x52   :  { %1004 = vmatmul.bf16.gmra.mxu3 %v1828_v3  ;;  %1053 = vmatmul.bf16.gmra.mxu1 %v1544_v4  ;;  %v1604_v3 = vor.u32 %v2013_v60, %v1601_v61  ;;  %v1796_v4 = vor.u32 %v2061_v62, %v1793_v63  ;;  %v1655_v60 = vld [vmem:[%s3159_s0 + $0x128] sm:$0xf]  ;;  %v2027_v61 = vld [vmem:[%s3159_s0 + $0x130] sm:$0xf0] }
  0x5a   :  { %1962 = vmatmul.msk.bf16.gmra.mxu2 %vm764_vm0, %v1572_v7 }
  0x61   :  { %889 = vmatmul.bf16.gmra.mxu0 %v1552_v14  ;;  %v1632_v14 = vor.u32 %v2021_v9, %v1631_v8  ;;  %v2022_v8 = vld [vmem:[%s3159_s0 + $0x10c] sm:$0xf]  ;;  %v1637_v9 = vld [vmem:[%s3159_s0 + $0x114] sm:$0xf0] }
  0x62   :  { %1009 = vmatmul.bf16.gmra.mxu3 %v1840_v15  ;;  %1058 = vmatmul.bf16.gmra.mxu1 %v1556_v16 }
  0x6a   :  { %1963 = vmatmul.msk.bf16.gmra.mxu2 %vm764_vm0, %v1584_v19  ;;  %v2017_v19 = vld [vmem:[%s3159_s0 + $0xe0] sm:$0xf0] }
  0x71   :  { %894 = vmatmul.bf16.gmra.mxu0 %v1564_v26 }
  0x72   :  { %1014 = vmatmul.bf16.gmra.mxu3 %v1852_v27  ;;  %1063 = vmatmul.bf16.gmra.mxu1 %v1568_v28  ;;  %v1612_v27 = vor.u32 %v2017_v19, %v1611_v18  ;;  %v1640_v18 = vor.u32 %v2022_v8, %v1637_v9 }
  0x7a   :  { %1964 = vmatmul.msk.bf16.gmra.mxu2 %vm764_vm0, %v1596_v31 }
  0x81   :  { %899 = vmatmul.bf16.gmra.mxu0 %v1576_v38 }
  0x82   :  { %1019 = vmatmul.bf16.gmra.mxu3 %v1864_v39  ;;  %1068 = vmatmul.bf16.gmra.mxu1 %v1580_v40  ;;  %v1644_v40 = vor.u32 %v2024_v35, %v1643_v34  ;;  %v1647_v34 = vld [vmem:[%s3159_s0 + $0x120] sm:$0xf]  ;;  %v2026_v35 = vld [vmem:[%s3159_s0 + $0x128] sm:$0xf0] }
  0x8a   :  { %1965 = vmatmul.msk.bf16.gmra.mxu2 %vm764_vm0, %v1608_v43 }
  0x8d   :  { %v1208_v50 = vpop.f32.mrf.mxu2 }
  0x91   :  { %904 = vmatmul.bf16.gmra.mxu0 %v1588_v51 }
  0x92   :  { %1024 = vmatmul.bf16.gmra.mxu3 %v1876_v52  ;;  %1073 = vmatmul.bf16.gmra.mxu1 %v1592_v53  ;;  %v1624_v53 = vor.u32 %v2020_v45, %v1623_v44  ;;  %v1648_v44 = vor.u32 %v2026_v35, %v1647_v34  ;;  %v1865_v34 = vld [vmem:[%s3159_s0 + $0x2dc] sm:$0xf0] }
  0x95   :  { %v1210_v56 = vpop.f32.mrf.mxu2 }
  0x9a   :  { %1966 = vmatmul.msk.bf16.gmra.mxu2 %vm764_vm0, %v1620_v57 }
  0x9d   :  { %v1213_v0 = vpop.f32.mrf.mxu2 }
  0x9e   :  { %v870_v2 = vpop.f32.mrf.mxu0 }
  0x9f   :  { %v1039_v5 = vpop.f32.mrf.mxu1 }
  0xa0   :  { %v1040_v6 = vadd.f32 %v1039_v5, %v870_v2  ;;  %v1656_v2 = vor.u32 %v2027_v61, %v1655_v60 }
  0xa1   :  { %909 = vmatmul.bf16.gmra.mxu0 %v1600_v1 }
  0xa2   :  { %v1209_v7 = vadd.f32 %v1208_v50, %v1040_v6  ;;  %1078 = vmatmul.bf16.gmra.mxu1 %v1604_v3  ;;  %1158 = vmatmul.bf16.vlgmr.msrb.gmra.mxu3 %v1796_v4  ;;  %v1635_v6 = vld [vmem:[%s3159_s0 + $0x108] sm:$0xf] }
  0xa4   :  { %v1368_v10 = vpack.c.bf16 %v1209_v7, %v1209_v7  ;;  %v2023_v7 = vld [vmem:[%s3159_s0 + $0x110] sm:$0xf0] }
  0xa5   :  { %v2436_v11 = vpop.f32.mrf.mxu3  ;;  %v1215_v12 = vpop.f32.mrf.mxu2 }
  0xa6   :  { %1433 = vst.msk [vmem:[%s3160_s2] sm:$0xf] %vm1432_vm1, %v1368_v10  ;;  %v872_v13 = vpop.f32.mrf.mxu0  ;;  %v2070_v10 = vld [vmem:[%s3159_s0 + $0x28c] sm:$0xf] }
  0xa7   :  { %v1041_v15 = vpop.f32.mrf.mxu1 }
  0xa8   :  { %v1042_v16 = vadd.f32 %v1041_v15, %v872_v13 }
  0xaa   :  { %v1211_v17 = vadd.f32 %v1210_v56, %v1042_v16  ;;  %1967 = vmatmul.msk.bf16.gmra.mxu2 %vm764_vm0, %v1632_v14  ;;  %v1820_v56 = vor.u32 %v2067_v48, %v1817_v49  ;;  %v1636_v16 = vor.u32 %v2023_v7, %v1635_v6 }
  0xac   :  { %v1369_v24 = vpack.c.bf16 %v1211_v17, %v1211_v17 }
  0xad   :  { %v2461_v25 = vpop.f32.mrf.mxu3  ;;  %v1218_v26 = vpop.f32.mrf.mxu2 }
  0xae   :  { %1434 = vst.msk [vmem:[%s3160_s2 + $0x4] sm:$0xf] %vm1432_vm1, %v1369_v24  ;;  %v875_v28 = vpop.f32.mrf.mxu0  ;;  %v2030_v24 = vld [vmem:[%s3159_s0 + $0x148] sm:$0xf0] }
  0xaf   :  { %v1044_v31 = vpop.f32.mrf.mxu1 }
  0xb0   :  { %v1045_v32 = vadd.f32 %v1044_v31, %v875_v28 }
  0xb1   :  { %914 = vmatmul.bf16.gmra.mxu0 %v1612_v27 }
  0xb2   :  { %v1214_v33 = vadd.f32 %v1213_v0, %v1045_v32  ;;  %1083 = vmatmul.bf16.gmra.mxu1 %v1616_v29  ;;  %1163 = vmatmul.bf16.gmra.mxu3 %v1808_v30  ;;  %v1668_v30 = vor.u32 %v2030_v24, %v1667_v23 }
  0xb4   :  { %v1370_v36 = vpack.c.bf16 %v1214_v33, %v1214_v33 }
  0xb5   :  { %v2473_v37 = vpop.f32.mrf.mxu3  ;;  %v1220_v38 = vpop.f32.mrf.mxu2 }
  0xb6   :  { %1435 = vst.msk [vmem:[%s3160_s2 + $0x8] sm:$0xf] %vm1432_vm1, %v1370_v36  ;;  %v877_v39 = vpop.f32.mrf.mxu0  ;;  %v2025_v36 = vld [vmem:[%s3159_s0 + $0x124] sm:$0xf] }
  0xb7   :  { %v1046_v41 = vpop.f32.mrf.mxu1 }
  0xb8   :  { %v1047_v42 = vadd.f32 %v1046_v41, %v877_v39  ;;  %v2073_v39 = vld [vmem:[%s3159_s0 + $0x2a4] sm:$0xf] }
  0xba   :  { %v1216_v43 = vadd.f32 %v1215_v12, %v1047_v42  ;;  %1968 = vmatmul.msk.bf16.gmra.mxu2 %vm764_vm0, %v1644_v40  ;;  %v1829_v12 = vld [vmem:[%s3159_s0 + $0x294] sm:$0xf0]  ;;  %v1841_v40 = vld [vmem:[%s3159_s0 + $0x2ac] sm:$0xf0] }
  0xbb   :  { %v1832_v19 = vor.u32 %v2070_v10, %v1829_v12  ;;  %v1844_v47 = vor.u32 %v2073_v39, %v1841_v40 }
  0xbc   :  { %v1371_v50 = vpack.c.bf16 %v1216_v43, %v1216_v43 }
  0xbd   :  { %v2498_v51 = vpop.f32.mrf.mxu3  ;;  %v1223_v52 = vpop.f32.mrf.mxu2 }
  0xbe   :  { %1436 = vst.msk [vmem:[%s3160_s2 + $0xc] sm:$0xf] %vm1432_vm1, %v1371_v50  ;;  %v880_v54 = vpop.f32.mrf.mxu0 }
  0xbf   :  { %v1049_v57 = vpop.f32.mrf.mxu1 }
  0xc0   :  { %v1050_v58 = vadd.f32 %v1049_v57, %v880_v54 }
  0xc1   :  { %919 = vmatmul.bf16.gmra.mxu0 %v1624_v53  ;;  %v2033_v53 = vld [vmem:[%s3159_s0 + $0x160] sm:$0xf0] }
  0xc2   :  { %v1219_v59 = vadd.f32 %v1218_v26, %v1050_v58  ;;  %1088 = vmatmul.bf16.gmra.mxu1 %v1628_v55  ;;  %1168 = vmatmul.bf16.gmra.mxu3 %v1820_v56 }
  0xc4   :  { %v1372_v62 = vpack.c.bf16 %v1219_v59, %v1219_v59 }
  0xc5   :  { %v2510_v63 = vpop.f32.mrf.mxu3  ;;  %v1225_v0 = vpop.f32.mrf.mxu2 }
  0xc6   :  { %1437 = vst.msk [vmem:[%s3160_s2 + $0x10] sm:$0xf] %vm1432_vm1, %v1372_v62  ;;  %v882_v1 = vpop.f32.mrf.mxu0  ;;  %v1659_v62 = vld [vmem:[%s3159_s0 + $0x138] sm:$0xf] }
  0xc7   :  { %v1051_v3 = vpop.f32.mrf.mxu1 }
  0xc8   :  { %v1052_v4 = vadd.f32 %v1051_v3, %v882_v1  ;;  %v2028_v1 = vld [vmem:[%s3159_s0 + $0x13c] sm:$0xf] }
  0xc9   :  { %v2076_v3 = vld [vmem:[%s3159_s0 + $0x2bc] sm:$0xf] }
  0xca   :  { %v1221_v5 = vadd.f32 %v1220_v38, %v1052_v4  ;;  %1969 = vmatmul.msk.bf16.gmra.mxu2 %vm764_vm0, %v1656_v2  ;;  %v1649_v38 = vld [vmem:[%s3159_s0 + $0x12c] sm:$0xf0]  ;;  %v1661_v2 = vld [vmem:[%s3159_s0 + $0x144] sm:$0xf0] }
  0xcb   :  { %v1652_v46 = vor.u32 %v2025_v36, %v1649_v38  ;;  %v1853_v4 = vld [vmem:[%s3159_s0 + $0x2c4] sm:$0xf0]  ;;  %v1664_v10 = vor.u32 %v2028_v1, %v1661_v2  ;;  %v1877_v1 = vld [vmem:[%s3159_s0 + $0x2f4] sm:$0xf0] }
  0xcc   :  { %v1373_v13 = vpack.c.bf16 %v1221_v5, %v1221_v5  ;;  %v1856_v12 = vor.u32 %v2076_v3, %v1853_v4 }
  0xcd   :  { %v2535_v14 = vpop.f32.mrf.mxu3  ;;  %v1228_v15 = vpop.f32.mrf.mxu2 }
  0xce   :  { %1438 = vst.msk [vmem:[%s3160_s2 + $0x14] sm:$0xf] %vm1432_vm1, %v1373_v13  ;;  %v885_v17 = vpop.f32.mrf.mxu0 }
  0xcf   :  { %v1054_v20 = vpop.f32.mrf.mxu1 }
  0xd0   :  { %v1055_v21 = vadd.f32 %v1054_v20, %v885_v17  ;;  %v1691_v17 = vld [vmem:[%s3159_s0 + $0x170] sm:$0xf] }
  0xd1   :  { %924 = vmatmul.bf16.gmra.mxu0 %v1636_v16 }
  0xd2   :  { %v1224_v22 = vadd.f32 %v1223_v52, %v1055_v21  ;;  %1093 = vmatmul.bf16.gmra.mxu1 %v1640_v18  ;;  %1173 = vmatmul.bf16.gmra.mxu3 %v1832_v19  ;;  %v1679_v52 = vld [vmem:[%s3159_s0 + $0x158] sm:$0xf]  ;;  %v2036_v18 = vld [vmem:[%s3159_s0 + $0x178] sm:$0xf0] }
  0xd3   :  { %v1680_v58 = vor.u32 %v2033_v53, %v1679_v52  ;;  %v1692_v23 = vor.u32 %v2036_v18, %v1691_v17 }
  0xd4   :  { %v1374_v26 = vpack.c.bf16 %v1224_v22, %v1224_v22 }
  0xd5   :  { %v2547_v27 = vpop.f32.mrf.mxu3  ;;  %v1230_v28 = vpop.f32.mrf.mxu2 }
  0xd6   :  { %1439 = vst.msk [vmem:[%s3160_s2 + $0x18] sm:$0xf] %vm1432_vm1, %v1374_v26  ;;  %v887_v29 = vpop.f32.mrf.mxu0 }
  0xd7   :  { %v1056_v31 = vpop.f32.mrf.mxu1 }
  0xd8   :  { %v1057_v32 = vadd.f32 %v1056_v31, %v887_v29  ;;  %v1671_v29 = vld [vmem:[%s3159_s0 + $0x150] sm:$0xf]  ;;  %v2031_v31 = vld [vmem:[%s3159_s0 + $0x154] sm:$0xf] }
  0xda   :  { %v1226_v33 = vadd.f32 %v1225_v0, %v1057_v32  ;;  %1970 = vmatmul.msk.bf16.gmra.mxu2 %vm764_vm0, %v1668_v30  ;;  %v2029_v0 = vld [vmem:[%s3159_s0 + $0x140] sm:$0xf0]  ;;  %v2032_v30 = vld [vmem:[%s3159_s0 + $0x158] sm:$0xf0]  ;;  %v1673_v32 = vld [vmem:[%s3159_s0 + $0x15c] sm:$0xf0] }
  0xdb   :  { %v1660_v8 = vor.u32 %v2029_v0, %v1659_v62  ;;  %v1672_v39 = vor.u32 %v2032_v30, %v1671_v29  ;;  %v1685_v62 = vld [vmem:[%s3159_s0 + $0x174] sm:$0xf0]  ;;  %v2082_v0 = vld [vmem:[%s3159_s0 + $0x2ec] sm:$0xf]  ;;  %v2037_v30 = vld [vmem:[%s3159_s0 + $0x184] sm:$0xf] }
  0xdc   :  { %v1375_v41 = vpack.c.bf16 %v1226_v33, %v1226_v33  ;;  %v2079_v33 = vld [vmem:[%s3159_s0 + $0x2d4] sm:$0xf]  ;;  %v2038_v29 = vld [vmem:[%s3159_s0 + $0x188] sm:$0xf0] }
  0xdd   :  { %v2572_v42 = vpop.f32.mrf.mxu3  ;;  %v1233_v43 = vpop.f32.mrf.mxu2 }
  0xde   :  { %1440 = vst.msk [vmem:[%s3160_s2 + $0x1c] sm:$0xf] %vm1432_vm1, %v1375_v41  ;;  %v890_v45 = vpop.f32.mrf.mxu0  ;;  %v1676_v41 = vor.u32 %v2031_v31, %v1673_v32  ;;  %v1697_v31 = vld [vmem:[%s3159_s0 + $0x18c] sm:$0xf0]  ;;  %v1823_v32 = vld [vmem:[%s3159_s0 + $0x278] sm:$0xf] }
  0xdf   :  { %v1059_v48 = vpop.f32.mrf.mxu1 }
  0xe0   :  { %v1060_v49 = vadd.f32 %v1059_v48, %v890_v45  ;;  %v2039_v48 = vld [vmem:[%s3159_s0 + $0x190] sm:$0xf0] }
  0xe1   :  { %929 = vmatmul.bf16.gmra.mxu0 %v1648_v44 }
  0xe2   :  { %v1229_v50 = vadd.f32 %v1228_v15, %v1060_v49  ;;  %1098 = vmatmul.bf16.gmra.mxu1 %v1652_v46  ;;  %1178 = vmatmul.bf16.gmra.mxu3 %v1844_v47  ;;  %v1703_v47 = vld [vmem:[%s3159_s0 + $0x188] sm:$0xf] }
  0xe4   :  { %v1376_v54 = vpack.c.bf16 %v1229_v50, %v1229_v50 }
  0xe5   :  { %v2584_v55 = vpop.f32.mrf.mxu3  ;;  %v1235_v56 = vpop.f32.mrf.mxu2 }
  0xe6   :  { %1441 = vst.msk [vmem:[%s3160_s2 + $0x20] sm:$0xf] %vm1432_vm1, %v1376_v54  ;;  %v892_v57 = vpop.f32.mrf.mxu0  ;;  %v1704_v54 = vor.u32 %v2039_v48, %v1703_v47  ;;  %v1727_v47 = vld [vmem:[%s3159_s0 + $0x1b8] sm:$0xf]  ;;  %v2045_v48 = vld [vmem:[%s3159_s0 + $0x1c0] sm:$0xf0] }
  0xe7   :  { %v1061_v59 = vpop.f32.mrf.mxu1 }
  0xe8   :  { %v1062_v60 = vadd.f32 %v1061_v59, %v892_v57  ;;  %v1683_v59 = vld [vmem:[%s3159_s0 + $0x168] sm:$0xf] }
  0xea   :  { %v1231_v61 = vadd.f32 %v1230_v28, %v1062_v60  ;;  %1971 = vmatmul.msk.bf16.gmra.mxu2 %vm764_vm0, %v1680_v58  ;;  %v2035_v60 = vld [vmem:[%s3159_s0 + $0x170] sm:$0xf0] }
  0xec   :  { %v1377_v5 = vpack.c.bf16 %v1231_v61, %v1231_v61  ;;  %v2034_v61 = vld [vmem:[%s3159_s0 + $0x16c] sm:$0xf] }
  0xed   :  { %v2609_v6 = vpop.f32.mrf.mxu3  ;;  %v1238_v7 = vpop.f32.mrf.mxu2 }
  0xee   :  { %1442 = vst.msk [vmem:[%s3160_s2 + $0x24] sm:$0xf] %vm1432_vm1, %v1377_v5  ;;  %v895_v9 = vpop.f32.mrf.mxu0  ;;  %v1684_v5 = vor.u32 %v2035_v60, %v1683_v59  ;;  %v1707_v60 = vld [vmem:[%s3159_s0 + $0x198] sm:$0xf] }
  0xef   :  { %v1064_v13 = vpop.f32.mrf.mxu1 }
  0xf0   :  { %v1065_v15 = vadd.f32 %v1064_v13, %v895_v9  ;;  %v1880_v9 = vor.u32 %v2082_v0, %v1877_v1  ;;  %v1709_v0 = vld [vmem:[%s3159_s0 + $0x1a4] sm:$0xf0]  ;;  %v1835_v1 = vld [vmem:[%s3159_s0 + $0x290] sm:$0xf] }
  0xf1   :  { %934 = vmatmul.bf16.gmra.mxu0 %v1660_v8  ;;  %v1688_v8 = vor.u32 %v2034_v61, %v1685_v62  ;;  %v2041_v61 = vld [vmem:[%s3159_s0 + $0x1a0] sm:$0xf0]  ;;  %v2040_v62 = vld [vmem:[%s3159_s0 + $0x19c] sm:$0xf] }
  0xf2   :  { %v1234_v16 = vadd.f32 %v1233_v43, %v1065_v15  ;;  %1103 = vmatmul.bf16.gmra.mxu1 %v1664_v10  ;;  %1183 = vmatmul.bf16.gmra.mxu3 %v1856_v12  ;;  %v1868_v43 = vor.u32 %v2079_v33, %v1865_v34  ;;  %v1715_v15 = vld [vmem:[%s3159_s0 + $0x1a0] sm:$0xf]  ;;  %v2069_v33 = vld [vmem:[%s3159_s0 + $0x280] sm:$0xf0] }
  0xf4   :  { %v1378_v19 = vpack.c.bf16 %v1234_v16, %v1234_v16  ;;  %v2042_v16 = vld [vmem:[%s3159_s0 + $0x1a8] sm:$0xf0] }
  0xf5   :  { %v2621_v20 = vpop.f32.mrf.mxu3  ;;  %v1240_v21 = vpop.f32.mrf.mxu2 }
  0xf6   :  { %1443 = vst.msk [vmem:[%s3160_s2 + $0x28] sm:$0xf] %vm1432_vm1, %v1378_v19  ;;  %v897_v22 = vpop.f32.mrf.mxu0 }
  0xf7   :  { %v1066_v24 = vpop.f32.mrf.mxu1 }
  0xf8   :  { %v1067_v26 = vadd.f32 %v1066_v24, %v897_v22  ;;  %v1716_v22 = vor.u32 %v2042_v16, %v1715_v15 }
  0xfa   :  { %v1236_v28 = vadd.f32 %v1235_v56, %v1067_v26  ;;  %1972 = vmatmul.msk.bf16.gmra.mxu2 %vm764_vm0, %v1692_v23 }
  0xfc   :  { %v1379_v35 = vpack.c.bf16 %v1236_v28, %v1236_v28  ;;  %v1695_v28 = vld [vmem:[%s3159_s0 + $0x180] sm:$0xf] }
  0xfd   :  { %v2646_v36 = vpop.f32.mrf.mxu3  ;;  %v1243_v38 = vpop.f32.mrf.mxu2 }
  0xfe   :  { %1444 = vst.msk [vmem:[%s3160_s2 + $0x2c] sm:$0xf] %vm1432_vm1, %v1379_v35  ;;  %v900_v40 = vpop.f32.mrf.mxu0 }
  0xff   :  { %v1069_v44 = vpop.f32.mrf.mxu1 }
 0x100   :  { %v1070_v45 = vadd.f32 %v1069_v44, %v900_v40 }
 0x101   :  { %939 = vmatmul.bf16.gmra.mxu0 %v1672_v39  ;;  %v1696_v39 = vor.u32 %v2038_v29, %v1695_v28 }
 0x102   :  { %v1239_v46 = vadd.f32 %v1238_v7, %v1070_v45  ;;  %1108 = vmatmul.bf16.gmra.mxu1 %v1676_v41  ;;  %1188 = vmatmul.bf16.gmra.mxu3 %v1868_v43  ;;  %v1700_v41 = vor.u32 %v2037_v30, %v1697_v31  ;;  %v1824_v43 = vor.u32 %v2069_v33, %v1823_v32  ;;  %v1719_v31 = vld [vmem:[%s3159_s0 + $0x1b0] sm:$0xf]  ;;  %v2044_v32 = vld [vmem:[%s3159_s0 + $0x1b8] sm:$0xf0]  ;;  %v2043_v33 = vld [vmem:[%s3159_s0 + $0x1b4] sm:$0xf] }
 0x104   :  { %v1380_v49 = vpack.c.bf16 %v1239_v46, %v1239_v46 }
 0x105   :  { %v2658_v50 = vpop.f32.mrf.mxu3  ;;  %v1245_v52 = vpop.f32.mrf.mxu2 }
 0x106   :  { %1445 = vst.msk [vmem:[%s3160_s2 + $0x30] sm:$0xf] %vm1432_vm1, %v1380_v49  ;;  %v902_v53 = vpop.f32.mrf.mxu0 }
 0x107   :  { %v1071_v56 = vpop.f32.mrf.mxu1 }
 0x108   :  { %v1072_v57 = vadd.f32 %v1071_v56, %v902_v53  ;;  %v1728_v56 = vor.u32 %v2045_v48, %v1727_v47 }
 0x10a   :  { %v1241_v58 = vadd.f32 %v1240_v21, %v1072_v57  ;;  %1973 = vmatmul.msk.bf16.gmra.mxu2 %vm764_vm0, %v1704_v54 }
 0x10c   :  { %v1381_v2 = vpack.c.bf16 %v1241_v58, %v1241_v58 }
 0x10d   :  { %v2683_v3 = vpop.f32.mrf.mxu3  ;;  %v1248_v4 = vpop.f32.mrf.mxu2 }
 0x10e   :  { %1446 = vst.msk [vmem:[%s3160_s2 + $0x34] sm:$0xf] %vm1432_vm1, %v1381_v2  ;;  %v905_v7 = vpop.f32.mrf.mxu0  ;;  %v2072_v2 = vld [vmem:[%s3159_s0 + $0x298] sm:$0xf0] }
 0x10f   :  { %v1074_v10 = vpop.f32.mrf.mxu1 }
 0x110   :  { %v1075_v12 = vadd.f32 %v1074_v10, %v905_v7  ;;  %v1712_v10 = vor.u32 %v2040_v62, %v1709_v0 }
 0x111   :  { %944 = vmatmul.bf16.gmra.mxu0 %v1684_v5 }
 0x112   :  { %v1244_v13 = vadd.f32 %v1243_v38, %v1075_v12  ;;  %1113 = vmatmul.bf16.gmra.mxu1 %v1688_v8  ;;  %1193 = vmatmul.bf16.gmra.mxu3 %v1880_v9  ;;  %v1708_v8 = vor.u32 %v2041_v61, %v1707_v60  ;;  %v1836_v12 = vor.u32 %v2072_v2, %v1835_v1  ;;  %v1731_v2 = vld [vmem:[%s3159_s0 + $0x1c8] sm:$0xf] }
 0x114   :  { %v1382_v17 = vpack.c.bf16 %v1244_v13, %v1244_v13 }
 0x115   :  { %v2695_v18 = vpop.f32.mrf.mxu3  ;;  %v1250_v19 = vpop.f32.mrf.mxu2 }
 0x116   :  { %1447 = vst.msk [vmem:[%s3160_s2 + $0x38] sm:$0xf] %vm1432_vm1, %v1382_v17  ;;  %v907_v21 = vpop.f32.mrf.mxu0  ;;  %v1739_v17 = vld [vmem:[%s3159_s0 + $0x1d0] sm:$0xf] }
 0x117   :  { %v1076_v23 = vpop.f32.mrf.mxu1 }
 0x118   :  { %v1077_v24 = vadd.f32 %v1076_v23, %v907_v21 }
 0x11a   :  { %v1246_v26 = vadd.f32 %v1245_v52, %v1077_v24  ;;  %1974 = vmatmul.msk.bf16.gmra.mxu2 %vm764_vm0, %v1716_v22 }
 0x11c   :  { %v1383_v34 = vpack.c.bf16 %v1246_v26, %v1246_v26 }
 0x11d   :  { %v2720_v35 = vpop.f32.mrf.mxu3  ;;  %v1253_v38 = vpop.f32.mrf.mxu2 }
 0x11e   :  { %1448 = vst.msk [vmem:[%s3160_s2 + $0x3c] sm:$0xf] %vm1432_vm1, %v1383_v34  ;;  %v910_v40 = vpop.f32.mrf.mxu0  ;;  %v1721_v34 = vld [vmem:[%s3159_s0 + $0x1bc] sm:$0xf0] }
 0x11f   :  { %v1079_v44 = vpop.f32.mrf.mxu1 }
 0x120   :  { %v1080_v45 = vadd.f32 %v1079_v44, %v910_v40  ;;  %v1720_v44 = vor.u32 %v2044_v32, %v1719_v31 }
 0x121   :  { %949 = vmatmul.bf16.gmra.mxu0 %v1696_v39  ;;  %v2075_v39 = vld [vmem:[%s3159_s0 + $0x2b0] sm:$0xf0] }
 0x122   :  { %v1249_v46 = vadd.f32 %v1248_v4, %v1080_v45  ;;  %1118 = vmatmul.bf16.gmra.mxu1 %v1700_v41  ;;  %1983 = vmatmul.msk.bf16.vlgmr.msra.gmra.mxu3 %vm764_vm0, %v1824_v43 }
 0x124   :  { %v1384_v49 = vpack.c.bf16 %v1249_v46, %v1249_v46  ;;  %v1724_v46 = vor.u32 %v2043_v33, %v1721_v34 }
 0x125   :  { %v2733_v52 = vpop.f32.mrf.mxu3  ;;  %v1255_v53 = vpop.f32.mrf.mxu2 }
 0x126   :  { %1449 = vst.msk [vmem:[%s3160_s2 + $0x40] sm:$0xf] %vm1432_vm1, %v1384_v49  ;;  %v912_v54 = vpop.f32.mrf.mxu0 }
 0x127   :  { %v1081_v57 = vpop.f32.mrf.mxu1 }
 0x128   :  { %v1082_v58 = vadd.f32 %v1081_v57, %v912_v54  ;;  %v1751_v54 = vld [vmem:[%s3159_s0 + $0x1e8] sm:$0xf] }
 0x12a   :  { %v1251_v59 = vadd.f32 %v1250_v19, %v1082_v58  ;;  %1975 = vmatmul.msk.bf16.gmra.mxu2 %vm764_vm0, %v1728_v56  ;;  %v2048_v19 = vld [vmem:[%s3159_s0 + $0x1d8] sm:$0xf0]  ;;  %v2051_v56 = vld [vmem:[%s3159_s0 + $0x1f0] sm:$0xf0] }
 0x12b   :  { %v1740_v26 = vor.u32 %v2048_v19, %v1739_v17  ;;  %v1752_v61 = vor.u32 %v2051_v56, %v1751_v54 }
 0x12c   :  { %v1385_v4 = vpack.c.bf16 %v1251_v59, %v1251_v59 }
 0x12d   :  { %v2758_v5 = vpop.f32.mrf.mxu3  ;;  %v1258_v7 = vpop.f32.mrf.mxu2 }
 0x12e   :  { %1450 = vst.msk [vmem:[%s3160_s2 + $0x44] sm:$0xf] %vm1432_vm1, %v1385_v4  ;;  %v915_v9 = vpop.f32.mrf.mxu0  ;;  %v2047_v4 = vld [vmem:[%s3159_s0 + $0x1d0] sm:$0xf0] }
 0x12f   :  { %v1084_v13 = vpop.f32.mrf.mxu1 }
 0x130   :  { %v1085_v15 = vadd.f32 %v1084_v13, %v915_v9  ;;  %v1859_v9 = vld [vmem:[%s3159_s0 + $0x2c0] sm:$0xf] }
 0x131   :  { %954 = vmatmul.bf16.gmra.mxu0 %v1708_v8  ;;  %v1733_v8 = vld [vmem:[%s3159_s0 + $0x1d4] sm:$0xf0] }
 0x132   :  { %v1254_v16 = vadd.f32 %v1253_v38, %v1085_v15  ;;  %1123 = vmatmul.bf16.gmra.mxu1 %v1712_v10  ;;  %1984 = vmatmul.msk.bf16.gmra.mxu3 %vm764_vm0, %v1836_v12  ;;  %v1847_v38 = vld [vmem:[%s3159_s0 + $0x2a8] sm:$0xf]  ;;  %v2078_v10 = vld [vmem:[%s3159_s0 + $0x2c8] sm:$0xf0] }
 0x133   :  { %v1848_v47 = vor.u32 %v2075_v39, %v1847_v38 }
 0x134   :  { %v1386_v21 = vpack.c.bf16 %v1254_v16, %v1254_v16  ;;  %v1732_v16 = vor.u32 %v2047_v4, %v1731_v2  ;;  %v2057_v2 = vld [vmem:[%s3159_s0 + $0x220] sm:$0xf0] }
 0x135   :  { %v2771_v22 = vpop.f32.mrf.mxu3  ;;  %v1260_v23 = vpop.f32.mrf.mxu2 }
 0x136   :  { %1451 = vst.msk [vmem:[%s3160_s2 + $0x48] sm:$0xf] %vm1432_vm1, %v1386_v21  ;;  %v917_v24 = vpop.f32.mrf.mxu0  ;;  %v1860_v21 = vor.u32 %v2078_v10, %v1859_v9 }
 0x137   :  { %v1086_v28 = vpop.f32.mrf.mxu1 }
 0x138   :  { %v1087_v29 = vadd.f32 %v1086_v28, %v917_v24  ;;  %v1763_v28 = vld [vmem:[%s3159_s0 + $0x200] sm:$0xf] }
 0x13a   :  { %v1256_v30 = vadd.f32 %v1255_v53, %v1087_v29  ;;  %1976 = vmatmul.msk.bf16.gmra.mxu2 %vm764_vm0, %v1740_v26  ;;  %v2054_v29 = vld [vmem:[%s3159_s0 + $0x208] sm:$0xf0] }
 0x13b   :  { %v1764_v34 = vor.u32 %v2054_v29, %v1763_v28 }
 0x13c   :  { %v1387_v40 = vpack.c.bf16 %v1256_v30, %v1256_v30 }
 0x13d   :  { %v2796_v41 = vpop.f32.mrf.mxu3  ;;  %v1263_v43 = vpop.f32.mrf.mxu2 }
 0x13e   :  { %1452 = vst.msk [vmem:[%s3160_s2 + $0x4c] sm:$0xf] %vm1432_vm1, %v1387_v40  ;;  %v920_v45 = vpop.f32.mrf.mxu0 }
 0x13f   :  { %v1089_v48 = vpop.f32.mrf.mxu1 }
 0x140   :  { %v1090_v49 = vadd.f32 %v1089_v48, %v920_v45  ;;  %v2049_v45 = vld [vmem:[%s3159_s0 + $0x1e4] sm:$0xf] }
 0x141   :  { %959 = vmatmul.bf16.gmra.mxu0 %v1720_v44  ;;  %v2050_v44 = vld [vmem:[%s3159_s0 + $0x1e8] sm:$0xf0]  ;;  %v2081_v48 = vld [vmem:[%s3159_s0 + $0x2e0] sm:$0xf0] }
 0x142   :  { %v1259_v53 = vadd.f32 %v1258_v7, %v1090_v49  ;;  %1128 = vmatmul.bf16.gmra.mxu1 %v1724_v46  ;;  %1985 = vmatmul.msk.bf16.gmra.mxu3 %vm764_vm0, %v1848_v47  ;;  %v2046_v7 = vld [vmem:[%s3159_s0 + $0x1cc] sm:$0xf]  ;;  %v1745_v46 = vld [vmem:[%s3159_s0 + $0x1ec] sm:$0xf0]  ;;  %v1871_v47 = vld [vmem:[%s3159_s0 + $0x2d8] sm:$0xf] }
 0x143   :  { %v1736_v19 = vor.u32 %v2046_v7, %v1733_v8 }
 0x144   :  { %v1388_v57 = vpack.c.bf16 %v1259_v53, %v1259_v53 }
 0x145   :  { %v2809_v58 = vpop.f32.mrf.mxu3  ;;  %v1265_v59 = vpop.f32.mrf.mxu2 }
 0x146   :  { %1453 = vst.msk [vmem:[%s3160_s2 + $0x50] sm:$0xf] %vm1432_vm1, %v1388_v57  ;;  %v922_v60 = vpop.f32.mrf.mxu0 }
 0x147   :  { %v1091_v62 = vpop.f32.mrf.mxu1 }
 0x148   :  { %v1092_v0 = vadd.f32 %v1091_v62, %v922_v60  ;;  %v1872_v60 = vor.u32 %v2081_v48, %v1871_v47 }
 0x14a   :  { %v1261_v1 = vadd.f32 %v1260_v23, %v1092_v0  ;;  %1977 = vmatmul.msk.bf16.gmra.mxu2 %vm764_vm0, %v1752_v61 }
 0x14c   :  { %v1389_v12 = vpack.c.bf16 %v1261_v1, %v1261_v1  ;;  %v1775_v1 = vld [vmem:[%s3159_s0 + $0x218] sm:$0xf] }
 0x14d   :  { %v2834_v13 = vpop.f32.mrf.mxu3  ;;  %v1268_v15 = vpop.f32.mrf.mxu2  ;;  %v1776_v10 = vor.u32 %v2057_v2, %v1775_v1 }
 0x14e   :  { %1454 = vst.msk [vmem:[%s3160_s2 + $0x54] sm:$0xf] %vm1432_vm1, %v1389_v12  ;;  %v925_v17 = vpop.f32.mrf.mxu0 }
 0x14f   :  { %v1094_v23 = vpop.f32.mrf.mxu1 }
 0x150   :  { %v1095_v24 = vadd.f32 %v1094_v23, %v925_v17  ;;  %v1755_v17 = vld [vmem:[%s3159_s0 + $0x1f8] sm:$0xf]  ;;  %v1757_v23 = vld [vmem:[%s3159_s0 + $0x204] sm:$0xf0] }
 0x151   :  { %964 = vmatmul.bf16.gmra.mxu0 %v1732_v16 }
 0x152   :  { %v1264_v26 = vadd.f32 %v1263_v43, %v1095_v24  ;;  %1133 = vmatmul.bf16.gmra.mxu1 %v1736_v19  ;;  %1986 = vmatmul.msk.bf16.gmra.mxu3 %vm764_vm0, %v1860_v21  ;;  %v1743_v43 = vld [vmem:[%s3159_s0 + $0x1e0] sm:$0xf]  ;;  %v2053_v19 = vld [vmem:[%s3159_s0 + $0x200] sm:$0xf0]  ;;  %v2052_v21 = vld [vmem:[%s3159_s0 + $0x1fc] sm:$0xf] }
 0x153   :  { %v1744_v56 = vor.u32 %v2050_v44, %v1743_v43  ;;  %v1883_v24 = vld [vmem:[%s3159_s0 + $0x2f0] sm:$0xf] }
 0x154   :  { %v1390_v30 = vpack.c.bf16 %v1264_v26, %v1264_v26  ;;  %v2084_v26 = vld [vmem:[%s3159_s0 + $0x2f8] sm:$0xf0]  ;;  %v1787_v44 = vld [vmem:[%s3159_s0 + $0x230] sm:$0xf] }
 0x155   :  { %v2847_v31 = vpop.f32.mrf.mxu3  ;;  %v1270_v32 = vpop.f32.mrf.mxu2 }
 0x156   :  { %1455 = vst.msk [vmem:[%s3160_s2 + $0x58] sm:$0xf] %vm1432_vm1, %v1390_v30  ;;  %v927_v33 = vpop.f32.mrf.mxu0 }
 0x157   :  { %v1096_v38 = vpop.f32.mrf.mxu1 }
 0x158   :  { %v1097_v39 = vadd.f32 %v1096_v38, %v927_v33  ;;  %v1884_v38 = vor.u32 %v2084_v26, %v1883_v24 }
 0x15a   :  { %v1266_v40 = vadd.f32 %v1265_v59, %v1097_v39  ;;  %1978 = vmatmul.msk.bf16.gmra.mxu2 %vm764_vm0, %v1764_v34  ;;  %v1748_v59 = vor.u32 %v2049_v45, %v1745_v46  ;;  %v1760_v34 = vor.u32 %v2052_v21, %v1757_v23  ;;  %v2060_v45 = vld [vmem:[%s3159_s0 + $0x238] sm:$0xf0] }
 0x15c   :  { %v1391_v49 = vpack.c.bf16 %v1266_v40, %v1266_v40 }
 0x15d   :  { %v2872_v53 = vpop.f32.mrf.mxu3  ;;  %v1273_v54 = vpop.f32.mrf.mxu2 }
 0x15e   :  { %1456 = vst.msk [vmem:[%s3160_s2 + $0x5c] sm:$0xf] %vm1432_vm1, %v1391_v49  ;;  %v930_v57 = vpop.f32.mrf.mxu0 }
 0x15f   :  { %v1099_v61 = vpop.f32.mrf.mxu1 }
 0x160   :  { %v1100_v62 = vadd.f32 %v1099_v61, %v930_v57  ;;  %v2056_v61 = vld [vmem:[%s3159_s0 + $0x218] sm:$0xf0] }
 0x161   :  { %969 = vmatmul.bf16.gmra.mxu0 %v1744_v56 }
 0x162   :  { %v1269_v0 = vadd.f32 %v1268_v15, %v1100_v62  ;;  %1138 = vmatmul.bf16.gmra.mxu1 %v1748_v59  ;;  %1987 = vmatmul.msk.bf16.gmra.mxu3 %vm764_vm0, %v1872_v60  ;;  %v1767_v60 = vld [vmem:[%s3159_s0 + $0x210] sm:$0xf]  ;;  %v2055_v62 = vld [vmem:[%s3159_s0 + $0x214] sm:$0xf] }
 0x164   :  { %v1392_v4 = vpack.c.bf16 %v1269_v0, %v1269_v0  ;;  %v1769_v0 = vld [vmem:[%s3159_s0 + $0x21c] sm:$0xf0] }
 0x165   :  { %v2885_v7 = vpop.f32.mrf.mxu3  ;;  %v1275_v8 = vpop.f32.mrf.mxu2 }
 0x166   :  { %1457 = vst.msk [vmem:[%s3160_s2 + $0x60] sm:$0xf] %vm1432_vm1, %v1392_v4  ;;  %v932_v9 = vpop.f32.mrf.mxu0 }
 0x167   :  { %v1101_v12 = vpop.f32.mrf.mxu1 }
 0x168   :  { %v1102_v15 = vadd.f32 %v1101_v12, %v932_v9 }
 0x16a   :  { %v1271_v16 = vadd.f32 %v1270_v32, %v1102_v15  ;;  %1979 = vmatmul.msk.bf16.gmra.mxu2 %vm764_vm0, %v1776_v10  ;;  %v1756_v32 = vor.u32 %v2053_v19, %v1755_v17  ;;  %v1772_v10 = vor.u32 %v2055_v62, %v1769_v0  ;;  %v1799_v17 = vld [vmem:[%s3159_s0 + $0x248] sm:$0xf]  ;;  %v2063_v19 = vld [vmem:[%s3159_s0 + $0x250] sm:$0xf0] }
 0x16c   :  { %v1393_v28 = vpack.c.bf16 %v1271_v16, %v1271_v16 }
 0x16d   :  { %v2910_v29 = vpop.f32.mrf.mxu3  ;;  %v1278_v30 = vpop.f32.mrf.mxu2 }
 0x16e   :  { %1458 = vst.msk [vmem:[%s3160_s2 + $0x64] sm:$0xf] %vm1432_vm1, %v1393_v28  ;;  %v935_v33 = vpop.f32.mrf.mxu0  ;;  %v1800_v28 = vor.u32 %v2063_v19, %v1799_v17 }
 0x16f   :  { %v1104_v39 = vpop.f32.mrf.mxu1 }
 0x170   :  { %v1105_v40 = vadd.f32 %v1104_v39, %v935_v33  ;;  %v2058_v39 = vld [vmem:[%s3159_s0 + $0x22c] sm:$0xf] }
 0x171   :  { %974 = vmatmul.bf16.gmra.mxu0 %v1756_v32 }
 0x172   :  { %v1274_v43 = vadd.f32 %v1273_v54, %v1105_v40  ;;  %1143 = vmatmul.bf16.gmra.mxu1 %v1760_v34  ;;  %1988 = vmatmul.msk.bf16.gmra.mxu3 %vm764_vm0, %v1884_v38  ;;  %v1788_v54 = vor.u32 %v2060_v45, %v1787_v44  ;;  %v1779_v34 = vld [vmem:[%s3159_s0 + $0x228] sm:$0xf]  ;;  %v2059_v38 = vld [vmem:[%s3159_s0 + $0x230] sm:$0xf0]  ;;  %v1781_v40 = vld [vmem:[%s3159_s0 + $0x234] sm:$0xf0] }
 0x174   :  { %v1394_v46 = vpack.c.bf16 %v1274_v43, %v1274_v43 }
 0x175   :  { %v2923_v47 = vpop.f32.mrf.mxu3  ;;  %v1280_v48 = vpop.f32.mrf.mxu2 }
 0x176   :  { %1459 = vst.msk [vmem:[%s3160_s2 + $0x68] sm:$0xf] %vm1432_vm1, %v1394_v46  ;;  %v937_v49 = vpop.f32.mrf.mxu0  ;;  %v1780_v46 = vor.u32 %v2059_v38, %v1779_v34 }
 0x177   :  { %v1106_v56 = vpop.f32.mrf.mxu1 }
 0x178   :  { %v1107_v57 = vadd.f32 %v1106_v56, %v937_v49  ;;  %v1784_v49 = vor.u32 %v2058_v39, %v1781_v40 }
 0x17a   :  { %v1276_v59 = vadd.f32 %v1275_v8, %v1107_v57  ;;  %1980 = vmatmul.msk.bf16.gmra.mxu2 %vm764_vm0, %v1788_v54  ;;  %v1768_v8 = vor.u32 %v2056_v61, %v1767_v60  ;;  %v2066_v60 = vld [vmem:[%s3159_s0 + $0x268] sm:$0xf0] }
 0x17c   :  { %v1395_v1 = vpack.c.bf16 %v1276_v59, %v1276_v59  ;;  %v1811_v59 = vld [vmem:[%s3159_s0 + $0x260] sm:$0xf] }
 0x17d   :  { %v2942_v2 = vpop.f32.mrf.mxu3  ;;  %v1283_v4 = vpop.f32.mrf.mxu2 }
 0x17e   :  { %1460 = vst.msk [vmem:[%s3160_s2 + $0x6c] sm:$0xf] %vm1432_vm1, %v1395_v1  ;;  %v940_v9 = vpop.f32.mrf.mxu0 }
 0x17f   :  { %v1109_v12 = vpop.f32.mrf.mxu1 }
 0x180   :  { %v1110_v15 = vadd.f32 %v1109_v12, %v940_v9 }
 0x181   :  { %979 = vmatmul.bf16.gmra.mxu0 %v1768_v8 }
 0x182   :  { %v1279_v16 = vadd.f32 %v1278_v30, %v1110_v15  ;;  %1148 = vmatmul.bf16.gmra.mxu1 %v1772_v10 }
 0x184   :  { %v1396_v21 = vpack.c.bf16 %v1279_v16, %v1279_v16 }
 0x185   :  { %v2954_v23 = vpop.f32.mrf.mxu3  ;;  %v1285_v24 = vpop.f32.mrf.mxu2 }
 0x186   :  { %1461 = vst.msk [vmem:[%s3160_s2 + $0x70] sm:$0xf] %vm1432_vm1, %v1396_v21  ;;  %v942_v26 = vpop.f32.mrf.mxu0 }
 0x187   :  { %v1111_v30 = vpop.f32.mrf.mxu1 }
 0x188   :  { %v1112_v32 = vadd.f32 %v1111_v30, %v942_v26 }
 0x18a   :  { %v1281_v33 = vadd.f32 %v1280_v48, %v1112_v32  ;;  %1981 = vmatmul.msk.bf16.gmra.mxu2 %vm764_vm0, %v1800_v28  ;;  %v1170_v28 = vadd.f32 %v2809_v58, %v2510_v63  ;;  %v1172_v63 = vadd.f32 %v2834_v13, %v2535_v14  ;;  %v1175_v14 = vadd.f32 %v2847_v31, %v2547_v27 }
 0x18b   :  { %v1177_v27 = vadd.f32 %v2872_v53, %v2572_v42  ;;  %v1180_v42 = vadd.f32 %v2885_v7, %v2584_v55  ;;  %v1182_v55 = vadd.f32 %v2910_v29, %v2609_v6  ;;  %v1185_v6 = vadd.f32 %v2923_v47, %v2621_v20 }
 0x18c   :  { %v1397_v43 = vpack.c.bf16 %v1281_v33, %v1281_v33  ;;  %v1187_v20 = vadd.f32 %v2942_v2, %v2646_v36  ;;  %v1190_v36 = vadd.f32 %v2954_v23, %v2658_v50 }
 0x18d   :  { %v2973_v44 = vpop.f32.mrf.mxu3  ;;  %v1288_v45 = vpop.f32.mrf.mxu2 }
 0x18e   :  { %1462 = vst.msk [vmem:[%s3160_s2 + $0x74] sm:$0xf] %vm1432_vm1, %v1397_v43  ;;  %v945_v48 = vpop.f32.mrf.mxu0  ;;  %v1192_v50 = vadd.f32 %v2973_v44, %v2683_v3 }
 0x18f   :  { %v1114_v54 = vpop.f32.mrf.mxu1 }
 0x190   :  { %v1115_v56 = vadd.f32 %v1114_v54, %v945_v48 }
 0x191   :  { %984 = vmatmul.bf16.gmra.mxu0 %v1780_v46 }
 0x192   :  { %v1284_v57 = vadd.f32 %v1283_v4, %v1115_v56  ;;  %1153 = vmatmul.bf16.gmra.mxu1 %v1784_v49  ;;  %v1812_v4 = vor.u32 %v2066_v60, %v1811_v59 }
 0x194   :  { %v1398_v61 = vpack.c.bf16 %v1284_v57, %v1284_v57 }
 0x195   :  { %v2985_v62 = vpop.f32.mrf.mxu3  ;;  %v1290_v0 = vpop.f32.mrf.mxu2 }
 0x196   :  { %1463 = vst.msk [vmem:[%s3160_s2 + $0x78] sm:$0xf] %vm1432_vm1, %v1398_v61  ;;  %v947_v1 = vpop.f32.mrf.mxu0  ;;  %v1195_v3 = vadd.f32 %v2985_v62, %v2695_v18 }
 0x197   :  { %v1116_v8 = vpop.f32.mrf.mxu1 }
 0x198   :  { %v1117_v9 = vadd.f32 %v1116_v8, %v947_v1 }
 0x19a   :  { %v1286_v10 = vadd.f32 %v1285_v24, %v1117_v9  ;;  %1982 = vmatmul.msk.bf16.gmra.mxu2 %vm764_vm0, %v1812_v4 }
 0x19c   :  { %v1399_v12 = vpack.c.bf16 %v1286_v10, %v1286_v10 }
 0x19d   :  { %v2992_v15 = vpop.f32.mrf.mxu3  ;;  %v1293_v16 = vpop.f32.mrf.mxu2 }
 0x19e   :  { %1464 = vst.msk [vmem:[%s3160_s2 + $0x7c] sm:$0xf] %vm1432_vm1, %v1399_v12  ;;  %v950_v17 = vpop.f32.mrf.mxu0  ;;  %v1197_v18 = vadd.f32 %v2992_v15, %v2720_v35 }
 0x19f   :  { %v1119_v19 = vpop.f32.mrf.mxu1 }
 0x1a0   :  { %v1120_v21 = vadd.f32 %v1119_v19, %v950_v17 }
 0x1a2   :  { %v1289_v26 = vadd.f32 %v1288_v45, %v1120_v21 }
 0x1a4   :  { %v1400_v30 = vpack.c.bf16 %v1289_v26, %v1289_v26 }
 0x1a5   :  { %v1295_v24 = vpop.f32.mrf.mxu2  ;;  %v1338_v32 = vpop.f32.mrf.mxu3 }
 0x1a6   :  { %1465 = vst.msk [vmem:[%s3160_s2 + $0x80] sm:$0xf] %vm1432_vm1, %v1400_v30  ;;  %v1339_v33 = vadd.f32 %v1338_v32, %v1170_v28  ;;  %v952_v34 = vpop.f32.mrf.mxu0 }
 0x1a7   :  { %v1121_v38 = vpop.f32.mrf.mxu1 }
 0x1a8   :  { %v1420_v39 = vpack.c.bf16 %v1339_v33, %v1339_v33  ;;  %v1122_v40 = vadd.f32 %v1121_v38, %v952_v34 }
 0x1aa   :  { %1485 = vst.msk [vmem:[%s3160_s2 + $0xd0] sm:$0xf] %vm1432_vm1, %v1420_v39  ;;  %v1291_v43 = vadd.f32 %v1290_v0, %v1122_v40 }
 0x1ac   :  { %v1401_v58 = vpack.c.bf16 %v1291_v43, %v1291_v43 }
 0x1ad   :  { %v1298_v45 = vpop.f32.mrf.mxu2  ;;  %v1340_v46 = vpop.f32.mrf.mxu3 }
 0x1ae   :  { %1466 = vst.msk [vmem:[%s3160_s2 + $0x84] sm:$0xf] %vm1432_vm1, %v1401_v58  ;;  %v1341_v48 = vadd.f32 %v1340_v46, %v1172_v63  ;;  %v955_v49 = vpop.f32.mrf.mxu0 }
 0x1af   :  { %v1124_v54 = vpop.f32.mrf.mxu1 }
 0x1b0   :  { %v1421_v56 = vpack.c.bf16 %v1341_v48, %v1341_v48  ;;  %v1125_v57 = vadd.f32 %v1124_v54, %v955_v49 }
 0x1b2   :  { %1486 = vst.msk [vmem:[%s3160_s2 + $0xd4] sm:$0xf] %vm1432_vm1, %v1421_v56  ;;  %v1294_v59 = vadd.f32 %v1293_v16, %v1125_v57 }
 0x1b4   :  { %v1402_v13 = vpack.c.bf16 %v1294_v59, %v1294_v59 }
 0x1b5   :  { %v1300_v60 = vpop.f32.mrf.mxu2  ;;  %v1343_v61 = vpop.f32.mrf.mxu3 }
 0x1b6   :  { %1467 = vst.msk [vmem:[%s3160_s2 + $0x88] sm:$0xf] %vm1432_vm1, %v1402_v13  ;;  %v1344_v0 = vadd.f32 %v1343_v61, %v1175_v14  ;;  %v957_v1 = vpop.f32.mrf.mxu0 }
 0x1b7   :  { %v1126_v4 = vpop.f32.mrf.mxu1 }
 0x1b8   :  { %v1422_v8 = vpack.c.bf16 %v1344_v0, %v1344_v0  ;;  %v1127_v9 = vadd.f32 %v1126_v4, %v957_v1 }
 0x1ba   :  { %1487 = vst.msk [vmem:[%s3160_s2 + $0xd8] sm:$0xf] %vm1432_vm1, %v1422_v8  ;;  %v1296_v10 = vadd.f32 %v1295_v24, %v1127_v9 }
 0x1bc   :  { %v1403_v31 = vpack.c.bf16 %v1296_v10, %v1296_v10 }
 0x1bd   :  { %v1303_v12 = vpop.f32.mrf.mxu2  ;;  %v1345_v16 = vpop.f32.mrf.mxu3 }
 0x1be   :  { %1468 = vst.msk [vmem:[%s3160_s2 + $0x8c] sm:$0xf] %vm1432_vm1, %v1403_v31  ;;  %v1346_v17 = vadd.f32 %v1345_v16, %v1177_v27  ;;  %v960_v19 = vpop.f32.mrf.mxu0 }
 0x1bf   :  { %v1129_v21 = vpop.f32.mrf.mxu1 }
 0x1c0   :  { %v1423_v26 = vpack.c.bf16 %v1346_v17, %v1346_v17  ;;  %v1130_v28 = vadd.f32 %v1129_v21, %v960_v19 }
 0x1c2   :  { %1488 = vst.msk [vmem:[%s3160_s2 + $0xdc] sm:$0xf] %vm1432_vm1, %v1423_v26  ;;  %v1299_v30 = vadd.f32 %v1298_v45, %v1130_v28 }
 0x1c4   :  { %v1404_v53 = vpack.c.bf16 %v1299_v30, %v1299_v30 }
 0x1c5   :  { %v1305_v24 = vpop.f32.mrf.mxu2  ;;  %v1348_v32 = vpop.f32.mrf.mxu3 }
 0x1c6   :  { %1469 = vst.msk [vmem:[%s3160_s2 + $0x90] sm:$0xf] %vm1432_vm1, %v1404_v53  ;;  %v1349_v33 = vadd.f32 %v1348_v32, %v1180_v42  ;;  %v962_v34 = vpop.f32.mrf.mxu0 }
 0x1c7   :  { %v1131_v38 = vpop.f32.mrf.mxu1 }
 0x1c8   :  { %v1424_v39 = vpack.c.bf16 %v1349_v33, %v1349_v33  ;;  %v1132_v40 = vadd.f32 %v1131_v38, %v962_v34 }
 0x1ca   :  { %1489 = vst.msk [vmem:[%s3160_s2 + $0xe0] sm:$0xf] %vm1432_vm1, %v1424_v39  ;;  %v1301_v43 = vadd.f32 %v1300_v60, %v1132_v40 }
 0x1cc   :  { %v1405_v7 = vpack.c.bf16 %v1301_v43, %v1301_v43 }
 0x1cd   :  { %v1308_v63 = vpop.f32.mrf.mxu2  ;;  %v1350_v58 = vpop.f32.mrf.mxu3 }
 0x1ce   :  { %1470 = vst.msk [vmem:[%s3160_s2 + $0x94] sm:$0xf] %vm1432_vm1, %v1405_v7  ;;  %v1351_v45 = vadd.f32 %v1350_v58, %v1182_v55  ;;  %v965_v46 = vpop.f32.mrf.mxu0 }
 0x1cf   :  { %v1134_v48 = vpop.f32.mrf.mxu1 }
 0x1d0   :  { %v1425_v49 = vpack.c.bf16 %v1351_v45, %v1351_v45  ;;  %v1135_v54 = vadd.f32 %v1134_v48, %v965_v46 }
 0x1d2   :  { %1490 = vst.msk [vmem:[%s3160_s2 + $0xe4] sm:$0xf] %vm1432_vm1, %v1425_v49  ;;  %v1304_v56 = vadd.f32 %v1303_v12, %v1135_v54 }
 0x1d4   :  { %v1406_v29 = vpack.c.bf16 %v1304_v56, %v1304_v56 }
 0x1d5   :  { %v1310_v57 = vpop.f32.mrf.mxu2  ;;  %v1353_v59 = vpop.f32.mrf.mxu3 }
 0x1d6   :  { %1471 = vst.msk [vmem:[%s3160_s2 + $0x98] sm:$0xf] %vm1432_vm1, %v1406_v29  ;;  %v1354_v14 = vadd.f32 %v1353_v59, %v1185_v6  ;;  %v967_v13 = vpop.f32.mrf.mxu0 }
 0x1d7   :  { %v1136_v60 = vpop.f32.mrf.mxu1 }
 0x1d8   :  { %v1426_v61 = vpack.c.bf16 %v1354_v14, %v1354_v14  ;;  %v1137_v0 = vadd.f32 %v1136_v60, %v967_v13 }
 0x1da   :  { %1491 = vst.msk [vmem:[%s3160_s2 + $0xe8] sm:$0xf] %vm1432_vm1, %v1426_v61  ;;  %v1306_v1 = vadd.f32 %v1305_v24, %v1137_v0 }
 0x1dc   :  { %v1407_v47 = vpack.c.bf16 %v1306_v1, %v1306_v1 }
 0x1dd   :  { %v1313_v4 = vpop.f32.mrf.mxu2  ;;  %v1355_v8 = vpop.f32.mrf.mxu3 }
 0x1de   :  { %1472 = vst.msk [vmem:[%s3160_s2 + $0x9c] sm:$0xf] %vm1432_vm1, %v1407_v47  ;;  %v1356_v9 = vadd.f32 %v1355_v8, %v1187_v20  ;;  %v970_v10 = vpop.f32.mrf.mxu0  ;;  %v1160_v20 = vadd.f32 %v2733_v52, %v2436_v11  ;;  %v1162_v11 = vadd.f32 %v2758_v5, %v2461_v25  ;;  %v1165_v25 = vadd.f32 %v2771_v22, %v2473_v37 }
 0x1df   :  { %v1139_v27 = vpop.f32.mrf.mxu1 }
 0x1e0   :  { %v1427_v31 = vpack.c.bf16 %v1356_v9, %v1356_v9  ;;  %v1140_v12 = vadd.f32 %v1139_v27, %v970_v10 }
 0x1e2   :  { %1492 = vst.msk [vmem:[%s3160_s2 + $0xec] sm:$0xf] %vm1432_vm1, %v1427_v31  ;;  %v1309_v16 = vadd.f32 %v1308_v63, %v1140_v12 }
 0x1e4   :  { %v1408_v2 = vpack.c.bf16 %v1309_v16, %v1309_v16 }
 0x1e5   :  { %v1315_v17 = vpop.f32.mrf.mxu2  ;;  %v1358_v19 = vpop.f32.mrf.mxu3 }
 0x1e6   :  { %1473 = vst.msk [vmem:[%s3160_s2 + $0xa0] sm:$0xf] %vm1432_vm1, %v1408_v2  ;;  %v1359_v21 = vadd.f32 %v1358_v19, %v1190_v36  ;;  %v972_v26 = vpop.f32.mrf.mxu0 }
 0x1e7   :  { %v1141_v28 = vpop.f32.mrf.mxu1 }
 0x1e8   :  { %v1428_v30 = vpack.c.bf16 %v1359_v21, %v1359_v21  ;;  %v1142_v42 = vadd.f32 %v1141_v28, %v972_v26 }
 0x1ea   :  { %1493 = vst.msk [vmem:[%s3160_s2 + $0xf0] sm:$0xf] %vm1432_vm1, %v1428_v30  ;;  %v1311_v53 = vadd.f32 %v1310_v57, %v1142_v42 }
 0x1ec   :  { %v1409_v23 = vpack.c.bf16 %v1311_v53, %v1311_v53  ;;  %v1167_v53 = vadd.f32 %v2796_v41, %v2498_v51 }
 0x1ed   :  { %v1318_v24 = vpop.f32.mrf.mxu2  ;;  %v1360_v32 = vpop.f32.mrf.mxu3 }
 0x1ee   :  { %1474 = vst.msk [vmem:[%s3160_s2 + $0xa4] sm:$0xf] %vm1432_vm1, %v1409_v23  ;;  %v1361_v33 = vadd.f32 %v1360_v32, %v1192_v50  ;;  %v975_v34 = vpop.f32.mrf.mxu0 }
 0x1ef   :  { %v1144_v38 = vpop.f32.mrf.mxu1 }
 0x1f0   :  { %v1429_v39 = vpack.c.bf16 %v1361_v33, %v1361_v33  ;;  %v1145_v40 = vadd.f32 %v1144_v38, %v975_v34 }
 0x1f2   :  { %1494 = vst.msk [vmem:[%s3160_s2 + $0xf4] sm:$0xf] %vm1432_vm1, %v1429_v39  ;;  %v1314_v43 = vadd.f32 %v1313_v4, %v1145_v40 }
 0x1f4   :  { %v1410_v44 = vpack.c.bf16 %v1314_v43, %v1314_v43 }
 0x1f5   :  { %v1320_v55 = vpop.f32.mrf.mxu2  ;;  %v1363_v7 = vpop.f32.mrf.mxu3 }
 0x1f6   :  { %1475 = vst.msk [vmem:[%s3160_s2 + $0xa8] sm:$0xf] %vm1432_vm1, %v1410_v44  ;;  %v1364_v63 = vadd.f32 %v1363_v7, %v1195_v3  ;;  %v977_v58 = vpop.f32.mrf.mxu0 }
 0x1f7   :  { %v1146_v45 = vpop.f32.mrf.mxu1 }
 0x1f8   :  { %v1430_v46 = vpack.c.bf16 %v1364_v63, %v1364_v63  ;;  %v1147_v48 = vadd.f32 %v1146_v45, %v977_v58 }
 0x1fa   :  { %1495 = vst.msk [vmem:[%s3160_s2 + $0xf8] sm:$0xf] %vm1432_vm1, %v1430_v46  ;;  %v1316_v49 = vadd.f32 %v1315_v17, %v1147_v48 }
 0x1fc   :  { %v1411_v62 = vpack.c.bf16 %v1316_v49, %v1316_v49 }
 0x1fd   :  { %v1323_v54 = vpop.f32.mrf.mxu2  ;;  %v1365_v56 = vpop.f32.mrf.mxu3 }
 0x1fe   :  { %1476 = vst.msk [vmem:[%s3160_s2 + $0xac] sm:$0xf] %vm1432_vm1, %v1411_v62  ;;  %v1366_v6 = vadd.f32 %v1365_v56, %v1197_v18  ;;  %v980_v29 = vpop.f32.mrf.mxu0 }
 0x1ff   :  { %v1149_v57 = vpop.f32.mrf.mxu1 }
 0x200   :  { %v1431_v59 = vpack.c.bf16 %v1366_v6, %v1366_v6  ;;  %v1150_v14 = vadd.f32 %v1149_v57, %v980_v29 }
 0x202   :  { %1496 = vst.msk [vmem:[%s3160_s2 + $0xfc] sm:$0xf] %vm1432_vm1, %v1431_v59  ;;  %v1319_v13 = vadd.f32 %v1318_v24, %v1150_v14 }
 0x204   :  { %v1412_v35 = vpack.c.bf16 %v1319_v13, %v1319_v13 }
 0x205   :  { %v1325_v15 = vpop.f32.mrf.mxu2 }
 0x206   :  { %1477 = vst.msk [vmem:[%s3160_s2 + $0xb0] sm:$0xf] %vm1432_vm1, %v1412_v35  ;;  %v982_v60 = vpop.f32.mrf.mxu0 }
 0x207   :  { %v1151_v61 = vpop.f32.mrf.mxu1 }
 0x208   :  { %v1152_v0 = vadd.f32 %v1151_v61, %v982_v60 }
 0x20a   :  { %v1321_v1 = vadd.f32 %v1320_v55, %v1152_v0 }
 0x20c   :  { %v1413_v47 = vpack.c.bf16 %v1321_v1, %v1321_v1 }
 0x20d   :  { %v1328_v4 = vpop.f32.mrf.mxu2 }
 0x20e   :  { %1478 = vst.msk [vmem:[%s3160_s2 + $0xb4] sm:$0xf] %vm1432_vm1, %v1413_v47  ;;  %v1329_v8 = vadd.f32 %v1328_v4, %v1160_v20  ;;  %v985_v9 = vpop.f32.mrf.mxu0 }
 0x20f   :  { %v1154_v10 = vpop.f32.mrf.mxu1 }
 0x210   :  { %v1416_v27 = vpack.c.bf16 %v1329_v8, %v1329_v8  ;;  %v1155_v31 = vadd.f32 %v1154_v10, %v985_v9 }
 0x212   :  { %1481 = vst.msk [vmem:[%s3160_s2 + $0xc0] sm:$0xf] %vm1432_vm1, %v1416_v27  ;;  %v1324_v12 = vadd.f32 %v1323_v54, %v1155_v31 }
 0x214   :  { %v1414_v52 = vpack.c.bf16 %v1324_v12, %v1324_v12 }
 0x215   :  { %v1330_v16 = vpop.f32.mrf.mxu2 }
 0x216   :  { %1479 = vst.msk [vmem:[%s3160_s2 + $0xb8] sm:$0xf] %vm1432_vm1, %v1414_v52  ;;  %v1331_v36 = vadd.f32 %v1330_v16, %v1162_v11  ;;  %v987_v2 = vpop.f32.mrf.mxu0 }
 0x217   :  { %v1156_v17 = vpop.f32.mrf.mxu1 }
 0x218   :  { %v1417_v19 = vpack.c.bf16 %v1331_v36, %v1331_v36  ;;  %v1157_v21 = vadd.f32 %v1156_v17, %v987_v2 }
 0x21a   :  { %1482 = vst.msk [vmem:[%s3160_s2 + $0xc4] sm:$0xf] %vm1432_vm1, %v1417_v19  ;;  %v1326_v26 = vadd.f32 %v1325_v15, %v1157_v21 }
 0x21c   :  { %v1415_v5 = vpack.c.bf16 %v1326_v26, %v1326_v26 }
 0x21d   :  { %v1333_v28 = vpop.f32.mrf.mxu2 }
 0x21e   :  { %1480 = vst.msk [vmem:[%s3160_s2 + $0xbc] sm:$0xf] %vm1432_vm1, %v1415_v5  ;;  %v1334_v30 = vadd.f32 %v1333_v28, %v1165_v25 }
 0x220   :  { %v1418_v42 = vpack.c.bf16 %v1334_v30, %v1334_v30 }
 0x222   :  { %1483 = vst.msk [vmem:[%s3160_s2 + $0xc8] sm:$0xf] %vm1432_vm1, %v1418_v42 }
 0x225   :  { %v1335_v50 = vpop.f32.mrf.mxu2 }
 0x226   :  { %v1336_v23 = vadd.f32 %v1335_v50, %v1167_v53 }
 0x228   :  { %v1419_v37 = vpack.c.bf16 %v1336_v23, %v1336_v23 }
 0x22a   :  { %1484 = vst.msk [vmem:[%s3160_s2 + $0xcc] sm:$0xf] %vm1432_vm1, %v1419_v37 }

// kernel: densenet_forward.29
= control target key start
LH: loop header
LB: loop body
LE: loop exit
PB: predicated region body
PF: predicated region fallthrough
CT: control target
= control target key end

     0   :  { %vm493_vm0 = vcmask 1043456   ;;  %vm396_vm1 = vcmask 195584   ;;  %vm930_vm2 = vcmask 257024   ;;  %s1906_s1 = inlined_call_operand.vmem [shape: bf16[24,32], index: 1, kind: input, shape index: {}]   ;;  %s1907_s0 = inlined_call_operand.vmem [shape: bf16[512,24], index: 0, kind: input, shape index: {}]   ;;  %s1908_s2 = inlined_call_operand.vmem [shape: f32[1,24], index: 2, kind: input, shape index: {}]   ;;  %s1909_s3 = inlined_call_operand.vmem [shape: f32[1,24], index: 3, kind: input, shape index: {}]   ;;  %s1910_s4 = inlined_call_operand.vmem [shape: f32[1,32], index: 4, kind: input, shape index: {}]   ;;  %s1911_s5 = inlined_call_operand.vmem [shape: f32[1,32], index: 5, kind: input, shape index: {}]   ;;  %s1912_s6 = inlined_call_operand.vmem [shape: bf16[512,32], index: 6, kind: output, shape index: {}]  }
   0x1   :  { %v386_v0 = vld [vmem:[%s1906_s1 + $0x8] sm:$0xf]  ;;  %v1037_v1 = vld [vmem:[%s1907_s0] sm:$0xff]  }
   0x2   :  { %v392_v2 = vunpack.c.l.b16 %v386_v0  ;;  %v1038_v3 = vunpack.c.l.bf16 %v1037_v1  ;;  %v1039_v4 = vunpack.c.h.bf16 %v1037_v1  ;;  %v1249_v5 = vld [vmem:[%s1908_s2] ss:$0 sm:$0xff]  ;;  %v1164_v27 = vld [vmem:[%s1907_s0 + $0x8] sm:$0xff]  }
   0x3   :  { %v1254_v6 = vld [vmem:[%s1909_s3] ss:$0 sm:$0xff]  ;;  %v1172_v36 = vld [vmem:[%s1907_s0 + $0x48] sm:$0xff]   ;;  %v1042_v40 = vunpack.c.l.bf16 %v1164_v27  ;;  %v1043_v47 = vunpack.c.h.bf16 %v1164_v27 }
   0x4   :  { %v1171_v7 = vld [vmem:[%s1907_s0 + $0x40] sm:$0xff]   ;;  %v394_v9 = vpack.c.b16 %v392_v2, %v392_v2  ;;  %v156_v10 = vmul.f32 %v1249_v5, %v1038_v3  ;;  %v157_v11 = vmul.f32 %v1249_v5, %v1039_v4  ;;  %v1180_v45 = vld [vmem:[%s1907_s0 + $0x88] sm:$0xff]   ;;  %v1074_v48 = vunpack.c.l.bf16 %v1172_v36 }
   0x5   :  { %v1179_v8 = vld [vmem:[%s1907_s0 + $0x80] sm:$0xff]   ;;  %v1070_v12 = vunpack.c.l.bf16 %v1171_v7  ;;  %v1071_v14 = vunpack.c.h.bf16 %v1171_v7  ;;  %v1188_v49 = vld [vmem:[%s1907_s0 + $0xc8] sm:$0xff]   ;;  %v1075_v53 = vunpack.c.h.bf16 %v1172_v36  ;;  %v158_v54 = vmul.f32 %v1249_v5, %v1042_v40 }
   0x6   :  { %v1187_v13 = vld [vmem:[%s1907_s0 + $0xc0] sm:$0xff]   ;;  %v1102_v15 = vunpack.c.l.bf16 %v1179_v8  ;;  %v1103_v16 = vunpack.c.h.bf16 %v1179_v8  ;;  %v495_v18 = vsel %vm493_vm0, %v394_v9, 0  ;;  %v224_v20 = vadd.f32 %v1254_v6, %v156_v10 }
   0x7   :  { %v1134_v17 = vunpack.c.l.bf16 %v1187_v13  ;;  %v1035_v19 = vld [vmem:[%s1906_s1] sm:$0xff]  ;;  %v225_v21 = vadd.f32 %v1254_v6, %v157_v11  ;;  %v172_v22 = vmul.f32 %v1249_v5, %v1070_v12  ;;  %503 = vmatpush.bf16.msra.mxu0 %v495_v18  ;;  %1195 = vmatpush.bf16.msra.mxu1 %v495_v18  ;;  %v173_v23 = vmul.f32 %v1249_v5, %v1071_v14 }
   0x8   :  { %v188_v24 = vmul.f32 %v1249_v5, %v1102_v15  ;;  %v189_v25 = vmul.f32 %v1249_v5, %v1103_v16  ;;  %v1135_v26 = vunpack.c.h.bf16 %v1187_v13  ;;  %1196 = vmatpush.bf16.msra.mxu2 %v495_v18  ;;  %1197 = vmatpush.bf16.msra.mxu3 %v495_v18  ;;  %v288_v28 = vmax.f32 %v224_v20, 0.0  ;;  %v1165_v15 = vld [vmem:[%s1907_s0 + $0x10] sm:$0xff]  }
   0x9   :  { %v289_v29 = vmax.f32 %v225_v21, 0.0  ;;  %v240_v30 = vadd.f32 %v1254_v6, %v172_v22  ;;  %v204_v31 = vmul.f32 %v1249_v5, %v1134_v17  ;;  %v241_v32 = vadd.f32 %v1254_v6, %v173_v23  ;;  %v1173_v20 = vld [vmem:[%s1907_s0 + $0x50] sm:$0xff]  }
   0xa   :  { %v256_v33 = vadd.f32 %v1254_v6, %v188_v24  ;;  %v257_v34 = vadd.f32 %v1254_v6, %v189_v25  ;;  %v205_v35 = vmul.f32 %v1249_v5, %v1135_v26  ;;  %v159_v55 = vmul.f32 %v1249_v5, %v1043_v47  ;;  %v1181_v21 = vld [vmem:[%s1907_s0 + $0x90] sm:$0xff]  }
   0xb   :  { %v352_v37 = vpack.c.bf16 %v289_v29, %v288_v28  ;;  %v304_v38 = vmax.f32 %v240_v30, 0.0  ;;  %v272_v39 = vadd.f32 %v1254_v6, %v204_v31  ;;  %504 = vmatpush.bf16.msra.mxu0 %v1035_v19  ;;  %1198 = vmatpush.bf16.msra.mxu1 %v1035_v19  ;;  %v305_v41 = vmax.f32 %v241_v32, 0.0  ;;  %v1189_v29 = vld [vmem:[%s1907_s0 + $0xd0] sm:$0xff]  }
   0xc   :  { %v320_v42 = vmax.f32 %v256_v33, 0.0  ;;  %v321_v43 = vmax.f32 %v257_v34, 0.0  ;;  %v273_v44 = vadd.f32 %v1254_v6, %v205_v35  ;;  %1199 = vmatpush.bf16.msra.mxu2 %v1035_v19  ;;  %1200 = vmatpush.bf16.msra.mxu3 %v1035_v19  ;;  %v174_v56 = vmul.f32 %v1249_v5, %v1074_v48 }
   0xd   :  { %v336_v46 = vmax.f32 %v272_v39, 0.0  ;;  %v360_v50 = vpack.c.bf16 %v305_v41, %v304_v38  ;;  %v1106_v57 = vunpack.c.l.bf16 %v1180_v45  ;;  %v175_v59 = vmul.f32 %v1249_v5, %v1075_v53 }
   0xe   :  { %v368_v51 = vpack.c.bf16 %v321_v43, %v320_v42  ;;  %v337_v52 = vmax.f32 %v273_v44, 0.0  ;;  %1003 = vmatmul.msk.bf16.vlgmr.msra.gmra.mxu0 %vm396_vm1, %v352_v37  ;;  %v1107_v60 = vunpack.c.h.bf16 %v1180_v45  ;;  %v1138_v61 = vunpack.c.l.bf16 %v1188_v49 }
   0xf   :  { %1011 = vmatmul.msk.bf16.vlgmr.msra.gmra.mxu1 %vm396_vm1, %v360_v50  ;;  %v190_v62 = vmul.f32 %v1249_v5, %v1106_v57  ;;  %v1139_v0 = vunpack.c.h.bf16 %v1188_v49  ;;  %v226_v2 = vadd.f32 %v1254_v6, %v158_v54  ;;  %v227_v3 = vadd.f32 %v1254_v6, %v159_v55  ;;  %v1166_v57 = vld [vmem:[%s1907_s0 + $0x18] sm:$0xff]  }
  0x10   :  { %1019 = vmatmul.msk.bf16.vlgmr.msra.gmra.mxu2 %vm396_vm1, %v368_v51  ;;  %v376_v58 = vpack.c.bf16 %v337_v52, %v336_v46  ;;  %v191_v63 = vmul.f32 %v1249_v5, %v1107_v60  ;;  %v206_v1 = vmul.f32 %v1249_v5, %v1138_v61  ;;  %v242_v4 = vadd.f32 %v1254_v6, %v174_v56  ;;  %v1174_v60 = vld [vmem:[%s1907_s0 + $0x58] sm:$0xff]  }
  0x11   :  { %v243_v7 = vadd.f32 %v1254_v6, %v175_v59  ;;  %v258_v8 = vadd.f32 %v1254_v6, %v190_v62  ;;  %v207_v10 = vmul.f32 %v1249_v5, %v1139_v0  ;;  %v290_v13 = vmax.f32 %v226_v2, 0.0  ;;  %v1182_v61 = vld [vmem:[%s1907_s0 + $0x98] sm:$0xff]  }
  0x12   :  { %1027 = vmatmul.msk.bf16.vlgmr.msra.gmra.mxu3 %vm396_vm1, %v376_v58  ;;  %v259_v9 = vadd.f32 %v1254_v6, %v191_v63  ;;  %v274_v11 = vadd.f32 %v1254_v6, %v206_v1  ;;  %v291_v14 = vmax.f32 %v227_v3, 0.0  ;;  %v306_v16 = vmax.f32 %v242_v4, 0.0 }
  0x13   :  { %v275_v12 = vadd.f32 %v1254_v6, %v207_v10  ;;  %v307_v17 = vmax.f32 %v243_v7, 0.0  ;;  %v322_v18 = vmax.f32 %v258_v8, 0.0  ;;  %v1046_v24 = vunpack.c.l.bf16 %v1165_v15  ;;  %v1190_v7 = vld [vmem:[%s1907_s0 + $0xd8] sm:$0xff]  }
  0x14   :  { %v323_v19 = vmax.f32 %v259_v9, 0.0  ;;  %v338_v22 = vmax.f32 %v274_v11, 0.0  ;;  %v353_v25 = vpack.c.bf16 %v291_v14, %v290_v13  ;;  %v1047_v26 = vunpack.c.h.bf16 %v1165_v15 }
  0x15   :  { %v339_v23 = vmax.f32 %v275_v12, 0.0  ;;  %v1078_v27 = vunpack.c.l.bf16 %v1173_v20  ;;  %v1079_v28 = vunpack.c.h.bf16 %v1173_v20  ;;  %v361_v30 = vpack.c.bf16 %v307_v17, %v306_v16 }
  0x16   :  { %v369_v31 = vpack.c.bf16 %v323_v19, %v322_v18  ;;  %v1110_v32 = vunpack.c.l.bf16 %v1181_v21  ;;  %v1111_v33 = vunpack.c.h.bf16 %v1181_v21  ;;  %v1142_v35 = vunpack.c.l.bf16 %v1189_v29 }
  0x17   :  { %v377_v34 = vpack.c.bf16 %v339_v23, %v338_v22  ;;  %v1143_v36 = vunpack.c.h.bf16 %v1189_v29  ;;  %v160_v37 = vmul.f32 %v1249_v5, %v1046_v24  ;;  %v161_v38 = vmul.f32 %v1249_v5, %v1047_v26 }
  0x18   :  { %v176_v39 = vmul.f32 %v1249_v5, %v1078_v27  ;;  %v177_v40 = vmul.f32 %v1249_v5, %v1079_v28  ;;  %v192_v41 = vmul.f32 %v1249_v5, %v1110_v32  ;;  %v193_v42 = vmul.f32 %v1249_v5, %v1111_v33 }
  0x19   :  { %v208_v43 = vmul.f32 %v1249_v5, %v1142_v35  ;;  %v209_v44 = vmul.f32 %v1249_v5, %v1143_v36  ;;  %v228_v45 = vadd.f32 %v1254_v6, %v160_v37  ;;  %v229_v46 = vadd.f32 %v1254_v6, %v161_v38  ;;  %v1175_v38 = vld [vmem:[%s1907_s0 + $0x60] sm:$0xff]  }
  0x1a   :  { %v244_v47 = vadd.f32 %v1254_v6, %v176_v39  ;;  %v245_v48 = vadd.f32 %v1254_v6, %v177_v40  ;;  %v260_v49 = vadd.f32 %v1254_v6, %v192_v41  ;;  %v261_v50 = vadd.f32 %v1254_v6, %v193_v42  ;;  %v1183_v40 = vld [vmem:[%s1907_s0 + $0xa0] sm:$0xff]  }
  0x1b   :  { %v276_v51 = vadd.f32 %v1254_v6, %v208_v43  ;;  %v277_v52 = vadd.f32 %v1254_v6, %v209_v44  ;;  %v292_v53 = vmax.f32 %v228_v45, 0.0  ;;  %v293_v54 = vmax.f32 %v229_v46, 0.0 }
  0x1c   :  { %v308_v55 = vmax.f32 %v244_v47, 0.0  ;;  %v309_v56 = vmax.f32 %v245_v48, 0.0  ;;  %v324_v58 = vmax.f32 %v260_v49, 0.0  ;;  %v325_v59 = vmax.f32 %v261_v50, 0.0  ;;  %v1191_v47 = vld [vmem:[%s1907_s0 + $0xe0] sm:$0xff]  }
  0x1d   :  { %v340_v62 = vmax.f32 %v276_v51, 0.0  ;;  %v341_v63 = vmax.f32 %v277_v52, 0.0  ;;  %v1050_v0 = vunpack.c.l.bf16 %v1166_v57  ;;  %v354_v1 = vpack.c.bf16 %v293_v54, %v292_v53 }
  0x1e   :  { %1004 = vmatmul.msk.bf16.gmra.mxu0 %vm396_vm1, %v353_v25  ;;  %v362_v2 = vpack.c.bf16 %v309_v56, %v308_v55  ;;  %v1051_v3 = vunpack.c.h.bf16 %v1166_v57  ;;  %v1082_v4 = vunpack.c.l.bf16 %v1174_v60  ;;  %v370_v8 = vpack.c.bf16 %v325_v59, %v324_v58 }
  0x1f   :  { %1012 = vmatmul.msk.bf16.gmra.mxu1 %vm396_vm1, %v361_v30  ;;  %v1083_v9 = vunpack.c.h.bf16 %v1174_v60  ;;  %v1114_v10 = vunpack.c.l.bf16 %v1182_v61  ;;  %v1115_v11 = vunpack.c.h.bf16 %v1182_v61  ;;  %v378_v12 = vpack.c.bf16 %v341_v63, %v340_v62 }
  0x20   :  { %1020 = vmatmul.msk.bf16.gmra.mxu2 %vm396_vm1, %v369_v31  ;;  %v1146_v13 = vunpack.c.l.bf16 %v1190_v7  ;;  %v1147_v14 = vunpack.c.h.bf16 %v1190_v7  ;;  %v162_v15 = vmul.f32 %v1249_v5, %v1050_v0  ;;  %v163_v16 = vmul.f32 %v1249_v5, %v1051_v3  ;;  %v1167_v31 = vld [vmem:[%s1907_s0 + $0x20] sm:$0xff]  }
  0x21   :  { %v178_v17 = vmul.f32 %v1249_v5, %v1082_v4  ;;  %v179_v18 = vmul.f32 %v1249_v5, %v1083_v9  ;;  %v194_v19 = vmul.f32 %v1249_v5, %v1114_v10  ;;  %v195_v20 = vmul.f32 %v1249_v5, %v1115_v11 }
  0x22   :  { %1028 = vmatmul.msk.bf16.gmra.mxu3 %vm396_vm1, %v377_v34  ;;  %v210_v21 = vmul.f32 %v1249_v5, %v1146_v13  ;;  %v211_v22 = vmul.f32 %v1249_v5, %v1147_v14  ;;  %v230_v23 = vadd.f32 %v1254_v6, %v162_v15  ;;  %v231_v24 = vadd.f32 %v1254_v6, %v163_v16  ;;  %v1168_v15 = vld [vmem:[%s1907_s0 + $0x28] sm:$0xff]  }
  0x23   :  { %v246_v25 = vadd.f32 %v1254_v6, %v178_v17  ;;  %v247_v26 = vadd.f32 %v1254_v6, %v179_v18  ;;  %v262_v27 = vadd.f32 %v1254_v6, %v194_v19  ;;  %v263_v28 = vadd.f32 %v1254_v6, %v195_v20  ;;  %v1176_v16 = vld [vmem:[%s1907_s0 + $0x68] sm:$0xff]  }
  0x24   :  { %v278_v29 = vadd.f32 %v1254_v6, %v210_v21  ;;  %v279_v30 = vadd.f32 %v1254_v6, %v211_v22  ;;  %v294_v32 = vmax.f32 %v230_v23, 0.0  ;;  %v295_v33 = vmax.f32 %v231_v24, 0.0  ;;  %v1184_v17 = vld [vmem:[%s1907_s0 + $0xa8] sm:$0xff]  }
  0x25   :  { %v310_v34 = vmax.f32 %v246_v25, 0.0  ;;  %v311_v35 = vmax.f32 %v247_v26, 0.0  ;;  %v326_v36 = vmax.f32 %v262_v27, 0.0  ;;  %v327_v37 = vmax.f32 %v263_v28, 0.0  ;;  %v1192_v21 = vld [vmem:[%s1907_s0 + $0xe8] sm:$0xff]  }
  0x26   :  { %v1054_v39 = vunpack.c.l.bf16 %v1167_v31  ;;  %v342_v41 = vmax.f32 %v278_v29, 0.0  ;;  %v343_v42 = vmax.f32 %v279_v30, 0.0  ;;  %v1055_v43 = vunpack.c.h.bf16 %v1167_v31 }
  0x27   :  { %v355_v44 = vpack.c.bf16 %v295_v33, %v294_v32  ;;  %v1086_v45 = vunpack.c.l.bf16 %v1175_v38  ;;  %v1087_v46 = vunpack.c.h.bf16 %v1175_v38  ;;  %v363_v48 = vpack.c.bf16 %v311_v35, %v310_v34 }
  0x28   :  { %v371_v49 = vpack.c.bf16 %v327_v37, %v326_v36  ;;  %v1118_v50 = vunpack.c.l.bf16 %v1183_v40  ;;  %v1119_v51 = vunpack.c.h.bf16 %v1183_v40  ;;  %v164_v52 = vmul.f32 %v1249_v5, %v1054_v39 }
  0x29   :  { %v379_v53 = vpack.c.bf16 %v343_v42, %v342_v41  ;;  %v165_v54 = vmul.f32 %v1249_v5, %v1055_v43  ;;  %v1150_v55 = vunpack.c.l.bf16 %v1191_v47  ;;  %v1151_v56 = vunpack.c.h.bf16 %v1191_v47 }
  0x2a   :  { %v180_v57 = vmul.f32 %v1249_v5, %v1086_v45  ;;  %v181_v58 = vmul.f32 %v1249_v5, %v1087_v46  ;;  %v196_v59 = vmul.f32 %v1249_v5, %v1118_v50  ;;  %v197_v60 = vmul.f32 %v1249_v5, %v1119_v51  ;;  %v1169_v51 = vld [vmem:[%s1907_s0 + $0x30] sm:$0xff]  }
  0x2b   :  { %v232_v61 = vadd.f32 %v1254_v6, %v164_v52  ;;  %v233_v62 = vadd.f32 %v1254_v6, %v165_v54  ;;  %v212_v63 = vmul.f32 %v1249_v5, %v1150_v55  ;;  %v213_v0 = vmul.f32 %v1249_v5, %v1151_v56  ;;  %v1177_v56 = vld [vmem:[%s1907_s0 + $0x70] sm:$0xff]  }
  0x2c   :  { %v264_v3 = vadd.f32 %v1254_v6, %v196_v59  ;;  %v265_v4 = vadd.f32 %v1254_v6, %v197_v60  ;;  %v1058_v23 = vunpack.c.l.bf16 %v1168_v15  ;;  %v1059_v24 = vunpack.c.h.bf16 %v1168_v15  ;;  %v1185_v59 = vld [vmem:[%s1907_s0 + $0xb0] sm:$0xff]  }
  0x2d   :  { %v296_v7 = vmax.f32 %v232_v61, 0.0  ;;  %v280_v9 = vadd.f32 %v1254_v6, %v212_v63  ;;  %v281_v10 = vadd.f32 %v1254_v6, %v213_v0  ;;  %v1090_v25 = vunpack.c.l.bf16 %v1176_v16 }
  0x2e   :  { %1005 = vmatmul.msk.bf16.gmra.mxu0 %vm396_vm1, %v354_v1  ;;  %v248_v1 = vadd.f32 %v1254_v6, %v180_v57  ;;  %v328_v13 = vmax.f32 %v264_v3, 0.0  ;;  %v329_v14 = vmax.f32 %v265_v4, 0.0  ;;  %v1091_v27 = vunpack.c.h.bf16 %v1176_v16 }
  0x2f   :  { %1013 = vmatmul.msk.bf16.gmra.mxu1 %vm396_vm1, %v362_v2  ;;  %v249_v2 = vadd.f32 %v1254_v6, %v181_v58  ;;  %v344_v19 = vmax.f32 %v280_v9, 0.0  ;;  %v345_v20 = vmax.f32 %v281_v10, 0.0  ;;  %v1122_v28 = vunpack.c.l.bf16 %v1184_v17 }
  0x30   :  { %1021 = vmatmul.msk.bf16.gmra.mxu2 %vm396_vm1, %v370_v8  ;;  %v297_v8 = vmax.f32 %v233_v62, 0.0  ;;  %v312_v11 = vmax.f32 %v248_v1, 0.0  ;;  %v372_v26 = vpack.c.bf16 %v329_v14, %v328_v13  ;;  %v1123_v29 = vunpack.c.h.bf16 %v1184_v17  ;;  %v1193_v1 = vld [vmem:[%s1907_s0 + $0xf0] sm:$0xff]  }
  0x31   :  { %v1154_v30 = vunpack.c.l.bf16 %v1192_v21  ;;  %v1155_v31 = vunpack.c.h.bf16 %v1192_v21  ;;  %v380_v32 = vpack.c.bf16 %v345_v20, %v344_v19  ;;  %v166_v33 = vmul.f32 %v1249_v5, %v1058_v23 }
  0x32   :  { %1029 = vmatmul.msk.bf16.gmra.mxu3 %vm396_vm1, %v378_v12  ;;  %v313_v12 = vmax.f32 %v249_v2, 0.0  ;;  %v356_v18 = vpack.c.bf16 %v297_v8, %v296_v7  ;;  %v167_v34 = vmul.f32 %v1249_v5, %v1059_v24  ;;  %v182_v35 = vmul.f32 %v1249_v5, %v1090_v25 }
  0x33   :  { %v183_v36 = vmul.f32 %v1249_v5, %v1091_v27  ;;  %v198_v37 = vmul.f32 %v1249_v5, %v1122_v28  ;;  %v199_v38 = vmul.f32 %v1249_v5, %v1123_v29  ;;  %v214_v39 = vmul.f32 %v1249_v5, %v1154_v30 }
  0x34   :  { %v364_v22 = vpack.c.bf16 %v313_v12, %v312_v11  ;;  %v215_v40 = vmul.f32 %v1249_v5, %v1155_v31  ;;  %v234_v41 = vadd.f32 %v1254_v6, %v166_v33  ;;  %v235_v42 = vadd.f32 %v1254_v6, %v167_v34  ;;  %v1170_v33 = vld [vmem:[%s1907_s0 + $0x38] sm:$0xff]  }
  0x35   :  { %v250_v43 = vadd.f32 %v1254_v6, %v182_v35  ;;  %v266_v45 = vadd.f32 %v1254_v6, %v198_v37  ;;  %v267_v46 = vadd.f32 %v1254_v6, %v199_v38  ;;  %v282_v47 = vadd.f32 %v1254_v6, %v214_v39  ;;  %v1178_v34 = vld [vmem:[%s1907_s0 + $0x78] sm:$0xff]  }
  0x36   :  { %v299_v50 = vmax.f32 %v235_v42, 0.0  ;;  %v1062_v60 = vunpack.c.l.bf16 %v1169_v51  ;;  %v1063_v61 = vunpack.c.h.bf16 %v1169_v51  ;;  %v1094_v63 = vunpack.c.l.bf16 %v1177_v56  ;;  %v1186_v35 = vld [vmem:[%s1907_s0 + $0xb8] sm:$0xff]  }
  0x37   :  { %v314_v52 = vmax.f32 %v250_v43, 0.0  ;;  %v330_v54 = vmax.f32 %v266_v45, 0.0  ;;  %v331_v55 = vmax.f32 %v267_v46, 0.0  ;;  %v346_v57 = vmax.f32 %v282_v47, 0.0  ;;  %v1194_v43 = vld [vmem:[%s1907_s0 + $0xf8] sm:$0xff]  }
  0x38   :  { %v1095_v0 = vunpack.c.h.bf16 %v1177_v56  ;;  %v1126_v4 = vunpack.c.l.bf16 %v1185_v59  ;;  %v1127_v7 = vunpack.c.h.bf16 %v1185_v59  ;;  %v168_v9 = vmul.f32 %v1249_v5, %v1062_v60 }
  0x39   :  { %v373_v3 = vpack.c.bf16 %v331_v55, %v330_v54  ;;  %v169_v10 = vmul.f32 %v1249_v5, %v1063_v61  ;;  %v1158_v11 = vunpack.c.l.bf16 %v1193_v1  ;;  %v1159_v12 = vunpack.c.h.bf16 %v1193_v1 }
  0x3a   :  { %v184_v13 = vmul.f32 %v1249_v5, %v1094_v63  ;;  %v185_v14 = vmul.f32 %v1249_v5, %v1095_v0  ;;  %v200_v15 = vmul.f32 %v1249_v5, %v1126_v4  ;;  %v201_v16 = vmul.f32 %v1249_v5, %v1127_v7 }
  0x3b   :  { %v236_v17 = vadd.f32 %v1254_v6, %v168_v9  ;;  %v216_v19 = vmul.f32 %v1249_v5, %v1158_v11  ;;  %v217_v20 = vmul.f32 %v1249_v5, %v1159_v12  ;;  %v1098_v42 = vunpack.c.l.bf16 %v1178_v34 }
  0x3c   :  { %v252_v21 = vadd.f32 %v1254_v6, %v184_v13  ;;  %v268_v23 = vadd.f32 %v1254_v6, %v200_v15  ;;  %v269_v24 = vadd.f32 %v1254_v6, %v201_v16  ;;  %v1099_v45 = vunpack.c.h.bf16 %v1178_v34  ;;  %v1520_v16 = vld [vmem:[%s1911_s5] ss:$0 sm:$0xff] }
  0x3d   :  { %v300_v25 = vmax.f32 %v236_v17, 0.0  ;;  %v284_v27 = vadd.f32 %v1254_v6, %v216_v19  ;;  %v285_v28 = vadd.f32 %v1254_v6, %v217_v20  ;;  %v1130_v46 = vunpack.c.l.bf16 %v1186_v35 }
  0x3e   :  { %1006 = vmatmul.msk.bf16.gmra.mxu0 %vm396_vm1, %v355_v44  ;;  %v251_v44 = vadd.f32 %v1254_v6, %v183_v36  ;;  %v316_v29 = vmax.f32 %v252_v21, 0.0  ;;  %v332_v31 = vmax.f32 %v268_v23, 0.0  ;;  %v1131_v47 = vunpack.c.h.bf16 %v1186_v35 }
  0x3f   :  { %1014 = vmatmul.msk.bf16.gmra.mxu1 %vm396_vm1, %v363_v48  ;;  %v283_v48 = vadd.f32 %v1254_v6, %v215_v40  ;;  %v348_v37 = vmax.f32 %v284_v27, 0.0  ;;  %v349_v38 = vmax.f32 %v285_v28, 0.0  ;;  %v1066_v40 = vunpack.c.l.bf16 %v1170_v33 }
  0x40   :  { %1022 = vmatmul.msk.bf16.gmra.mxu2 %vm396_vm1, %v371_v49  ;;  %v298_v49 = vmax.f32 %v234_v41, 0.0  ;;  %v1067_v41 = vunpack.c.h.bf16 %v1170_v33  ;;  %v187_v54 = vmul.f32 %v1249_v5, %v1099_v45  ;;  %v202_v55 = vmul.f32 %v1249_v5, %v1130_v46 }
  0x41   :  { %v347_v58 = vmax.f32 %v283_v48, 0.0  ;;  %v382_v48 = vpack.c.bf16 %v349_v38, %v348_v37  ;;  %v170_v51 = vmul.f32 %v1249_v5, %v1066_v40  ;;  %v203_v56 = vmul.f32 %v1249_v5, %v1131_v47 }
  0x42   :  { %1030 = vmatmul.msk.bf16.gmra.mxu3 %vm396_vm1, %v379_v53  ;;  %v315_v53 = vmax.f32 %v251_v44, 0.0  ;;  %v357_v62 = vpack.c.bf16 %v299_v50, %v298_v49  ;;  %v1162_v49 = vunpack.c.l.bf16 %v1194_v43  ;;  %v1163_v50 = vunpack.c.h.bf16 %v1194_v43 }
  0x43   :  { %v381_v8 = vpack.c.bf16 %v347_v58, %v346_v57  ;;  %v238_v59 = vadd.f32 %v1254_v6, %v170_v51  ;;  %v270_v63 = vadd.f32 %v1254_v6, %v202_v55  ;;  %v271_v0 = vadd.f32 %v1254_v6, %v203_v56 }
  0x44   :  { %v365_v2 = vpack.c.bf16 %v315_v53, %v314_v52  ;;  %v171_v52 = vmul.f32 %v1249_v5, %v1067_v41  ;;  %v186_v53 = vmul.f32 %v1249_v5, %v1098_v42  ;;  %v218_v57 = vmul.f32 %v1249_v5, %v1162_v49 }
  0x45   :  { %v219_v58 = vmul.f32 %v1249_v5, %v1163_v50  ;;  %v335_v9 = vmax.f32 %v271_v0, 0.0 }
  0x46   :  { %v239_v60 = vadd.f32 %v1254_v6, %v171_v52  ;;  %v254_v61 = vadd.f32 %v1254_v6, %v186_v53  ;;  %v286_v1 = vadd.f32 %v1254_v6, %v218_v57 }
  0x48   :  { %v303_v4 = vmax.f32 %v239_v60, 0.0  ;;  %v318_v7 = vmax.f32 %v254_v61, 0.0 }
  0x4e   :  { %1007 = vmatmul.msk.bf16.gmra.mxu0 %vm396_vm1, %v356_v18  ;;  %v237_v18 = vadd.f32 %v1254_v6, %v169_v10  ;;  %v350_v10 = vmax.f32 %v286_v1, 0.0 }
  0x4f   :  { %1015 = vmatmul.msk.bf16.gmra.mxu1 %vm396_vm1, %v364_v22  ;;  %v253_v22 = vadd.f32 %v1254_v6, %v185_v14 }
  0x50   :  { %1023 = vmatmul.msk.bf16.gmra.mxu2 %vm396_vm1, %v372_v26  ;;  %v301_v26 = vmax.f32 %v237_v18, 0.0 }
  0x51   :  { %v317_v30 = vmax.f32 %v253_v22, 0.0 }
  0x52   :  { %1031 = vmatmul.msk.bf16.gmra.mxu3 %vm396_vm1, %v380_v32  ;;  %v333_v32 = vmax.f32 %v269_v24, 0.0  ;;  %v358_v36 = vpack.c.bf16 %v301_v26, %v300_v25 }
  0x53   :  { %v366_v39 = vpack.c.bf16 %v317_v30, %v316_v29 }
  0x54   :  { %v374_v44 = vpack.c.bf16 %v333_v32, %v332_v31 }
  0x5e   :  { %1008 = vmatmul.msk.bf16.gmra.mxu0 %vm396_vm1, %v357_v62  ;;  %v255_v62 = vadd.f32 %v1254_v6, %v187_v54 }
  0x5f   :  { %1016 = vmatmul.msk.bf16.gmra.mxu1 %vm396_vm1, %v365_v2  ;;  %v287_v2 = vadd.f32 %v1254_v6, %v219_v58  ;;  %v1515_v6 = vld [vmem:[%s1910_s4] ss:$0 sm:$0xff] }
  0x60   :  { %1024 = vmatmul.msk.bf16.gmra.mxu2 %vm396_vm1, %v373_v3  ;;  %v302_v3 = vmax.f32 %v238_v59, 0.0  ;;  %v319_v5 = vmax.f32 %v255_v62, 0.0 }
  0x61   :  { %v351_v11 = vmax.f32 %v287_v2, 0.0 }
  0x62   :  { %1032 = vmatmul.msk.bf16.gmra.mxu3 %vm396_vm1, %v381_v8  ;;  %v334_v8 = vmax.f32 %v270_v63, 0.0  ;;  %v359_v12 = vpack.c.bf16 %v303_v4, %v302_v3  ;;  %v367_v13 = vpack.c.bf16 %v319_v5, %v318_v7 }
  0x63   :  { %v383_v15 = vpack.c.bf16 %v351_v11, %v350_v10 }
  0x64   :  { %v375_v14 = vpack.c.bf16 %v335_v9, %v334_v8 }
  0x6e   :  { %1009 = vmatmul.msk.bf16.gmra.mxu0 %vm396_vm1, %v358_v36 }
  0x6f   :  { %1017 = vmatmul.msk.bf16.gmra.mxu1 %vm396_vm1, %v366_v39 }
  0x70   :  { %1025 = vmatmul.msk.bf16.gmra.mxu2 %vm396_vm1, %v374_v44 }
  0x72   :  { %1033 = vmatmul.msk.bf16.gmra.mxu3 %vm396_vm1, %v382_v48 }
  0x7e   :  { %1010 = vmatmul.msk.bf16.gmra.mxu0 %vm396_vm1, %v359_v12 }
  0x7f   :  { %1018 = vmatmul.msk.bf16.gmra.mxu1 %vm396_vm1, %v367_v13 }
  0x80   :  { %1026 = vmatmul.msk.bf16.gmra.mxu2 %vm396_vm1, %v375_v14 }
  0x82   :  { %1034 = vmatmul.msk.bf16.gmra.mxu3 %vm396_vm1, %v383_v15 }
  0x8b   :  { %v506_v17 = vpop.f32.mrf.mxu0 }
  0x8c   :  { %v670_v18 = vmul.f32 %v1515_v6, %v506_v17  ;;  %v546_v19 = vpop.f32.mrf.mxu1 }
  0x8d   :  { %v686_v20 = vmul.f32 %v1515_v6, %v546_v19 }
  0x8e   :  { %v738_v21 = vadd.f32 %v1520_v16, %v670_v18 }
  0x8f   :  { %v754_v22 = vadd.f32 %v1520_v16, %v686_v20 }
  0x90   :  { %v802_v23 = vmax.f32 %v738_v21, 0.0 }
  0x91   :  { %v818_v24 = vmax.f32 %v754_v22, 0.0 }
  0x92   :  { %v866_v25 = vpack.c.bf16 %v802_v23, %v802_v23 }
  0x93   :  { %v586_v26 = vpop.f32.mrf.mxu2  ;;  %v882_v27 = vpack.c.bf16 %v818_v24, %v818_v24  ;;  %v508_v29 = vpop.f32.mrf.mxu0 }
  0x94   :  { %v702_v28 = vmul.f32 %v1515_v6, %v586_v26  ;;  %931 = vst.msk [vmem:[%s1912_s6] sm:$0xf] %vm930_vm2, %v866_v25  ;;  %v671_v31 = vmul.f32 %v1515_v6, %v508_v29  ;;  %v548_v32 = vpop.f32.mrf.mxu1 }
  0x95   :  { %v626_v30 = vpop.f32.mrf.mxu3  ;;  %947 = vst.msk [vmem:[%s1912_s6 + $0x40] sm:$0xf] %vm930_vm2, %v882_v27  ;;  %v687_v35 = vmul.f32 %v1515_v6, %v548_v32 }
  0x96   :  { %v770_v33 = vadd.f32 %v1520_v16, %v702_v28  ;;  %v718_v34 = vmul.f32 %v1515_v6, %v626_v30  ;;  %v739_v36 = vadd.f32 %v1520_v16, %v671_v31 }
  0x97   :  { %v755_v39 = vadd.f32 %v1520_v16, %v687_v35 }
  0x98   :  { %v834_v37 = vmax.f32 %v770_v33, 0.0  ;;  %v786_v38 = vadd.f32 %v1520_v16, %v718_v34  ;;  %v803_v40 = vmax.f32 %v739_v36, 0.0 }
  0x99   :  { %v819_v43 = vmax.f32 %v755_v39, 0.0 }
  0x9a   :  { %v898_v41 = vpack.c.bf16 %v834_v37, %v834_v37  ;;  %v850_v42 = vmax.f32 %v786_v38, 0.0  ;;  %v867_v44 = vpack.c.bf16 %v803_v40, %v803_v40 }
  0x9b   :  { %v588_v45 = vpop.f32.mrf.mxu2  ;;  %v883_v47 = vpack.c.bf16 %v819_v43, %v819_v43  ;;  %v511_v49 = vpop.f32.mrf.mxu0 }
  0x9c   :  { %963 = vst.msk [vmem:[%s1912_s6 + $0x80] sm:$0xf] %vm930_vm2, %v898_v41  ;;  %v914_v46 = vpack.c.bf16 %v850_v42, %v850_v42  ;;  %v703_v48 = vmul.f32 %v1515_v6, %v588_v45  ;;  %v672_v51 = vmul.f32 %v1515_v6, %v511_v49  ;;  %v551_v52 = vpop.f32.mrf.mxu1 }
  0x9d   :  { %932 = vst.msk [vmem:[%s1912_s6 + $0x4] sm:$0xf] %vm930_vm2, %v867_v44  ;;  %v628_v50 = vpop.f32.mrf.mxu3  ;;  %v688_v55 = vmul.f32 %v1515_v6, %v551_v52 }
  0x9e   :  { %979 = vst.msk [vmem:[%s1912_s6 + $0xc0] sm:$0xf] %vm930_vm2, %v914_v46  ;;  %v771_v53 = vadd.f32 %v1520_v16, %v703_v48  ;;  %v719_v54 = vmul.f32 %v1515_v6, %v628_v50  ;;  %v740_v56 = vadd.f32 %v1520_v16, %v672_v51 }
  0x9f   :  { %948 = vst.msk [vmem:[%s1912_s6 + $0x44] sm:$0xf] %vm930_vm2, %v883_v47  ;;  %v756_v59 = vadd.f32 %v1520_v16, %v688_v55 }
  0xa0   :  { %v835_v57 = vmax.f32 %v771_v53, 0.0  ;;  %v787_v58 = vadd.f32 %v1520_v16, %v719_v54  ;;  %v804_v60 = vmax.f32 %v740_v56, 0.0 }
  0xa1   :  { %v820_v63 = vmax.f32 %v756_v59, 0.0 }
  0xa2   :  { %v899_v61 = vpack.c.bf16 %v835_v57, %v835_v57  ;;  %v851_v62 = vmax.f32 %v787_v58, 0.0  ;;  %v868_v0 = vpack.c.bf16 %v804_v60, %v804_v60 }
  0xa3   :  { %v591_v1 = vpop.f32.mrf.mxu2  ;;  %v884_v3 = vpack.c.bf16 %v820_v63, %v820_v63  ;;  %v513_v7 = vpop.f32.mrf.mxu0 }
  0xa4   :  { %964 = vst.msk [vmem:[%s1912_s6 + $0x84] sm:$0xf] %vm930_vm2, %v899_v61  ;;  %v915_v2 = vpack.c.bf16 %v851_v62, %v851_v62  ;;  %v704_v4 = vmul.f32 %v1515_v6, %v591_v1  ;;  %v673_v8 = vmul.f32 %v1515_v6, %v513_v7  ;;  %v553_v9 = vpop.f32.mrf.mxu1 }
  0xa5   :  { %933 = vst.msk [vmem:[%s1912_s6 + $0x8] sm:$0xf] %vm930_vm2, %v868_v0  ;;  %v631_v5 = vpop.f32.mrf.mxu3  ;;  %v689_v12 = vmul.f32 %v1515_v6, %v553_v9 }
  0xa6   :  { %980 = vst.msk [vmem:[%s1912_s6 + $0xc4] sm:$0xf] %vm930_vm2, %v915_v2  ;;  %v772_v10 = vadd.f32 %v1520_v16, %v704_v4  ;;  %v720_v11 = vmul.f32 %v1515_v6, %v631_v5  ;;  %v741_v13 = vadd.f32 %v1520_v16, %v673_v8 }
  0xa7   :  { %949 = vst.msk [vmem:[%s1912_s6 + $0x48] sm:$0xf] %vm930_vm2, %v884_v3  ;;  %v757_v17 = vadd.f32 %v1520_v16, %v689_v12 }
  0xa8   :  { %v836_v14 = vmax.f32 %v772_v10, 0.0  ;;  %v788_v15 = vadd.f32 %v1520_v16, %v720_v11  ;;  %v805_v18 = vmax.f32 %v741_v13, 0.0 }
  0xa9   :  { %v821_v21 = vmax.f32 %v757_v17, 0.0 }
  0xaa   :  { %v900_v19 = vpack.c.bf16 %v836_v14, %v836_v14  ;;  %v852_v20 = vmax.f32 %v788_v15, 0.0  ;;  %v869_v22 = vpack.c.bf16 %v805_v18, %v805_v18 }
  0xab   :  { %v593_v23 = vpop.f32.mrf.mxu2  ;;  %v885_v25 = vpack.c.bf16 %v821_v21, %v821_v21  ;;  %v516_v27 = vpop.f32.mrf.mxu0 }
  0xac   :  { %965 = vst.msk [vmem:[%s1912_s6 + $0x88] sm:$0xf] %vm930_vm2, %v900_v19  ;;  %v916_v24 = vpack.c.bf16 %v852_v20, %v852_v20  ;;  %v705_v26 = vmul.f32 %v1515_v6, %v593_v23  ;;  %v674_v29 = vmul.f32 %v1515_v6, %v516_v27  ;;  %v556_v30 = vpop.f32.mrf.mxu1 }
  0xad   :  { %934 = vst.msk [vmem:[%s1912_s6 + $0xc] sm:$0xf] %vm930_vm2, %v869_v22  ;;  %v633_v28 = vpop.f32.mrf.mxu3  ;;  %v690_v33 = vmul.f32 %v1515_v6, %v556_v30 }
  0xae   :  { %981 = vst.msk [vmem:[%s1912_s6 + $0xc8] sm:$0xf] %vm930_vm2, %v916_v24  ;;  %v773_v31 = vadd.f32 %v1520_v16, %v705_v26  ;;  %v721_v32 = vmul.f32 %v1515_v6, %v633_v28  ;;  %v742_v34 = vadd.f32 %v1520_v16, %v674_v29 }
  0xaf   :  { %950 = vst.msk [vmem:[%s1912_s6 + $0x4c] sm:$0xf] %vm930_vm2, %v885_v25  ;;  %v758_v37 = vadd.f32 %v1520_v16, %v690_v33 }
  0xb0   :  { %v837_v35 = vmax.f32 %v773_v31, 0.0  ;;  %v789_v36 = vadd.f32 %v1520_v16, %v721_v32  ;;  %v806_v38 = vmax.f32 %v742_v34, 0.0 }
  0xb1   :  { %v822_v41 = vmax.f32 %v758_v37, 0.0 }
  0xb2   :  { %v901_v39 = vpack.c.bf16 %v837_v35, %v837_v35  ;;  %v853_v40 = vmax.f32 %v789_v36, 0.0  ;;  %v870_v42 = vpack.c.bf16 %v806_v38, %v806_v38 }
  0xb3   :  { %v596_v43 = vpop.f32.mrf.mxu2  ;;  %v886_v45 = vpack.c.bf16 %v822_v41, %v822_v41  ;;  %v518_v47 = vpop.f32.mrf.mxu0 }
  0xb4   :  { %966 = vst.msk [vmem:[%s1912_s6 + $0x8c] sm:$0xf] %vm930_vm2, %v901_v39  ;;  %v917_v44 = vpack.c.bf16 %v853_v40, %v853_v40  ;;  %v706_v46 = vmul.f32 %v1515_v6, %v596_v43  ;;  %v675_v49 = vmul.f32 %v1515_v6, %v518_v47  ;;  %v558_v50 = vpop.f32.mrf.mxu1 }
  0xb5   :  { %935 = vst.msk [vmem:[%s1912_s6 + $0x10] sm:$0xf] %vm930_vm2, %v870_v42  ;;  %v636_v48 = vpop.f32.mrf.mxu3  ;;  %v691_v53 = vmul.f32 %v1515_v6, %v558_v50 }
  0xb6   :  { %982 = vst.msk [vmem:[%s1912_s6 + $0xcc] sm:$0xf] %vm930_vm2, %v917_v44  ;;  %v774_v51 = vadd.f32 %v1520_v16, %v706_v46  ;;  %v722_v52 = vmul.f32 %v1515_v6, %v636_v48  ;;  %v743_v54 = vadd.f32 %v1520_v16, %v675_v49 }
  0xb7   :  { %951 = vst.msk [vmem:[%s1912_s6 + $0x50] sm:$0xf] %vm930_vm2, %v886_v45  ;;  %v759_v57 = vadd.f32 %v1520_v16, %v691_v53 }
  0xb8   :  { %v838_v55 = vmax.f32 %v774_v51, 0.0  ;;  %v790_v56 = vadd.f32 %v1520_v16, %v722_v52  ;;  %v807_v58 = vmax.f32 %v743_v54, 0.0 }
  0xb9   :  { %v823_v61 = vmax.f32 %v759_v57, 0.0 }
  0xba   :  { %v902_v59 = vpack.c.bf16 %v838_v55, %v838_v55  ;;  %v854_v60 = vmax.f32 %v790_v56, 0.0  ;;  %v871_v62 = vpack.c.bf16 %v807_v58, %v807_v58 }
  0xbb   :  { %v598_v63 = vpop.f32.mrf.mxu2  ;;  %v887_v1 = vpack.c.bf16 %v823_v61, %v823_v61  ;;  %v521_v3 = vpop.f32.mrf.mxu0 }
  0xbc   :  { %967 = vst.msk [vmem:[%s1912_s6 + $0x90] sm:$0xf] %vm930_vm2, %v902_v59  ;;  %v918_v0 = vpack.c.bf16 %v854_v60, %v854_v60  ;;  %v707_v2 = vmul.f32 %v1515_v6, %v598_v63  ;;  %v676_v7 = vmul.f32 %v1515_v6, %v521_v3  ;;  %v561_v5 = vpop.f32.mrf.mxu1 }
  0xbd   :  { %936 = vst.msk [vmem:[%s1912_s6 + $0x14] sm:$0xf] %vm930_vm2, %v871_v62  ;;  %v638_v4 = vpop.f32.mrf.mxu3  ;;  %v692_v10 = vmul.f32 %v1515_v6, %v561_v5 }
  0xbe   :  { %983 = vst.msk [vmem:[%s1912_s6 + $0xd0] sm:$0xf] %vm930_vm2, %v918_v0  ;;  %v775_v8 = vadd.f32 %v1520_v16, %v707_v2  ;;  %v723_v9 = vmul.f32 %v1515_v6, %v638_v4  ;;  %v744_v11 = vadd.f32 %v1520_v16, %v676_v7 }
  0xbf   :  { %952 = vst.msk [vmem:[%s1912_s6 + $0x54] sm:$0xf] %vm930_vm2, %v887_v1  ;;  %v760_v14 = vadd.f32 %v1520_v16, %v692_v10 }
  0xc0   :  { %v839_v12 = vmax.f32 %v775_v8, 0.0  ;;  %v791_v13 = vadd.f32 %v1520_v16, %v723_v9  ;;  %v808_v15 = vmax.f32 %v744_v11, 0.0 }
  0xc1   :  { %v824_v19 = vmax.f32 %v760_v14, 0.0 }
  0xc2   :  { %v903_v17 = vpack.c.bf16 %v839_v12, %v839_v12  ;;  %v855_v18 = vmax.f32 %v791_v13, 0.0  ;;  %v872_v20 = vpack.c.bf16 %v808_v15, %v808_v15 }
  0xc3   :  { %v601_v21 = vpop.f32.mrf.mxu2  ;;  %v888_v23 = vpack.c.bf16 %v824_v19, %v824_v19  ;;  %v523_v25 = vpop.f32.mrf.mxu0 }
  0xc4   :  { %968 = vst.msk [vmem:[%s1912_s6 + $0x94] sm:$0xf] %vm930_vm2, %v903_v17  ;;  %v919_v22 = vpack.c.bf16 %v855_v18, %v855_v18  ;;  %v708_v24 = vmul.f32 %v1515_v6, %v601_v21  ;;  %v677_v27 = vmul.f32 %v1515_v6, %v523_v25  ;;  %v563_v28 = vpop.f32.mrf.mxu1 }
  0xc5   :  { %937 = vst.msk [vmem:[%s1912_s6 + $0x18] sm:$0xf] %vm930_vm2, %v872_v20  ;;  %v641_v26 = vpop.f32.mrf.mxu3  ;;  %v693_v31 = vmul.f32 %v1515_v6, %v563_v28 }
  0xc6   :  { %984 = vst.msk [vmem:[%s1912_s6 + $0xd4] sm:$0xf] %vm930_vm2, %v919_v22  ;;  %v776_v29 = vadd.f32 %v1520_v16, %v708_v24  ;;  %v724_v30 = vmul.f32 %v1515_v6, %v641_v26  ;;  %v745_v32 = vadd.f32 %v1520_v16, %v677_v27 }
  0xc7   :  { %953 = vst.msk [vmem:[%s1912_s6 + $0x58] sm:$0xf] %vm930_vm2, %v888_v23  ;;  %v761_v35 = vadd.f32 %v1520_v16, %v693_v31 }
  0xc8   :  { %v840_v33 = vmax.f32 %v776_v29, 0.0  ;;  %v792_v34 = vadd.f32 %v1520_v16, %v724_v30  ;;  %v809_v36 = vmax.f32 %v745_v32, 0.0 }
  0xc9   :  { %v825_v39 = vmax.f32 %v761_v35, 0.0 }
  0xca   :  { %v904_v37 = vpack.c.bf16 %v840_v33, %v840_v33  ;;  %v856_v38 = vmax.f32 %v792_v34, 0.0  ;;  %v873_v40 = vpack.c.bf16 %v809_v36, %v809_v36 }
  0xcb   :  { %v603_v41 = vpop.f32.mrf.mxu2  ;;  %v889_v43 = vpack.c.bf16 %v825_v39, %v825_v39  ;;  %v526_v45 = vpop.f32.mrf.mxu0 }
  0xcc   :  { %969 = vst.msk [vmem:[%s1912_s6 + $0x98] sm:$0xf] %vm930_vm2, %v904_v37  ;;  %v920_v42 = vpack.c.bf16 %v856_v38, %v856_v38  ;;  %v709_v44 = vmul.f32 %v1515_v6, %v603_v41  ;;  %v678_v47 = vmul.f32 %v1515_v6, %v526_v45  ;;  %v566_v48 = vpop.f32.mrf.mxu1 }
  0xcd   :  { %938 = vst.msk [vmem:[%s1912_s6 + $0x1c] sm:$0xf] %vm930_vm2, %v873_v40  ;;  %v643_v46 = vpop.f32.mrf.mxu3  ;;  %v694_v51 = vmul.f32 %v1515_v6, %v566_v48 }
  0xce   :  { %985 = vst.msk [vmem:[%s1912_s6 + $0xd8] sm:$0xf] %vm930_vm2, %v920_v42  ;;  %v777_v49 = vadd.f32 %v1520_v16, %v709_v44  ;;  %v725_v50 = vmul.f32 %v1515_v6, %v643_v46  ;;  %v746_v52 = vadd.f32 %v1520_v16, %v678_v47 }
  0xcf   :  { %954 = vst.msk [vmem:[%s1912_s6 + $0x5c] sm:$0xf] %vm930_vm2, %v889_v43  ;;  %v762_v55 = vadd.f32 %v1520_v16, %v694_v51 }
  0xd0   :  { %v841_v53 = vmax.f32 %v777_v49, 0.0  ;;  %v793_v54 = vadd.f32 %v1520_v16, %v725_v50  ;;  %v810_v56 = vmax.f32 %v746_v52, 0.0 }
  0xd1   :  { %v826_v59 = vmax.f32 %v762_v55, 0.0 }
  0xd2   :  { %v905_v57 = vpack.c.bf16 %v841_v53, %v841_v53  ;;  %v857_v58 = vmax.f32 %v793_v54, 0.0  ;;  %v874_v60 = vpack.c.bf16 %v810_v56, %v810_v56 }
  0xd3   :  { %v606_v61 = vpop.f32.mrf.mxu2  ;;  %v890_v63 = vpack.c.bf16 %v826_v59, %v826_v59  ;;  %v528_v1 = vpop.f32.mrf.mxu0 }
  0xd4   :  { %970 = vst.msk [vmem:[%s1912_s6 + $0x9c] sm:$0xf] %vm930_vm2, %v905_v57  ;;  %v921_v62 = vpack.c.bf16 %v857_v58, %v857_v58  ;;  %v710_v0 = vmul.f32 %v1515_v6, %v606_v61  ;;  %v679_v3 = vmul.f32 %v1515_v6, %v528_v1  ;;  %v568_v4 = vpop.f32.mrf.mxu1 }
  0xd5   :  { %939 = vst.msk [vmem:[%s1912_s6 + $0x20] sm:$0xf] %vm930_vm2, %v874_v60  ;;  %v646_v2 = vpop.f32.mrf.mxu3  ;;  %v695_v8 = vmul.f32 %v1515_v6, %v568_v4 }
  0xd6   :  { %986 = vst.msk [vmem:[%s1912_s6 + $0xdc] sm:$0xf] %vm930_vm2, %v921_v62  ;;  %v778_v7 = vadd.f32 %v1520_v16, %v710_v0  ;;  %v726_v5 = vmul.f32 %v1515_v6, %v646_v2  ;;  %v747_v9 = vadd.f32 %v1520_v16, %v679_v3 }
  0xd7   :  { %955 = vst.msk [vmem:[%s1912_s6 + $0x60] sm:$0xf] %vm930_vm2, %v890_v63  ;;  %v763_v12 = vadd.f32 %v1520_v16, %v695_v8 }
  0xd8   :  { %v842_v10 = vmax.f32 %v778_v7, 0.0  ;;  %v794_v11 = vadd.f32 %v1520_v16, %v726_v5  ;;  %v811_v13 = vmax.f32 %v747_v9, 0.0 }
  0xd9   :  { %v827_v17 = vmax.f32 %v763_v12, 0.0 }
  0xda   :  { %v906_v14 = vpack.c.bf16 %v842_v10, %v842_v10  ;;  %v858_v15 = vmax.f32 %v794_v11, 0.0  ;;  %v875_v18 = vpack.c.bf16 %v811_v13, %v811_v13 }
  0xdb   :  { %v608_v19 = vpop.f32.mrf.mxu2  ;;  %v891_v21 = vpack.c.bf16 %v827_v17, %v827_v17  ;;  %v531_v23 = vpop.f32.mrf.mxu0 }
  0xdc   :  { %971 = vst.msk [vmem:[%s1912_s6 + $0xa0] sm:$0xf] %vm930_vm2, %v906_v14  ;;  %v922_v20 = vpack.c.bf16 %v858_v15, %v858_v15  ;;  %v711_v22 = vmul.f32 %v1515_v6, %v608_v19  ;;  %v680_v25 = vmul.f32 %v1515_v6, %v531_v23  ;;  %v571_v26 = vpop.f32.mrf.mxu1 }
  0xdd   :  { %940 = vst.msk [vmem:[%s1912_s6 + $0x24] sm:$0xf] %vm930_vm2, %v875_v18  ;;  %v648_v24 = vpop.f32.mrf.mxu3  ;;  %v696_v29 = vmul.f32 %v1515_v6, %v571_v26 }
  0xde   :  { %987 = vst.msk [vmem:[%s1912_s6 + $0xe0] sm:$0xf] %vm930_vm2, %v922_v20  ;;  %v779_v27 = vadd.f32 %v1520_v16, %v711_v22  ;;  %v727_v28 = vmul.f32 %v1515_v6, %v648_v24  ;;  %v748_v30 = vadd.f32 %v1520_v16, %v680_v25 }
  0xdf   :  { %956 = vst.msk [vmem:[%s1912_s6 + $0x64] sm:$0xf] %vm930_vm2, %v891_v21  ;;  %v764_v33 = vadd.f32 %v1520_v16, %v696_v29 }
  0xe0   :  { %v843_v31 = vmax.f32 %v779_v27, 0.0  ;;  %v795_v32 = vadd.f32 %v1520_v16, %v727_v28  ;;  %v812_v34 = vmax.f32 %v748_v30, 0.0 }
  0xe1   :  { %v828_v37 = vmax.f32 %v764_v33, 0.0 }
  0xe2   :  { %v907_v35 = vpack.c.bf16 %v843_v31, %v843_v31  ;;  %v859_v36 = vmax.f32 %v795_v32, 0.0  ;;  %v876_v38 = vpack.c.bf16 %v812_v34, %v812_v34 }
  0xe3   :  { %v611_v39 = vpop.f32.mrf.mxu2  ;;  %v892_v41 = vpack.c.bf16 %v828_v37, %v828_v37  ;;  %v533_v43 = vpop.f32.mrf.mxu0 }
  0xe4   :  { %972 = vst.msk [vmem:[%s1912_s6 + $0xa4] sm:$0xf] %vm930_vm2, %v907_v35  ;;  %v923_v40 = vpack.c.bf16 %v859_v36, %v859_v36  ;;  %v712_v42 = vmul.f32 %v1515_v6, %v611_v39  ;;  %v681_v45 = vmul.f32 %v1515_v6, %v533_v43  ;;  %v573_v46 = vpop.f32.mrf.mxu1 }
  0xe5   :  { %941 = vst.msk [vmem:[%s1912_s6 + $0x28] sm:$0xf] %vm930_vm2, %v876_v38  ;;  %v651_v44 = vpop.f32.mrf.mxu3  ;;  %v697_v49 = vmul.f32 %v1515_v6, %v573_v46 }
  0xe6   :  { %988 = vst.msk [vmem:[%s1912_s6 + $0xe4] sm:$0xf] %vm930_vm2, %v923_v40  ;;  %v780_v47 = vadd.f32 %v1520_v16, %v712_v42  ;;  %v728_v48 = vmul.f32 %v1515_v6, %v651_v44  ;;  %v749_v50 = vadd.f32 %v1520_v16, %v681_v45 }
  0xe7   :  { %957 = vst.msk [vmem:[%s1912_s6 + $0x68] sm:$0xf] %vm930_vm2, %v892_v41  ;;  %v765_v53 = vadd.f32 %v1520_v16, %v697_v49 }
  0xe8   :  { %v844_v51 = vmax.f32 %v780_v47, 0.0  ;;  %v796_v52 = vadd.f32 %v1520_v16, %v728_v48  ;;  %v813_v54 = vmax.f32 %v749_v50, 0.0 }
  0xe9   :  { %v829_v57 = vmax.f32 %v765_v53, 0.0 }
  0xea   :  { %v908_v55 = vpack.c.bf16 %v844_v51, %v844_v51  ;;  %v860_v56 = vmax.f32 %v796_v52, 0.0  ;;  %v877_v58 = vpack.c.bf16 %v813_v54, %v813_v54 }
  0xeb   :  { %v613_v59 = vpop.f32.mrf.mxu2  ;;  %v893_v61 = vpack.c.bf16 %v829_v57, %v829_v57  ;;  %v536_v63 = vpop.f32.mrf.mxu0 }
  0xec   :  { %973 = vst.msk [vmem:[%s1912_s6 + $0xa8] sm:$0xf] %vm930_vm2, %v908_v55  ;;  %v924_v60 = vpack.c.bf16 %v860_v56, %v860_v56  ;;  %v713_v62 = vmul.f32 %v1515_v6, %v613_v59  ;;  %v682_v1 = vmul.f32 %v1515_v6, %v536_v63  ;;  %v576_v2 = vpop.f32.mrf.mxu1 }
  0xed   :  { %942 = vst.msk [vmem:[%s1912_s6 + $0x2c] sm:$0xf] %vm930_vm2, %v877_v58  ;;  %v653_v0 = vpop.f32.mrf.mxu3  ;;  %v698_v7 = vmul.f32 %v1515_v6, %v576_v2 }
  0xee   :  { %989 = vst.msk [vmem:[%s1912_s6 + $0xe8] sm:$0xf] %vm930_vm2, %v924_v60  ;;  %v781_v3 = vadd.f32 %v1520_v16, %v713_v62  ;;  %v729_v4 = vmul.f32 %v1515_v6, %v653_v0  ;;  %v750_v5 = vadd.f32 %v1520_v16, %v682_v1 }
  0xef   :  { %958 = vst.msk [vmem:[%s1912_s6 + $0x6c] sm:$0xf] %vm930_vm2, %v893_v61  ;;  %v766_v10 = vadd.f32 %v1520_v16, %v698_v7 }
  0xf0   :  { %v845_v8 = vmax.f32 %v781_v3, 0.0  ;;  %v797_v9 = vadd.f32 %v1520_v16, %v729_v4  ;;  %v814_v11 = vmax.f32 %v750_v5, 0.0 }
  0xf1   :  { %v830_v14 = vmax.f32 %v766_v10, 0.0 }
  0xf2   :  { %v909_v12 = vpack.c.bf16 %v845_v8, %v845_v8  ;;  %v861_v13 = vmax.f32 %v797_v9, 0.0  ;;  %v878_v15 = vpack.c.bf16 %v814_v11, %v814_v11 }
  0xf3   :  { %v616_v17 = vpop.f32.mrf.mxu2  ;;  %v894_v19 = vpack.c.bf16 %v830_v14, %v830_v14  ;;  %v538_v21 = vpop.f32.mrf.mxu0 }
  0xf4   :  { %974 = vst.msk [vmem:[%s1912_s6 + $0xac] sm:$0xf] %vm930_vm2, %v909_v12  ;;  %v925_v18 = vpack.c.bf16 %v861_v13, %v861_v13  ;;  %v714_v20 = vmul.f32 %v1515_v6, %v616_v17  ;;  %v683_v23 = vmul.f32 %v1515_v6, %v538_v21  ;;  %v578_v24 = vpop.f32.mrf.mxu1 }
  0xf5   :  { %943 = vst.msk [vmem:[%s1912_s6 + $0x30] sm:$0xf] %vm930_vm2, %v878_v15  ;;  %v656_v22 = vpop.f32.mrf.mxu3  ;;  %v699_v27 = vmul.f32 %v1515_v6, %v578_v24 }
  0xf6   :  { %990 = vst.msk [vmem:[%s1912_s6 + $0xec] sm:$0xf] %vm930_vm2, %v925_v18  ;;  %v782_v25 = vadd.f32 %v1520_v16, %v714_v20  ;;  %v730_v26 = vmul.f32 %v1515_v6, %v656_v22  ;;  %v751_v28 = vadd.f32 %v1520_v16, %v683_v23 }
  0xf7   :  { %959 = vst.msk [vmem:[%s1912_s6 + $0x70] sm:$0xf] %vm930_vm2, %v894_v19  ;;  %v767_v31 = vadd.f32 %v1520_v16, %v699_v27 }
  0xf8   :  { %v846_v29 = vmax.f32 %v782_v25, 0.0  ;;  %v798_v30 = vadd.f32 %v1520_v16, %v730_v26  ;;  %v815_v32 = vmax.f32 %v751_v28, 0.0 }
  0xf9   :  { %v831_v35 = vmax.f32 %v767_v31, 0.0 }
  0xfa   :  { %v910_v33 = vpack.c.bf16 %v846_v29, %v846_v29  ;;  %v862_v34 = vmax.f32 %v798_v30, 0.0  ;;  %v879_v36 = vpack.c.bf16 %v815_v32, %v815_v32 }
  0xfb   :  { %v618_v37 = vpop.f32.mrf.mxu2  ;;  %v895_v39 = vpack.c.bf16 %v831_v35, %v831_v35  ;;  %v541_v41 = vpop.f32.mrf.mxu0 }
  0xfc   :  { %975 = vst.msk [vmem:[%s1912_s6 + $0xb0] sm:$0xf] %vm930_vm2, %v910_v33  ;;  %v926_v38 = vpack.c.bf16 %v862_v34, %v862_v34  ;;  %v715_v40 = vmul.f32 %v1515_v6, %v618_v37  ;;  %v684_v43 = vmul.f32 %v1515_v6, %v541_v41  ;;  %v581_v44 = vpop.f32.mrf.mxu1 }
  0xfd   :  { %944 = vst.msk [vmem:[%s1912_s6 + $0x34] sm:$0xf] %vm930_vm2, %v879_v36  ;;  %v658_v42 = vpop.f32.mrf.mxu3  ;;  %v700_v47 = vmul.f32 %v1515_v6, %v581_v44 }
  0xfe   :  { %991 = vst.msk [vmem:[%s1912_s6 + $0xf0] sm:$0xf] %vm930_vm2, %v926_v38  ;;  %v783_v45 = vadd.f32 %v1520_v16, %v715_v40  ;;  %v731_v46 = vmul.f32 %v1515_v6, %v658_v42  ;;  %v752_v48 = vadd.f32 %v1520_v16, %v684_v43 }
  0xff   :  { %960 = vst.msk [vmem:[%s1912_s6 + $0x74] sm:$0xf] %vm930_vm2, %v895_v39  ;;  %v768_v51 = vadd.f32 %v1520_v16, %v700_v47 }
 0x100   :  { %v847_v49 = vmax.f32 %v783_v45, 0.0  ;;  %v799_v50 = vadd.f32 %v1520_v16, %v731_v46  ;;  %v816_v52 = vmax.f32 %v752_v48, 0.0 }
 0x101   :  { %v832_v55 = vmax.f32 %v768_v51, 0.0 }
 0x102   :  { %v911_v53 = vpack.c.bf16 %v847_v49, %v847_v49  ;;  %v863_v54 = vmax.f32 %v799_v50, 0.0  ;;  %v880_v56 = vpack.c.bf16 %v816_v52, %v816_v52 }
 0x103   :  { %v621_v57 = vpop.f32.mrf.mxu2  ;;  %v896_v59 = vpack.c.bf16 %v832_v55, %v832_v55  ;;  %v543_v61 = vpop.f32.mrf.mxu0 }
 0x104   :  { %976 = vst.msk [vmem:[%s1912_s6 + $0xb4] sm:$0xf] %vm930_vm2, %v911_v53  ;;  %v927_v58 = vpack.c.bf16 %v863_v54, %v863_v54  ;;  %v716_v60 = vmul.f32 %v1515_v6, %v621_v57  ;;  %v685_v63 = vmul.f32 %v1515_v6, %v543_v61  ;;  %v583_v0 = vpop.f32.mrf.mxu1 }
 0x105   :  { %945 = vst.msk [vmem:[%s1912_s6 + $0x38] sm:$0xf] %vm930_vm2, %v880_v56  ;;  %v661_v62 = vpop.f32.mrf.mxu3  ;;  %v701_v3 = vmul.f32 %v1515_v6, %v583_v0 }
 0x106   :  { %992 = vst.msk [vmem:[%s1912_s6 + $0xf4] sm:$0xf] %vm930_vm2, %v927_v58  ;;  %v784_v1 = vadd.f32 %v1520_v16, %v716_v60  ;;  %v732_v2 = vmul.f32 %v1515_v6, %v661_v62  ;;  %v753_v4 = vadd.f32 %v1520_v16, %v685_v63 }
 0x107   :  { %961 = vst.msk [vmem:[%s1912_s6 + $0x78] sm:$0xf] %vm930_vm2, %v896_v59  ;;  %v769_v8 = vadd.f32 %v1520_v16, %v701_v3 }
 0x108   :  { %v848_v7 = vmax.f32 %v784_v1, 0.0  ;;  %v800_v5 = vadd.f32 %v1520_v16, %v732_v2  ;;  %v817_v9 = vmax.f32 %v753_v4, 0.0 }
 0x109   :  { %v833_v12 = vmax.f32 %v769_v8, 0.0 }
 0x10a   :  { %v912_v10 = vpack.c.bf16 %v848_v7, %v848_v7  ;;  %v864_v11 = vmax.f32 %v800_v5, 0.0  ;;  %v881_v13 = vpack.c.bf16 %v817_v9, %v817_v9 }
 0x10b   :  { %v623_v14 = vpop.f32.mrf.mxu2  ;;  %v897_v17 = vpack.c.bf16 %v833_v12, %v833_v12 }
 0x10c   :  { %977 = vst.msk [vmem:[%s1912_s6 + $0xb8] sm:$0xf] %vm930_vm2, %v912_v10  ;;  %v928_v15 = vpack.c.bf16 %v864_v11, %v864_v11  ;;  %v717_v18 = vmul.f32 %v1515_v6, %v623_v14 }
 0x10d   :  { %946 = vst.msk [vmem:[%s1912_s6 + $0x3c] sm:$0xf] %vm930_vm2, %v881_v13  ;;  %v663_v19 = vpop.f32.mrf.mxu3 }
 0x10e   :  { %993 = vst.msk [vmem:[%s1912_s6 + $0xf8] sm:$0xf] %vm930_vm2, %v928_v15  ;;  %v785_v20 = vadd.f32 %v1520_v16, %v717_v18  ;;  %v733_v21 = vmul.f32 %v1515_v6, %v663_v19 }
 0x10f   :  { %962 = vst.msk [vmem:[%s1912_s6 + $0x7c] sm:$0xf] %vm930_vm2, %v897_v17 }
 0x110   :  { %v849_v22 = vmax.f32 %v785_v20, 0.0  ;;  %v801_v23 = vadd.f32 %v1520_v16, %v733_v21 }
 0x112   :  { %v913_v24 = vpack.c.bf16 %v849_v22, %v849_v22  ;;  %v865_v25 = vmax.f32 %v801_v23, 0.0 }
 0x114   :  { %978 = vst.msk [vmem:[%s1912_s6 + $0xbc] sm:$0xf] %vm930_vm2, %v913_v24  ;;  %v929_v26 = vpack.c.bf16 %v865_v25, %v865_v25 }
 0x116   :  { %994 = vst.msk [vmem:[%s1912_s6 + $0xfc] sm:$0xf] %vm930_vm2, %v929_v26 }

// kernel: tile.33
= control target key start
LH: loop header
LB: loop body
LE: loop exit
PB: predicated region body
PF: predicated region fallthrough
CT: control target
= control target key end

     0   :  { %s22_s0 = inlined_call_operand.vmem [shape: f32[32], index: 0, kind: input, shape index: {}]   ;;  %s23_s1 = inlined_call_operand.vmem [shape: f32[4,32], index: 1, kind: output, shape index: {}]  }
   0x1   :  { %v4_v0 = vld [vmem:[%s22_s0] ss:$0 sm:$0xff] }
   0x2   :  { %5 = vst [vmem:[%s23_s1] sm:$0xf] %v4_v0 }

// kernel: tile.34
= control target key start
LH: loop header
LB: loop body
LE: loop exit
PB: predicated region body
PF: predicated region fallthrough
CT: control target
= control target key end

     0   :  { %s37_s8 = smov 32   ;;  %s38_s9 = smov 64   ;;  %vm7_vm0 = vcmask 261120   ;;  %vm13_vm1 = vcmask 1048320   ;;  %vm19_vm2 = vcmask 785920   ;;  %vm25_vm3 = vcmask 523520   ;;  %s55_s0 = inlined_call_operand.vmem [shape: f32[4,32], index: 0, kind: input, shape index: {}]   ;;  %s56_s1 = inlined_call_operand.vmem [shape: f32[1,128], index: 1, kind: output, shape index: {}]  }
   0x1   :  { %v4_v0 = vld [vmem:[%s55_s0] sm:$0xf]  ;;  %s36_s0 = smov 96  }
   0x2   :  { %5 = vst [vmem:[#allocation1] sm:$0xf] %v4_v0 }
   0x9   :  { %v10_v1 = vld [vmem:[#allocation1 + $0x3] sm:$0x1]   ;;  %v22_v2 = vld [vmem:[#allocation1 + $0x1] sm:$0x1]   ;;  %v16_v3 = vld [vmem:[#allocation1 + $0x2] sm:$0x1]  }
   0xa   :  { %11 = vrot.lane.b32.xlu0 %v10_v1, %s36_s0  ;;  %23 = vrot.lane.b32.xlu1 %v22_v2, %s37_s8  ;;  %v6_v4 = vld [vmem:[#allocation1] sm:$0x1]  }
   0xb   :  { %8 = vst.msk [vmem:[#allocation0] sm:$0x1] %vm7_vm0, %v6_v4  }
  0x12   :  { %17 = vrot.lane.b32.xlu0 %v16_v3, %s38_s9 }
  0x7c   :  { %v12_v5 = vpop.permute.xlu0 %11   ;;  %v24_v6 = vpop.permute.xlu1 %23  }
  0x7d   :  { %14 = vst.msk [vmem:[#allocation0] sm:$0x1] %vm13_vm1, %v12_v5  }
  0x84   :  { %v18_v7 = vpop.permute.xlu0 %17  }
  0x85   :  { %20 = vst.msk [vmem:[#allocation0] sm:$0x1] %vm19_vm2, %v18_v7  }
  0x86   :  { %26 = vst.msk [vmem:[#allocation0] sm:$0x1] %vm25_vm3, %v24_v6  }
  0x8d   :  { %v29_v8 = vld [vmem:[#allocation0] sm:$0x1] }
  0x8e   :  { %32 = vst [vmem:[%s56_s1] sm:$0x1] %v29_v8 }

// kernel: densenet_forward.32
= control target key start
LH: loop header
LB: loop body
LE: loop exit
PB: predicated region body
PF: predicated region fallthrough
CT: control target
= control target key end

     0   :  { %vm84_vm0 = vcmask 261120   ;;  %vm174_vm1 = vcmask 125952   ;;  %s376_s1 = inlined_call_operand.vmem [shape: bf16[32,16], index: 1, kind: input, shape index: {}]   ;;  %s377_s0 = inlined_call_operand.vmem [shape: bf16[128,32], index: 0, kind: input, shape index: {}]   ;;  %s378_s2 = inlined_call_operand.vmem [shape: bf16[128,16], index: 2, kind: output, shape index: {}]  }
   0x1   :  { %v252_v0 = vld [vmem:[%s376_s1 + $0x8] sm:$0xff]  ;;  %v251_v1 = vld [vmem:[%s376_s1] sm:$0xff]  ;;  %v245_v3 = vld [vmem:[%s377_s0 + $0x10] sm:$0xff] }
   0x2   :  { %115 = vmatpush.bf16.msra.mxu0 %v252_v0  ;;  %253 = vmatpush.bf16.msra.mxu1 %v252_v0  ;;  %v243_v2 = vld [vmem:[%s377_s0] sm:$0xff]  ;;  %v249_v5 = vld [vmem:[%s377_s0 + $0x30] sm:$0xff]  ;;  %v244_v6 = vld [vmem:[%s377_s0 + $0x8] sm:$0xff] }
   0x3   :  { %254 = vmatpush.bf16.msra.mxu2 %v252_v0  ;;  %255 = vmatpush.bf16.msra.mxu3 %v252_v0  ;;  %v247_v4 = vld [vmem:[%s377_s0 + $0x20] sm:$0xff]  ;;  %v246_v7 = vld [vmem:[%s377_s0 + $0x18] sm:$0xff]  ;;  %v248_v8 = vld [vmem:[%s377_s0 + $0x28] sm:$0xff] }
   0x4   :  { %v250_v9 = vld [vmem:[%s377_s0 + $0x38] sm:$0xff] }
   0x6   :  { %116 = vmatpush.bf16.msra.mxu0 %v251_v1  ;;  %256 = vmatpush.bf16.msra.mxu1 %v251_v1 }
   0x7   :  { %257 = vmatpush.bf16.msra.mxu2 %v251_v1  ;;  %258 = vmatpush.bf16.msra.mxu3 %v251_v1 }
   0x9   :  { %235 = vmatmul.msk.bf16.vlgmr.msra.gmra.mxu0 %vm84_vm0, %v243_v2  ;;  %237 = vmatmul.msk.bf16.vlgmr.msra.gmra.mxu1 %vm84_vm0, %v245_v3 }
   0xa   :  { %239 = vmatmul.msk.bf16.vlgmr.msra.gmra.mxu2 %vm84_vm0, %v247_v4  ;;  %241 = vmatmul.msk.bf16.vlgmr.msra.gmra.mxu3 %vm84_vm0, %v249_v5 }
  0x19   :  { %236 = vmatmul.msk.bf16.gmra.mxu0 %vm84_vm0, %v244_v6  ;;  %238 = vmatmul.msk.bf16.gmra.mxu1 %vm84_vm0, %v246_v7 }
  0x1a   :  { %240 = vmatmul.msk.bf16.gmra.mxu2 %vm84_vm0, %v248_v8  ;;  %242 = vmatmul.msk.bf16.gmra.mxu3 %vm84_vm0, %v250_v9 }
  0x86   :  { %v118_v10 = vpop.f32.mrf.mxu0  ;;  %v128_v11 = vpop.f32.mrf.mxu1 }
  0x87   :  { %v158_v12 = vpack.c.bf16 %v118_v10, %v118_v10  ;;  %v162_v13 = vpack.c.bf16 %v128_v11, %v128_v11 }
  0x89   :  { %175 = vst.msk [vmem:[%s378_s2] sm:$0xf] %vm174_vm1, %v158_v12 }
  0x8a   :  { %179 = vst.msk [vmem:[%s378_s2 + $0x10] sm:$0xf] %vm174_vm1, %v162_v13 }
  0x8d   :  { %v138_v14 = vpop.f32.mrf.mxu2  ;;  %v148_v15 = vpop.f32.mrf.mxu3 }
  0x8e   :  { %v166_v16 = vpack.c.bf16 %v138_v14, %v138_v14  ;;  %v170_v17 = vpack.c.bf16 %v148_v15, %v148_v15  ;;  %v120_v18 = vpop.f32.mrf.mxu0  ;;  %v130_v19 = vpop.f32.mrf.mxu1 }
  0x8f   :  { %v159_v20 = vpack.c.bf16 %v120_v18, %v120_v18  ;;  %v163_v21 = vpack.c.bf16 %v130_v19, %v130_v19 }
  0x90   :  { %183 = vst.msk [vmem:[%s378_s2 + $0x20] sm:$0xf] %vm174_vm1, %v166_v16 }
  0x91   :  { %187 = vst.msk [vmem:[%s378_s2 + $0x30] sm:$0xf] %vm174_vm1, %v170_v17 }
  0x92   :  { %176 = vst.msk [vmem:[%s378_s2 + $0x4] sm:$0xf] %vm174_vm1, %v159_v20 }
  0x93   :  { %180 = vst.msk [vmem:[%s378_s2 + $0x14] sm:$0xf] %vm174_vm1, %v163_v21 }
  0x95   :  { %v140_v22 = vpop.f32.mrf.mxu2  ;;  %v150_v23 = vpop.f32.mrf.mxu3 }
  0x96   :  { %v167_v24 = vpack.c.bf16 %v140_v22, %v140_v22  ;;  %v171_v25 = vpack.c.bf16 %v150_v23, %v150_v23  ;;  %v123_v26 = vpop.f32.mrf.mxu0  ;;  %v133_v27 = vpop.f32.mrf.mxu1 }
  0x97   :  { %v160_v28 = vpack.c.bf16 %v123_v26, %v123_v26  ;;  %v164_v29 = vpack.c.bf16 %v133_v27, %v133_v27 }
  0x98   :  { %184 = vst.msk [vmem:[%s378_s2 + $0x24] sm:$0xf] %vm174_vm1, %v167_v24 }
  0x99   :  { %188 = vst.msk [vmem:[%s378_s2 + $0x34] sm:$0xf] %vm174_vm1, %v171_v25 }
  0x9a   :  { %177 = vst.msk [vmem:[%s378_s2 + $0x8] sm:$0xf] %vm174_vm1, %v160_v28 }
  0x9b   :  { %181 = vst.msk [vmem:[%s378_s2 + $0x18] sm:$0xf] %vm174_vm1, %v164_v29 }
  0x9d   :  { %v143_v30 = vpop.f32.mrf.mxu2  ;;  %v153_v31 = vpop.f32.mrf.mxu3 }
  0x9e   :  { %v168_v32 = vpack.c.bf16 %v143_v30, %v143_v30  ;;  %v172_v33 = vpack.c.bf16 %v153_v31, %v153_v31  ;;  %v125_v34 = vpop.f32.mrf.mxu0  ;;  %v135_v35 = vpop.f32.mrf.mxu1 }
  0x9f   :  { %v161_v36 = vpack.c.bf16 %v125_v34, %v125_v34  ;;  %v165_v37 = vpack.c.bf16 %v135_v35, %v135_v35 }
  0xa0   :  { %185 = vst.msk [vmem:[%s378_s2 + $0x28] sm:$0xf] %vm174_vm1, %v168_v32 }
  0xa1   :  { %189 = vst.msk [vmem:[%s378_s2 + $0x38] sm:$0xf] %vm174_vm1, %v172_v33 }
  0xa2   :  { %178 = vst.msk [vmem:[%s378_s2 + $0xc] sm:$0xf] %vm174_vm1, %v161_v36 }
  0xa3   :  { %182 = vst.msk [vmem:[%s378_s2 + $0x1c] sm:$0xf] %vm174_vm1, %v165_v37 }
  0xa5   :  { %v145_v38 = vpop.f32.mrf.mxu2  ;;  %v155_v39 = vpop.f32.mrf.mxu3 }
  0xa6   :  { %v169_v40 = vpack.c.bf16 %v145_v38, %v145_v38  ;;  %v173_v41 = vpack.c.bf16 %v155_v39, %v155_v39 }
  0xa8   :  { %186 = vst.msk [vmem:[%s378_s2 + $0x2c] sm:$0xf] %vm174_vm1, %v169_v40 }
  0xa9   :  { %190 = vst.msk [vmem:[%s378_s2 + $0x3c] sm:$0xf] %vm174_vm1, %v173_v41 }

// kernel: densenet_forward.31
= control target key start
LH: loop header
LB: loop body
LE: loop exit
PB: predicated region body
PF: predicated region fallthrough
CT: control target
= control target key end

     0   :  { %v192_v3 = vmov 4.0   ;;  %s268_s0 = inlined_call_operand.vmem [shape: bf16[4,32,128], index: 0, kind: input, shape index: {}]   ;;  %s269_s1 = inlined_call_operand.vmem [shape: f32[1,128], index: 1, kind: input, shape index: {}]   ;;  %s270_s2 = inlined_call_operand.vmem [shape: f32[1,128], index: 2, kind: input, shape index: {}]   ;;  %s271_s3 = inlined_call_operand.vmem [shape: bf16[32,128], index: 3, kind: output, shape index: {}]  }
   0x1   :  { %v138_v0 = vld [vmem:[%s268_s0] sm:$0xff]   ;;  %v180_v1 = vld [vmem:[%s268_s0 + $0x10] sm:$0xff]   ;;  %190 = vrcp.f32 %v192_v3  ;;  %v179_v36 = vld [vmem:[%s268_s0 + $0x8] sm:$0xff]  }
   0x2   :  { %v182_v2 = vld [vmem:[%s268_s0 + $0x20] sm:$0xff]   ;;  %v139_v4 = vunpack.c.l.bf16 %v138_v0  ;;  %v140_v5 = vunpack.c.h.bf16 %v138_v0  ;;  %v147_v6 = vunpack.c.l.bf16 %v180_v1  ;;  %v148_v7 = vunpack.c.h.bf16 %v180_v1  ;;  %v184_v8 = vld [vmem:[%s268_s0 + $0x30] sm:$0xff]   ;;  %v181_v37 = vld [vmem:[%s268_s0 + $0x18] sm:$0xff]  }
   0x3   :  { %v188_v9 = vld [vmem:[%s269_s1] ss:$0 sm:$0xff]  ;;  %v155_v10 = vunpack.c.l.bf16 %v182_v2  ;;  %v156_v11 = vunpack.c.h.bf16 %v182_v2  ;;  %v163_v12 = vunpack.c.l.bf16 %v184_v8  ;;  %v164_v13 = vunpack.c.h.bf16 %v184_v8  ;;  %v183_v42 = vld [vmem:[%s268_s0 + $0x28] sm:$0xff]   ;;  %v185_v46 = vld [vmem:[%s268_s0 + $0x38] sm:$0xff]  }
   0x4   :  { %v231_v14 = vld [vmem:[%s270_s2] ss:$0 sm:$0xff]  ;;  %v50_v15 = vmul.f32 %v188_v9, %v139_v4  ;;  %v51_v16 = vmul.f32 %v188_v9, %v140_v5  ;;  %v54_v17 = vmul.f32 %v188_v9, %v147_v6  ;;  %v55_v18 = vmul.f32 %v188_v9, %v148_v7 }
   0x5   :  { %v58_v19 = vmul.f32 %v188_v9, %v155_v10  ;;  %v59_v20 = vmul.f32 %v188_v9, %v156_v11  ;;  %v62_v21 = vmul.f32 %v188_v9, %v163_v12  ;;  %v63_v22 = vmul.f32 %v188_v9, %v164_v13 }
   0x6   :  { %v70_v23 = vadd.f32 %v231_v14, %v50_v15  ;;  %v71_v24 = vadd.f32 %v231_v14, %v51_v16  ;;  %v74_v25 = vadd.f32 %v231_v14, %v54_v17  ;;  %v75_v26 = vadd.f32 %v231_v14, %v55_v18 }
   0x7   :  { %v191_v27 = vpop.eup %190  ;;  %v78_v28 = vadd.f32 %v231_v14, %v58_v19  ;;  %v79_v29 = vadd.f32 %v231_v14, %v59_v20  ;;  %v82_v30 = vadd.f32 %v231_v14, %v62_v21  ;;  %v83_v31 = vadd.f32 %v231_v14, %v63_v22 }
   0x8   :  { %v86_v32 = vmax.f32 %v70_v23, 0.0  ;;  %v87_v33 = vmax.f32 %v71_v24, 0.0  ;;  %v90_v34 = vmax.f32 %v74_v25, 0.0  ;;  %v91_v35 = vmax.f32 %v75_v26, 0.0 }
   0x9   :  { %v94_v38 = vmax.f32 %v78_v28, 0.0  ;;  %v95_v39 = vmax.f32 %v79_v29, 0.0  ;;  %v98_v40 = vmax.f32 %v82_v30, 0.0  ;;  %v99_v41 = vmax.f32 %v83_v31, 0.0 }
   0xa   :  { %v102_v43 = vadd.f32 %v90_v34, %v86_v32  ;;  %v105_v44 = vadd.f32 %v91_v35, %v87_v33  ;;  %v115_v45 = vmul.f32 4.0, %v191_v27  ;;  %vm119_vm0 = vweird.f32 %v191_v27 }
   0xb   :  { %v143_v47 = vunpack.c.l.bf16 %v179_v36  ;;  %v144_v48 = vunpack.c.h.bf16 %v179_v36  ;;  %v151_v49 = vunpack.c.l.bf16 %v181_v37  ;;  %v152_v50 = vunpack.c.h.bf16 %v181_v37 }
   0xc   :  { %v103_v51 = vadd.f32 %v102_v43, %v94_v38  ;;  %v106_v52 = vadd.f32 %v105_v44, %v95_v39  ;;  %v116_v53 = vsub.f32 1.0, %v115_v45  ;;  %v159_v54 = vunpack.c.l.bf16 %v183_v42 }
   0xd   :  { %v160_v55 = vunpack.c.h.bf16 %v183_v42  ;;  %v167_v56 = vunpack.c.l.bf16 %v185_v46  ;;  %v168_v57 = vunpack.c.h.bf16 %v185_v46  ;;  %v52_v58 = vmul.f32 %v188_v9, %v143_v47 }
   0xe   :  { %v104_v59 = vadd.f32 %v103_v51, %v98_v40  ;;  %v107_v60 = vadd.f32 %v106_v52, %v99_v41  ;;  %v117_v61 = vmul.f32 %v191_v27, %v116_v53  ;;  %v53_v62 = vmul.f32 %v188_v9, %v144_v48 }
   0xf   :  { %v56_v63 = vmul.f32 %v188_v9, %v151_v49  ;;  %v57_v0 = vmul.f32 %v188_v9, %v152_v50  ;;  %v60_v1 = vmul.f32 %v188_v9, %v159_v54  ;;  %v61_v2 = vmul.f32 %v188_v9, %v160_v55 }
  0x10   :  { %v118_v3 = vadd.f32 %v191_v27, %v117_v61  ;;  %v64_v4 = vmul.f32 %v188_v9, %v167_v56  ;;  %v65_v5 = vmul.f32 %v188_v9, %v168_v57  ;;  %v72_v6 = vadd.f32 %v231_v14, %v52_v58 }
  0x11   :  { %v73_v7 = vadd.f32 %v231_v14, %v53_v62  ;;  %v76_v8 = vadd.f32 %v231_v14, %v56_v63  ;;  %v77_v10 = vadd.f32 %v231_v14, %v57_v0  ;;  %v80_v11 = vadd.f32 %v231_v14, %v60_v1 }
  0x12   :  { %v120_v12 = vsel %vm119_vm0, %v191_v27, %v118_v3  ;;  %v81_v13 = vadd.f32 %v231_v14, %v61_v2  ;;  %v84_v15 = vadd.f32 %v231_v14, %v64_v4  ;;  %v85_v16 = vadd.f32 %v231_v14, %v65_v5 }
  0x13   :  { %v121_v17 = vmul.f32 %v120_v12, %v104_v59  ;;  %v122_v9 = vmul.f32 %v120_v12, %v107_v60  ;;  %v88_v18 = vmax.f32 %v72_v6, 0.0  ;;  %v89_v19 = vmax.f32 %v73_v7, 0.0 }
  0x14   :  { %v92_v20 = vmax.f32 %v76_v8, 0.0  ;;  %v93_v21 = vmax.f32 %v77_v10, 0.0  ;;  %v96_v22 = vmax.f32 %v80_v11, 0.0  ;;  %v97_v23 = vmax.f32 %v81_v13, 0.0 }
  0x15   :  { %v172_v24 = vpack.c.bf16 %v122_v9, %v121_v17  ;;  %v100_v25 = vmax.f32 %v84_v15, 0.0  ;;  %v101_v26 = vmax.f32 %v85_v16, 0.0 }
  0x16   :  { %v108_v28 = vadd.f32 %v92_v20, %v88_v18  ;;  %v111_v29 = vadd.f32 %v93_v21, %v89_v19 }
  0x17   :  { %173 = vst [vmem:[%s271_s3] sm:$0xff] %v172_v24  }
  0x18   :  { %v109_v27 = vadd.f32 %v108_v28, %v96_v22  ;;  %v112_v30 = vadd.f32 %v111_v29, %v97_v23 }
  0x1a   :  { %v110_v14 = vadd.f32 %v109_v27, %v100_v25  ;;  %v113_v31 = vadd.f32 %v112_v30, %v101_v26 }
  0x1c   :  { %v123_v32 = vmul.f32 %v120_v12, %v110_v14  ;;  %v124_v33 = vmul.f32 %v120_v12, %v113_v31 }
  0x1e   :  { %v177_v34 = vpack.c.bf16 %v124_v33, %v123_v32 }
  0x20   :  { %186 = vst [vmem:[%s271_s3 + $0x8] sm:$0xff] %v177_v34  }

// kernel: densenet_forward.33
= control target key start
LH: loop header
LB: loop body
LE: loop exit
PB: predicated region body
PF: predicated region fallthrough
CT: control target
= control target key end

     0   :  { %vm128_vm0 = vcmask 130048   ;;  %vm274_vm1 = vcmask 257024   ;;  %s572_s1 = inlined_call_operand.vmem [shape: bf16[16,32], index: 1, kind: input, shape index: {}]   ;;  %s573_s0 = inlined_call_operand.vmem [shape: bf16[128,16], index: 0, kind: input, shape index: {}]   ;;  %s574_s2 = inlined_call_operand.vmem [shape: f32[1,16], index: 2, kind: input, shape index: {}]   ;;  %s575_s3 = inlined_call_operand.vmem [shape: f32[1,16], index: 3, kind: input, shape index: {}]   ;;  %s576_s4 = inlined_call_operand.vmem [shape: f32[1,32], index: 4, kind: input, shape index: {}]   ;;  %s577_s5 = inlined_call_operand.vmem [shape: f32[1,32], index: 5, kind: input, shape index: {}]   ;;  %s578_s6 = inlined_call_operand.vmem [shape: bf16[128,32], index: 6, kind: output, shape index: {}]  }
   0x1   :  { %v307_v0 = vld [vmem:[%s572_s1] sm:$0xff]  ;;  %v341_v6 = vld [vmem:[%s573_s0 + $0x10] sm:$0xff]   ;;  %v340_v25 = vld [vmem:[%s573_s0 + $0x8] sm:$0xff]  }
   0x2   :  { %v309_v1 = vld [vmem:[%s573_s0] sm:$0xff]   ;;  %160 = vmatpush.bf16.msra.mxu0 %v307_v0  ;;  %347 = vmatpush.bf16.msra.mxu1 %v307_v0  ;;  %v345_v8 = vld [vmem:[%s573_s0 + $0x30] sm:$0xff]   ;;  %v318_v11 = vunpack.c.l.bf16 %v341_v6  ;;  %v319_v12 = vunpack.c.h.bf16 %v341_v6  ;;  %v342_v34 = vld [vmem:[%s573_s0 + $0x18] sm:$0xff]   ;;  %v314_v38 = vunpack.c.l.bf16 %v340_v25  ;;  %v315_v45 = vunpack.c.h.bf16 %v340_v25 }
   0x3   :  { %v310_v2 = vunpack.c.l.bf16 %v309_v1  ;;  %v311_v3 = vunpack.c.h.bf16 %v309_v1  ;;  %v398_v4 = vld [vmem:[%s574_s2] ss:$0 sm:$0xff]  ;;  %348 = vmatpush.bf16.msra.mxu2 %v307_v0  ;;  %349 = vmatpush.bf16.msra.mxu3 %v307_v0  ;;  %v334_v15 = vunpack.c.l.bf16 %v345_v8  ;;  %v335_v16 = vunpack.c.h.bf16 %v345_v8  ;;  %v344_v39 = vld [vmem:[%s573_s0 + $0x28] sm:$0xff]   ;;  %v346_v48 = vld [vmem:[%s573_s0 + $0x38] sm:$0xff]  }
   0x4   :  { %v403_v5 = vld [vmem:[%s575_s3] ss:$0 sm:$0xff]  ;;  %v64_v19 = vmul.f32 %v398_v4, %v318_v11  ;;  %v65_v20 = vmul.f32 %v398_v4, %v319_v12  ;;  %v62_v46 = vmul.f32 %v398_v4, %v314_v38  ;;  %v322_v47 = vunpack.c.l.bf16 %v342_v34 }
   0x5   :  { %v343_v7 = vld [vmem:[%s573_s0 + $0x20] sm:$0xff]   ;;  %v60_v9 = vmul.f32 %v398_v4, %v310_v2  ;;  %v61_v10 = vmul.f32 %v398_v4, %v311_v3  ;;  %v72_v23 = vmul.f32 %v398_v4, %v334_v15  ;;  %v73_v24 = vmul.f32 %v398_v4, %v335_v16 }
   0x6   :  { %v326_v13 = vunpack.c.l.bf16 %v343_v7  ;;  %v327_v14 = vunpack.c.h.bf16 %v343_v7  ;;  %v84_v28 = vadd.f32 %v403_v5, %v64_v19  ;;  %v85_v29 = vadd.f32 %v403_v5, %v65_v20  ;;  %v474_v20 = vld [vmem:[%s577_s5] ss:$0 sm:$0xff] }
   0x7   :  { %v80_v17 = vadd.f32 %v403_v5, %v60_v9  ;;  %v81_v18 = vadd.f32 %v403_v5, %v61_v10  ;;  %v92_v32 = vadd.f32 %v403_v5, %v72_v23  ;;  %v93_v33 = vadd.f32 %v403_v5, %v73_v24 }
   0x8   :  { %v68_v21 = vmul.f32 %v398_v4, %v326_v13  ;;  %v69_v22 = vmul.f32 %v398_v4, %v327_v14  ;;  %v100_v36 = vmax.f32 %v84_v28, 0.0  ;;  %v101_v37 = vmax.f32 %v85_v29, 0.0 }
   0x9   :  { %v96_v26 = vmax.f32 %v80_v17, 0.0  ;;  %v97_v27 = vmax.f32 %v81_v18, 0.0  ;;  %v108_v42 = vmax.f32 %v92_v32, 0.0  ;;  %v109_v43 = vmax.f32 %v93_v33, 0.0 }
   0xa   :  { %v88_v30 = vadd.f32 %v403_v5, %v68_v21  ;;  %v89_v31 = vadd.f32 %v403_v5, %v69_v22  ;;  %v114_v44 = vpack.c.bf16 %v101_v37, %v100_v36  ;;  %v323_v51 = vunpack.c.h.bf16 %v342_v34 }
   0xb   :  { %v112_v35 = vpack.c.bf16 %v97_v27, %v96_v26  ;;  %v118_v50 = vpack.c.bf16 %v109_v43, %v108_v42  ;;  %v330_v52 = vunpack.c.l.bf16 %v344_v39  ;;  %v63_v53 = vmul.f32 %v398_v4, %v315_v45 }
   0xc   :  { %v104_v40 = vmax.f32 %v88_v30, 0.0  ;;  %v105_v41 = vmax.f32 %v89_v31, 0.0  ;;  %301 = vmatmul.msk.bf16.vlgmr.msra.gmra.mxu1 %vm128_vm0, %v114_v44  ;;  %v66_v54 = vmul.f32 %v398_v4, %v322_v47  ;;  %v331_v55 = vunpack.c.h.bf16 %v344_v39 }
   0xd   :  { %299 = vmatmul.msk.bf16.vlgmr.msra.gmra.mxu0 %vm128_vm0, %v112_v35  ;;  %305 = vmatmul.msk.bf16.vlgmr.msra.gmra.mxu3 %vm128_vm0, %v118_v50  ;;  %v67_v56 = vmul.f32 %v398_v4, %v323_v51  ;;  %v70_v57 = vmul.f32 %v398_v4, %v330_v52  ;;  %v338_v58 = vunpack.c.l.bf16 %v346_v48  ;;  %v339_v59 = vunpack.c.h.bf16 %v346_v48 }
   0xe   :  { %v116_v49 = vpack.c.bf16 %v105_v41, %v104_v40  ;;  %v82_v60 = vadd.f32 %v403_v5, %v62_v46  ;;  %v83_v61 = vadd.f32 %v403_v5, %v63_v53  ;;  %v71_v62 = vmul.f32 %v398_v4, %v331_v55 }
   0xf   :  { %v74_v63 = vmul.f32 %v398_v4, %v338_v58  ;;  %v75_v0 = vmul.f32 %v398_v4, %v339_v59  ;;  %v86_v1 = vadd.f32 %v403_v5, %v66_v54  ;;  %v87_v2 = vadd.f32 %v403_v5, %v67_v56 }
  0x10   :  { %303 = vmatmul.msk.bf16.vlgmr.msra.gmra.mxu2 %vm128_vm0, %v116_v49  ;;  %v90_v3 = vadd.f32 %v403_v5, %v70_v57  ;;  %v91_v6 = vadd.f32 %v403_v5, %v71_v62  ;;  %v98_v9 = vmax.f32 %v82_v60, 0.0  ;;  %v99_v10 = vmax.f32 %v83_v61, 0.0 }
  0x11   :  { %v94_v7 = vadd.f32 %v403_v5, %v74_v63  ;;  %v95_v8 = vadd.f32 %v403_v5, %v75_v0  ;;  %v102_v11 = vmax.f32 %v86_v1, 0.0  ;;  %v103_v12 = vmax.f32 %v87_v2, 0.0  ;;  %v469_v5 = vld [vmem:[%s576_s4] ss:$0 sm:$0xff] }
  0x12   :  { %v106_v13 = vmax.f32 %v90_v3, 0.0  ;;  %v107_v14 = vmax.f32 %v91_v6, 0.0  ;;  %v113_v16 = vpack.c.bf16 %v99_v10, %v98_v9 }
  0x13   :  { %v110_v15 = vmax.f32 %v94_v7, 0.0  ;;  %v111_v4 = vmax.f32 %v95_v8, 0.0  ;;  %v115_v17 = vpack.c.bf16 %v103_v12, %v102_v11 }
  0x14   :  { %v117_v18 = vpack.c.bf16 %v107_v14, %v106_v13 }
  0x15   :  { %v119_v19 = vpack.c.bf16 %v111_v4, %v110_v15 }
  0x1c   :  { %302 = vmatmul.msk.bf16.gmra.mxu1 %vm128_vm0, %v115_v17 }
  0x1d   :  { %300 = vmatmul.msk.bf16.gmra.mxu0 %vm128_vm0, %v113_v16  ;;  %306 = vmatmul.msk.bf16.gmra.mxu3 %vm128_vm0, %v119_v19 }
  0x20   :  { %304 = vmatmul.msk.bf16.gmra.mxu2 %vm128_vm0, %v117_v18 }
  0x89   :  { %v172_v23 = vpop.f32.mrf.mxu1 }
  0x8a   :  { %v162_v21 = vpop.f32.mrf.mxu0  ;;  %v210_v25 = vmul.f32 %v469_v5, %v172_v23 }
  0x8b   :  { %v206_v22 = vmul.f32 %v469_v5, %v162_v21 }
  0x8c   :  { %v230_v27 = vadd.f32 %v474_v20, %v210_v25 }
  0x8d   :  { %v226_v24 = vadd.f32 %v474_v20, %v206_v22 }
  0x8e   :  { %v246_v29 = vmax.f32 %v230_v27, 0.0 }
  0x8f   :  { %v242_v26 = vmax.f32 %v226_v24, 0.0 }
  0x90   :  { %v262_v31 = vpack.c.bf16 %v246_v29, %v246_v29  ;;  %v192_v33 = vpop.f32.mrf.mxu3 }
  0x91   :  { %v258_v28 = vpack.c.bf16 %v242_v26, %v242_v26  ;;  %v218_v36 = vmul.f32 %v469_v5, %v192_v33  ;;  %v174_v37 = vpop.f32.mrf.mxu1 }
  0x92   :  { %v164_v30 = vpop.f32.mrf.mxu0  ;;  %279 = vst.msk [vmem:[%s578_s6 + $0x10] sm:$0xf] %vm274_vm1, %v262_v31  ;;  %v211_v39 = vmul.f32 %v469_v5, %v174_v37 }
  0x93   :  { %275 = vst.msk [vmem:[%s578_s6] sm:$0xf] %vm274_vm1, %v258_v28  ;;  %v182_v32 = vpop.f32.mrf.mxu2  ;;  %v207_v34 = vmul.f32 %v469_v5, %v164_v30  ;;  %v238_v41 = vadd.f32 %v474_v20, %v218_v36 }
  0x94   :  { %v214_v35 = vmul.f32 %v469_v5, %v182_v32  ;;  %v231_v43 = vadd.f32 %v474_v20, %v211_v39 }
  0x95   :  { %v227_v38 = vadd.f32 %v474_v20, %v207_v34  ;;  %v254_v45 = vmax.f32 %v238_v41, 0.0 }
  0x96   :  { %v234_v40 = vadd.f32 %v474_v20, %v214_v35  ;;  %v247_v47 = vmax.f32 %v231_v43, 0.0 }
  0x97   :  { %v243_v42 = vmax.f32 %v227_v38, 0.0  ;;  %v270_v49 = vpack.c.bf16 %v254_v45, %v254_v45 }
  0x98   :  { %v250_v44 = vmax.f32 %v234_v40, 0.0  ;;  %v263_v51 = vpack.c.bf16 %v247_v47, %v247_v47  ;;  %v194_v53 = vpop.f32.mrf.mxu3 }
  0x99   :  { %v259_v46 = vpack.c.bf16 %v243_v42, %v243_v42  ;;  %v219_v56 = vmul.f32 %v469_v5, %v194_v53  ;;  %v177_v57 = vpop.f32.mrf.mxu1  ;;  %287 = vst.msk [vmem:[%s578_s6 + $0x30] sm:$0xf] %vm274_vm1, %v270_v49 }
  0x9a   :  { %v266_v48 = vpack.c.bf16 %v250_v44, %v250_v44  ;;  %v167_v50 = vpop.f32.mrf.mxu0  ;;  %v212_v59 = vmul.f32 %v469_v5, %v177_v57  ;;  %280 = vst.msk [vmem:[%s578_s6 + $0x14] sm:$0xf] %vm274_vm1, %v263_v51 }
  0x9b   :  { %276 = vst.msk [vmem:[%s578_s6 + $0x4] sm:$0xf] %vm274_vm1, %v259_v46  ;;  %v184_v52 = vpop.f32.mrf.mxu2  ;;  %v208_v54 = vmul.f32 %v469_v5, %v167_v50  ;;  %v239_v61 = vadd.f32 %v474_v20, %v219_v56 }
  0x9c   :  { %283 = vst.msk [vmem:[%s578_s6 + $0x20] sm:$0xf] %vm274_vm1, %v266_v48  ;;  %v215_v55 = vmul.f32 %v469_v5, %v184_v52  ;;  %v232_v63 = vadd.f32 %v474_v20, %v212_v59 }
  0x9d   :  { %v228_v58 = vadd.f32 %v474_v20, %v208_v54  ;;  %v255_v1 = vmax.f32 %v239_v61, 0.0 }
  0x9e   :  { %v235_v60 = vadd.f32 %v474_v20, %v215_v55  ;;  %v248_v3 = vmax.f32 %v232_v63, 0.0 }
  0x9f   :  { %v244_v62 = vmax.f32 %v228_v58, 0.0  ;;  %v271_v7 = vpack.c.bf16 %v255_v1, %v255_v1 }
  0xa0   :  { %v251_v0 = vmax.f32 %v235_v60, 0.0  ;;  %v264_v9 = vpack.c.bf16 %v248_v3, %v248_v3  ;;  %v197_v11 = vpop.f32.mrf.mxu3 }
  0xa1   :  { %v260_v2 = vpack.c.bf16 %v244_v62, %v244_v62  ;;  %v220_v14 = vmul.f32 %v469_v5, %v197_v11  ;;  %v179_v15 = vpop.f32.mrf.mxu1  ;;  %288 = vst.msk [vmem:[%s578_s6 + $0x34] sm:$0xf] %vm274_vm1, %v271_v7 }
  0xa2   :  { %v267_v6 = vpack.c.bf16 %v251_v0, %v251_v0  ;;  %v169_v8 = vpop.f32.mrf.mxu0  ;;  %v213_v16 = vmul.f32 %v469_v5, %v179_v15  ;;  %281 = vst.msk [vmem:[%s578_s6 + $0x18] sm:$0xf] %vm274_vm1, %v264_v9 }
  0xa3   :  { %277 = vst.msk [vmem:[%s578_s6 + $0x8] sm:$0xf] %vm274_vm1, %v260_v2  ;;  %v187_v10 = vpop.f32.mrf.mxu2  ;;  %v209_v12 = vmul.f32 %v469_v5, %v169_v8  ;;  %v240_v18 = vadd.f32 %v474_v20, %v220_v14 }
  0xa4   :  { %284 = vst.msk [vmem:[%s578_s6 + $0x24] sm:$0xf] %vm274_vm1, %v267_v6  ;;  %v216_v13 = vmul.f32 %v469_v5, %v187_v10  ;;  %v233_v21 = vadd.f32 %v474_v20, %v213_v16 }
  0xa5   :  { %v229_v4 = vadd.f32 %v474_v20, %v209_v12  ;;  %v256_v23 = vmax.f32 %v240_v18, 0.0 }
  0xa6   :  { %v236_v17 = vadd.f32 %v474_v20, %v216_v13  ;;  %v249_v25 = vmax.f32 %v233_v21, 0.0 }
  0xa7   :  { %v245_v19 = vmax.f32 %v229_v4, 0.0  ;;  %v272_v27 = vpack.c.bf16 %v256_v23, %v256_v23 }
  0xa8   :  { %v252_v22 = vmax.f32 %v236_v17, 0.0  ;;  %v265_v28 = vpack.c.bf16 %v249_v25, %v249_v25  ;;  %v199_v30 = vpop.f32.mrf.mxu3 }
  0xa9   :  { %v261_v24 = vpack.c.bf16 %v245_v19, %v245_v19  ;;  %v221_v32 = vmul.f32 %v469_v5, %v199_v30  ;;  %289 = vst.msk [vmem:[%s578_s6 + $0x38] sm:$0xf] %vm274_vm1, %v272_v27 }
  0xaa   :  { %v268_v26 = vpack.c.bf16 %v252_v22, %v252_v22  ;;  %282 = vst.msk [vmem:[%s578_s6 + $0x1c] sm:$0xf] %vm274_vm1, %v265_v28 }
  0xab   :  { %278 = vst.msk [vmem:[%s578_s6 + $0xc] sm:$0xf] %vm274_vm1, %v261_v24  ;;  %v189_v29 = vpop.f32.mrf.mxu2  ;;  %v241_v34 = vadd.f32 %v474_v20, %v221_v32 }
  0xac   :  { %285 = vst.msk [vmem:[%s578_s6 + $0x28] sm:$0xf] %vm274_vm1, %v268_v26  ;;  %v217_v31 = vmul.f32 %v469_v5, %v189_v29 }
  0xad   :  { %v257_v36 = vmax.f32 %v241_v34, 0.0 }
  0xae   :  { %v237_v33 = vadd.f32 %v474_v20, %v217_v31 }
  0xaf   :  { %v273_v38 = vpack.c.bf16 %v257_v36, %v257_v36 }
  0xb0   :  { %v253_v35 = vmax.f32 %v237_v33, 0.0 }
  0xb1   :  { %290 = vst.msk [vmem:[%s578_s6 + $0x3c] sm:$0xf] %vm274_vm1, %v273_v38 }
  0xb2   :  { %v269_v37 = vpack.c.bf16 %v253_v35, %v253_v35 }
  0xb4   :  { %286 = vst.msk [vmem:[%s578_s6 + $0x2c] sm:$0xf] %vm274_vm1, %v269_v37 }

// kernel: densenet_forward.35
= control target key start
LH: loop header
LB: loop body
LE: loop exit
PB: predicated region body
PF: predicated region fallthrough
CT: control target
= control target key end

     0   :  { %vm157_vm0 = vcmask 1043456   ;;  %vm132_vm1 = vcmask 195584   ;;  %vm282_vm2 = vcmask 257024   ;;  %s587_s1 = inlined_call_operand.vmem [shape: bf16[24,32], index: 1, kind: input, shape index: {}]   ;;  %s588_s0 = inlined_call_operand.vmem [shape: bf16[128,24], index: 0, kind: input, shape index: {}]   ;;  %s589_s2 = inlined_call_operand.vmem [shape: f32[1,24], index: 2, kind: input, shape index: {}]   ;;  %s590_s3 = inlined_call_operand.vmem [shape: f32[1,24], index: 3, kind: input, shape index: {}]   ;;  %s591_s4 = inlined_call_operand.vmem [shape: f32[1,32], index: 4, kind: input, shape index: {}]   ;;  %s592_s5 = inlined_call_operand.vmem [shape: f32[1,32], index: 5, kind: input, shape index: {}]   ;;  %s593_s6 = inlined_call_operand.vmem [shape: bf16[128,32], index: 6, kind: output, shape index: {}]  }
   0x1   :  { %v122_v0 = vld [vmem:[%s587_s1 + $0x8] sm:$0xf]  ;;  %v317_v1 = vld [vmem:[%s588_s0] sm:$0xff]   ;;  %v349_v7 = vld [vmem:[%s588_s0 + $0x10] sm:$0xff]  }
   0x2   :  { %v128_v2 = vunpack.c.l.b16 %v122_v0  ;;  %v318_v3 = vunpack.c.l.bf16 %v317_v1  ;;  %v319_v4 = vunpack.c.h.bf16 %v317_v1  ;;  %v409_v5 = vld [vmem:[%s589_s2] ss:$0 sm:$0xff]  ;;  %v326_v12 = vunpack.c.l.bf16 %v349_v7  ;;  %v353_v13 = vld [vmem:[%s588_s0 + $0x30] sm:$0xff]   ;;  %v348_v27 = vld [vmem:[%s588_s0 + $0x8] sm:$0xff]  }
   0x3   :  { %v414_v6 = vld [vmem:[%s590_s3] ss:$0 sm:$0xff]  ;;  %v327_v14 = vunpack.c.h.bf16 %v349_v7  ;;  %v342_v17 = vunpack.c.l.bf16 %v353_v13  ;;  %v343_v26 = vunpack.c.h.bf16 %v353_v13  ;;  %v350_v36 = vld [vmem:[%s588_s0 + $0x18] sm:$0xff]   ;;  %v322_v40 = vunpack.c.l.bf16 %v348_v27  ;;  %v352_v45 = vld [vmem:[%s588_s0 + $0x28] sm:$0xff]  }
   0x4   :  { %v351_v8 = vld [vmem:[%s588_s0 + $0x20] sm:$0xff]   ;;  %v130_v9 = vpack.c.b16 %v128_v2, %v128_v2  ;;  %v60_v10 = vmul.f32 %v409_v5, %v318_v3  ;;  %v61_v11 = vmul.f32 %v409_v5, %v319_v4  ;;  %v64_v21 = vmul.f32 %v409_v5, %v326_v12  ;;  %v354_v49 = vld [vmem:[%s588_s0 + $0x38] sm:$0xff]  }
   0x5   :  { %v334_v15 = vunpack.c.l.bf16 %v351_v8  ;;  %v335_v16 = vunpack.c.h.bf16 %v351_v8  ;;  %v315_v22 = vld [vmem:[%s587_s1] sm:$0xff]  ;;  %v65_v23 = vmul.f32 %v409_v5, %v327_v14  ;;  %v72_v31 = vmul.f32 %v409_v5, %v342_v17 }
   0x6   :  { %v159_v18 = vsel %vm157_vm0, %v130_v9, 0  ;;  %v80_v19 = vadd.f32 %v414_v6, %v60_v10  ;;  %v81_v20 = vadd.f32 %v414_v6, %v61_v11  ;;  %v84_v30 = vadd.f32 %v414_v6, %v64_v21 }
   0x7   :  { %167 = vmatpush.bf16.msra.mxu0 %v159_v18  ;;  %355 = vmatpush.bf16.msra.mxu1 %v159_v18  ;;  %v68_v24 = vmul.f32 %v409_v5, %v334_v15  ;;  %v69_v25 = vmul.f32 %v409_v5, %v335_v16  ;;  %v85_v32 = vadd.f32 %v414_v6, %v65_v23  ;;  %v323_v47 = vunpack.c.h.bf16 %v348_v27 }
   0x8   :  { %356 = vmatpush.bf16.msra.mxu2 %v159_v18  ;;  %357 = vmatpush.bf16.msra.mxu3 %v159_v18  ;;  %v96_v28 = vmax.f32 %v80_v19, 0.0  ;;  %v97_v29 = vmax.f32 %v81_v20, 0.0  ;;  %v73_v35 = vmul.f32 %v409_v5, %v343_v26  ;;  %v100_v38 = vmax.f32 %v84_v30, 0.0 }
   0x9   :  { %v88_v33 = vadd.f32 %v414_v6, %v68_v24  ;;  %v89_v34 = vadd.f32 %v414_v6, %v69_v25  ;;  %v92_v39 = vadd.f32 %v414_v6, %v72_v31  ;;  %v101_v41 = vmax.f32 %v85_v32, 0.0 }
   0xa   :  { %v112_v37 = vpack.c.bf16 %v97_v29, %v96_v28  ;;  %v93_v44 = vadd.f32 %v414_v6, %v73_v35  ;;  %v330_v48 = vunpack.c.l.bf16 %v350_v36  ;;  %v331_v53 = vunpack.c.h.bf16 %v350_v36 }
   0xb   :  { %168 = vmatpush.bf16.msra.mxu0 %v315_v22  ;;  %358 = vmatpush.bf16.msra.mxu1 %v315_v22  ;;  %v104_v42 = vmax.f32 %v88_v33, 0.0  ;;  %v105_v43 = vmax.f32 %v89_v34, 0.0  ;;  %v108_v46 = vmax.f32 %v92_v39, 0.0  ;;  %v114_v50 = vpack.c.bf16 %v101_v41, %v100_v38 }
   0xc   :  { %359 = vmatpush.bf16.msra.mxu2 %v315_v22  ;;  %360 = vmatpush.bf16.msra.mxu3 %v315_v22  ;;  %v109_v52 = vmax.f32 %v93_v44, 0.0  ;;  %v62_v54 = vmul.f32 %v409_v5, %v322_v40  ;;  %v63_v55 = vmul.f32 %v409_v5, %v323_v47  ;;  %v66_v56 = vmul.f32 %v409_v5, %v330_v48 }
   0xd   :  { %v116_v51 = vpack.c.bf16 %v105_v43, %v104_v42  ;;  %v338_v57 = vunpack.c.l.bf16 %v352_v45  ;;  %v67_v59 = vmul.f32 %v409_v5, %v331_v53  ;;  %v339_v60 = vunpack.c.h.bf16 %v352_v45 }
   0xe   :  { %307 = vmatmul.msk.bf16.vlgmr.msra.gmra.mxu0 %vm132_vm1, %v112_v37  ;;  %309 = vmatmul.msk.bf16.vlgmr.msra.gmra.mxu1 %vm132_vm1, %v114_v50  ;;  %v118_v58 = vpack.c.bf16 %v109_v52, %v108_v46  ;;  %v346_v61 = vunpack.c.l.bf16 %v354_v49  ;;  %v347_v0 = vunpack.c.h.bf16 %v354_v49  ;;  %v82_v2 = vadd.f32 %v414_v6, %v62_v54 }
   0xf   :  { %311 = vmatmul.msk.bf16.vlgmr.msra.gmra.mxu2 %vm132_vm1, %v116_v51  ;;  %v70_v62 = vmul.f32 %v409_v5, %v338_v57  ;;  %v71_v63 = vmul.f32 %v409_v5, %v339_v60  ;;  %v83_v3 = vadd.f32 %v414_v6, %v63_v55  ;;  %v86_v4 = vadd.f32 %v414_v6, %v66_v56 }
  0x10   :  { %313 = vmatmul.msk.bf16.vlgmr.msra.gmra.mxu3 %vm132_vm1, %v118_v58  ;;  %v74_v1 = vmul.f32 %v409_v5, %v346_v61  ;;  %v87_v7 = vadd.f32 %v414_v6, %v67_v59  ;;  %v75_v10 = vmul.f32 %v409_v5, %v347_v0  ;;  %v98_v13 = vmax.f32 %v82_v2, 0.0  ;;  %v484_v5 = vld [vmem:[%s591_s4] ss:$0 sm:$0xff] }
  0x11   :  { %v90_v8 = vadd.f32 %v414_v6, %v70_v62  ;;  %v91_v9 = vadd.f32 %v414_v6, %v71_v63  ;;  %v99_v14 = vmax.f32 %v83_v3, 0.0  ;;  %v102_v15 = vmax.f32 %v86_v4, 0.0 }
  0x12   :  { %v94_v11 = vadd.f32 %v414_v6, %v74_v1  ;;  %v95_v12 = vadd.f32 %v414_v6, %v75_v10  ;;  %v103_v16 = vmax.f32 %v87_v7, 0.0  ;;  %v489_v6 = vld [vmem:[%s592_s5] ss:$0 sm:$0xff] }
  0x13   :  { %v106_v17 = vmax.f32 %v90_v8, 0.0  ;;  %v107_v18 = vmax.f32 %v91_v9, 0.0  ;;  %v113_v21 = vpack.c.bf16 %v99_v14, %v98_v13 }
  0x14   :  { %v110_v19 = vmax.f32 %v94_v11, 0.0  ;;  %v111_v20 = vmax.f32 %v95_v12, 0.0  ;;  %v115_v22 = vpack.c.bf16 %v103_v16, %v102_v15 }
  0x15   :  { %v117_v23 = vpack.c.bf16 %v107_v18, %v106_v17 }
  0x16   :  { %v119_v24 = vpack.c.bf16 %v111_v20, %v110_v19 }
  0x1e   :  { %308 = vmatmul.msk.bf16.gmra.mxu0 %vm132_vm1, %v113_v21  ;;  %310 = vmatmul.msk.bf16.gmra.mxu1 %vm132_vm1, %v115_v22 }
  0x1f   :  { %312 = vmatmul.msk.bf16.gmra.mxu2 %vm132_vm1, %v117_v23 }
  0x20   :  { %314 = vmatmul.msk.bf16.gmra.mxu3 %vm132_vm1, %v119_v24 }
  0x8b   :  { %v170_v25 = vpop.f32.mrf.mxu0  ;;  %v180_v27 = vpop.f32.mrf.mxu1 }
  0x8c   :  { %v214_v26 = vmul.f32 %v484_v5, %v170_v25  ;;  %v218_v28 = vmul.f32 %v484_v5, %v180_v27 }
  0x8e   :  { %v234_v29 = vadd.f32 %v489_v6, %v214_v26  ;;  %v238_v30 = vadd.f32 %v489_v6, %v218_v28 }
  0x90   :  { %v250_v31 = vmax.f32 %v234_v29, 0.0  ;;  %v254_v32 = vmax.f32 %v238_v30, 0.0 }
  0x92   :  { %v266_v33 = vpack.c.bf16 %v250_v31, %v250_v31  ;;  %v190_v34 = vpop.f32.mrf.mxu2  ;;  %v270_v35 = vpack.c.bf16 %v254_v32, %v254_v32 }
  0x93   :  { %v222_v36 = vmul.f32 %v484_v5, %v190_v34  ;;  %v172_v37 = vpop.f32.mrf.mxu0  ;;  %v200_v38 = vpop.f32.mrf.mxu3 }
  0x94   :  { %283 = vst.msk [vmem:[%s593_s6] sm:$0xf] %vm282_vm2, %v266_v33  ;;  %v215_v39 = vmul.f32 %v484_v5, %v172_v37  ;;  %v182_v40 = vpop.f32.mrf.mxu1  ;;  %v226_v42 = vmul.f32 %v484_v5, %v200_v38 }
  0x95   :  { %287 = vst.msk [vmem:[%s593_s6 + $0x10] sm:$0xf] %vm282_vm2, %v270_v35  ;;  %v242_v41 = vadd.f32 %v489_v6, %v222_v36  ;;  %v219_v43 = vmul.f32 %v484_v5, %v182_v40 }
  0x96   :  { %v235_v44 = vadd.f32 %v489_v6, %v215_v39  ;;  %v246_v46 = vadd.f32 %v489_v6, %v226_v42 }
  0x97   :  { %v258_v45 = vmax.f32 %v242_v41, 0.0  ;;  %v239_v47 = vadd.f32 %v489_v6, %v219_v43 }
  0x98   :  { %v251_v48 = vmax.f32 %v235_v44, 0.0  ;;  %v262_v50 = vmax.f32 %v246_v46, 0.0 }
  0x99   :  { %v274_v49 = vpack.c.bf16 %v258_v45, %v258_v45  ;;  %v255_v51 = vmax.f32 %v239_v47, 0.0 }
  0x9a   :  { %v267_v52 = vpack.c.bf16 %v251_v48, %v251_v48  ;;  %v192_v53 = vpop.f32.mrf.mxu2  ;;  %v278_v54 = vpack.c.bf16 %v262_v50, %v262_v50 }
  0x9b   :  { %291 = vst.msk [vmem:[%s593_s6 + $0x20] sm:$0xf] %vm282_vm2, %v274_v49  ;;  %v271_v55 = vpack.c.bf16 %v255_v51, %v255_v51  ;;  %v223_v56 = vmul.f32 %v484_v5, %v192_v53  ;;  %v175_v57 = vpop.f32.mrf.mxu0  ;;  %v202_v58 = vpop.f32.mrf.mxu3 }
  0x9c   :  { %284 = vst.msk [vmem:[%s593_s6 + $0x4] sm:$0xf] %vm282_vm2, %v267_v52  ;;  %v216_v59 = vmul.f32 %v484_v5, %v175_v57  ;;  %v185_v60 = vpop.f32.mrf.mxu1  ;;  %v227_v62 = vmul.f32 %v484_v5, %v202_v58 }
  0x9d   :  { %295 = vst.msk [vmem:[%s593_s6 + $0x30] sm:$0xf] %vm282_vm2, %v278_v54  ;;  %v243_v61 = vadd.f32 %v489_v6, %v223_v56  ;;  %v220_v63 = vmul.f32 %v484_v5, %v185_v60 }
  0x9e   :  { %288 = vst.msk [vmem:[%s593_s6 + $0x14] sm:$0xf] %vm282_vm2, %v271_v55  ;;  %v236_v0 = vadd.f32 %v489_v6, %v216_v59  ;;  %v247_v2 = vadd.f32 %v489_v6, %v227_v62 }
  0x9f   :  { %v259_v1 = vmax.f32 %v243_v61, 0.0  ;;  %v240_v3 = vadd.f32 %v489_v6, %v220_v63 }
  0xa0   :  { %v252_v4 = vmax.f32 %v236_v0, 0.0  ;;  %v263_v8 = vmax.f32 %v247_v2, 0.0 }
  0xa1   :  { %v275_v7 = vpack.c.bf16 %v259_v1, %v259_v1  ;;  %v256_v9 = vmax.f32 %v240_v3, 0.0 }
  0xa2   :  { %v268_v10 = vpack.c.bf16 %v252_v4, %v252_v4  ;;  %v195_v11 = vpop.f32.mrf.mxu2  ;;  %v279_v12 = vpack.c.bf16 %v263_v8, %v263_v8 }
  0xa3   :  { %292 = vst.msk [vmem:[%s593_s6 + $0x24] sm:$0xf] %vm282_vm2, %v275_v7  ;;  %v272_v13 = vpack.c.bf16 %v256_v9, %v256_v9  ;;  %v224_v14 = vmul.f32 %v484_v5, %v195_v11  ;;  %v177_v15 = vpop.f32.mrf.mxu0  ;;  %v205_v16 = vpop.f32.mrf.mxu3 }
  0xa4   :  { %285 = vst.msk [vmem:[%s593_s6 + $0x8] sm:$0xf] %vm282_vm2, %v268_v10  ;;  %v217_v17 = vmul.f32 %v484_v5, %v177_v15  ;;  %v187_v18 = vpop.f32.mrf.mxu1  ;;  %v228_v20 = vmul.f32 %v484_v5, %v205_v16 }
  0xa5   :  { %296 = vst.msk [vmem:[%s593_s6 + $0x34] sm:$0xf] %vm282_vm2, %v279_v12  ;;  %v244_v19 = vadd.f32 %v489_v6, %v224_v14  ;;  %v221_v21 = vmul.f32 %v484_v5, %v187_v18 }
  0xa6   :  { %289 = vst.msk [vmem:[%s593_s6 + $0x18] sm:$0xf] %vm282_vm2, %v272_v13  ;;  %v237_v22 = vadd.f32 %v489_v6, %v217_v17  ;;  %v248_v24 = vadd.f32 %v489_v6, %v228_v20 }
  0xa7   :  { %v260_v23 = vmax.f32 %v244_v19, 0.0  ;;  %v241_v25 = vadd.f32 %v489_v6, %v221_v21 }
  0xa8   :  { %v253_v26 = vmax.f32 %v237_v22, 0.0  ;;  %v264_v28 = vmax.f32 %v248_v24, 0.0 }
  0xa9   :  { %v276_v27 = vpack.c.bf16 %v260_v23, %v260_v23  ;;  %v257_v29 = vmax.f32 %v241_v25, 0.0 }
  0xaa   :  { %v269_v30 = vpack.c.bf16 %v253_v26, %v253_v26  ;;  %v197_v31 = vpop.f32.mrf.mxu2  ;;  %v280_v32 = vpack.c.bf16 %v264_v28, %v264_v28 }
  0xab   :  { %293 = vst.msk [vmem:[%s593_s6 + $0x28] sm:$0xf] %vm282_vm2, %v276_v27  ;;  %v273_v33 = vpack.c.bf16 %v257_v29, %v257_v29  ;;  %v225_v34 = vmul.f32 %v484_v5, %v197_v31  ;;  %v207_v35 = vpop.f32.mrf.mxu3 }
  0xac   :  { %286 = vst.msk [vmem:[%s593_s6 + $0xc] sm:$0xf] %vm282_vm2, %v269_v30  ;;  %v229_v37 = vmul.f32 %v484_v5, %v207_v35 }
  0xad   :  { %297 = vst.msk [vmem:[%s593_s6 + $0x38] sm:$0xf] %vm282_vm2, %v280_v32  ;;  %v245_v36 = vadd.f32 %v489_v6, %v225_v34 }
  0xae   :  { %290 = vst.msk [vmem:[%s593_s6 + $0x1c] sm:$0xf] %vm282_vm2, %v273_v33  ;;  %v249_v39 = vadd.f32 %v489_v6, %v229_v37 }
  0xaf   :  { %v261_v38 = vmax.f32 %v245_v36, 0.0 }
  0xb0   :  { %v265_v41 = vmax.f32 %v249_v39, 0.0 }
  0xb1   :  { %v277_v40 = vpack.c.bf16 %v261_v38, %v261_v38 }
  0xb2   :  { %v281_v42 = vpack.c.bf16 %v265_v41, %v265_v41 }
  0xb3   :  { %294 = vst.msk [vmem:[%s593_s6 + $0x2c] sm:$0xf] %vm282_vm2, %v277_v40 }
  0xb4   :  { %298 = vst.msk [vmem:[%s593_s6 + $0x3c] sm:$0xf] %vm282_vm2, %v281_v42 }

// kernel: densenet_forward.34
= control target key start
LH: loop header
LB: loop body
LE: loop exit
PB: predicated region body
PF: predicated region fallthrough
CT: control target
= control target key end

     0   :  { %vm308_vm0 = vcmask 261120   ;;  %vm496_vm1 = vcmask 60416   ;;  %s1036_s1 = inlined_call_operand.vmem [shape: bf16[288,8], index: 1, kind: input, shape index: {}]   ;;  %s1037_s0 = inlined_call_operand.vmem [shape: bf16[128,288], index: 0, kind: input, shape index: {}]   ;;  %s1038_s2 = inlined_call_operand.vmem [shape: bf16[128,8], index: 2, kind: output, shape index: {}]  }
   0x1   :  { %v724_v0 = vld [vmem:[%s1036_s1 + $0x38] sm:$0xff]  ;;  %v734_v2 = vld [vmem:[%s1036_s1 + $0x88] sm:$0xff]  ;;  %v723_v3 = vld [vmem:[%s1036_s1 + $0x30] sm:$0xff] }
   0x2   :  { %v732_v1 = vld [vmem:[%s1036_s1 + $0x78] sm:$0xff]  ;;  %333 = vmatpush.bf16.msra.mxu0 %v724_v0  ;;  %735 = vmatpush.bf16.msra.mxu3 %v724_v0  ;;  %v731_v4 = vld [vmem:[%s1036_s1 + $0x70] sm:$0xff]  ;;  %v733_v5 = vld [vmem:[%s1036_s1 + $0x80] sm:$0xff] }
   0x3   :  { %382 = vmatpush.bf16.msra.mxu1 %v732_v1  ;;  %437 = vmatpush.bf16.msra.mxu2 %v734_v2  ;;  %v527_v6 = vld [vmem:[%s1037_s0 + $0x8] sm:$0xf]  ;;  %v695_v7 = vld [vmem:[%s1037_s0 + $0x10] sm:$0xf0]  ;;  %v721_v11 = vld [vmem:[%s1036_s1 + $0x20] sm:$0xff] }
   0x4   :  { %v528_v8 = vor.u32 %v695_v7, %v527_v6  ;;  %v722_v9 = vld [vmem:[%s1036_s1 + $0x28] sm:$0xff]  ;;  %v729_v12 = vld [vmem:[%s1036_s1 + $0x60] sm:$0xff]  ;;  %v720_v13 = vld [vmem:[%s1036_s1 + $0x18] sm:$0xff] }
   0x5   :  { %v730_v10 = vld [vmem:[%s1036_s1 + $0x68] sm:$0xff]  ;;  %v728_v14 = vld [vmem:[%s1036_s1 + $0x58] sm:$0xff]  ;;  %v719_v15 = vld [vmem:[%s1036_s1 + $0x10] sm:$0xff] }
   0x6   :  { %334 = vmatpush.bf16.msra.mxu0 %v723_v3  ;;  %736 = vmatpush.bf16.msra.mxu3 %v723_v3  ;;  %v727_v16 = vld [vmem:[%s1036_s1 + $0x50] sm:$0xff]  ;;  %v539_v17 = vld [vmem:[%s1037_s0 + $0x20] sm:$0xf]  ;;  %v698_v18 = vld [vmem:[%s1037_s0 + $0x28] sm:$0xf0] }
   0x7   :  { %383 = vmatpush.bf16.msra.mxu1 %v731_v4  ;;  %438 = vmatpush.bf16.msra.mxu2 %v733_v5  ;;  %v540_v19 = vor.u32 %v698_v18, %v539_v17  ;;  %v718_v20 = vld [vmem:[%s1036_s1 + $0x8] sm:$0xff]  ;;  %v717_v22 = vld [vmem:[%s1036_s1] sm:$0xff]  ;;  %v591_v26 = vld [vmem:[%s1037_s0 + $0x90] sm:$0xf] }
   0x8   :  { %v726_v21 = vld [vmem:[%s1036_s1 + $0x48] sm:$0xff]  ;;  %v725_v23 = vld [vmem:[%s1036_s1 + $0x40] sm:$0xff]  ;;  %v712_v27 = vld [vmem:[%s1037_s0 + $0x98] sm:$0xf0] }
   0x9   :  { %v519_v24 = vld [vmem:[%s1037_s0] sm:$0xf]  ;;  %v694_v25 = vld [vmem:[%s1037_s0 + $0x8] sm:$0xf0]  ;;  %v693_v28 = vld [vmem:[%s1037_s0 + $0x4] sm:$0xf]  ;;  %v592_v31 = vor.u32 %v712_v27, %v591_v26 }
   0xa   :  { %685 = vmatmul.msk.bf16.vlgmr.msra.gmra.mxu2 %vm308_vm0, %v528_v8  ;;  %335 = vmatpush.bf16.msra.mxu0 %v722_v9  ;;  %v521_v29 = vld [vmem:[%s1037_s0 + $0xc] sm:$0xf0]  ;;  %v520_v30 = vor.u32 %v694_v25, %v519_v24  ;;  %v551_v33 = vld [vmem:[%s1037_s0 + $0x38] sm:$0xf]  ;;  %v701_v34 = vld [vmem:[%s1037_s0 + $0x40] sm:$0xf0] }
   0xb   :  { %737 = vmatpush.bf16.msra.mxu3 %v722_v9  ;;  %384 = vmatpush.bf16.msra.mxu1 %v730_v10  ;;  %v524_v32 = vor.u32 %v693_v28, %v521_v29  ;;  %v552_v35 = vor.u32 %v701_v34, %v551_v33  ;;  %v531_v36 = vld [vmem:[%s1037_s0 + $0x18] sm:$0xf]  ;;  %v697_v37 = vld [vmem:[%s1037_s0 + $0x20] sm:$0xf0]  ;;  %v603_v38 = vld [vmem:[%s1037_s0 + $0xa8] sm:$0xf] }
   0xc   :  { %v715_v39 = vld [vmem:[%s1037_s0 + $0xb0] sm:$0xf0]  ;;  %v696_v40 = vld [vmem:[%s1037_s0 + $0x1c] sm:$0xf]  ;;  %v533_v41 = vld [vmem:[%s1037_s0 + $0x24] sm:$0xf0]  ;;  %v532_v42 = vor.u32 %v697_v37, %v531_v36 }
   0xd   :  { %v604_v43 = vor.u32 %v715_v39, %v603_v38  ;;  %v536_v44 = vor.u32 %v696_v40, %v533_v41  ;;  %v563_v45 = vld [vmem:[%s1037_s0 + $0x50] sm:$0xf]  ;;  %v704_v46 = vld [vmem:[%s1037_s0 + $0x58] sm:$0xf0]  ;;  %v699_v50 = vld [vmem:[%s1037_s0 + $0x34] sm:$0xf] }
   0xe   :  { %336 = vmatpush.bf16.msra.mxu0 %v721_v11  ;;  %v564_v47 = vor.u32 %v704_v46, %v563_v45  ;;  %v543_v48 = vld [vmem:[%s1037_s0 + $0x30] sm:$0xf]  ;;  %v700_v49 = vld [vmem:[%s1037_s0 + $0x38] sm:$0xf0]  ;;  %v545_v51 = vld [vmem:[%s1037_s0 + $0x3c] sm:$0xf0] }
   0xf   :  { %738 = vmatpush.bf16.msra.mxu3 %v721_v11  ;;  %385 = vmatpush.bf16.msra.mxu1 %v729_v12  ;;  %v711_v52 = vld [vmem:[%s1037_s0 + $0x94] sm:$0xf]  ;;  %v593_v53 = vld [vmem:[%s1037_s0 + $0x9c] sm:$0xf0]  ;;  %v544_v54 = vor.u32 %v700_v49, %v543_v48  ;;  %v548_v55 = vor.u32 %v699_v50, %v545_v51  ;;  %v575_v57 = vld [vmem:[%s1037_s0 + $0x68] sm:$0xf] }
  0x10   :  { %v596_v56 = vor.u32 %v711_v52, %v593_v53  ;;  %v707_v58 = vld [vmem:[%s1037_s0 + $0x70] sm:$0xf0]  ;;  %v555_v60 = vld [vmem:[%s1037_s0 + $0x48] sm:$0xf]  ;;  %v702_v62 = vld [vmem:[%s1037_s0 + $0x4c] sm:$0xf] }
  0x11   :  { %v576_v59 = vor.u32 %v707_v58, %v575_v57  ;;  %v703_v61 = vld [vmem:[%s1037_s0 + $0x50] sm:$0xf0]  ;;  %v557_v63 = vld [vmem:[%s1037_s0 + $0x54] sm:$0xf0]  ;;  %v714_v0 = vld [vmem:[%s1037_s0 + $0xac] sm:$0xf] }
  0x12   :  { %337 = vmatpush.bf16.msra.mxu0 %v720_v13  ;;  %v556_v2 = vor.u32 %v703_v61, %v555_v60  ;;  %v560_v3 = vor.u32 %v702_v62, %v557_v63  ;;  %v587_v5 = vld [vmem:[%s1037_s0 + $0x80] sm:$0xf]  ;;  %v710_v6 = vld [vmem:[%s1037_s0 + $0x88] sm:$0xf0]  ;;  %v569_v11 = vld [vmem:[%s1037_s0 + $0x6c] sm:$0xf0] }
  0x13   :  { %739 = vmatpush.bf16.msra.mxu3 %v720_v13  ;;  %386 = vmatpush.bf16.msra.mxu1 %v728_v14  ;;  %v588_v7 = vor.u32 %v710_v6, %v587_v5  ;;  %v567_v8 = vld [vmem:[%s1037_s0 + $0x60] sm:$0xf]  ;;  %v706_v9 = vld [vmem:[%s1037_s0 + $0x68] sm:$0xf0]  ;;  %v579_v17 = vld [vmem:[%s1037_s0 + $0x78] sm:$0xf] }
  0x14   :  { %v709_v18 = vld [vmem:[%s1037_s0 + $0x80] sm:$0xf0]  ;;  %v716_v24 = vld [vmem:[%s1037_s0 + $0xb8] sm:$0xf0] }
  0x16   :  { %338 = vmatpush.bf16.msra.mxu0 %v719_v15 }
  0x17   :  { %740 = vmatpush.bf16.msra.mxu3 %v719_v15  ;;  %387 = vmatpush.bf16.msra.mxu1 %v727_v16  ;;  %v713_v15 = vld [vmem:[%s1037_s0 + $0xa0] sm:$0xf0] }
  0x1a   :  { %686 = vmatmul.msk.bf16.gmra.mxu2 %vm308_vm0, %v540_v19  ;;  %339 = vmatpush.bf16.msra.mxu0 %v718_v20  ;;  %v708_v19 = vld [vmem:[%s1037_s0 + $0x7c] sm:$0xf] }
  0x1b   :  { %741 = vmatpush.bf16.msra.mxu3 %v718_v20  ;;  %388 = vmatpush.bf16.msra.mxu1 %v726_v21  ;;  %v581_v20 = vld [vmem:[%s1037_s0 + $0x84] sm:$0xf0] }
  0x1e   :  { %340 = vmatpush.bf16.msra.mxu0 %v717_v22 }
  0x1f   :  { %742 = vmatpush.bf16.msra.mxu3 %v717_v22  ;;  %389 = vmatpush.bf16.msra.mxu1 %v725_v23  ;;  %v584_v22 = vor.u32 %v708_v19, %v581_v20 }
  0x21   :  { %341 = vmatmul.bf16.vlgmr.msra.gmra.mxu0 %v520_v30 }
  0x22   :  { %371 = vmatmul.bf16.vlgmr.msra.gmra.mxu3 %v592_v31  ;;  %390 = vmatmul.bf16.vlgmr.msra.gmra.mxu1 %v524_v32 }
  0x23   :  { %743 = vmatpush.bf16.msrb.mxu3 %v732_v1  ;;  %v605_v1 = vld [vmem:[%s1037_s0 + $0xb4] sm:$0xf0] }
  0x27   :  { %744 = vmatpush.bf16.msrb.mxu3 %v731_v4  ;;  %v608_v4 = vor.u32 %v714_v0, %v605_v1 }
  0x2a   :  { %687 = vmatmul.msk.bf16.gmra.mxu2 %vm308_vm0, %v552_v35 }
  0x2b   :  { %745 = vmatpush.bf16.msrb.mxu3 %v730_v10  ;;  %v705_v10 = vld [vmem:[%s1037_s0 + $0x64] sm:$0xf] }
  0x2c   :  { %v572_v13 = vor.u32 %v705_v10, %v569_v11 }
  0x2f   :  { %746 = vmatpush.bf16.msrb.mxu3 %v729_v12  ;;  %v568_v12 = vor.u32 %v706_v9, %v567_v8 }
  0x31   :  { %346 = vmatmul.bf16.gmra.mxu0 %v532_v42 }
  0x32   :  { %376 = vmatmul.bf16.gmra.mxu3 %v604_v43  ;;  %395 = vmatmul.bf16.gmra.mxu1 %v536_v44 }
  0x33   :  { %747 = vmatpush.bf16.msrb.mxu3 %v728_v14  ;;  %v599_v14 = vld [vmem:[%s1037_s0 + $0x98] sm:$0xf] }
  0x37   :  { %748 = vmatpush.bf16.msrb.mxu3 %v727_v16  ;;  %v600_v16 = vor.u32 %v713_v15, %v599_v14 }
  0x3a   :  { %688 = vmatmul.msk.bf16.gmra.mxu2 %vm308_vm0, %v564_v47 }
  0x3b   :  { %749 = vmatpush.bf16.msrb.mxu3 %v726_v21  ;;  %v580_v21 = vor.u32 %v709_v18, %v579_v17 }
  0x3f   :  { %750 = vmatpush.bf16.msrb.mxu3 %v725_v23  ;;  %v611_v23 = vld [vmem:[%s1037_s0 + $0xb0] sm:$0xf] }
  0x40   :  { %v612_v25 = vor.u32 %v716_v24, %v611_v23 }
  0x41   :  { %351 = vmatmul.bf16.gmra.mxu0 %v544_v54 }
  0x42   :  { %400 = vmatmul.bf16.gmra.mxu1 %v548_v55  ;;  %420 = vmatmul.bf16.vlgmr.msrb.gmra.mxu3 %v596_v56 }
  0x4a   :  { %689 = vmatmul.msk.bf16.gmra.mxu2 %vm308_vm0, %v576_v59 }
  0x51   :  { %356 = vmatmul.bf16.gmra.mxu0 %v556_v2 }
  0x52   :  { %405 = vmatmul.bf16.gmra.mxu1 %v560_v3  ;;  %425 = vmatmul.bf16.gmra.mxu3 %v608_v4 }
  0x5a   :  { %690 = vmatmul.msk.bf16.gmra.mxu2 %vm308_vm0, %v588_v7 }
  0x61   :  { %361 = vmatmul.bf16.gmra.mxu0 %v568_v12 }
  0x62   :  { %410 = vmatmul.bf16.gmra.mxu1 %v572_v13 }
  0x6a   :  { %691 = vmatmul.msk.bf16.gmra.mxu2 %vm308_vm0, %v600_v16 }
  0x71   :  { %366 = vmatmul.bf16.gmra.mxu0 %v580_v21 }
  0x72   :  { %415 = vmatmul.bf16.gmra.mxu1 %v584_v22 }
  0x7a   :  { %692 = vmatmul.msk.bf16.gmra.mxu2 %vm308_vm0, %v612_v25 }
  0x8d   :  { %v440_v26 = vpop.f32.mrf.mxu2 }
  0x95   :  { %v442_v27 = vpop.f32.mrf.mxu2 }
  0x9d   :  { %v445_v28 = vpop.f32.mrf.mxu2 }
  0x9e   :  { %v342_v29 = vpop.f32.mrf.mxu0 }
  0x9f   :  { %v391_v30 = vpop.f32.mrf.mxu1 }
  0xa0   :  { %v392_v31 = vadd.f32 %v391_v30, %v342_v29 }
  0xa2   :  { %v441_v32 = vadd.f32 %v440_v26, %v392_v31 }
  0xa4   :  { %v480_v33 = vpack.c.bf16 %v441_v32, %v441_v32 }
  0xa5   :  { %v447_v34 = vpop.f32.mrf.mxu2  ;;  %v372_v51 = vpop.f32.mrf.mxu3 }
  0xa6   :  { %497 = vst.msk [vmem:[%s1038_s2] sm:$0xf] %vm496_vm1, %v480_v33  ;;  %v344_v35 = vpop.f32.mrf.mxu0 }
  0xa7   :  { %v393_v36 = vpop.f32.mrf.mxu1 }
  0xa8   :  { %v394_v37 = vadd.f32 %v393_v36, %v344_v35 }
  0xaa   :  { %v443_v38 = vadd.f32 %v442_v27, %v394_v37 }
  0xac   :  { %v481_v39 = vpack.c.bf16 %v443_v38, %v443_v38 }
  0xad   :  { %v450_v40 = vpop.f32.mrf.mxu2  ;;  %v374_v59 = vpop.f32.mrf.mxu3 }
  0xae   :  { %498 = vst.msk [vmem:[%s1038_s2 + $0x4] sm:$0xf] %vm496_vm1, %v481_v39  ;;  %v347_v41 = vpop.f32.mrf.mxu0 }
  0xaf   :  { %v396_v42 = vpop.f32.mrf.mxu1 }
  0xb0   :  { %v397_v43 = vadd.f32 %v396_v42, %v347_v41 }
  0xb2   :  { %v446_v44 = vadd.f32 %v445_v28, %v397_v43 }
  0xb4   :  { %v482_v45 = vpack.c.bf16 %v446_v44, %v446_v44 }
  0xb5   :  { %v452_v46 = vpop.f32.mrf.mxu2  ;;  %v377_v4 = vpop.f32.mrf.mxu3 }
  0xb6   :  { %499 = vst.msk [vmem:[%s1038_s2 + $0x8] sm:$0xf] %vm496_vm1, %v482_v45  ;;  %v349_v47 = vpop.f32.mrf.mxu0 }
  0xb7   :  { %v398_v48 = vpop.f32.mrf.mxu1 }
  0xb8   :  { %v399_v49 = vadd.f32 %v398_v48, %v349_v47 }
  0xba   :  { %v448_v50 = vadd.f32 %v447_v34, %v399_v49 }
  0xbc   :  { %v483_v52 = vpack.c.bf16 %v448_v50, %v448_v50 }
  0xbd   :  { %v455_v53 = vpop.f32.mrf.mxu2  ;;  %v379_v13 = vpop.f32.mrf.mxu3 }
  0xbe   :  { %500 = vst.msk [vmem:[%s1038_s2 + $0xc] sm:$0xf] %vm496_vm1, %v483_v52  ;;  %v352_v54 = vpop.f32.mrf.mxu0 }
  0xbf   :  { %v401_v55 = vpop.f32.mrf.mxu1 }
  0xc0   :  { %v402_v56 = vadd.f32 %v401_v55, %v352_v54 }
  0xc2   :  { %v451_v57 = vadd.f32 %v450_v40, %v402_v56 }
  0xc4   :  { %v484_v58 = vpack.c.bf16 %v451_v57, %v451_v57 }
  0xc5   :  { %v457_v60 = vpop.f32.mrf.mxu2  ;;  %v421_v21 = vpop.f32.mrf.mxu3 }
  0xc6   :  { %501 = vst.msk [vmem:[%s1038_s2 + $0x10] sm:$0xf] %vm496_vm1, %v484_v58  ;;  %v354_v61 = vpop.f32.mrf.mxu0  ;;  %v422_v28 = vadd.f32 %v421_v21, %v372_v51 }
  0xc7   :  { %v403_v62 = vpop.f32.mrf.mxu1 }
  0xc8   :  { %v404_v63 = vadd.f32 %v403_v62, %v354_v61 }
  0xca   :  { %v453_v0 = vadd.f32 %v452_v46, %v404_v63 }
  0xcc   :  { %v485_v1 = vpack.c.bf16 %v453_v0, %v453_v0 }
  0xcd   :  { %v460_v2 = vpop.f32.mrf.mxu2  ;;  %v423_v30 = vpop.f32.mrf.mxu3 }
  0xce   :  { %502 = vst.msk [vmem:[%s1038_s2 + $0x14] sm:$0xf] %vm496_vm1, %v485_v1  ;;  %v357_v3 = vpop.f32.mrf.mxu0  ;;  %v424_v38 = vadd.f32 %v423_v30, %v374_v59 }
  0xcf   :  { %v406_v5 = vpop.f32.mrf.mxu1 }
  0xd0   :  { %v407_v6 = vadd.f32 %v406_v5, %v357_v3 }
  0xd2   :  { %v456_v7 = vadd.f32 %v455_v53, %v407_v6 }
  0xd4   :  { %v486_v8 = vpack.c.bf16 %v456_v7, %v456_v7 }
  0xd5   :  { %v462_v9 = vpop.f32.mrf.mxu2  ;;  %v426_v43 = vpop.f32.mrf.mxu3 }
  0xd6   :  { %503 = vst.msk [vmem:[%s1038_s2 + $0x18] sm:$0xf] %vm496_vm1, %v486_v8  ;;  %v359_v10 = vpop.f32.mrf.mxu0  ;;  %v427_v48 = vadd.f32 %v426_v43, %v377_v4 }
  0xd7   :  { %v408_v11 = vpop.f32.mrf.mxu1 }
  0xd8   :  { %v409_v12 = vadd.f32 %v408_v11, %v359_v10 }
  0xda   :  { %v458_v14 = vadd.f32 %v457_v60, %v409_v12 }
  0xdc   :  { %v487_v15 = vpack.c.bf16 %v458_v14, %v458_v14 }
  0xdd   :  { %v465_v16 = vpop.f32.mrf.mxu2  ;;  %v428_v53 = vpop.f32.mrf.mxu3 }
  0xde   :  { %504 = vst.msk [vmem:[%s1038_s2 + $0x1c] sm:$0xf] %vm496_vm1, %v487_v15  ;;  %v362_v17 = vpop.f32.mrf.mxu0  ;;  %v429_v54 = vadd.f32 %v428_v53, %v379_v13 }
  0xdf   :  { %v411_v18 = vpop.f32.mrf.mxu1 }
  0xe0   :  { %v412_v19 = vadd.f32 %v411_v18, %v362_v17 }
  0xe2   :  { %v461_v20 = vadd.f32 %v460_v2, %v412_v19 }
  0xe4   :  { %v488_v22 = vpack.c.bf16 %v461_v20, %v461_v20 }
  0xe5   :  { %v467_v23 = vpop.f32.mrf.mxu2 }
  0xe6   :  { %505 = vst.msk [vmem:[%s1038_s2 + $0x20] sm:$0xf] %vm496_vm1, %v488_v22  ;;  %v364_v24 = vpop.f32.mrf.mxu0 }
  0xe7   :  { %v413_v25 = vpop.f32.mrf.mxu1 }
  0xe8   :  { %v414_v26 = vadd.f32 %v413_v25, %v364_v24 }
  0xea   :  { %v463_v27 = vadd.f32 %v462_v9, %v414_v26 }
  0xec   :  { %v489_v29 = vpack.c.bf16 %v463_v27, %v463_v27 }
  0xed   :  { %v470_v31 = vpop.f32.mrf.mxu2 }
  0xee   :  { %506 = vst.msk [vmem:[%s1038_s2 + $0x24] sm:$0xf] %vm496_vm1, %v489_v29  ;;  %v471_v32 = vadd.f32 %v470_v31, %v422_v28  ;;  %v367_v33 = vpop.f32.mrf.mxu0 }
  0xef   :  { %v416_v34 = vpop.f32.mrf.mxu1 }
  0xf0   :  { %v492_v35 = vpack.c.bf16 %v471_v32, %v471_v32  ;;  %v417_v36 = vadd.f32 %v416_v34, %v367_v33 }
  0xf2   :  { %509 = vst.msk [vmem:[%s1038_s2 + $0x30] sm:$0xf] %vm496_vm1, %v492_v35  ;;  %v466_v37 = vadd.f32 %v465_v16, %v417_v36 }
  0xf4   :  { %v490_v39 = vpack.c.bf16 %v466_v37, %v466_v37 }
  0xf5   :  { %v472_v40 = vpop.f32.mrf.mxu2 }
  0xf6   :  { %507 = vst.msk [vmem:[%s1038_s2 + $0x28] sm:$0xf] %vm496_vm1, %v490_v39  ;;  %v473_v41 = vadd.f32 %v472_v40, %v424_v38  ;;  %v369_v42 = vpop.f32.mrf.mxu0 }
  0xf7   :  { %v418_v44 = vpop.f32.mrf.mxu1 }
  0xf8   :  { %v493_v45 = vpack.c.bf16 %v473_v41, %v473_v41  ;;  %v419_v46 = vadd.f32 %v418_v44, %v369_v42 }
  0xfa   :  { %510 = vst.msk [vmem:[%s1038_s2 + $0x34] sm:$0xf] %vm496_vm1, %v493_v45  ;;  %v468_v47 = vadd.f32 %v467_v23, %v419_v46 }
  0xfc   :  { %v491_v49 = vpack.c.bf16 %v468_v47, %v468_v47 }
  0xfd   :  { %v475_v50 = vpop.f32.mrf.mxu2 }
  0xfe   :  { %508 = vst.msk [vmem:[%s1038_s2 + $0x2c] sm:$0xf] %vm496_vm1, %v491_v49  ;;  %v476_v51 = vadd.f32 %v475_v50, %v427_v48 }
 0x100   :  { %v494_v52 = vpack.c.bf16 %v476_v51, %v476_v51 }
 0x102   :  { %511 = vst.msk [vmem:[%s1038_s2 + $0x38] sm:$0xf] %vm496_vm1, %v494_v52 }
 0x105   :  { %v477_v55 = vpop.f32.mrf.mxu2 }
 0x106   :  { %v478_v56 = vadd.f32 %v477_v55, %v429_v54 }
 0x108   :  { %v495_v57 = vpack.c.bf16 %v478_v56, %v478_v56 }
 0x10a   :  { %512 = vst.msk [vmem:[%s1038_s2 + $0x3c] sm:$0xf] %vm496_vm1, %v495_v57 }

// kernel: densenet_forward.38
= control target key start
LH: loop header
LB: loop body
LE: loop exit
PB: predicated region body
PF: predicated region fallthrough
CT: control target
= control target key end

     0   :  { %vm42_vm0 = vcmask 261120   ;;  %vm72_vm1 = vcmask 125952   ;;  %s144_s1 = inlined_call_operand.vmem [shape: bf16[32,16], index: 1, kind: input, shape index: {}]   ;;  %s145_s0 = inlined_call_operand.vmem [shape: bf16[32,32], index: 0, kind: input, shape index: {}]   ;;  %s146_s2 = inlined_call_operand.vmem [shape: bf16[32,16], index: 2, kind: output, shape index: {}]  }
   0x1   :  { %v102_v0 = vld [vmem:[%s144_s1 + $0x8] sm:$0xff]  ;;  %v101_v1 = vld [vmem:[%s144_s1] sm:$0xff] }
   0x2   :  { %55 = vmatpush.bf16.msra.mxu0 %v102_v0  ;;  %103 = vmatpush.bf16.msra.mxu1 %v102_v0  ;;  %v99_v2 = vld [vmem:[%s145_s0] sm:$0xff]  ;;  %v100_v3 = vld [vmem:[%s145_s0 + $0x8] sm:$0xff] }
   0x6   :  { %56 = vmatpush.bf16.msra.mxu0 %v101_v1  ;;  %104 = vmatpush.bf16.msra.mxu1 %v101_v1 }
   0x9   :  { %97 = vmatmul.msk.bf16.vlgmr.msra.gmra.mxu0 %vm42_vm0, %v99_v2  ;;  %98 = vmatmul.msk.bf16.vlgmr.msra.gmra.mxu1 %vm42_vm0, %v100_v3 }
  0x86   :  { %v58_v4 = vpop.f32.mrf.mxu0  ;;  %v63_v5 = vpop.f32.mrf.mxu1 }
  0x87   :  { %v68_v6 = vpack.c.bf16 %v58_v4, %v58_v4  ;;  %v70_v7 = vpack.c.bf16 %v63_v5, %v63_v5 }
  0x89   :  { %73 = vst.msk [vmem:[%s146_s2] sm:$0xf] %vm72_vm1, %v68_v6 }
  0x8a   :  { %75 = vst.msk [vmem:[%s146_s2 + $0x8] sm:$0xf] %vm72_vm1, %v70_v7 }
  0x8e   :  { %v60_v8 = vpop.f32.mrf.mxu0  ;;  %v65_v9 = vpop.f32.mrf.mxu1 }
  0x8f   :  { %v69_v10 = vpack.c.bf16 %v60_v8, %v60_v8  ;;  %v71_v11 = vpack.c.bf16 %v65_v9, %v65_v9 }
  0x91   :  { %74 = vst.msk [vmem:[%s146_s2 + $0x4] sm:$0xf] %vm72_vm1, %v69_v10 }
  0x92   :  { %76 = vst.msk [vmem:[%s146_s2 + $0xc] sm:$0xf] %vm72_vm1, %v71_v11 }

// kernel: densenet_forward.37
= control target key start
LH: loop header
LB: loop body
LE: loop exit
PB: predicated region body
PF: predicated region fallthrough
CT: control target
= control target key end

     0   :  { %v73_v2 = vmov 4.0   ;;  %s109_s0 = inlined_call_operand.vmem [shape: bf16[4,8,128], index: 0, kind: input, shape index: {}]   ;;  %s110_s1 = inlined_call_operand.vmem [shape: f32[1,128], index: 1, kind: input, shape index: {}]   ;;  %s111_s2 = inlined_call_operand.vmem [shape: f32[1,128], index: 2, kind: input, shape index: {}]   ;;  %s112_s3 = inlined_call_operand.vmem [shape: bf16[8,128], index: 3, kind: output, shape index: {}]  }
   0x1   :  { %v60_v0 = vld [vmem:[%s109_s0] sm:$0xff]   ;;  %v67_v1 = vld [vmem:[%s109_s0 + $0x8] sm:$0xff]   ;;  %71 = vrcp.f32 %v73_v2 }
   0x2   :  { %v61_v3 = vunpack.c.l.bf16 %v60_v0  ;;  %v62_v4 = vunpack.c.h.bf16 %v60_v0  ;;  %v65_v5 = vunpack.c.l.bf16 %v67_v1  ;;  %v66_v6 = vunpack.c.h.bf16 %v67_v1  ;;  %v69_v7 = vld [vmem:[%s110_s1] ss:$0 sm:$0xff] }
   0x3   :  { %v70_v8 = vld [vmem:[%s111_s2] ss:$0 sm:$0xff] }
   0x4   :  { %v26_v9 = vmul.f32 %v69_v7, %v61_v3  ;;  %v27_v10 = vmul.f32 %v69_v7, %v62_v4  ;;  %v28_v11 = vmul.f32 %v69_v7, %v65_v5  ;;  %v29_v12 = vmul.f32 %v69_v7, %v66_v6 }
   0x6   :  { %v34_v13 = vadd.f32 %v70_v8, %v26_v9  ;;  %v35_v14 = vadd.f32 %v70_v8, %v27_v10  ;;  %v36_v15 = vadd.f32 %v70_v8, %v28_v11  ;;  %v37_v16 = vadd.f32 %v70_v8, %v29_v12 }
   0x7   :  { %v72_v17 = vpop.eup %71 }
   0x8   :  { %v38_v18 = vmax.f32 %v34_v13, 0.0  ;;  %v39_v19 = vmax.f32 %v35_v14, 0.0  ;;  %v40_v20 = vmax.f32 %v36_v15, 0.0  ;;  %v46_v21 = vmul.f32 4.0, %v72_v17 }
   0x9   :  { %v41_v22 = vmax.f32 %v37_v16, 0.0  ;;  %vm50_vm0 = vweird.f32 %v72_v17 }
   0xa   :  { %v42_v23 = vadd.f32 %v39_v19, %v38_v18  ;;  %v47_v24 = vsub.f32 1.0, %v46_v21 }
   0xc   :  { %v43_v25 = vadd.f32 %v42_v23, %v40_v20  ;;  %v48_v26 = vmul.f32 %v72_v17, %v47_v24 }
   0xe   :  { %v44_v27 = vadd.f32 %v43_v25, %v41_v22  ;;  %v49_v28 = vadd.f32 %v72_v17, %v48_v26 }
  0x10   :  { %v51_v29 = vsel %vm50_vm0, %v72_v17, %v49_v28 }
  0x11   :  { %v52_v30 = vmul.f32 %v51_v29, %v44_v27 }
  0x13   :  { %v53_v31 = vpack.c.bf16 %v52_v30, %v52_v30 }
  0x15   :  { %54 = vst [vmem:[%s112_s3] sm:$0xf] %v53_v31 }

// kernel: densenet_forward.39
= control target key start
LH: loop header
LB: loop body
LE: loop exit
PB: predicated region body
PF: predicated region fallthrough
CT: control target
= control target key end

     0   :  { %vm62_vm0 = vcmask 130048   ;;  %vm112_vm1 = vcmask 257024   ;;  %s214_s1 = inlined_call_operand.vmem [shape: bf16[16,32], index: 1, kind: input, shape index: {}]   ;;  %s215_s0 = inlined_call_operand.vmem [shape: bf16[32,16], index: 0, kind: input, shape index: {}]   ;;  %s216_s2 = inlined_call_operand.vmem [shape: f32[1,16], index: 2, kind: input, shape index: {}]   ;;  %s217_s3 = inlined_call_operand.vmem [shape: f32[1,16], index: 3, kind: input, shape index: {}]   ;;  %s218_s4 = inlined_call_operand.vmem [shape: f32[1,32], index: 4, kind: input, shape index: {}]   ;;  %s219_s5 = inlined_call_operand.vmem [shape: f32[1,32], index: 5, kind: input, shape index: {}]   ;;  %s220_s6 = inlined_call_operand.vmem [shape: bf16[32,32], index: 6, kind: output, shape index: {}]  }
   0x1   :  { %v127_v0 = vld [vmem:[%s214_s1] sm:$0xff]  ;;  %v136_v6 = vld [vmem:[%s215_s0 + $0x8] sm:$0xff]  }
   0x2   :  { %v129_v1 = vld [vmem:[%s215_s0] sm:$0xff]   ;;  %76 = vmatpush.bf16.msra.mxu0 %v127_v0  ;;  %137 = vmatpush.bf16.msra.mxu1 %v127_v0  ;;  %v134_v9 = vunpack.c.l.bf16 %v136_v6  ;;  %v135_v10 = vunpack.c.h.bf16 %v136_v6 }
   0x3   :  { %v130_v2 = vunpack.c.l.bf16 %v129_v1  ;;  %v131_v3 = vunpack.c.h.bf16 %v129_v1  ;;  %v138_v4 = vld [vmem:[%s216_s2] ss:$0 sm:$0xff] }
   0x4   :  { %v139_v5 = vld [vmem:[%s217_s3] ss:$0 sm:$0xff]  ;;  %v38_v13 = vmul.f32 %v138_v4, %v134_v9  ;;  %v39_v14 = vmul.f32 %v138_v4, %v135_v10 }
   0x5   :  { %v36_v7 = vmul.f32 %v138_v4, %v130_v2  ;;  %v37_v8 = vmul.f32 %v138_v4, %v131_v3  ;;  %v140_v23 = vld [vmem:[%s218_s4] ss:$0 sm:$0xff] }
   0x6   :  { %v46_v17 = vadd.f32 %v139_v5, %v38_v13  ;;  %v47_v18 = vadd.f32 %v139_v5, %v39_v14  ;;  %v141_v24 = vld [vmem:[%s219_s5] ss:$0 sm:$0xff] }
   0x7   :  { %v44_v11 = vadd.f32 %v139_v5, %v36_v7  ;;  %v45_v12 = vadd.f32 %v139_v5, %v37_v8 }
   0x8   :  { %v50_v20 = vmax.f32 %v46_v17, 0.0  ;;  %v51_v21 = vmax.f32 %v47_v18, 0.0 }
   0x9   :  { %v48_v15 = vmax.f32 %v44_v11, 0.0  ;;  %v49_v16 = vmax.f32 %v45_v12, 0.0 }
   0xa   :  { %v53_v22 = vpack.c.bf16 %v51_v21, %v50_v20 }
   0xb   :  { %v52_v19 = vpack.c.bf16 %v49_v16, %v48_v15 }
   0xc   :  { %126 = vmatmul.msk.bf16.vlgmr.msra.gmra.mxu1 %vm62_vm0, %v53_v22 }
   0xd   :  { %125 = vmatmul.msk.bf16.vlgmr.msra.gmra.mxu0 %vm62_vm0, %v52_v19 }
  0x89   :  { %v83_v27 = vpop.f32.mrf.mxu1 }
  0x8a   :  { %v78_v25 = vpop.f32.mrf.mxu0  ;;  %v94_v29 = vmul.f32 %v140_v23, %v83_v27 }
  0x8b   :  { %v92_v26 = vmul.f32 %v140_v23, %v78_v25 }
  0x8c   :  { %v102_v31 = vadd.f32 %v141_v24, %v94_v29 }
  0x8d   :  { %v100_v28 = vadd.f32 %v141_v24, %v92_v26 }
  0x8e   :  { %v106_v33 = vmax.f32 %v102_v31, 0.0 }
  0x8f   :  { %v104_v30 = vmax.f32 %v100_v28, 0.0 }
  0x90   :  { %v110_v35 = vpack.c.bf16 %v106_v33, %v106_v33 }
  0x91   :  { %v108_v32 = vpack.c.bf16 %v104_v30, %v104_v30  ;;  %v85_v37 = vpop.f32.mrf.mxu1 }
  0x92   :  { %v80_v34 = vpop.f32.mrf.mxu0  ;;  %115 = vst.msk [vmem:[%s220_s6 + $0x8] sm:$0xf] %vm112_vm1, %v110_v35  ;;  %v95_v39 = vmul.f32 %v140_v23, %v85_v37 }
  0x93   :  { %113 = vst.msk [vmem:[%s220_s6] sm:$0xf] %vm112_vm1, %v108_v32  ;;  %v93_v36 = vmul.f32 %v140_v23, %v80_v34 }
  0x94   :  { %v103_v41 = vadd.f32 %v141_v24, %v95_v39 }
  0x95   :  { %v101_v38 = vadd.f32 %v141_v24, %v93_v36 }
  0x96   :  { %v107_v43 = vmax.f32 %v103_v41, 0.0 }
  0x97   :  { %v105_v40 = vmax.f32 %v101_v38, 0.0 }
  0x98   :  { %v111_v44 = vpack.c.bf16 %v107_v43, %v107_v43 }
  0x99   :  { %v109_v42 = vpack.c.bf16 %v105_v40, %v105_v40 }
  0x9a   :  { %116 = vst.msk [vmem:[%s220_s6 + $0xc] sm:$0xf] %vm112_vm1, %v111_v44 }
  0x9b   :  { %114 = vst.msk [vmem:[%s220_s6 + $0x4] sm:$0xf] %vm112_vm1, %v109_v42 }

// kernel: densenet_forward.40
= control target key start
LH: loop header
LB: loop body
LE: loop exit
PB: predicated region body
PF: predicated region fallthrough
CT: control target
= control target key end

     0   :  { %vm194_vm0 = vcmask 261120   ;;  %vm262_vm1 = vcmask 60416   ;;  %s524_s1 = inlined_call_operand.vmem [shape: bf16[288,8], index: 1, kind: input, shape index: {}]   ;;  %s525_s0 = inlined_call_operand.vmem [shape: bf16[32,288], index: 0, kind: input, shape index: {}]   ;;  %s526_s2 = inlined_call_operand.vmem [shape: bf16[32,8], index: 2, kind: output, shape index: {}]  }
   0x1   :  { %v382_v0 = vld [vmem:[%s524_s1 + $0x38] sm:$0xff]  ;;  %v381_v2 = vld [vmem:[%s524_s1 + $0x30] sm:$0xff]  ;;  %v392_v4 = vld [vmem:[%s524_s1 + $0x88] sm:$0xff] }
   0x2   :  { %v390_v1 = vld [vmem:[%s524_s1 + $0x78] sm:$0xff]  ;;  %201 = vmatpush.bf16.msra.mxu0 %v382_v0  ;;  %v389_v3 = vld [vmem:[%s524_s1 + $0x70] sm:$0xff]  ;;  %393 = vmatpush.bf16.msra.mxu3 %v382_v0  ;;  %v391_v5 = vld [vmem:[%s524_s1 + $0x80] sm:$0xff] }
   0x3   :  { %220 = vmatpush.bf16.msra.mxu1 %v390_v1  ;;  %245 = vmatpush.bf16.msra.mxu2 %v392_v4  ;;  %v281_v6 = vld [vmem:[%s525_s0 + $0x8] sm:$0xf]  ;;  %v371_v7 = vld [vmem:[%s525_s0 + $0x10] sm:$0xf0]  ;;  %v379_v11 = vld [vmem:[%s524_s1 + $0x20] sm:$0xff] }
   0x4   :  { %v380_v8 = vld [vmem:[%s524_s1 + $0x28] sm:$0xff]  ;;  %v282_v10 = vor.u32 %v371_v7, %v281_v6  ;;  %v387_v12 = vld [vmem:[%s524_s1 + $0x60] sm:$0xff]  ;;  %v378_v13 = vld [vmem:[%s524_s1 + $0x18] sm:$0xff] }
   0x5   :  { %v388_v9 = vld [vmem:[%s524_s1 + $0x68] sm:$0xff]  ;;  %v386_v14 = vld [vmem:[%s524_s1 + $0x58] sm:$0xff]  ;;  %v377_v15 = vld [vmem:[%s524_s1 + $0x10] sm:$0xff] }
   0x6   :  { %202 = vmatpush.bf16.msra.mxu0 %v381_v2  ;;  %394 = vmatpush.bf16.msra.mxu3 %v381_v2  ;;  %v385_v16 = vld [vmem:[%s524_s1 + $0x50] sm:$0xff]  ;;  %v293_v17 = vld [vmem:[%s525_s0 + $0x20] sm:$0xf]  ;;  %v374_v18 = vld [vmem:[%s525_s0 + $0x28] sm:$0xf0] }
   0x7   :  { %221 = vmatpush.bf16.msra.mxu1 %v389_v3  ;;  %246 = vmatpush.bf16.msra.mxu2 %v391_v5  ;;  %v376_v19 = vld [vmem:[%s524_s1 + $0x8] sm:$0xff]  ;;  %v294_v21 = vor.u32 %v374_v18, %v293_v17  ;;  %v375_v22 = vld [vmem:[%s524_s1] sm:$0xff]  ;;  %v275_v27 = vld [vmem:[%s525_s0 + $0xc] sm:$0xf0] }
   0x8   :  { %v384_v20 = vld [vmem:[%s524_s1 + $0x48] sm:$0xff]  ;;  %v383_v23 = vld [vmem:[%s524_s1 + $0x40] sm:$0xff]  ;;  %v285_v28 = vld [vmem:[%s525_s0 + $0x18] sm:$0xf] }
   0x9   :  { %v273_v24 = vld [vmem:[%s525_s0] sm:$0xf]  ;;  %v370_v25 = vld [vmem:[%s525_s0 + $0x8] sm:$0xf0]  ;;  %v369_v26 = vld [vmem:[%s525_s0 + $0x4] sm:$0xf] }
   0xa   :  { %203 = vmatpush.bf16.msra.mxu0 %v380_v8  ;;  %395 = vmatpush.bf16.msra.mxu3 %v380_v8  ;;  %v373_v29 = vld [vmem:[%s525_s0 + $0x20] sm:$0xf0]  ;;  %v274_v30 = vor.u32 %v370_v25, %v273_v24  ;;  %v278_v31 = vor.u32 %v369_v26, %v275_v27  ;;  %v372_v33 = vld [vmem:[%s525_s0 + $0x1c] sm:$0xf]  ;;  %v287_v34 = vld [vmem:[%s525_s0 + $0x24] sm:$0xf0] }
   0xb   :  { %222 = vmatpush.bf16.msra.mxu1 %v388_v9  ;;  %367 = vmatmul.msk.bf16.vlgmr.msra.gmra.mxu2 %vm194_vm0, %v282_v10  ;;  %v286_v32 = vor.u32 %v373_v29, %v285_v28  ;;  %v290_v35 = vor.u32 %v372_v33, %v287_v34 }
   0xe   :  { %204 = vmatpush.bf16.msra.mxu0 %v379_v11  ;;  %396 = vmatpush.bf16.msra.mxu3 %v379_v11 }
   0xf   :  { %223 = vmatpush.bf16.msra.mxu1 %v387_v12 }
  0x12   :  { %205 = vmatpush.bf16.msra.mxu0 %v378_v13  ;;  %397 = vmatpush.bf16.msra.mxu3 %v378_v13 }
  0x13   :  { %224 = vmatpush.bf16.msra.mxu1 %v386_v14 }
  0x16   :  { %206 = vmatpush.bf16.msra.mxu0 %v377_v15  ;;  %398 = vmatpush.bf16.msra.mxu3 %v377_v15 }
  0x17   :  { %225 = vmatpush.bf16.msra.mxu1 %v385_v16 }
  0x1a   :  { %207 = vmatpush.bf16.msra.mxu0 %v376_v19  ;;  %399 = vmatpush.bf16.msra.mxu3 %v376_v19 }
  0x1b   :  { %226 = vmatpush.bf16.msra.mxu1 %v384_v20  ;;  %368 = vmatmul.msk.bf16.gmra.mxu2 %vm194_vm0, %v294_v21 }
  0x1e   :  { %208 = vmatpush.bf16.msra.mxu0 %v375_v22  ;;  %400 = vmatpush.bf16.msra.mxu3 %v375_v22 }
  0x1f   :  { %227 = vmatpush.bf16.msra.mxu1 %v383_v23 }
  0x21   :  { %209 = vmatmul.bf16.vlgmr.msra.gmra.mxu0 %v274_v30  ;;  %214 = vmatmul.bf16.vlgmr.msra.gmra.mxu3 %v286_v32 }
  0x22   :  { %228 = vmatmul.bf16.vlgmr.msra.gmra.mxu1 %v278_v31 }
  0x32   :  { %233 = vmatmul.bf16.gmra.mxu1 %v290_v35 }
  0x8e   :  { %v248_v36 = vpop.f32.mrf.mxu2 }
  0x96   :  { %v250_v42 = vpop.f32.mrf.mxu2 }
  0x9e   :  { %v210_v37 = vpop.f32.mrf.mxu0  ;;  %v253_v49 = vpop.f32.mrf.mxu2 }
  0x9f   :  { %v229_v38 = vpop.f32.mrf.mxu1 }
  0xa0   :  { %v230_v39 = vadd.f32 %v229_v38, %v210_v37 }
  0xa2   :  { %v249_v40 = vadd.f32 %v248_v36, %v230_v39 }
  0xa4   :  { %v258_v41 = vpack.c.bf16 %v249_v40, %v249_v40  ;;  %v215_v48 = vpop.f32.mrf.mxu3 }
  0xa6   :  { %263 = vst.msk [vmem:[%s526_s2] sm:$0xf] %vm262_vm1, %v258_v41  ;;  %v212_v43 = vpop.f32.mrf.mxu0  ;;  %v255_v57 = vpop.f32.mrf.mxu2 }
  0xa7   :  { %v231_v44 = vpop.f32.mrf.mxu1 }
  0xa8   :  { %v232_v45 = vadd.f32 %v231_v44, %v212_v43 }
  0xaa   :  { %v251_v46 = vadd.f32 %v250_v42, %v232_v45 }
  0xac   :  { %v259_v47 = vpack.c.bf16 %v251_v46, %v251_v46  ;;  %v217_v54 = vpop.f32.mrf.mxu3 }
  0xae   :  { %264 = vst.msk [vmem:[%s526_s2 + $0x4] sm:$0xf] %vm262_vm1, %v259_v47 }
  0xaf   :  { %v234_v50 = vpop.f32.mrf.mxu1 }
  0xb0   :  { %v235_v51 = vadd.f32 %v234_v50, %v215_v48 }
  0xb2   :  { %v254_v52 = vadd.f32 %v253_v49, %v235_v51 }
  0xb4   :  { %v260_v53 = vpack.c.bf16 %v254_v52, %v254_v52 }
  0xb6   :  { %265 = vst.msk [vmem:[%s526_s2 + $0x8] sm:$0xf] %vm262_vm1, %v260_v53 }
  0xb7   :  { %v236_v55 = vpop.f32.mrf.mxu1 }
  0xb8   :  { %v237_v56 = vadd.f32 %v236_v55, %v217_v54 }
  0xba   :  { %v256_v58 = vadd.f32 %v255_v57, %v237_v56 }
  0xbc   :  { %v261_v59 = vpack.c.bf16 %v256_v58, %v256_v58 }
  0xbe   :  { %266 = vst.msk [vmem:[%s526_s2 + $0xc] sm:$0xf] %vm262_vm1, %v261_v59 }

// kernel: densenet_forward.41
= control target key start
LH: loop header
LB: loop body
LE: loop exit
PB: predicated region body
PF: predicated region fallthrough
CT: control target
= control target key end

     0   :  { %vm73_vm0 = vcmask 1043456   ;;  %vm66_vm1 = vcmask 195584   ;;  %vm120_vm2 = vcmask 257024   ;;  %s226_s1 = inlined_call_operand.vmem [shape: bf16[24,32], index: 1, kind: input, shape index: {}]   ;;  %s227_s0 = inlined_call_operand.vmem [shape: bf16[32,24], index: 0, kind: input, shape index: {}]   ;;  %s228_s2 = inlined_call_operand.vmem [shape: f32[1,24], index: 2, kind: input, shape index: {}]   ;;  %s229_s3 = inlined_call_operand.vmem [shape: f32[1,24], index: 3, kind: input, shape index: {}]   ;;  %s230_s4 = inlined_call_operand.vmem [shape: f32[1,32], index: 4, kind: input, shape index: {}]   ;;  %s231_s5 = inlined_call_operand.vmem [shape: f32[1,32], index: 5, kind: input, shape index: {}]   ;;  %s232_s6 = inlined_call_operand.vmem [shape: bf16[32,32], index: 6, kind: output, shape index: {}]  }
   0x1   :  { %v56_v0 = vld [vmem:[%s226_s1 + $0x8] sm:$0xf]  ;;  %v137_v1 = vld [vmem:[%s227_s0] sm:$0xff]  }
   0x2   :  { %v62_v2 = vunpack.c.l.b16 %v56_v0  ;;  %v138_v3 = vunpack.c.l.bf16 %v137_v1  ;;  %v139_v4 = vunpack.c.h.bf16 %v137_v1  ;;  %v147_v5 = vld [vmem:[%s228_s2] ss:$0 sm:$0xff]  ;;  %v144_v7 = vld [vmem:[%s227_s0 + $0x8] sm:$0xff]  }
   0x3   :  { %v148_v6 = vld [vmem:[%s229_s3] ss:$0 sm:$0xff]  ;;  %v142_v11 = vunpack.c.l.bf16 %v144_v7  ;;  %v143_v12 = vunpack.c.h.bf16 %v144_v7 }
   0x4   :  { %v64_v8 = vpack.c.b16 %v62_v2, %v62_v2  ;;  %v36_v9 = vmul.f32 %v147_v5, %v138_v3  ;;  %v37_v10 = vmul.f32 %v147_v5, %v139_v4  ;;  %v135_v17 = vld [vmem:[%s226_s1] sm:$0xff] }
   0x5   :  { %v38_v16 = vmul.f32 %v147_v5, %v142_v11  ;;  %v39_v18 = vmul.f32 %v147_v5, %v143_v12  ;;  %v149_v27 = vld [vmem:[%s230_s4] ss:$0 sm:$0xff] }
   0x6   :  { %v75_v13 = vsel %vm73_vm0, %v64_v8, 0  ;;  %v44_v14 = vadd.f32 %v148_v6, %v36_v9  ;;  %v45_v15 = vadd.f32 %v148_v6, %v37_v10  ;;  %v150_v28 = vld [vmem:[%s231_s5] ss:$0 sm:$0xff] }
   0x7   :  { %83 = vmatpush.bf16.msra.mxu0 %v75_v13  ;;  %145 = vmatpush.bf16.msra.mxu1 %v75_v13  ;;  %v46_v21 = vadd.f32 %v148_v6, %v38_v16  ;;  %v47_v22 = vadd.f32 %v148_v6, %v39_v18 }
   0x8   :  { %v48_v19 = vmax.f32 %v44_v14, 0.0  ;;  %v49_v20 = vmax.f32 %v45_v15, 0.0 }
   0x9   :  { %v50_v24 = vmax.f32 %v46_v21, 0.0  ;;  %v51_v25 = vmax.f32 %v47_v22, 0.0 }
   0xa   :  { %v52_v23 = vpack.c.bf16 %v49_v20, %v48_v19 }
   0xb   :  { %84 = vmatpush.bf16.msra.mxu0 %v135_v17  ;;  %146 = vmatpush.bf16.msra.mxu1 %v135_v17  ;;  %v53_v26 = vpack.c.bf16 %v51_v25, %v50_v24 }
   0xe   :  { %133 = vmatmul.msk.bf16.vlgmr.msra.gmra.mxu0 %vm66_vm1, %v52_v23  ;;  %134 = vmatmul.msk.bf16.vlgmr.msra.gmra.mxu1 %vm66_vm1, %v53_v26 }
  0x8b   :  { %v86_v29 = vpop.f32.mrf.mxu0  ;;  %v91_v31 = vpop.f32.mrf.mxu1 }
  0x8c   :  { %v100_v30 = vmul.f32 %v149_v27, %v86_v29  ;;  %v102_v32 = vmul.f32 %v149_v27, %v91_v31 }
  0x8e   :  { %v108_v33 = vadd.f32 %v150_v28, %v100_v30  ;;  %v110_v34 = vadd.f32 %v150_v28, %v102_v32 }
  0x90   :  { %v112_v35 = vmax.f32 %v108_v33, 0.0  ;;  %v114_v36 = vmax.f32 %v110_v34, 0.0 }
  0x92   :  { %v116_v37 = vpack.c.bf16 %v112_v35, %v112_v35  ;;  %v118_v38 = vpack.c.bf16 %v114_v36, %v114_v36 }
  0x93   :  { %v88_v39 = vpop.f32.mrf.mxu0  ;;  %v93_v41 = vpop.f32.mrf.mxu1 }
  0x94   :  { %121 = vst.msk [vmem:[%s232_s6] sm:$0xf] %vm120_vm2, %v116_v37  ;;  %v101_v40 = vmul.f32 %v149_v27, %v88_v39  ;;  %v103_v42 = vmul.f32 %v149_v27, %v93_v41 }
  0x95   :  { %123 = vst.msk [vmem:[%s232_s6 + $0x8] sm:$0xf] %vm120_vm2, %v118_v38 }
  0x96   :  { %v109_v43 = vadd.f32 %v150_v28, %v101_v40  ;;  %v111_v44 = vadd.f32 %v150_v28, %v103_v42 }
  0x98   :  { %v113_v45 = vmax.f32 %v109_v43, 0.0  ;;  %v115_v46 = vmax.f32 %v111_v44, 0.0 }
  0x9a   :  { %v117_v47 = vpack.c.bf16 %v113_v45, %v113_v45  ;;  %v119_v48 = vpack.c.bf16 %v115_v46, %v115_v46 }
  0x9c   :  { %122 = vst.msk [vmem:[%s232_s6 + $0x4] sm:$0xf] %vm120_vm2, %v117_v47 }
  0x9d   :  { %124 = vst.msk [vmem:[%s232_s6 + $0xc] sm:$0xf] %vm120_vm2, %v119_v48 }

// kernel: densenet_forward.43
= control target key start
LH: loop header
LB: loop body
LE: loop exit
PB: predicated region body
PF: predicated region fallthrough
CT: control target
= control target key end

     0   :  { %v69_v3 = vmov 4.0   ;;  %vm42_vm0 = vcmask 1041408   ;;  %s111_s0 = inlined_call_operand.vmem [shape: bf16[4,2,128], index: 0, kind: input, shape index: {}]   ;;  %s112_s1 = inlined_call_operand.vmem [shape: f32[1,128], index: 1, kind: input, shape index: {}]   ;;  %s113_s2 = inlined_call_operand.vmem [shape: f32[1,128], index: 2, kind: input, shape index: {}]   ;;  %s114_s3 = inlined_call_operand.vmem [shape: bf16[2,128], index: 3, kind: output, shape index: {}]  }
   0x1   :  { %v14_v0 = vld [vmem:[%s111_s0] sm:$0x1]  ;;  %v15_v1 = vld [vmem:[%s111_s0 + $0x1] sm:$0x1]  ;;  %v16_v2 = vld [vmem:[%s111_s0 + $0x2] sm:$0x1]  ;;  %67 = vrcp.f32 %v69_v3 }
   0x2   :  { %v17_v4 = vld [vmem:[%s111_s0 + $0x3] sm:$0x1]  ;;  %v18_v5 = vunpack.c.l.bf16 %v14_v0  ;;  %v19_v6 = vunpack.c.l.bf16 %v15_v1  ;;  %v20_v7 = vunpack.c.l.bf16 %v16_v2  ;;  %v65_v8 = vld [vmem:[%s112_s1] ss:$0 sm:$0xff] }
   0x3   :  { %v21_v9 = vunpack.c.l.bf16 %v17_v4  ;;  %v66_v10 = vld [vmem:[%s113_s2] ss:$0 sm:$0xff] }
   0x4   :  { %v26_v11 = vmul.f32 %v65_v8, %v18_v5  ;;  %v27_v12 = vmul.f32 %v65_v8, %v19_v6  ;;  %v28_v13 = vmul.f32 %v65_v8, %v20_v7 }
   0x5   :  { %v29_v14 = vmul.f32 %v65_v8, %v21_v9 }
   0x6   :  { %v34_v15 = vadd.f32 %v66_v10, %v26_v11  ;;  %v35_v16 = vadd.f32 %v66_v10, %v27_v12  ;;  %v36_v17 = vadd.f32 %v66_v10, %v28_v13 }
   0x7   :  { %v68_v18 = vpop.eup %67  ;;  %v37_v19 = vadd.f32 %v66_v10, %v29_v14 }
   0x8   :  { %v38_v20 = vmax.f32 %v34_v15, 0.0  ;;  %v39_v21 = vmax.f32 %v35_v16, 0.0  ;;  %v40_v22 = vmax.f32 %v36_v17, 0.0  ;;  %v51_v23 = vmul.f32 4.0, %v68_v18 }
   0x9   :  { %v41_v24 = vmax.f32 %v37_v19, 0.0  ;;  %vm55_vm1 = vweird.f32 %v68_v18 }
   0xa   :  { %v43_v25 = vsel %vm42_vm0, %v38_v20, 0.0  ;;  %v44_v26 = vsel %vm42_vm0, %v39_v21, 0.0  ;;  %v46_v27 = vsel %vm42_vm0, %v40_v22, 0.0  ;;  %v52_v28 = vsub.f32 1.0, %v51_v23 }
   0xb   :  { %v45_v29 = vadd.f32 %v44_v26, %v43_v25  ;;  %v48_v30 = vsel %vm42_vm0, %v41_v24, 0.0 }
   0xc   :  { %v53_v31 = vmul.f32 %v68_v18, %v52_v28 }
   0xd   :  { %v47_v32 = vadd.f32 %v46_v27, %v45_v29 }
   0xe   :  { %v54_v33 = vadd.f32 %v68_v18, %v53_v31 }
   0xf   :  { %v49_v34 = vadd.f32 %v48_v30, %v47_v32 }
  0x10   :  { %v56_v35 = vsel %vm55_vm1, %v68_v18, %v54_v33 }
  0x11   :  { %v57_v36 = vmul.f32 %v56_v35, %v49_v34 }
  0x13   :  { %v58_v37 = vpack.c.bf16 %v57_v36, %v57_v36 }
  0x15   :  { %59 = vst [vmem:[%s114_s3] sm:$0x1] %v58_v37 }

// kernel: densenet_forward.44
= control target key start
LH: loop header
LB: loop body
LE: loop exit
PB: predicated region body
PF: predicated region fallthrough
CT: control target
= control target key end

     0   :  { %vm29_vm0 = vcmask 261120   ;;  %vm47_vm1 = vcmask 125952   ;;  %s91_s1 = inlined_call_operand.vmem [shape: bf16[32,16], index: 1, kind: input, shape index: {}]   ;;  %s92_s0 = inlined_call_operand.vmem [shape: bf16[8,32], index: 0, kind: input, shape index: {}]   ;;  %s93_s2 = inlined_call_operand.vmem [shape: bf16[8,16], index: 2, kind: output, shape index: {}]  }
   0x1   :  { %v63_v0 = vld [vmem:[%s91_s1 + $0x8] sm:$0xff]  ;;  %v62_v1 = vld [vmem:[%s91_s1] sm:$0xff] }
   0x2   :  { %39 = vmatpush.bf16.msra.mxu0 %v63_v0  ;;  %v12_v2 = vld [vmem:[%s92_s0] sm:$0xf] }
   0x6   :  { %40 = vmatpush.bf16.msra.mxu0 %v62_v1 }
   0x9   :  { %61 = vmatmul.msk.bf16.vlgmr.msra.gmra.mxu0 %vm29_vm0, %v12_v2 }
  0x86   :  { %v42_v3 = vpop.f32.mrf.mxu0 }
  0x87   :  { %v46_v4 = vpack.c.bf16 %v42_v3, %v42_v3 }
  0x89   :  { %48 = vst.msk [vmem:[%s93_s2] sm:$0xf] %vm47_vm1, %v46_v4 }
  0x8e   :  { %v44_v5 = vpop.f32.mrf.mxu0 }

// kernel: densenet_forward.45
= control target key start
LH: loop header
LB: loop body
LE: loop exit
PB: predicated region body
PF: predicated region fallthrough
CT: control target
= control target key end

     0   :  { %vm46_vm0 = vcmask 130048   ;;  %vm75_vm1 = vcmask 257024   ;;  %s147_s1 = inlined_call_operand.vmem [shape: bf16[16,32], index: 1, kind: input, shape index: {}]   ;;  %s148_s0 = inlined_call_operand.vmem [shape: bf16[8,16], index: 0, kind: input, shape index: {}]   ;;  %s149_s2 = inlined_call_operand.vmem [shape: f32[1,16], index: 2, kind: input, shape index: {}]   ;;  %s150_s3 = inlined_call_operand.vmem [shape: f32[1,16], index: 3, kind: input, shape index: {}]   ;;  %s151_s4 = inlined_call_operand.vmem [shape: f32[1,32], index: 4, kind: input, shape index: {}]   ;;  %s152_s5 = inlined_call_operand.vmem [shape: f32[1,32], index: 5, kind: input, shape index: {}]   ;;  %s153_s6 = inlined_call_operand.vmem [shape: bf16[8,32], index: 6, kind: output, shape index: {}]  }
   0x1   :  { %v86_v0 = vld [vmem:[%s147_s1] sm:$0xff] }
   0x2   :  { %v24_v1 = vld [vmem:[%s148_s0] sm:$0xf]  ;;  %57 = vmatpush.bf16.msra.mxu0 %v86_v0 }
   0x3   :  { %v25_v2 = vunpack.c.l.bf16 %v24_v1  ;;  %v87_v3 = vld [vmem:[%s149_s2] ss:$0 sm:$0xff] }
   0x4   :  { %v88_v4 = vld [vmem:[%s150_s3] ss:$0 sm:$0xff] }
   0x5   :  { %v30_v5 = vmul.f32 %v87_v3, %v25_v2  ;;  %v89_v9 = vld [vmem:[%s151_s4] ss:$0 sm:$0xff] }
   0x6   :  { %v90_v10 = vld [vmem:[%s152_s5] ss:$0 sm:$0xff] }
   0x7   :  { %v35_v6 = vadd.f32 %v88_v4, %v30_v5 }
   0x9   :  { %v36_v7 = vmax.f32 %v35_v6, 0.0 }
   0xb   :  { %v37_v8 = vpack.c.bf16 %v36_v7, %v36_v7 }
   0xd   :  { %85 = vmatmul.msk.bf16.vlgmr.msra.gmra.mxu0 %vm46_vm0, %v37_v8 }
  0x8a   :  { %v59_v11 = vpop.f32.mrf.mxu0 }
  0x8b   :  { %v67_v12 = vmul.f32 %v89_v9, %v59_v11 }
  0x8d   :  { %v72_v13 = vadd.f32 %v90_v10, %v67_v12 }
  0x8f   :  { %v73_v14 = vmax.f32 %v72_v13, 0.0 }
  0x91   :  { %v74_v15 = vpack.c.bf16 %v73_v14, %v73_v14 }
  0x92   :  { %v61_v16 = vpop.f32.mrf.mxu0 }
  0x93   :  { %76 = vst.msk [vmem:[%s153_s6] sm:$0xf] %vm75_vm1, %v74_v15 }

// kernel: densenet_forward.49
= control target key start
LH: loop header
LB: loop body
LE: loop exit
PB: predicated region body
PF: predicated region fallthrough
CT: control target
= control target key end

     0   :  { %10 = vsyncpa [#allocation3], 0  ;;  %s255_s0 = inlined_call_operand.vmem [shape: bf16[2,4,32], index: 0, kind: input, shape index: {}]   ;;  %s256_s1 = inlined_call_operand.vmem [shape: f32[1,32], index: 1, kind: input, shape index: {}]   ;;  %s257_s2 = inlined_call_operand.vmem [shape: f32[1,32], index: 2, kind: input, shape index: {}]   ;;  %s258_s3 = inlined_call_operand.vmem [shape: f32[32,10], index: 3, kind: input, shape index: {}]   ;;  %s259_s4 = inlined_call_operand.hbm [shape: f32[1,10], index: 4, kind: input, shape index: {}]   ;;  %s260_s5 = inlined_call_operand.hbm [shape: f32[2,10], index: 5, kind: output, shape index: {}]  }
   0x1   :  { %11 = vsyncpa [#allocation4], 0  ;;  %s25_s20 = sshll.u32 %s259_s4, 4  ;;  %s192_s21 = smov [#allocation2]   ;;  %s26_s20 = int_to_ptr.hbm [resolvable:$true] %s25_s20 }
   0x2   :  { %s27_s22 = sshll.u32 %s192_s21, 4  ;;  %s28_s22 = int_to_ptr.vmem [resolvable:$true] %s27_s22 }
   0x3   :  { %30 = dma.hbm_to_vmem [thread:$0]  %s26_s20, 16, %s28_s22, [#allocation3]  }
   0x4   :  { %188 = dma.done.wait [#allocation3], 16  }
   0x5   :  { %189 = vsyncadd [#allocation3], 4294967280  ;;  %v193_v0 = vmov 4.0   ;;  %v80_v1 = vld [vmem:[%s258_s3 + $0x18] sm:$0xff]  ;;  %v79_v2 = vld [vmem:[%s258_s3 + $0x10] sm:$0xff]  ;;  %vm53_vm0 = vcmask 257024  }
   0x6   :  { %138 = vrcp.f32 %v193_v0  ;;  %104 = vmatpush.msra.mxu0 %v80_v1  ;;  %v78_v4 = vld [vmem:[%s258_s3 + $0x8] sm:$0xff]  ;;  %v35_v5 = vld [vmem:[%s255_s0] sm:$0x3]  ;;  %v36_v6 = vld [vmem:[%s255_s0 + $0x2] sm:$0x3]  ;;  %vm87_vm2 = vcmask 1041409  }
   0x7   :  { %v37_v7 = vunpack.c.l.bf16 %v35_v5  ;;  %v38_v8 = vunpack.c.l.bf16 %v36_v6  ;;  %v135_v9 = vld [vmem:[%s256_s1] ss:$0 sm:$0xff]  ;;  %vm89_vm3 = vcmask 261120   ;;  %s194_s0 = smov [#allocation5]   ;;  %s121_s13 = sshll.u32 %s260_s5, 4  ;;  %vm112_vm4 = vcmask 74752   ;;  %s122_s13 = int_to_ptr.hbm [resolvable:$true] %s121_s13 }
   0x8   :  { %105 = vmatpush.msra.mxu0 %v79_v2  ;;  %v136_v10 = vld [vmem:[%s257_s2] ss:$0 sm:$0xff]  ;;  %s119_s1 = sshll.u32 %s194_s0, 4  ;;  %s120_s1 = int_to_ptr.vmem [resolvable:$true] %s119_s1 }
   0x9   :  { %v77_v11 = vld [vmem:[%s258_s3] sm:$0xff]  ;;  %v43_v12 = vmul.f32 %v135_v9, %v37_v7  ;;  %v44_v13 = vmul.f32 %v135_v9, %v38_v8 }
   0xa   :  { %106 = vmatpush.msra.mxu0 %v78_v4  ;;  %v137_v40 = vld [vmem:[#allocation2] ss:$0 sm:$0xff] }
   0xb   :  { %v49_v15 = vadd.f32 %v136_v10, %v43_v12  ;;  %v50_v16 = vadd.f32 %v136_v10, %v44_v13 }
   0xc   :  { %v139_v3 = vpop.eup %138  ;;  %107 = vmatpush.msra.mxu0 %v77_v11 }
   0xd   :  { %v69_v14 = vmul.f32 4.0, %v139_v3  ;;  %v51_v17 = vmax.f32 %v49_v15, 0.0  ;;  %v52_v18 = vmax.f32 %v50_v16, 0.0  ;;  %vm73_vm1 = vweird.f32 %v139_v3 }
   0xf   :  { %v70_v19 = vsub.f32 1.0, %v69_v14  ;;  %v54_v20 = vsel %vm53_vm0, %v51_v17, 0.0  ;;  %v61_v21 = vsel %vm53_vm0, %v52_v18, 0.0 }
  0x10   :  { %v55_v22 = vrot.slane %v54_v20, 4  ;;  %v62_v23 = vrot.slane %v61_v21, 4 }
  0x11   :  { %v71_v24 = vmul.f32 %v139_v3, %v70_v19 }
  0x12   :  { %v56_v25 = vadd.f32 %v55_v22, %v54_v20  ;;  %v63_v26 = vadd.f32 %v62_v23, %v61_v21 }
  0x13   :  { %v72_v29 = vadd.f32 %v139_v3, %v71_v24 }
  0x14   :  { %v57_v27 = vrot.slane %v56_v25, 2  ;;  %v64_v28 = vrot.slane %v63_v26, 2 }
  0x15   :  { %v74_v34 = vsel %vm73_vm1, %v139_v3, %v72_v29 }
  0x16   :  { %v58_v30 = vadd.f32 %v57_v27, %v56_v25  ;;  %v65_v31 = vadd.f32 %v64_v28, %v63_v26 }
  0x18   :  { %v59_v32 = vrot.slane %v58_v30, 1  ;;  %v66_v33 = vrot.slane %v65_v31, 1 }
  0x1a   :  { %v60_v35 = vadd.f32 %v59_v32, %v58_v30  ;;  %v67_v36 = vadd.f32 %v66_v33, %v65_v31 }
  0x1c   :  { %v75_v37 = vmul.f32 %v74_v34, %v60_v35  ;;  %v76_v38 = vmul.f32 %v74_v34, %v67_v36 }
  0x1e   :  { %v88_v39 = vsel %vm87_vm2, %v76_v38, %v75_v37 }
  0x1f   :  { %131 = vmatmul.msk.f32.vlgmr.msra.gmra.mxu0 %vm89_vm3, %v88_v39 }
  0x9c   :  { %v109_v41 = vpop.f32.mrf.mxu0 }
  0x9d   :  { %v110_v42 = vadd.f32 %v137_v40, %v109_v41 }
  0x9f   :  { %113 = vst.msk [vmem:[#allocation5] sm:$0x3] %vm112_vm4, %v110_v42 }
  0xa0   :  { %124 = dma.vmem_to_hbm [thread:$0]  %s120_s1, 32, %s122_s13, [#allocation4]  }
  0xa1   :  { %190 = dma.done.wait [#allocation4], 32  }
  0xa2   :  { %191 = vsyncadd [#allocation4], 4294967264 }
  0xa3   :  { %129 = vsyncpa [#allocation3], 1 }
  0xa4   :  { %130 = vsyncpa [#allocation4], 1 }

// kernel: densenet_forward.46
= control target key start
LH: loop header
LB: loop body
LE: loop exit
PB: predicated region body
PF: predicated region fallthrough
CT: control target
= control target key end

     0   :  { %vm168_vm0 = vcmask 261120   ;;  %vm212_vm1 = vcmask 60416   ;;  %s387_s1 = inlined_call_operand.vmem [shape: bf16[288,8], index: 1, kind: input, shape index: {}]   ;;  %s388_s0 = inlined_call_operand.vmem [shape: bf16[8,288], index: 0, kind: input, shape index: {}]   ;;  %s389_s2 = inlined_call_operand.vmem [shape: bf16[8,8], index: 2, kind: output, shape index: {}]  }
   0x1   :  { %v298_v0 = vld [vmem:[%s387_s1 + $0x38] sm:$0xff]  ;;  %v297_v2 = vld [vmem:[%s387_s1 + $0x30] sm:$0xff]  ;;  %v308_v4 = vld [vmem:[%s387_s1 + $0x88] sm:$0xff] }
   0x2   :  { %v306_v1 = vld [vmem:[%s387_s1 + $0x78] sm:$0xff]  ;;  %172 = vmatpush.bf16.msra.mxu0 %v298_v0  ;;  %v305_v3 = vld [vmem:[%s387_s1 + $0x70] sm:$0xff]  ;;  %204 = vmatpush.bf16.msra.mxu2 %v308_v4  ;;  %v307_v5 = vld [vmem:[%s387_s1 + $0x80] sm:$0xff] }
   0x3   :  { %185 = vmatpush.bf16.msra.mxu1 %v306_v1  ;;  %v13_v6 = vld [vmem:[%s388_s0 + $0x8] sm:$0xf]  ;;  %v295_v11 = vld [vmem:[%s387_s1 + $0x20] sm:$0xff]  ;;  %v294_v13 = vld [vmem:[%s387_s1 + $0x18] sm:$0xff] }
   0x4   :  { %v54_v7 = vunpack.c.l.b16 %v13_v6  ;;  %v296_v8 = vld [vmem:[%s387_s1 + $0x28] sm:$0xff]  ;;  %v303_v12 = vld [vmem:[%s387_s1 + $0x60] sm:$0xff]  ;;  %v302_v14 = vld [vmem:[%s387_s1 + $0x58] sm:$0xff] }
   0x5   :  { %v304_v9 = vld [vmem:[%s387_s1 + $0x68] sm:$0xff]  ;;  %v293_v15 = vld [vmem:[%s387_s1 + $0x10] sm:$0xff]  ;;  %v12_v19 = vld [vmem:[%s388_s0] sm:$0xff] }
   0x6   :  { %173 = vmatpush.bf16.msra.mxu0 %v297_v2  ;;  %v57_v10 = vpack.c.b16 %v54_v7, %v54_v7  ;;  %205 = vmatpush.bf16.msra.mxu2 %v307_v5  ;;  %v301_v16 = vld [vmem:[%s387_s1 + $0x50] sm:$0xff]  ;;  %v292_v17 = vld [vmem:[%s387_s1 + $0x8] sm:$0xff]  ;;  %v52_v20 = vunpack.c.l.b16 %v12_v19  ;;  %v53_v21 = vunpack.c.h.b16 %v12_v19  ;;  %v291_v22 = vld [vmem:[%s387_s1] sm:$0xff] }
   0x7   :  { %186 = vmatpush.bf16.msra.mxu1 %v305_v3  ;;  %v300_v18 = vld [vmem:[%s387_s1 + $0x48] sm:$0xff]  ;;  %v299_v23 = vld [vmem:[%s387_s1 + $0x40] sm:$0xff] }
   0x8   :  { %v55_v24 = vpack.c.b16 %v52_v20, %v52_v20  ;;  %v56_v25 = vpack.c.b16 %v53_v21, %v53_v21 }
   0x9   :  { %290 = vmatmul.msk.bf16.vlgmr.msra.gmra.mxu2 %vm168_vm0, %v57_v10 }
   0xa   :  { %174 = vmatpush.bf16.msra.mxu0 %v296_v8 }
   0xb   :  { %187 = vmatpush.bf16.msra.mxu1 %v304_v9 }
   0xe   :  { %175 = vmatpush.bf16.msra.mxu0 %v295_v11 }
   0xf   :  { %188 = vmatpush.bf16.msra.mxu1 %v303_v12 }
  0x12   :  { %176 = vmatpush.bf16.msra.mxu0 %v294_v13 }
  0x13   :  { %189 = vmatpush.bf16.msra.mxu1 %v302_v14 }
  0x16   :  { %177 = vmatpush.bf16.msra.mxu0 %v293_v15 }
  0x17   :  { %190 = vmatpush.bf16.msra.mxu1 %v301_v16 }
  0x1a   :  { %178 = vmatpush.bf16.msra.mxu0 %v292_v17 }
  0x1b   :  { %191 = vmatpush.bf16.msra.mxu1 %v300_v18 }
  0x1e   :  { %179 = vmatpush.bf16.msra.mxu0 %v291_v22 }
  0x1f   :  { %192 = vmatpush.bf16.msra.mxu1 %v299_v23 }
  0x21   :  { %180 = vmatmul.bf16.vlgmr.msra.gmra.mxu0 %v55_v24 }
  0x22   :  { %193 = vmatmul.bf16.vlgmr.msra.gmra.mxu1 %v56_v25 }
  0x8c   :  { %v207_v26 = vpop.f32.mrf.mxu2 }
  0x94   :  { %v209_v27 = vpop.f32.mrf.mxu2 }
  0x9e   :  { %v181_v28 = vpop.f32.mrf.mxu0 }
  0x9f   :  { %v194_v29 = vpop.f32.mrf.mxu1 }
  0xa0   :  { %v195_v30 = vadd.f32 %v194_v29, %v181_v28 }
  0xa2   :  { %v208_v31 = vadd.f32 %v207_v26, %v195_v30 }
  0xa4   :  { %v211_v32 = vpack.c.bf16 %v208_v31, %v208_v31 }
  0xa6   :  { %213 = vst.msk [vmem:[%s389_s2] sm:$0xf] %vm212_vm1, %v211_v32  ;;  %v183_v33 = vpop.f32.mrf.mxu0 }
  0xa7   :  { %v196_v34 = vpop.f32.mrf.mxu1 }

// kernel: densenet_forward.47
= control target key start
LH: loop header
LB: loop body
LE: loop exit
PB: predicated region body
PF: predicated region fallthrough
CT: control target
= control target key end

     0   :  { %vm54_vm0 = vcmask 1043456   ;;  %vm50_vm1 = vcmask 195584   ;;  %vm83_vm2 = vcmask 257024   ;;  %s158_s1 = inlined_call_operand.vmem [shape: bf16[24,32], index: 1, kind: input, shape index: {}]   ;;  %s159_s0 = inlined_call_operand.vmem [shape: bf16[8,24], index: 0, kind: input, shape index: {}]   ;;  %s160_s2 = inlined_call_operand.vmem [shape: f32[1,24], index: 2, kind: input, shape index: {}]   ;;  %s161_s3 = inlined_call_operand.vmem [shape: f32[1,24], index: 3, kind: input, shape index: {}]   ;;  %s162_s4 = inlined_call_operand.vmem [shape: f32[1,32], index: 4, kind: input, shape index: {}]   ;;  %s163_s5 = inlined_call_operand.vmem [shape: f32[1,32], index: 5, kind: input, shape index: {}]   ;;  %s164_s6 = inlined_call_operand.vmem [shape: bf16[8,32], index: 6, kind: output, shape index: {}]  }
   0x1   :  { %v40_v0 = vld [vmem:[%s158_s1 + $0x8] sm:$0xf]  ;;  %v24_v1 = vld [vmem:[%s159_s0] sm:$0xf] }
   0x2   :  { %v46_v2 = vunpack.c.l.b16 %v40_v0  ;;  %v25_v3 = vunpack.c.l.bf16 %v24_v1  ;;  %v95_v4 = vld [vmem:[%s160_s2] ss:$0 sm:$0xff] }
   0x3   :  { %v96_v5 = vld [vmem:[%s161_s3] ss:$0 sm:$0xff] }
   0x4   :  { %v48_v6 = vpack.c.b16 %v46_v2, %v46_v2  ;;  %v30_v7 = vmul.f32 %v95_v4, %v25_v3  ;;  %v94_v10 = vld [vmem:[%s158_s1] sm:$0xff] }
   0x5   :  { %v97_v13 = vld [vmem:[%s162_s4] ss:$0 sm:$0xff] }
   0x6   :  { %v56_v8 = vsel %vm54_vm0, %v48_v6, 0  ;;  %v35_v9 = vadd.f32 %v96_v5, %v30_v7  ;;  %v98_v14 = vld [vmem:[%s163_s5] ss:$0 sm:$0xff] }
   0x7   :  { %64 = vmatpush.bf16.msra.mxu0 %v56_v8 }
   0x8   :  { %v36_v11 = vmax.f32 %v35_v9, 0.0 }
   0xa   :  { %v37_v12 = vpack.c.bf16 %v36_v11, %v36_v11 }
   0xb   :  { %65 = vmatpush.bf16.msra.mxu0 %v94_v10 }
   0xe   :  { %93 = vmatmul.msk.bf16.vlgmr.msra.gmra.mxu0 %vm50_vm1, %v37_v12 }
  0x8b   :  { %v67_v15 = vpop.f32.mrf.mxu0 }
  0x8c   :  { %v75_v16 = vmul.f32 %v97_v13, %v67_v15 }
  0x8e   :  { %v80_v17 = vadd.f32 %v98_v14, %v75_v16 }
  0x90   :  { %v81_v18 = vmax.f32 %v80_v17, 0.0 }
  0x92   :  { %v82_v19 = vpack.c.bf16 %v81_v18, %v81_v18 }
  0x93   :  { %v69_v20 = vpop.f32.mrf.mxu0 }
  0x94   :  { %84 = vst.msk [vmem:[%s164_s6] sm:$0xf] %vm83_vm2, %v82_v19 }

</bundles_post_ra>
